<compile_context>
chip_gen: v5e
topology: v5e:2x2
jax: 0.10.0
libtpu: 0.0.40
codegen_flags: <defaults>
</compile_context>

<pallas_src>
import jax
import jax.numpy as jnp
from jax.experimental import pallas as pl
from jax.experimental.pallas import tpu as pltpu


LANE = 128            # lane width: channel padding unit and Cout tile
_BN_EPS = 1e-5


def _rup(x, m=LANE):
    return (x + m - 1) // m * m


# --------------------------------------------------------------------------
# Fused [maxpool] + concat + 3x3 conv + bias + ReLU kernel
# --------------------------------------------------------------------------
def _make_fused_kernel(n_in, pool_first, H, W, cins, cout):
    """Build the kernel body for one (batch, cout-tile) grid step.

    Ref order: x_0..x_{n-1}, w_0..w_{n-1}, bias, out, t0, t1, t2
      x_j  : (1, H, W, cins[j]) bf16   input j at output resolution; if
             pool_first and j == 0: (1, 2H, W, 2*cins[0]) with width pairs
             packed into lanes (free HBM regroup) -> 2x2 max-pooled in-kernel.
      w_j  : (9, cins[j], cout) bf16   3x3 taps, row-major (ky, kx)
      bias : (1, cout) f32             conv bias with eval-mode BN folded in
      out  : (1, H*W, cout) bf16       lane-dense flattened output
      t_kx : (H*W, cout) f32 VMEM      per-column-tap accumulators
    """
    HW = H * W

    def kernel(*refs):
        x_refs = refs[:n_in]
        w_refs = refs[n_in:2 * n_in]
        b_ref = refs[2 * n_in]
        o_ref = refs[2 * n_in + 1]
        t_refs = refs[2 * n_in + 2:2 * n_in + 5]

        for t in t_refs:
            t[...] = jnp.zeros(t.shape, t.dtype)

        for j in range(n_in):
            cj = cins[j]
            if j == 0 and pool_first:
                xp = x_refs[j][0]                                   # (2H, W, 2*cj)
                wmax = jnp.maximum(xp[:, :, :cj], xp[:, :, cj:])    # pool along W
                wmax = wmax.reshape(H, 2, W, cj)                    # leading split
                x = jnp.max(wmax, axis=1)                           # pool along H
            else:
                x = x_refs[j][0]                                    # (H, W, cj)

            # Row (ky) shifts with zero fill: leading-dim concats only (cheap,
            # no sublane/lane relayout), one flatten per shift instead of one
            # slice+reshape per tap.
            zrow = jnp.zeros((1, W, cj), x.dtype)
            shifted = (
                jnp.concatenate([zrow, x[:H - 1]], axis=0),         # X[h-1, w]
                x,                                                  # X[h,   w]
                jnp.concatenate([x[1:], zrow], axis=0),             # X[h+1, w]
            )
            for ky in range(3):
                a = shifted[ky].reshape(HW, cj)
                for kx in range(3):
                    t_refs[kx][...] += jnp.dot(
                        a, w_refs[j][ky * 3 + kx],
                        preferred_element_type=jnp.float32)

        # Column (kx) combination with zero halo:
        #   out[h, w] = T1[h, w] + T0[h, w-1] + T2[h, w+1]
        # done on the flattened (HW, cout) accumulators; cross-row wraps are
        # masked via the in-row column index.
        w_idx = jax.lax.broadcasted_iota(jnp.int32, (HW, cout), 0) % W
        zrow2 = jnp.zeros((1, cout), jnp.float32)
        t0 = t_refs[0][...]
        t2 = t_refs[2][...]
        left = jnp.concatenate([zrow2, t0[:HW - 1]], axis=0)        # T0 at flat i-1
        right = jnp.concatenate([t2[1:], zrow2], axis=0)            # T2 at flat i+1
        acc = (t_refs[1][...]
               + jnp.where(w_idx == 0, 0.0, left)
               + jnp.where(w_idx == W - 1, 0.0, right)
               + b_ref[...])
        o_ref[0] = jnp.maximum(acc, 0.0).astype(o_ref.dtype)

    return kernel


def fused_cat_conv(p, xs, pool_first):
    """Fused [2x2 maxpool of xs[0]] + concat + 3x3 conv + bias + ReLU.

    xs: list of NHWC bf16 activations with lane-padded channel counts; xs[-1]
    defines the output resolution.  Returns (N, H, W, Cout_padded) bf16."""
    N = xs[-1].shape[0]
    H, W = xs[-1].shape[1], xs[-1].shape[2]
    cout = p["b"].shape[-1]                       # already a multiple of LANE
    HW = H * W
    n_in = len(xs)
    n_co = cout // LANE

    arrays, in_specs, cins = [], [], []
    for j, x in enumerate(xs):
        cj = x.shape[-1]
        cins.append(cj)
        if j == 0 and pool_first:
            assert x.shape[1] == 2 * H and x.shape[2] == 2 * W
            # Free row-major regroup: width pairs packed into the lane dim so
            # the pool inside the kernel is two aligned lane slices + max.
            x = x.reshape(N, 2 * H, W, 2 * cj)
            spec = pl.BlockSpec((1, 2 * H, W, 2 * cj), lambda n, co: (n, 0, 0, 0))
        else:
            assert x.shape[1] == H and x.shape[2] == W
            spec = pl.BlockSpec((1, H, W, cj), lambda n, co: (n, 0, 0, 0))
        arrays.append(x)
        in_specs.append(spec)
    for w in p["ws"]:
        arrays.append(w)
        in_specs.append(pl.BlockSpec((9, w.shape[1], LANE), lambda n, co: (0, 0, co)))
    arrays.append(p["b"])
    in_specs.append(pl.BlockSpec((1, LANE), lambda n, co: (0, co)))

    kernel = _make_fused_kernel(n_in, pool_first, H, W, tuple(cins), LANE)
    out = pl.pallas_call(
        kernel,
        out_shape=jax.ShapeDtypeStruct((N, HW, cout), jnp.bfloat16),
        grid=(N, n_co),
        in_specs=in_specs,
        out_specs=pl.BlockSpec((1, HW, LANE), lambda n, co: (n, 0, co)),
        scratch_shapes=[pltpu.VMEM((HW, LANE), jnp.float32) for _ in range(3)],
        compiler_params=pltpu.CompilerParams(
            dimension_semantics=("parallel", "parallel"),
            vmem_limit_bytes=32 * 1024 * 1024),
    )(*arrays)
    # Free row-major regroup back to NHWC.
    return out.reshape(N, H, W, cout)


# --------------------------------------------------------------------------
# Pure-JAX fp32 reference (correctness check only, not the fast path)
# --------------------------------------------------------------------------
def _ref_cat_conv(p, xs, pool_first):
    xs = [x.astype(jnp.float32) for x in xs]
    if pool_first:
        x0 = xs[0]
        n, h2, w2, ch = x0.shape
        x0 = x0.reshape(n, h2 // 2, 2, w2 // 2, 2, ch).max(axis=(2, 4))
        xs = [x0] + list(xs[1:])
    x = jnp.concatenate(xs, axis=-1)
    w = jnp.concatenate([wj.astype(jnp.float32) for wj in p["ws"]], axis=1)
    w = w.reshape(3, 3, w.shape[1], w.shape[2])            # (ky, kx, Cin, Cout)
    y = jax.lax.conv_general_dilated(
        x, w, window_strides=(1, 1), padding="SAME",
        dimension_numbers=("NHWC", "HWIO", "NHWC"))
    return jnp.maximum(y + p["b"][0], 0.0)


# --------------------------------------------------------------------------
# Parameters (conv + folded eval-mode BN), stored per concat-input and padded
# --------------------------------------------------------------------------
def _init_conv_bn(key, cin_list, cout):
    cout_p = _rup(cout)
    keys = jax.random.split(key, len(cin_list) + 1)
    fan_in = 9.0 * sum(cin_list)
    s = 1.0 / jnp.sqrt(1.0 + _BN_EPS)   # fold eval-mode BN (mean=0, var=1, g=1, b=0)
    ws = []
    for k, cin in zip(keys[:len(cin_list)], cin_list):
        w = jax.random.normal(k, (3, 3, cin, cout), jnp.float32) / jnp.sqrt(fan_in)
        wp = jnp.zeros((9, _rup(cin), cout_p), jnp.float32)
        wp = wp.at[:, :cin, :cout].set((w * s).reshape(9, cin, cout))
        ws.append(wp.astype(jnp.bfloat16))
    b = jax.random.normal(keys[-1], (cout,), jnp.float32) * 0.01
    bp = jnp.zeros((1, cout_p), jnp.float32).at[0, :cout].set(b * s)
    return {"ws": ws, "b": bp}


def init_yc_cat_params(key, channel_list, pool_list):
    nb = len(channel_list)
    keys = jax.random.split(key, 2 + 3 * (nb - 1))
    params = {
        "cdblock0": _init_conv_bn(keys[0], [channel_list[-1]] * 3, channel_list[-1]),
        "cddecoder0": {
            **_init_conv_bn(keys[1], [channel_list[-2], channel_list[-1]], channel_list[-1]),
            "pool": pool_list[-2],
        },
    }
    k = 2
    for i in range(1, nb):
        params[f"cdblock{i}"] = _init_conv_bn(
            keys[k], [channel_list[i - 1]] * 3, channel_list[i - 1]); k += 1
        params[f"decoder{i}"] = {
            **_init_conv_bn(keys[k], [channel_list[i - 1], channel_list[i]], channel_list[i]),
            "pool": pool_list[i]}; k += 1
        params[f"cddecoder{i}"] = {
            **_init_conv_bn(keys[k], [channel_list[i - 1], channel_list[i]], channel_list[i]),
            "pool": pool_list[i]}; k += 1
    return params


# --------------------------------------------------------------------------
# Module forward (mirror of YC_CAT.forward)
# --------------------------------------------------------------------------
def tcat_forward(p, y1, y2, c):
    return fused_cat_conv(p, [y1, y2, c], pool_first=False)


def cat_forward(p, x1, x2):
    return fused_cat_conv(p, [x1, x2], pool_first=p["pool"])


def _pad_cast(x):
    """Zero-pad channels to a lane multiple once at model entry; cast to bf16."""
    c = x.shape[-1]
    cp = _rup(c)
    if cp != c:
        x = jnp.pad(x, ((0, 0), (0, 0), (0, 0), (0, cp - c)))
    return x.astype(jnp.bfloat16)


def yc_cat_forward(params, y1, y2, c, num_branches=4):
    """Lists ordered coarse -> fine: entry k has channel_list[-1-k] channels at
    spatial (base >> (depth-1-k)).  Returns bf16 activations sliced back to the
    module's channel counts."""
    orig_ch = [t.shape[-1] for t in c]
    y1 = [_pad_cast(t) for t in y1]
    y2 = [_pad_cast(t) for t in y2]
    c = [_pad_cast(t) for t in c]
    for i in range(1, num_branches):
        c[-i] = tcat_forward(params[f"cdblock{i}"], y1[-i], y2[-i], c[-i])
        y1[-i - 1] = cat_forward(params[f"decoder{i}"], y1[-i], y1[-i - 1])
        y2[-i - 1] = cat_forward(params[f"decoder{i}"], y2[-i], y2[-i - 1])
        c[-i - 1] = cat_forward(params[f"cddecoder{i}"], c[-i], c[-i - 1])
    c[0] = tcat_forward(params["cdblock0"], y1[0], y2[0], c[0])
    c[0] = cat_forward(params["cddecoder0"], c[1], c[0])
    unpad = lambda lst: [t[..., :ch] for t, ch in zip(lst, orig_ch)]
    return unpad(y1), unpad(y2), unpad(c)


# --------------------------------------------------------------------------
if __name__ == "__main__":
    key = jax.random.PRNGKey(0)
    N = 2
    base = 16                              # finest spatial resolution
    channel_list = [8, 16, 32, 64]         # small analogue of [32, 64, 160, 256]
    pool_list = [True, True, True, True]
    depth = len(channel_list)

    kp, kf = jax.random.split(key)
    params = init_yc_cat_params(kp, channel_list, pool_list)

    feat_keys = jax.random.split(kf, 3 * depth)

    def make_feats(keys):
        feats = []
        for k in range(depth):            # k=0 coarsest ... k=depth-1 finest
            s = base >> (depth - 1 - k)
            ch = channel_list[depth - 1 - k]
            feats.append(jax.random.normal(keys[k], (N, s, s, ch), jnp.float32))
        return feats

    y1 = make_feats(feat_keys[0:depth])
    y2 = make_feats(feat_keys[depth:2 * depth])
    c = make_feats(feat_keys[2 * depth:3 * depth])

    # --- single-layer correctness checks vs. pure-JAX reference -------------
    y1p = [_pad_cast(t) for t in y1]
    y2p = [_pad_cast(t) for t in y2]
    cp_ = [_pad_cast(t) for t in c]

    # TCAT path (no pooling): 3-way concat + 3x3 conv + BN + ReLU.
    k_out = tcat_forward(params["cdblock1"], y1p[-1], y2p[-1], cp_[-1])
    r_out = _ref_cat_conv(params["cdblock1"], [y1p[-1], y2p[-1], cp_[-1]], False)
    assert jnp.allclose(k_out.astype(jnp.float32), r_out, atol=5e-2, rtol=5e-2), \
        "TCAT kernel mismatch vs reference"

    # CAT path (2x2 maxpool of x1 + concat + conv).
    k_out = cat_forward(params["decoder1"], y1p[-1], y1p[-2])
    r_out = _ref_cat_conv(params["decoder1"], [y1p[-1], y1p[-2]],
                          params["decoder1"]["pool"])
    assert jnp.allclose(k_out.astype(jnp.float32), r_out, atol=5e-2, rtol=5e-2), \
        "CAT kernel mismatch vs reference"

    # --- full module forward -------------------------------------------------
    y1_out, y2_out, c_out = yc_cat_forward(params, y1, y2, c, num_branches=depth)

    for t in y1_out + y2_out + c_out:
        jax.block_until_ready(t)

    print("KERNEL_OK")
</pallas_src>

<mosaic_0001>
module attributes {stable_mosaic.version = 11 : i64} {
  func.func @kernel(%arg0: i32, %arg1: i32, %arg2: memref<1x16x16x128xbf16, #tpu.memory_space<vmem>>, %arg3: memref<1x16x16x128xbf16, #tpu.memory_space<vmem>>, %arg4: memref<1x16x16x128xbf16, #tpu.memory_space<vmem>>, %arg5: memref<9x128x128xbf16, #tpu.memory_space<vmem>>, %arg6: memref<9x128x128xbf16, #tpu.memory_space<vmem>>, %arg7: memref<9x128x128xbf16, #tpu.memory_space<vmem>>, %arg8: memref<1x128xf32, #tpu.memory_space<vmem>>, %arg9: memref<1x256x128xbf16, #tpu.memory_space<vmem>>, %arg10: memref<256x128xf32, #tpu.memory_space<vmem>>, %arg11: memref<256x128xf32, #tpu.memory_space<vmem>>, %arg12: memref<256x128xf32, #tpu.memory_space<vmem>>) attributes {dimension_semantics = [#tpu.dimension_semantics<parallel>, #tpu.dimension_semantics<parallel>], iteration_bounds = array<i64: 2, 1>, scalar_prefetch = 0 : i64, scratch_operands = 3 : i64, tpu.core_type = #tpu.core_type<tc>, window_params = [{transform_indices = @transform_0, window_bounds = array<i64: 1, 16, 16, 128>}, {transform_indices = @transform_1, window_bounds = array<i64: 1, 16, 16, 128>}, {transform_indices = @transform_2, window_bounds = array<i64: 1, 16, 16, 128>}, {transform_indices = @transform_3, window_bounds = array<i64: 9, 128, 128>}, {transform_indices = @transform_4, window_bounds = array<i64: 9, 128, 128>}, {transform_indices = @transform_5, window_bounds = array<i64: 9, 128, 128>}, {transform_indices = @transform_6, window_bounds = array<i64: 1, 128>}, {transform_indices = @transform_7, window_bounds = array<i64: 1, 256, 128>}]} {
    %cst = arith.constant 0.000000e+00 : f32
    %0 = vector.broadcast %cst : f32 to vector<256x128xf32>
    %c0 = arith.constant 0 : index
    %c0_0 = arith.constant 0 : index
    %1 = vector.load %arg10[%c0, %c0_0] : memref<256x128xf32, #tpu.memory_space<vmem>>, vector<256x128xf32>
    tpu.vector_store %arg10[%c0, %c0_0], %0 {strides = array<i32>} : memref<256x128xf32, #tpu.memory_space<vmem>>, vector<256x128xf32>,
    %cst_1 = arith.constant 0.000000e+00 : f32
    %2 = vector.broadcast %cst_1 : f32 to vector<256x128xf32>
    %c0_2 = arith.constant 0 : index
    %c0_3 = arith.constant 0 : index
    %3 = vector.load %arg11[%c0_2, %c0_3] : memref<256x128xf32, #tpu.memory_space<vmem>>, vector<256x128xf32>
    tpu.vector_store %arg11[%c0_2, %c0_3], %2 {strides = array<i32>} : memref<256x128xf32, #tpu.memory_space<vmem>>, vector<256x128xf32>,
    %cst_4 = arith.constant 0.000000e+00 : f32
    %4 = vector.broadcast %cst_4 : f32 to vector<256x128xf32>
    %c0_5 = arith.constant 0 : index
    %c0_6 = arith.constant 0 : index
    %5 = vector.load %arg12[%c0_5, %c0_6] : memref<256x128xf32, #tpu.memory_space<vmem>>, vector<256x128xf32>
    tpu.vector_store %arg12[%c0_5, %c0_6], %4 {strides = array<i32>} : memref<256x128xf32, #tpu.memory_space<vmem>>, vector<256x128xf32>,
    %c0_7 = arith.constant 0 : index
    %c0_8 = arith.constant 0 : index
    %c0_9 = arith.constant 0 : index
    %c0_10 = arith.constant 0 : index
    %6 = vector.load %arg2[%c0_7, %c0_8, %c0_9, %c0_10] : memref<1x16x16x128xbf16, #tpu.memory_space<vmem>>, vector<1x16x16x128xbf16>
    %7 = vector.shape_cast %6 : vector<1x16x16x128xbf16> to vector<16x16x128xbf16>
    %cst_11 = arith.constant 0.000000e+00 : bf16
    %8 = vector.broadcast %cst_11 : bf16 to vector<1x16x128xbf16>
    %9 = vector.extract_strided_slice %7 {offsets = [0, 0, 0], sizes = [15, 16, 128], strides = [1, 1, 1]} : vector<16x16x128xbf16> to vector<15x16x128xbf16>
    %10 = tpu.concatenate %8, %9 in 0 : vector<1x16x128xbf16>, vector<15x16x128xbf16> -> vector<16x16x128xbf16>
    %11 = vector.extract_strided_slice %7 {offsets = [1, 0, 0], sizes = [15, 16, 128], strides = [1, 1, 1]} : vector<16x16x128xbf16> to vector<15x16x128xbf16>
    %12 = tpu.concatenate %11, %8 in 0 : vector<15x16x128xbf16>, vector<1x16x128xbf16> -> vector<16x16x128xbf16>
    %13 = vector.shape_cast %10 : vector<16x16x128xbf16> to vector<256x128xbf16>
    %c0_12 = arith.constant 0 : index
    %c0_13 = arith.constant 0 : index
    %14 = vector.load %arg10[%c0_12, %c0_13] : memref<256x128xf32, #tpu.memory_space<vmem>>, vector<256x128xf32>
    %c0_14 = arith.constant 0 : index
    %c0_15 = arith.constant 0 : index
    %c0_16 = arith.constant 0 : index
    %15 = vector.load %arg5[%c0_14, %c0_15, %c0_16] : memref<9x128x128xbf16, #tpu.memory_space<vmem>>, vector<1x128x128xbf16>
    %16 = vector.shape_cast %15 : vector<1x128x128xbf16> to vector<128x128xbf16>
    %cst_17 = arith.constant dense<0.000000e+00> : vector<256x128xf32>
    %17 = tpu.matmul %13, %16, %cst_17 {dimension_numbers = #tpu.dot_dimension_numbers<[1], [0], [0], [1], [0, 0, 1, 1], [], []>} : vector<256x128xbf16>, vector<128x128xbf16>, vector<256x128xf32> -> vector<256x128xf32>
    %18 = arith.addf %14, %17 : vector<256x128xf32>
    %c0_18 = arith.constant 0 : index
    %c0_19 = arith.constant 0 : index
    %19 = vector.load %arg10[%c0_18, %c0_19] : memref<256x128xf32, #tpu.memory_space<vmem>>, vector<256x128xf32>
    tpu.vector_store %arg10[%c0_18, %c0_19], %18 {strides = array<i32>} : memref<256x128xf32, #tpu.memory_space<vmem>>, vector<256x128xf32>,
    %c0_20 = arith.constant 0 : index
    %c0_21 = arith.constant 0 : index
    %20 = vector.load %arg11[%c0_20, %c0_21] : memref<256x128xf32, #tpu.memory_space<vmem>>, vector<256x128xf32>
    %c1 = arith.constant 1 : index
    %c0_22 = arith.constant 0 : index
    %c0_23 = arith.constant 0 : index
    %21 = vector.load %arg5[%c1, %c0_22, %c0_23] : memref<9x128x128xbf16, #tpu.memory_space<vmem>>, vector<1x128x128xbf16>
    %22 = vector.shape_cast %21 : vector<1x128x128xbf16> to vector<128x128xbf16>
    %cst_24 = arith.constant dense<0.000000e+00> : vector<256x128xf32>
    %23 = tpu.matmul %13, %22, %cst_24 {dimension_numbers = #tpu.dot_dimension_numbers<[1], [0], [0], [1], [0, 0, 1, 1], [], []>} : vector<256x128xbf16>, vector<128x128xbf16>, vector<256x128xf32> -> vector<256x128xf32>
    %24 = arith.addf %20, %23 : vector<256x128xf32>
    %c0_25 = arith.constant 0 : index
    %c0_26 = arith.constant 0 : index
    %25 = vector.load %arg11[%c0_25, %c0_26] : memref<256x128xf32, #tpu.memory_space<vmem>>, vector<256x128xf32>
    tpu.vector_store %arg11[%c0_25, %c0_26], %24 {strides = array<i32>} : memref<256x128xf32, #tpu.memory_space<vmem>>, vector<256x128xf32>,
    %c0_27 = arith.constant 0 : index
    %c0_28 = arith.constant 0 : index
    %26 = vector.load %arg12[%c0_27, %c0_28] : memref<256x128xf32, #tpu.memory_space<vmem>>, vector<256x128xf32>
    %c2 = arith.constant 2 : index
    %c0_29 = arith.constant 0 : index
    %c0_30 = arith.constant 0 : index
    %27 = vector.load %arg5[%c2, %c0_29, %c0_30] : memref<9x128x128xbf16, #tpu.memory_space<vmem>>, vector<1x128x128xbf16>
    %28 = vector.shape_cast %27 : vector<1x128x128xbf16> to vector<128x128xbf16>
    %cst_31 = arith.constant dense<0.000000e+00> : vector<256x128xf32>
    %29 = tpu.matmul %13, %28, %cst_31 {dimension_numbers = #tpu.dot_dimension_numbers<[1], [0], [0], [1], [0, 0, 1, 1], [], []>} : vector<256x128xbf16>, vector<128x128xbf16>, vector<256x128xf32> -> vector<256x128xf32>
    %30 = arith.addf %26, %29 : vector<256x128xf32>
    %c0_32 = arith.constant 0 : index
    %c0_33 = arith.constant 0 : index
    %31 = vector.load %arg12[%c0_32, %c0_33] : memref<256x128xf32, #tpu.memory_space<vmem>>, vector<256x128xf32>
    tpu.vector_store %arg12[%c0_32, %c0_33], %30 {strides = array<i32>} : memref<256x128xf32, #tpu.memory_space<vmem>>, vector<256x128xf32>,
    %32 = vector.shape_cast %7 : vector<16x16x128xbf16> to vector<256x128xbf16>
    %c0_34 = arith.constant 0 : index
    %c0_35 = arith.constant 0 : index
    %33 = vector.load %arg10[%c0_34, %c0_35] : memref<256x128xf32, #tpu.memory_space<vmem>>, vector<256x128xf32>
    %c3 = arith.constant 3 : index
    %c0_36 = arith.constant 0 : index
    %c0_37 = arith.constant 0 : index
    %34 = vector.load %arg5[%c3, %c0_36, %c0_37] : memref<9x128x128xbf16, #tpu.memory_space<vmem>>, vector<1x128x128xbf16>
    %35 = vector.shape_cast %34 : vector<1x128x128xbf16> to vector<128x128xbf16>
    %cst_38 = arith.constant dense<0.000000e+00> : vector<256x128xf32>
    %36 = tpu.matmul %32, %35, %cst_38 {dimension_numbers = #tpu.dot_dimension_numbers<[1], [0], [0], [1], [0, 0, 1, 1], [], []>} : vector<256x128xbf16>, vector<128x128xbf16>, vector<256x128xf32> -> vector<256x128xf32>
    %37 = arith.addf %33, %36 : vector<256x128xf32>
    %c0_39 = arith.constant 0 : index
    %c0_40 = arith.constant 0 : index
    %38 = vector.load %arg10[%c0_39, %c0_40] : memref<256x128xf32, #tpu.memory_space<vmem>>, vector<256x128xf32>
    tpu.vector_store %arg10[%c0_39, %c0_40], %37 {strides = array<i32>} : memref<256x128xf32, #tpu.memory_space<vmem>>, vector<256x128xf32>,
    %c0_41 = arith.constant 0 : index
    %c0_42 = arith.constant 0 : index
    %39 = vector.load %arg11[%c0_41, %c0_42] : memref<256x128xf32, #tpu.memory_space<vmem>>, vector<256x128xf32>
    %c4 = arith.constant 4 : index
    %c0_43 = arith.constant 0 : index
    %c0_44 = arith.constant 0 : index
    %40 = vector.load %arg5[%c4, %c0_43, %c0_44] : memref<9x128x128xbf16, #tpu.memory_space<vmem>>, vector<1x128x128xbf16>
    %41 = vector.shape_cast %40 : vector<1x128x128xbf16> to vector<128x128xbf16>
    %cst_45 = arith.constant dense<0.000000e+00> : vector<256x128xf32>
    %42 = tpu.matmul %32, %41, %cst_45 {dimension_numbers = #tpu.dot_dimension_numbers<[1], [0], [0], [1], [0, 0, 1, 1], [], []>} : vector<256x128xbf16>, vector<128x128xbf16>, vector<256x128xf32> -> vector<256x128xf32>
    %43 = arith.addf %39, %42 : vector<256x128xf32>
    %c0_46 = arith.constant 0 : index
    %c0_47 = arith.constant 0 : index
    %44 = vector.load %arg11[%c0_46, %c0_47] : memref<256x128xf32, #tpu.memory_space<vmem>>, vector<256x128xf32>
    tpu.vector_store %arg11[%c0_46, %c0_47], %43 {strides = array<i32>} : memref<256x128xf32, #tpu.memory_space<vmem>>, vector<256x128xf32>,
    %c0_48 = arith.constant 0 : index
    %c0_49 = arith.constant 0 : index
    %45 = vector.load %arg12[%c0_48, %c0_49] : memref<256x128xf32, #tpu.memory_space<vmem>>, vector<256x128xf32>
    %c5 = arith.constant 5 : index
    %c0_50 = arith.constant 0 : index
    %c0_51 = arith.constant 0 : index
    %46 = vector.load %arg5[%c5, %c0_50, %c0_51] : memref<9x128x128xbf16, #tpu.memory_space<vmem>>, vector<1x128x128xbf16>
    %47 = vector.shape_cast %46 : vector<1x128x128xbf16> to vector<128x128xbf16>
    %cst_52 = arith.constant dense<0.000000e+00> : vector<256x128xf32>
    %48 = tpu.matmul %32, %47, %cst_52 {dimension_numbers = #tpu.dot_dimension_numbers<[1], [0], [0], [1], [0, 0, 1, 1], [], []>} : vector<256x128xbf16>, vector<128x128xbf16>, vector<256x128xf32> -> vector<256x128xf32>
    %49 = arith.addf %45, %48 : vector<256x128xf32>
    %c0_53 = arith.constant 0 : index
    %c0_54 = arith.constant 0 : index
    %50 = vector.load %arg12[%c0_53, %c0_54] : memref<256x128xf32, #tpu.memory_space<vmem>>, vector<256x128xf32>
    tpu.vector_store %arg12[%c0_53, %c0_54], %49 {strides = array<i32>} : memref<256x128xf32, #tpu.memory_space<vmem>>, vector<256x128xf32>,
    %51 = vector.shape_cast %12 : vector<16x16x128xbf16> to vector<256x128xbf16>
    %c0_55 = arith.constant 0 : index
    %c0_56 = arith.constant 0 : index
    %52 = vector.load %arg10[%c0_55, %c0_56] : memref<256x128xf32, #tpu.memory_space<vmem>>, vector<256x128xf32>
    %c6 = arith.constant 6 : index
    %c0_57 = arith.constant 0 : index
    %c0_58 = arith.constant 0 : index
    %53 = vector.load %arg5[%c6, %c0_57, %c0_58] : memref<9x128x128xbf16, #tpu.memory_space<vmem>>, vector<1x128x128xbf16>
    %54 = vector.shape_cast %53 : vector<1x128x128xbf16> to vector<128x128xbf16>
    %cst_59 = arith.constant dense<0.000000e+00> : vector<256x128xf32>
    %55 = tpu.matmul %51, %54, %cst_59 {dimension_numbers = #tpu.dot_dimension_numbers<[1], [0], [0], [1], [0, 0, 1, 1], [], []>} : vector<256x128xbf16>, vector<128x128xbf16>, vector<256x128xf32> -> vector<256x128xf32>
    %56 = arith.addf %52, %55 : vector<256x128xf32>
    %c0_60 = arith.constant 0 : index
    %c0_61 = arith.constant 0 : index
    %57 = vector.load %arg10[%c0_60, %c0_61] : memref<256x128xf32, #tpu.memory_space<vmem>>, vector<256x128xf32>
    tpu.vector_store %arg10[%c0_60, %c0_61], %56 {strides = array<i32>} : memref<256x128xf32, #tpu.memory_space<vmem>>, vector<256x128xf32>,
    %c0_62 = arith.constant 0 : index
    %c0_63 = arith.constant 0 : index
    %58 = vector.load %arg11[%c0_62, %c0_63] : memref<256x128xf32, #tpu.memory_space<vmem>>, vector<256x128xf32>
    %c7 = arith.constant 7 : index
    %c0_64 = arith.constant 0 : index
    %c0_65 = arith.constant 0 : index
    %59 = vector.load %arg5[%c7, %c0_64, %c0_65] : memref<9x128x128xbf16, #tpu.memory_space<vmem>>, vector<1x128x128xbf16>
    %60 = vector.shape_cast %59 : vector<1x128x128xbf16> to vector<128x128xbf16>
    %cst_66 = arith.constant dense<0.000000e+00> : vector<256x128xf32>
    %61 = tpu.matmul %51, %60, %cst_66 {dimension_numbers = #tpu.dot_dimension_numbers<[1], [0], [0], [1], [0, 0, 1, 1], [], []>} : vector<256x128xbf16>, vector<128x128xbf16>, vector<256x128xf32> -> vector<256x128xf32>
    %62 = arith.addf %58, %61 : vector<256x128xf32>
    %c0_67 = arith.constant 0 : index
    %c0_68 = arith.constant 0 : index
    %63 = vector.load %arg11[%c0_67, %c0_68] : memref<256x128xf32, #tpu.memory_space<vmem>>, vector<256x128xf32>
    tpu.vector_store %arg11[%c0_67, %c0_68], %62 {strides = array<i32>} : memref<256x128xf32, #tpu.memory_space<vmem>>, vector<256x128xf32>,
    %c0_69 = arith.constant 0 : index
    %c0_70 = arith.constant 0 : index
    %64 = vector.load %arg12[%c0_69, %c0_70] : memref<256x128xf32, #tpu.memory_space<vmem>>, vector<256x128xf32>
    %c8 = arith.constant 8 : index
    %c0_71 = arith.constant 0 : index
    %c0_72 = arith.constant 0 : index
    %65 = vector.load %arg5[%c8, %c0_71, %c0_72] : memref<9x128x128xbf16, #tpu.memory_space<vmem>>, vector<1x128x128xbf16>
    %66 = vector.shape_cast %65 : vector<1x128x128xbf16> to vector<128x128xbf16>
    %cst_73 = arith.constant dense<0.000000e+00> : vector<256x128xf32>
    %67 = tpu.matmul %51, %66, %cst_73 {dimension_numbers = #tpu.dot_dimension_numbers<[1], [0], [0], [1], [0, 0, 1, 1], [], []>} : vector<256x128xbf16>, vector<128x128xbf16>, vector<256x128xf32> -> vector<256x128xf32>
    %68 = arith.addf %64, %67 : vector<256x128xf32>
    %c0_74 = arith.constant 0 : index
    %c0_75 = arith.constant 0 : index
    %69 = vector.load %arg12[%c0_74, %c0_75] : memref<256x128xf32, #tpu.memory_space<vmem>>, vector<256x128xf32>
    tpu.vector_store %arg12[%c0_74, %c0_75], %68 {strides = array<i32>} : memref<256x128xf32, #tpu.memory_space<vmem>>, vector<256x128xf32>,
    %c0_76 = arith.constant 0 : index
    %c0_77 = arith.constant 0 : index
    %c0_78 = arith.constant 0 : index
    %c0_79 = arith.constant 0 : index
    %70 = vector.load %arg3[%c0_76, %c0_77, %c0_78, %c0_79] : memref<1x16x16x128xbf16, #tpu.memory_space<vmem>>, vector<1x16x16x128xbf16>
    %71 = vector.shape_cast %70 : vector<1x16x16x128xbf16> to vector<16x16x128xbf16>
    %cst_80 = arith.constant 0.000000e+00 : bf16
    %72 = vector.broadcast %cst_80 : bf16 to vector<1x16x128xbf16>
    %73 = vector.extract_strided_slice %71 {offsets = [0, 0, 0], sizes = [15, 16, 128], strides = [1, 1, 1]} : vector<16x16x128xbf16> to vector<15x16x128xbf16>
    %74 = tpu.concatenate %72, %73 in 0 : vector<1x16x128xbf16>, vector<15x16x128xbf16> -> vector<16x16x128xbf16>
    %75 = vector.extract_strided_slice %71 {offsets = [1, 0, 0], sizes = [15, 16, 128], strides = [1, 1, 1]} : vector<16x16x128xbf16> to vector<15x16x128xbf16>
    %76 = tpu.concatenate %75, %72 in 0 : vector<15x16x128xbf16>, vector<1x16x128xbf16> -> vector<16x16x128xbf16>
    %77 = vector.shape_cast %74 : vector<16x16x128xbf16> to vector<256x128xbf16>
    %c0_81 = arith.constant 0 : index
    %c0_82 = arith.constant 0 : index
    %78 = vector.load %arg10[%c0_81, %c0_82] : memref<256x128xf32, #tpu.memory_space<vmem>>, vector<256x128xf32>
    %c0_83 = arith.constant 0 : index
    %c0_84 = arith.constant 0 : index
    %c0_85 = arith.constant 0 : index
    %79 = vector.load %arg6[%c0_83, %c0_84, %c0_85] : memref<9x128x128xbf16, #tpu.memory_space<vmem>>, vector<1x128x128xbf16>
    %80 = vector.shape_cast %79 : vector<1x128x128xbf16> to vector<128x128xbf16>
    %cst_86 = arith.constant dense<0.000000e+00> : vector<256x128xf32>
    %81 = tpu.matmul %77, %80, %cst_86 {dimension_numbers = #tpu.dot_dimension_numbers<[1], [0], [0], [1], [0, 0, 1, 1], [], []>} : vector<256x128xbf16>, vector<128x128xbf16>, vector<256x128xf32> -> vector<256x128xf32>
    %82 = arith.addf %78, %81 : vector<256x128xf32>
    %c0_87 = arith.constant 0 : index
    %c0_88 = arith.constant 0 : index
    %83 = vector.load %arg10[%c0_87, %c0_88] : memref<256x128xf32, #tpu.memory_space<vmem>>, vector<256x128xf32>
    tpu.vector_store %arg10[%c0_87, %c0_88], %82 {strides = array<i32>} : memref<256x128xf32, #tpu.memory_space<vmem>>, vector<256x128xf32>,
    %c0_89 = arith.constant 0 : index
    %c0_90 = arith.constant 0 : index
    %84 = vector.load %arg11[%c0_89, %c0_90] : memref<256x128xf32, #tpu.memory_space<vmem>>, vector<256x128xf32>
    %c1_91 = arith.constant 1 : index
    %c0_92 = arith.constant 0 : index
    %c0_93 = arith.constant 0 : index
    %85 = vector.load %arg6[%c1_91, %c0_92, %c0_93] : memref<9x128x128xbf16, #tpu.memory_space<vmem>>, vector<1x128x128xbf16>
    %86 = vector.shape_cast %85 : vector<1x128x128xbf16> to vector<128x128xbf16>
    %cst_94 = arith.constant dense<0.000000e+00> : vector<256x128xf32>
    %87 = tpu.matmul %77, %86, %cst_94 {dimension_numbers = #tpu.dot_dimension_numbers<[1], [0], [0], [1], [0, 0, 1, 1], [], []>} : vector<256x128xbf16>, vector<128x128xbf16>, vector<256x128xf32> -> vector<256x128xf32>
    %88 = arith.addf %84, %87 : vector<256x128xf32>
    %c0_95 = arith.constant 0 : index
    %c0_96 = arith.constant 0 : index
    %89 = vector.load %arg11[%c0_95, %c0_96] : memref<256x128xf32, #tpu.memory_space<vmem>>, vector<256x128xf32>
    tpu.vector_store %arg11[%c0_95, %c0_96], %88 {strides = array<i32>} : memref<256x128xf32, #tpu.memory_space<vmem>>, vector<256x128xf32>,
    %c0_97 = arith.constant 0 : index
    %c0_98 = arith.constant 0 : index
    %90 = vector.load %arg12[%c0_97, %c0_98] : memref<256x128xf32, #tpu.memory_space<vmem>>, vector<256x128xf32>
    %c2_99 = arith.constant 2 : index
    %c0_100 = arith.constant 0 : index
    %c0_101 = arith.constant 0 : index
    %91 = vector.load %arg6[%c2_99, %c0_100, %c0_101] : memref<9x128x128xbf16, #tpu.memory_space<vmem>>, vector<1x128x128xbf16>
    %92 = vector.shape_cast %91 : vector<1x128x128xbf16> to vector<128x128xbf16>
    %cst_102 = arith.constant dense<0.000000e+00> : vector<256x128xf32>
    %93 = tpu.matmul %77, %92, %cst_102 {dimension_numbers = #tpu.dot_dimension_numbers<[1], [0], [0], [1], [0, 0, 1, 1], [], []>} : vector<256x128xbf16>, vector<128x128xbf16>, vector<256x128xf32> -> vector<256x128xf32>
    %94 = arith.addf %90, %93 : vector<256x128xf32>
    %c0_103 = arith.constant 0 : index
    %c0_104 = arith.constant 0 : index
    %95 = vector.load %arg12[%c0_103, %c0_104] : memref<256x128xf32, #tpu.memory_space<vmem>>, vector<256x128xf32>
    tpu.vector_store %arg12[%c0_103, %c0_104], %94 {strides = array<i32>} : memref<256x128xf32, #tpu.memory_space<vmem>>, vector<256x128xf32>,
    %96 = vector.shape_cast %71 : vector<16x16x128xbf16> to vector<256x128xbf16>
    %c0_105 = arith.constant 0 : index
    %c0_106 = arith.constant 0 : index
    %97 = vector.load %arg10[%c0_105, %c0_106] : memref<256x128xf32, #tpu.memory_space<vmem>>, vector<256x128xf32>
    %c3_107 = arith.constant 3 : index
    %c0_108 = arith.constant 0 : index
    %c0_109 = arith.constant 0 : index
    %98 = vector.load %arg6[%c3_107, %c0_108, %c0_109] : memref<9x128x128xbf16, #tpu.memory_space<vmem>>, vector<1x128x128xbf16>
    %99 = vector.shape_cast %98 : vector<1x128x128xbf16> to vector<128x128xbf16>
    %cst_110 = arith.constant dense<0.000000e+00> : vector<256x128xf32>
    %100 = tpu.matmul %96, %99, %cst_110 {dimension_numbers = #tpu.dot_dimension_numbers<[1], [0], [0], [1], [0, 0, 1, 1], [], []>} : vector<256x128xbf16>, vector<128x128xbf16>, vector<256x128xf32> -> vector<256x128xf32>
    %101 = arith.addf %97, %100 : vector<256x128xf32>
    %c0_111 = arith.constant 0 : index
    %c0_112 = arith.constant 0 : index
    %102 = vector.load %arg10[%c0_111, %c0_112] : memref<256x128xf32, #tpu.memory_space<vmem>>, vector<256x128xf32>
    tpu.vector_store %arg10[%c0_111, %c0_112], %101 {strides = array<i32>} : memref<256x128xf32, #tpu.memory_space<vmem>>, vector<256x128xf32>,
    %c0_113 = arith.constant 0 : index
    %c0_114 = arith.constant 0 : index
    %103 = vector.load %arg11[%c0_113, %c0_114] : memref<256x128xf32, #tpu.memory_space<vmem>>, vector<256x128xf32>
    %c4_115 = arith.constant 4 : index
    %c0_116 = arith.constant 0 : index
    %c0_117 = arith.constant 0 : index
    %104 = vector.load %arg6[%c4_115, %c0_116, %c0_117] : memref<9x128x128xbf16, #tpu.memory_space<vmem>>, vector<1x128x128xbf16>
    %105 = vector.shape_cast %104 : vector<1x128x128xbf16> to vector<128x128xbf16>
    %cst_118 = arith.constant dense<0.000000e+00> : vector<256x128xf32>
    %106 = tpu.matmul %96, %105, %cst_118 {dimension_numbers = #tpu.dot_dimension_numbers<[1], [0], [0], [1], [0, 0, 1, 1], [], []>} : vector<256x128xbf16>, vector<128x128xbf16>, vector<256x128xf32> -> vector<256x128xf32>
    %107 = arith.addf %103, %106 : vector<256x128xf32>
    %c0_119 = arith.constant 0 : index
    %c0_120 = arith.constant 0 : index
    %108 = vector.load %arg11[%c0_119, %c0_120] : memref<256x128xf32, #tpu.memory_space<vmem>>, vector<256x128xf32>
    tpu.vector_store %arg11[%c0_119, %c0_120], %107 {strides = array<i32>} : memref<256x128xf32, #tpu.memory_space<vmem>>, vector<256x128xf32>,
    %c0_121 = arith.constant 0 : index
    %c0_122 = arith.constant 0 : index
    %109 = vector.load %arg12[%c0_121, %c0_122] : memref<256x128xf32, #tpu.memory_space<vmem>>, vector<256x128xf32>
    %c5_123 = arith.constant 5 : index
    %c0_124 = arith.constant 0 : index
    %c0_125 = arith.constant 0 : index
    %110 = vector.load %arg6[%c5_123, %c0_124, %c0_125] : memref<9x128x128xbf16, #tpu.memory_space<vmem>>, vector<1x128x128xbf16>
    %111 = vector.shape_cast %110 : vector<1x128x128xbf16> to vector<128x128xbf16>
    %cst_126 = arith.constant dense<0.000000e+00> : vector<256x128xf32>
    %112 = tpu.matmul %96, %111, %cst_126 {dimension_numbers = #tpu.dot_dimension_numbers<[1], [0], [0], [1], [0, 0, 1, 1], [], []>} : vector<256x128xbf16>, vector<128x128xbf16>, vector<256x128xf32> -> vector<256x128xf32>
    %113 = arith.addf %109, %112 : vector<256x128xf32>
    %c0_127 = arith.constant 0 : index
    %c0_128 = arith.constant 0 : index
    %114 = vector.load %arg12[%c0_127, %c0_128] : memref<256x128xf32, #tpu.memory_space<vmem>>, vector<256x128xf32>
    tpu.vector_store %arg12[%c0_127, %c0_128], %113 {strides = array<i32>} : memref<256x128xf32, #tpu.memory_space<vmem>>, vector<256x128xf32>,
    %115 = vector.shape_cast %76 : vector<16x16x128xbf16> to vector<256x128xbf16>
    %c0_129 = arith.constant 0 : index
    %c0_130 = arith.constant 0 : index
    %116 = vector.load %arg10[%c0_129, %c0_130] : memref<256x128xf32, #tpu.memory_space<vmem>>, vector<256x128xf32>
    %c6_131 = arith.constant 6 : index
    %c0_132 = arith.constant 0 : index
    %c0_133 = arith.constant 0 : index
    %117 = vector.load %arg6[%c6_131, %c0_132, %c0_133] : memref<9x128x128xbf16, #tpu.memory_space<vmem>>, vector<1x128x128xbf16>
    %118 = vector.shape_cast %117 : vector<1x128x128xbf16> to vector<128x128xbf16>
    %cst_134 = arith.constant dense<0.000000e+00> : vector<256x128xf32>
    %119 = tpu.matmul %115, %118, %cst_134 {dimension_numbers = #tpu.dot_dimension_numbers<[1], [0], [0], [1], [0, 0, 1, 1], [], []>} : vector<256x128xbf16>, vector<128x128xbf16>, vector<256x128xf32> -> vector<256x128xf32>
    %120 = arith.addf %116, %119 : vector<256x128xf32>
    %c0_135 = arith.constant 0 : index
    %c0_136 = arith.constant 0 : index
    %121 = vector.load %arg10[%c0_135, %c0_136] : memref<256x128xf32, #tpu.memory_space<vmem>>, vector<256x128xf32>
    tpu.vector_store %arg10[%c0_135, %c0_136], %120 {strides = array<i32>} : memref<256x128xf32, #tpu.memory_space<vmem>>, vector<256x128xf32>,
    %c0_137 = arith.constant 0 : index
    %c0_138 = arith.constant 0 : index
    %122 = vector.load %arg11[%c0_137, %c0_138] : memref<256x128xf32, #tpu.memory_space<vmem>>, vector<256x128xf32>
    %c7_139 = arith.constant 7 : index
    %c0_140 = arith.constant 0 : index
    %c0_141 = arith.constant 0 : index
    %123 = vector.load %arg6[%c7_139, %c0_140, %c0_141] : memref<9x128x128xbf16, #tpu.memory_space<vmem>>, vector<1x128x128xbf16>
    %124 = vector.shape_cast %123 : vector<1x128x128xbf16> to vector<128x128xbf16>
    %cst_142 = arith.constant dense<0.000000e+00> : vector<256x128xf32>
    %125 = tpu.matmul %115, %124, %cst_142 {dimension_numbers = #tpu.dot_dimension_numbers<[1], [0], [0], [1], [0, 0, 1, 1], [], []>} : vector<256x128xbf16>, vector<128x128xbf16>, vector<256x128xf32> -> vector<256x128xf32>
    %126 = arith.addf %122, %125 : vector<256x128xf32>
    %c0_143 = arith.constant 0 : index
    %c0_144 = arith.constant 0 : index
    %127 = vector.load %arg11[%c0_143, %c0_144] : memref<256x128xf32, #tpu.memory_space<vmem>>, vector<256x128xf32>
    tpu.vector_store %arg11[%c0_143, %c0_144], %126 {strides = array<i32>} : memref<256x128xf32, #tpu.memory_space<vmem>>, vector<256x128xf32>,
    %c0_145 = arith.constant 0 : index
    %c0_146 = arith.constant 0 : index
    %128 = vector.load %arg12[%c0_145, %c0_146] : memref<256x128xf32, #tpu.memory_space<vmem>>, vector<256x128xf32>
    %c8_147 = arith.constant 8 : index
    %c0_148 = arith.constant 0 : index
    %c0_149 = arith.constant 0 : index
    %129 = vector.load %arg6[%c8_147, %c0_148, %c0_149] : memref<9x128x128xbf16, #tpu.memory_space<vmem>>, vector<1x128x128xbf16>
    %130 = vector.shape_cast %129 : vector<1x128x128xbf16> to vector<128x128xbf16>
    %cst_150 = arith.constant dense<0.000000e+00> : vector<256x128xf32>
    %131 = tpu.matmul %115, %130, %cst_150 {dimension_numbers = #tpu.dot_dimension_numbers<[1], [0], [0], [1], [0, 0, 1, 1], [], []>} : vector<256x128xbf16>, vector<128x128xbf16>, vector<256x128xf32> -> vector<256x128xf32>
    %132 = arith.addf %128, %131 : vector<256x128xf32>
    %c0_151 = arith.constant 0 : index
    %c0_152 = arith.constant 0 : index
    %133 = vector.load %arg12[%c0_151, %c0_152] : memref<256x128xf32, #tpu.memory_space<vmem>>, vector<256x128xf32>
    tpu.vector_store %arg12[%c0_151, %c0_152], %132 {strides = array<i32>} : memref<256x128xf32, #tpu.memory_space<vmem>>, vector<256x128xf32>,
    %c0_153 = arith.constant 0 : index
    %c0_154 = arith.constant 0 : index
    %c0_155 = arith.constant 0 : index
    %c0_156 = arith.constant 0 : index
    %134 = vector.load %arg4[%c0_153, %c0_154, %c0_155, %c0_156] : memref<1x16x16x128xbf16, #tpu.memory_space<vmem>>, vector<1x16x16x128xbf16>
    %135 = vector.shape_cast %134 : vector<1x16x16x128xbf16> to vector<16x16x128xbf16>
    %cst_157 = arith.constant 0.000000e+00 : bf16
    %136 = vector.broadcast %cst_157 : bf16 to vector<1x16x128xbf16>
    %137 = vector.extract_strided_slice %135 {offsets = [0, 0, 0], sizes = [15, 16, 128], strides = [1, 1, 1]} : vector<16x16x128xbf16> to vector<15x16x128xbf16>
    %138 = tpu.concatenate %136, %137 in 0 : vector<1x16x128xbf16>, vector<15x16x128xbf16> -> vector<16x16x128xbf16>
    %139 = vector.extract_strided_slice %135 {offsets = [1, 0, 0], sizes = [15, 16, 128], strides = [1, 1, 1]} : vector<16x16x128xbf16> to vector<15x16x128xbf16>
    %140 = tpu.concatenate %139, %136 in 0 : vector<15x16x128xbf16>, vector<1x16x128xbf16> -> vector<16x16x128xbf16>
    %141 = vector.shape_cast %138 : vector<16x16x128xbf16> to vector<256x128xbf16>
    %c0_158 = arith.constant 0 : index
    %c0_159 = arith.constant 0 : index
    %142 = vector.load %arg10[%c0_158, %c0_159] : memref<256x128xf32, #tpu.memory_space<vmem>>, vector<256x128xf32>
    %c0_160 = arith.constant 0 : index
    %c0_161 = arith.constant 0 : index
    %c0_162 = arith.constant 0 : index
    %143 = vector.load %arg7[%c0_160, %c0_161, %c0_162] : memref<9x128x128xbf16, #tpu.memory_space<vmem>>, vector<1x128x128xbf16>
    %144 = vector.shape_cast %143 : vector<1x128x128xbf16> to vector<128x128xbf16>
    %cst_163 = arith.constant dense<0.000000e+00> : vector<256x128xf32>
    %145 = tpu.matmul %141, %144, %cst_163 {dimension_numbers = #tpu.dot_dimension_numbers<[1], [0], [0], [1], [0, 0, 1, 1], [], []>} : vector<256x128xbf16>, vector<128x128xbf16>, vector<256x128xf32> -> vector<256x128xf32>
    %146 = arith.addf %142, %145 : vector<256x128xf32>
    %c0_164 = arith.constant 0 : index
    %c0_165 = arith.constant 0 : index
    %147 = vector.load %arg10[%c0_164, %c0_165] : memref<256x128xf32, #tpu.memory_space<vmem>>, vector<256x128xf32>
    tpu.vector_store %arg10[%c0_164, %c0_165], %146 {strides = array<i32>} : memref<256x128xf32, #tpu.memory_space<vmem>>, vector<256x128xf32>,
    %c0_166 = arith.constant 0 : index
    %c0_167 = arith.constant 0 : index
    %148 = vector.load %arg11[%c0_166, %c0_167] : memref<256x128xf32, #tpu.memory_space<vmem>>, vector<256x128xf32>
    %c1_168 = arith.constant 1 : index
    %c0_169 = arith.constant 0 : index
    %c0_170 = arith.constant 0 : index
    %149 = vector.load %arg7[%c1_168, %c0_169, %c0_170] : memref<9x128x128xbf16, #tpu.memory_space<vmem>>, vector<1x128x128xbf16>
    %150 = vector.shape_cast %149 : vector<1x128x128xbf16> to vector<128x128xbf16>
    %cst_171 = arith.constant dense<0.000000e+00> : vector<256x128xf32>
    %151 = tpu.matmul %141, %150, %cst_171 {dimension_numbers = #tpu.dot_dimension_numbers<[1], [0], [0], [1], [0, 0, 1, 1], [], []>} : vector<256x128xbf16>, vector<128x128xbf16>, vector<256x128xf32> -> vector<256x128xf32>
    %152 = arith.addf %148, %151 : vector<256x128xf32>
    %c0_172 = arith.constant 0 : index
    %c0_173 = arith.constant 0 : index
    %153 = vector.load %arg11[%c0_172, %c0_173] : memref<256x128xf32, #tpu.memory_space<vmem>>, vector<256x128xf32>
    tpu.vector_store %arg11[%c0_172, %c0_173], %152 {strides = array<i32>} : memref<256x128xf32, #tpu.memory_space<vmem>>, vector<256x128xf32>,
    %c0_174 = arith.constant 0 : index
    %c0_175 = arith.constant 0 : index
    %154 = vector.load %arg12[%c0_174, %c0_175] : memref<256x128xf32, #tpu.memory_space<vmem>>, vector<256x128xf32>
    %c2_176 = arith.constant 2 : index
    %c0_177 = arith.constant 0 : index
    %c0_178 = arith.constant 0 : index
    %155 = vector.load %arg7[%c2_176, %c0_177, %c0_178] : memref<9x128x128xbf16, #tpu.memory_space<vmem>>, vector<1x128x128xbf16>
    %156 = vector.shape_cast %155 : vector<1x128x128xbf16> to vector<128x128xbf16>
    %cst_179 = arith.constant dense<0.000000e+00> : vector<256x128xf32>
    %157 = tpu.matmul %141, %156, %cst_179 {dimension_numbers = #tpu.dot_dimension_numbers<[1], [0], [0], [1], [0, 0, 1, 1], [], []>} : vector<256x128xbf16>, vector<128x128xbf16>, vector<256x128xf32> -> vector<256x128xf32>
    %158 = arith.addf %154, %157 : vector<256x128xf32>
    %c0_180 = arith.constant 0 : index
    %c0_181 = arith.constant 0 : index
    %159 = vector.load %arg12[%c0_180, %c0_181] : memref<256x128xf32, #tpu.memory_space<vmem>>, vector<256x128xf32>
    tpu.vector_store %arg12[%c0_180, %c0_181], %158 {strides = array<i32>} : memref<256x128xf32, #tpu.memory_space<vmem>>, vector<256x128xf32>,
    %160 = vector.shape_cast %135 : vector<16x16x128xbf16> to vector<256x128xbf16>
    %c0_182 = arith.constant 0 : index
    %c0_183 = arith.constant 0 : index
    %161 = vector.load %arg10[%c0_182, %c0_183] : memref<256x128xf32, #tpu.memory_space<vmem>>, vector<256x128xf32>
    %c3_184 = arith.constant 3 : index
    %c0_185 = arith.constant 0 : index
    %c0_186 = arith.constant 0 : index
    %162 = vector.load %arg7[%c3_184, %c0_185, %c0_186] : memref<9x128x128xbf16, #tpu.memory_space<vmem>>, vector<1x128x128xbf16>
    %163 = vector.shape_cast %162 : vector<1x128x128xbf16> to vector<128x128xbf16>
    %cst_187 = arith.constant dense<0.000000e+00> : vector<256x128xf32>
    %164 = tpu.matmul %160, %163, %cst_187 {dimension_numbers = #tpu.dot_dimension_numbers<[1], [0], [0], [1], [0, 0, 1, 1], [], []>} : vector<256x128xbf16>, vector<128x128xbf16>, vector<256x128xf32> -> vector<256x128xf32>
    %165 = arith.addf %161, %164 : vector<256x128xf32>
    %c0_188 = arith.constant 0 : index
    %c0_189 = arith.constant 0 : index
    %166 = vector.load %arg10[%c0_188, %c0_189] : memref<256x128xf32, #tpu.memory_space<vmem>>, vector<256x128xf32>
    tpu.vector_store %arg10[%c0_188, %c0_189], %165 {strides = array<i32>} : memref<256x128xf32, #tpu.memory_space<vmem>>, vector<256x128xf32>,
    %c0_190 = arith.constant 0 : index
    %c0_191 = arith.constant 0 : index
    %167 = vector.load %arg11[%c0_190, %c0_191] : memref<256x128xf32, #tpu.memory_space<vmem>>, vector<256x128xf32>
    %c4_192 = arith.constant 4 : index
    %c0_193 = arith.constant 0 : index
    %c0_194 = arith.constant 0 : index
    %168 = vector.load %arg7[%c4_192, %c0_193, %c0_194] : memref<9x128x128xbf16, #tpu.memory_space<vmem>>, vector<1x128x128xbf16>
    %169 = vector.shape_cast %168 : vector<1x128x128xbf16> to vector<128x128xbf16>
    %cst_195 = arith.constant dense<0.000000e+00> : vector<256x128xf32>
    %170 = tpu.matmul %160, %169, %cst_195 {dimension_numbers = #tpu.dot_dimension_numbers<[1], [0], [0], [1], [0, 0, 1, 1], [], []>} : vector<256x128xbf16>, vector<128x128xbf16>, vector<256x128xf32> -> vector<256x128xf32>
    %171 = arith.addf %167, %170 : vector<256x128xf32>
    %c0_196 = arith.constant 0 : index
    %c0_197 = arith.constant 0 : index
    %172 = vector.load %arg11[%c0_196, %c0_197] : memref<256x128xf32, #tpu.memory_space<vmem>>, vector<256x128xf32>
    tpu.vector_store %arg11[%c0_196, %c0_197], %171 {strides = array<i32>} : memref<256x128xf32, #tpu.memory_space<vmem>>, vector<256x128xf32>,
    %c0_198 = arith.constant 0 : index
    %c0_199 = arith.constant 0 : index
    %173 = vector.load %arg12[%c0_198, %c0_199] : memref<256x128xf32, #tpu.memory_space<vmem>>, vector<256x128xf32>
    %c5_200 = arith.constant 5 : index
    %c0_201 = arith.constant 0 : index
    %c0_202 = arith.constant 0 : index
    %174 = vector.load %arg7[%c5_200, %c0_201, %c0_202] : memref<9x128x128xbf16, #tpu.memory_space<vmem>>, vector<1x128x128xbf16>
    %175 = vector.shape_cast %174 : vector<1x128x128xbf16> to vector<128x128xbf16>
    %cst_203 = arith.constant dense<0.000000e+00> : vector<256x128xf32>
    %176 = tpu.matmul %160, %175, %cst_203 {dimension_numbers = #tpu.dot_dimension_numbers<[1], [0], [0], [1], [0, 0, 1, 1], [], []>} : vector<256x128xbf16>, vector<128x128xbf16>, vector<256x128xf32> -> vector<256x128xf32>
    %177 = arith.addf %173, %176 : vector<256x128xf32>
    %c0_204 = arith.constant 0 : index
    %c0_205 = arith.constant 0 : index
    %178 = vector.load %arg12[%c0_204, %c0_205] : memref<256x128xf32, #tpu.memory_space<vmem>>, vector<256x128xf32>
    tpu.vector_store %arg12[%c0_204, %c0_205], %177 {strides = array<i32>} : memref<256x128xf32, #tpu.memory_space<vmem>>, vector<256x128xf32>,
    %179 = vector.shape_cast %140 : vector<16x16x128xbf16> to vector<256x128xbf16>
    %c0_206 = arith.constant 0 : index
    %c0_207 = arith.constant 0 : index
    %180 = vector.load %arg10[%c0_206, %c0_207] : memref<256x128xf32, #tpu.memory_space<vmem>>, vector<256x128xf32>
    %c6_208 = arith.constant 6 : index
    %c0_209 = arith.constant 0 : index
    %c0_210 = arith.constant 0 : index
    %181 = vector.load %arg7[%c6_208, %c0_209, %c0_210] : memref<9x128x128xbf16, #tpu.memory_space<vmem>>, vector<1x128x128xbf16>
    %182 = vector.shape_cast %181 : vector<1x128x128xbf16> to vector<128x128xbf16>
    %cst_211 = arith.constant dense<0.000000e+00> : vector<256x128xf32>
    %183 = tpu.matmul %179, %182, %cst_211 {dimension_numbers = #tpu.dot_dimension_numbers<[1], [0], [0], [1], [0, 0, 1, 1], [], []>} : vector<256x128xbf16>, vector<128x128xbf16>, vector<256x128xf32> -> vector<256x128xf32>
    %184 = arith.addf %180, %183 : vector<256x128xf32>
    %c0_212 = arith.constant 0 : index
    %c0_213 = arith.constant 0 : index
    %185 = vector.load %arg10[%c0_212, %c0_213] : memref<256x128xf32, #tpu.memory_space<vmem>>, vector<256x128xf32>
    tpu.vector_store %arg10[%c0_212, %c0_213], %184 {strides = array<i32>} : memref<256x128xf32, #tpu.memory_space<vmem>>, vector<256x128xf32>,
    %c0_214 = arith.constant 0 : index
    %c0_215 = arith.constant 0 : index
    %186 = vector.load %arg11[%c0_214, %c0_215] : memref<256x128xf32, #tpu.memory_space<vmem>>, vector<256x128xf32>
    %c7_216 = arith.constant 7 : index
    %c0_217 = arith.constant 0 : index
    %c0_218 = arith.constant 0 : index
    %187 = vector.load %arg7[%c7_216, %c0_217, %c0_218] : memref<9x128x128xbf16, #tpu.memory_space<vmem>>, vector<1x128x128xbf16>
    %188 = vector.shape_cast %187 : vector<1x128x128xbf16> to vector<128x128xbf16>
    %cst_219 = arith.constant dense<0.000000e+00> : vector<256x128xf32>
    %189 = tpu.matmul %179, %188, %cst_219 {dimension_numbers = #tpu.dot_dimension_numbers<[1], [0], [0], [1], [0, 0, 1, 1], [], []>} : vector<256x128xbf16>, vector<128x128xbf16>, vector<256x128xf32> -> vector<256x128xf32>
    %190 = arith.addf %186, %189 : vector<256x128xf32>
    %c0_220 = arith.constant 0 : index
    %c0_221 = arith.constant 0 : index
    %191 = vector.load %arg11[%c0_220, %c0_221] : memref<256x128xf32, #tpu.memory_space<vmem>>, vector<256x128xf32>
    tpu.vector_store %arg11[%c0_220, %c0_221], %190 {strides = array<i32>} : memref<256x128xf32, #tpu.memory_space<vmem>>, vector<256x128xf32>,
    %c0_222 = arith.constant 0 : index
    %c0_223 = arith.constant 0 : index
    %192 = vector.load %arg12[%c0_222, %c0_223] : memref<256x128xf32, #tpu.memory_space<vmem>>, vector<256x128xf32>
    %c8_224 = arith.constant 8 : index
    %c0_225 = arith.constant 0 : index
    %c0_226 = arith.constant 0 : index
    %193 = vector.load %arg7[%c8_224, %c0_225, %c0_226] : memref<9x128x128xbf16, #tpu.memory_space<vmem>>, vector<1x128x128xbf16>
    %194 = vector.shape_cast %193 : vector<1x128x128xbf16> to vector<128x128xbf16>
    %cst_227 = arith.constant dense<0.000000e+00> : vector<256x128xf32>
    %195 = tpu.matmul %179, %194, %cst_227 {dimension_numbers = #tpu.dot_dimension_numbers<[1], [0], [0], [1], [0, 0, 1, 1], [], []>} : vector<256x128xbf16>, vector<128x128xbf16>, vector<256x128xf32> -> vector<256x128xf32>
    %196 = arith.addf %192, %195 : vector<256x128xf32>
    %c0_228 = arith.constant 0 : index
    %c0_229 = arith.constant 0 : index
    %197 = vector.load %arg12[%c0_228, %c0_229] : memref<256x128xf32, #tpu.memory_space<vmem>>, vector<256x128xf32>
    tpu.vector_store %arg12[%c0_228, %c0_229], %196 {strides = array<i32>} : memref<256x128xf32, #tpu.memory_space<vmem>>, vector<256x128xf32>,
    %198 = tpu.iota {dimensions = array<i32: 0>} : vector<256x128xi32>
    %c16_i32 = arith.constant 16 : i32
    %c0_i32 = arith.constant 0 : i32
    %199 = arith.cmpi eq, %c16_i32, %c0_i32 : i32
    %c1_i32 = arith.constant 1 : i32
    %200 = arith.select %199, %c1_i32, %c16_i32 : i32
    %201 = vector.broadcast %200 : i32 to vector<256x128xi32>
    %202 = arith.remsi %198, %201 : vector<256x128xi32>
    %c0_i32_230 = arith.constant 0 : i32
    %203 = vector.broadcast %c0_i32_230 : i32 to vector<256x128xi32>
    %204 = arith.cmpi ne, %202, %203 : vector<256x128xi32>
    %c0_i32_231 = arith.constant 0 : i32
    %205 = vector.broadcast %c0_i32_231 : i32 to vector<256x128xi32>
    %206 = arith.cmpi slt, %202, %205 : vector<256x128xi32>
    %c0_i32_232 = arith.constant 0 : i32
    %207 = arith.cmpi slt, %200, %c0_i32_232 : i32
    %208 = vector.broadcast %207 : i1 to vector<256x128xi1>
    %209 = vector.broadcast %208 : vector<256x128xi1> to vector<256x128xi1>
    %210 = arith.xori %206, %209 : vector<256x128xi1>
    %211 = arith.andi %210, %204 : vector<256x128xi1>
    %212 = vector.broadcast %200 : i32 to vector<256x128xi32>
    %213 = arith.addi %202, %212 : vector<256x128xi32>
    %214 = arith.select %211, %213, %202 : vector<256x128xi1>, vector<256x128xi32>
    %cst_233 = arith.constant 0.000000e+00 : f32
    %215 = vector.broadcast %cst_233 : f32 to vector<1x128xf32>
    %c0_234 = arith.constant 0 : index
    %c0_235 = arith.constant 0 : index
    %216 = vector.load %arg10[%c0_234, %c0_235] : memref<256x128xf32, #tpu.memory_space<vmem>>, vector<256x128xf32>
    %c0_236 = arith.constant 0 : index
    %c0_237 = arith.constant 0 : index
    %217 = vector.load %arg12[%c0_236, %c0_237] : memref<256x128xf32, #tpu.memory_space<vmem>>, vector<256x128xf32>
    %218 = vector.extract_strided_slice %216 {offsets = [0, 0], sizes = [255, 128], strides = [1, 1]} : vector<256x128xf32> to vector<255x128xf32>
    %219 = tpu.concatenate %215, %218 in 0 : vector<1x128xf32>, vector<255x128xf32> -> vector<256x128xf32>
    %220 = vector.extract_strided_slice %217 {offsets = [1, 0], sizes = [255, 128], strides = [1, 1]} : vector<256x128xf32> to vector<255x128xf32>
    %221 = tpu.concatenate %220, %215 in 0 : vector<255x128xf32>, vector<1x128xf32> -> vector<256x128xf32>
    %c0_238 = arith.constant 0 : index
    %c0_239 = arith.constant 0 : index
    %222 = vector.load %arg11[%c0_238, %c0_239] : memref<256x128xf32, #tpu.memory_space<vmem>>, vector<256x128xf32>
    %c0_i32_240 = arith.constant 0 : i32
    %223 = vector.broadcast %c0_i32_240 : i32 to vector<256x128xi32>
    %224 = arith.cmpi eq, %214, %223 : vector<256x128xi32>
    %cst_241 = arith.constant 0.000000e+00 : f32
    %225 = vector.broadcast %cst_241 : f32 to vector<256x128xf32>
    %226 = arith.select %224, %225, %219 : vector<256x128xi1>, vector<256x128xf32>
    %227 = arith.addf %222, %226 : vector<256x128xf32>
    %c15_i32 = arith.constant 15 : i32
    %228 = vector.broadcast %c15_i32 : i32 to vector<256x128xi32>
    %229 = arith.cmpi eq, %214, %228 : vector<256x128xi32>
    %cst_242 = arith.constant 0.000000e+00 : f32
    %230 = vector.broadcast %cst_242 : f32 to vector<256x128xf32>
    %231 = arith.select %229, %230, %221 : vector<256x128xi1>, vector<256x128xf32>
    %232 = arith.addf %227, %231 : vector<256x128xf32>
    %c0_243 = arith.constant 0 : index
    %c0_244 = arith.constant 0 : index
    %233 = vector.load %arg8[%c0_243, %c0_244] : memref<1x128xf32, #tpu.memory_space<vmem>>, vector<1x128xf32>
    %234 = vector.broadcast %233 : vector<1x128xf32> to vector<256x128xf32>
    %235 = arith.addf %232, %234 : vector<256x128xf32>
    %cst_245 = arith.constant 0.000000e+00 : f32
    %236 = vector.broadcast %cst_245 : f32 to vector<256x128xf32>
    %237 = arith.maximumf %235, %236 : vector<256x128xf32>
    %238 = arith.truncf %237 : vector<256x128xf32> to vector<256x128xbf16>
    %c0_246 = arith.constant 0 : index
    %c0_247 = arith.constant 0 : index
    %c0_248 = arith.constant 0 : index
    %239 = vector.load %arg9[%c0_246, %c0_247, %c0_248] : memref<1x256x128xbf16, #tpu.memory_space<vmem>>, vector<1x256x128xbf16>
    %240 = vector.shape_cast %239 : vector<1x256x128xbf16> to vector<256x128xbf16>
    %241 = vector.shape_cast %238 : vector<256x128xbf16> to vector<1x256x128xbf16>
    tpu.vector_store %arg9[%c0_246, %c0_247, %c0_248], %241 {strides = array<i32>} : memref<1x256x128xbf16, #tpu.memory_space<vmem>>, vector<1x256x128xbf16>,
    return
  }
  func.func @transform_0(%arg0: i32, %arg1: i32) -> (i32, i32, i32, i32) {
    %c0_i32 = arith.constant 0 : i32
    %c0_i32_0 = arith.constant 0 : i32
    %c0_i32_1 = arith.constant 0 : i32
    %c0_i32_2 = arith.constant 0 : i32
    return %arg0, %c0_i32, %c0_i32_0, %c0_i32_1 : i32, i32, i32, i32
  }
  func.func @transform_1(%arg0: i32, %arg1: i32) -> (i32, i32, i32, i32) {
    %c0_i32 = arith.constant 0 : i32
    %c0_i32_0 = arith.constant 0 : i32
    %c0_i32_1 = arith.constant 0 : i32
    %c0_i32_2 = arith.constant 0 : i32
    return %arg0, %c0_i32, %c0_i32_0, %c0_i32_1 : i32, i32, i32, i32
  }
  func.func @transform_2(%arg0: i32, %arg1: i32) -> (i32, i32, i32, i32) {
    %c0_i32 = arith.constant 0 : i32
    %c0_i32_0 = arith.constant 0 : i32
    %c0_i32_1 = arith.constant 0 : i32
    %c0_i32_2 = arith.constant 0 : i32
    return %arg0, %c0_i32, %c0_i32_0, %c0_i32_1 : i32, i32, i32, i32
  }
  func.func @transform_3(%arg0: i32, %arg1: i32) -> (i32, i32, i32) {
    %c0_i32 = arith.constant 0 : i32
    %c0_i32_0 = arith.constant 0 : i32
    %c0_i32_1 = arith.constant 0 : i32
    return %c0_i32, %c0_i32_0, %arg1 : i32, i32, i32
  }
  func.func @transform_4(%arg0: i32, %arg1: i32) -> (i32, i32, i32) {
    %c0_i32 = arith.constant 0 : i32
    %c0_i32_0 = arith.constant 0 : i32
    %c0_i32_1 = arith.constant 0 : i32
    return %c0_i32, %c0_i32_0, %arg1 : i32, i32, i32
  }
  func.func @transform_5(%arg0: i32, %arg1: i32) -> (i32, i32, i32) {
    %c0_i32 = arith.constant 0 : i32
    %c0_i32_0 = arith.constant 0 : i32
    %c0_i32_1 = arith.constant 0 : i32
    return %c0_i32, %c0_i32_0, %arg1 : i32, i32, i32
  }
  func.func @transform_6(%arg0: i32, %arg1: i32) -> (i32, i32) {
    %c0_i32 = arith.constant 0 : i32
    %c0_i32_0 = arith.constant 0 : i32
    return %c0_i32, %arg1 : i32, i32
  }
  func.func @transform_7(%arg0: i32, %arg1: i32) -> (i32, i32, i32) {
    %c0_i32 = arith.constant 0 : i32
    %c0_i32_0 = arith.constant 0 : i32
    return %arg0, %c0_i32, %arg1 : i32, i32, i32
  }
}

</mosaic_0001>

<bundles_post_ra>
// kernel: tpu_custom_call.1
= control target key start
LH: loop header
LB: loop body
LE: loop exit
PB: predicated region body
PF: predicated region fallthrough
CT: control target
= control target key end

     0   :  { %s13635_s0 = inlined_call_operand.hbm [shape: bf16[2,16,16,128], index: 0, kind: input, shape index: {}]   ;;  %s13636_s1 = inlined_call_operand.hbm [shape: bf16[2,16,16,128], index: 1, kind: input, shape index: {}]   ;;  %s13637_s2 = inlined_call_operand.hbm [shape: bf16[2,16,16,128], index: 2, kind: input, shape index: {}]   ;;  %s13638_s3 = inlined_call_operand.hbm [shape: bf16[9,128,128], index: 3, kind: input, shape index: {}]   ;;  %s13639_s4 = inlined_call_operand.hbm [shape: bf16[9,128,128], index: 4, kind: input, shape index: {}]   ;;  %s13640_s5 = inlined_call_operand.hbm [shape: bf16[9,128,128], index: 5, kind: input, shape index: {}]   ;;  %s13641_s6 = inlined_call_operand.vmem [shape: f32[1,128], index: 6, kind: input, shape index: {}]   ;;  %s13642_s7 = inlined_call_operand.hbm [shape: bf16[2,256,128], index: 7, kind: output, shape index: {}]  }
   0x1   :  { %13677 = sst [smem:[#allocation151_spill]] %s13636_s1 }
   0x2   :  { %13678 = sst [smem:[#allocation152_spill]] %s13638_s3 }
   0x3   :  { %13679 = sst [smem:[#allocation153_spill]] %s13639_s4 }
   0x4   :  { %13680 = sst [smem:[#allocation154_spill]] %s13640_s5 }
   0x5   :  { %12 = vsyncpa [#allocation6], 0 }
   0x6   :  { %14 = vsyncpa [#allocation6 + $0x1], 0 }
   0x7   :  { %15 = vsyncpa [#allocation9], 0 }
   0x8   :  { %17 = vsyncpa [#allocation9 + $0x1], 0 }
   0x9   :  { %18 = vsyncpa [#allocation12], 0 }
   0xa   :  { %19 = vsyncpa [#allocation15], 0 }
   0xb   :  { %20 = vsyncpa [#allocation7], 0 }
   0xc   :  { %22 = vsyncpa [#allocation7 + $0x1], 0  ;;  %s10936_s24 = smov 0   ;;  %s10938_s25 = smov 0  }
   0xd   :  { %s10940_s26 = smov 0   ;;  %s10942_s27 = smov 0  }
   0xe   :  { %s10944_s28 = smov 0   ;;  %s10946_s29 = smov 0  }
   0xf LB: > { %13681 = sst [smem:[#allocation22_spill]] %s10882_s28  ;;  %s10967_s30 = sadd.s32 4294967295, %s10886_s29   ;;  %s10886_s29 = sphi %s10946_s29, %s28_s29   ;;  %s10882_s28 = sphi %s10944_s28, %s14408_s28   ;;  %s10878_s27 = sphi %s10942_s27, %s14407_s27   ;;  %s10874_s26 = sphi %s10940_s26, %s14411_s26   ;;  %s10870_s25 = sphi %s10938_s25, %s14410_s25   ;;  %s10866_s24 = sphi %s10936_s24, %s14409_s24  }
  0x10   : > { %13682 = sst [smem:[#allocation23_spill]] %s10886_s29  ;;  %s8997_s8 = sadd.s32 4294967294, %s10886_s29  }
  0x11   : > { %p60_p0 = scmp.ne.s32.totalorder %s10870_s25, %s10866_s24  ;;  %p61_p1 = scmp.eq.s32.totalorder %s10967_s30, 0 }
  0x12   : > { %p242_p2 = scmp.eq.s32.totalorder %s10967_s30, 1  ;;  %p248_p3 = scmp.eq.s32.totalorder %s8997_s8, 1 }
  0x13   : > { %p10976_p4 = por %p61_p1, %p60_p0  ;;  %p8998_p5 = scmp.ge.s32.totalorder %s10886_s29, 1 }
  0x14   : > { %p10981_p6 = por %p248_p3, %p60_p0  ;;  %p255_p7 = scmp.lt.s32.totalorder %s10886_s29, 3 }
  0x15   : > { %s13686_s3 = sld [smem:[#allocation152_spill]]  ;;  %s10888_s15 = smov [#allocation11]  }
  0x16   : > { %s13684_s10 = scalar_select %p10981_p6, 1, 0 }
  0x17   : > { %p10989_p8 = pnand %p8998_p5, %p255_p7  ;;  %s270_s16 = sshll.u32 %s10888_s15, 4  ;;  %s271_s16 = int_to_ptr.vmem [resolvable:$true] %s270_s16 }
  0x18   : > { %13685 = sst [smem:[#allocation24_spill]] %s13684_s10  ;;  %p9003_p11 = scmp.ge.s32.totalorder %s10886_s29, 2 }
  0x19   : > { %p10489_p9 = pneg %p10989_p8  ;;  %s13643_s18 = smov 64  }
  0x1a   : > { %s13645_s19 = smov 4   ;;  %s40_s20 = sadd.s32 1, %s10882_s28 }
  0x1b   : > { %s268_s13 = sshll.u32 %s13686_s3, 4  ;;  %p10997_p10 = pnand %p10489_p9, %p61_p1  ;;  %s269_s13 = int_to_ptr.hbm [resolvable:$true] %s268_s13 }
  0x1c   : > { %p42_p12 = scmp.ge.s32.totalorder %s40_s20, 2  ;;  %s47_s21 = sadd.s32 1, %s10874_s26 }
  0x1d   : > { %10492 = dma.hbm_to_vmem [thread:$0]  (!%p10997_p10), %s269_s13, 9216, %s271_s16, [#allocation12], %s13643_s18, %s13643_s18, %s13645_s19  }
  0x1e   : > { %p54_p13 = scmp.ne.s32.totalorder %s10874_s26, %s10870_s25  ;;  %p55_p0 = scmp.eq.s32.totalorder %s10886_s29, 0 }
  0x1f   : > { %s14413_s20 = smov (%p42_p12, %s40_s20), 0  ;;  %p10516_p7 = scmp.lt.s32.totalorder %s10886_s29, 2 }
  0x20   : > { %13689 = sst [smem:[#allocation25_spill]] %s14413_s20  ;;  %p56_p3 = por %p55_p0, %p54_p13 }
  0x21   : > { %p11016_p5 = por %p242_p2, %p54_p13  ;;  %s44_s23 = ssub.s32 %s10882_s28, %s14413_s20 }
  0x22   : > { %p45_p9 = scmp.eq.s32.totalorder %s44_s23, 0  ;;  %s13647_s8 = sand.u32 1, %s10874_s26  }
  0x23   : > { %s11026_s11 = sshll.u32 %s13647_s8, 7  ;;  %s11029_s12 = sshll.u32 %s10882_s28, 7 }
  0x24   : > { %s11032_s13 = scalar_select %p45_p9, %s10874_s26, %s47_s21  }
  0x25   : > { %p11034_p12 = pnand %p10516_p7, %p56_p3  ;;  %s344_s16 = sand.u32 1, %s10886_s29  }
  0x26   : > { %13691 = sst [smem:[#allocation26_spill]] %s11032_s13  ;;  %s348_s8 = scalar_lea.vmem [#allocation8], %s11026_s11 }
  0x27   : > { %s13693_s1 = sld [smem:[#allocation151_spill]]  ;;  %s356_s20 = sshll.u32 %s348_s8, 4  ;;  %s357_s20 = int_to_ptr.vmem [resolvable:$true] %s356_s20 }
  0x28   : > { %s11044_s21 = scalar_lea.sflag [#allocation9], %s344_s16  ;;  %s13694_s28 = smov 4  }
  0x29   : > { %s13695_s13 = smov 64   ;;  %s13696_s4 = sld [smem:[#allocation153_spill]] }
  0x2a   : > { %s10891_s19 = smov [#allocation13]   ;;  %s13697_s5 = sld [smem:[#allocation154_spill]] }
  0x2b   : > { %s286_s8 = sshll.u32 %s10891_s19, 4  ;;  %s326_s19 = scalar_lea.vmem [#allocation5], %s11026_s11  ;;  %s287_s8 = int_to_ptr.vmem [resolvable:$true] %s286_s8 }
  0x2d   : > { %s353_s23 = scalar_lea.hbm %s13693_s1, %s11029_s12 }
  0x2e   : > { %s354_s3 = sshll.u32 %s353_s23, 4  ;;  %s334_s23 = sshll.u32 %s326_s19, 4  ;;  %s355_s3 = int_to_ptr.hbm [resolvable:$true] %s354_s3  ;;  %s335_s23 = int_to_ptr.vmem [resolvable:$true] %s334_s23 }
  0x2f   : > { %10505 = dma.hbm_to_vmem [thread:$0]  (!%p11034_p12), %s355_s3, 2048, %s357_s20, %s11044_s21, %s13695_s13, %s13695_s13, %s13694_s28  }
  0x30   : > { %s284_s18 = sshll.u32 %s13696_s4, 4  ;;  %s300_s16 = sshll.u32 %s13697_s5, 4  ;;  %s285_s18 = int_to_ptr.hbm [resolvable:$true] %s284_s18  ;;  %s301_s16 = int_to_ptr.hbm [resolvable:$true] %s300_s16 }
  0x31   : > { %10495 = dma.hbm_to_vmem [thread:$0]  (!%p10997_p10), %s285_s18, 9216, %s287_s8, [#allocation12], %s13695_s13, %s13695_s13, %s13694_s28  }
  0x32   : > { %s10892_s3 = smov [#allocation14]   ;;  %s331_s20 = scalar_lea.hbm %s13635_s0, %s11029_s12 }
  0x33   : > { %s302_s29 = sshll.u32 %s10892_s3, 4  ;;  %s332_s4 = sshll.u32 %s331_s20, 4  ;;  %s303_s29 = int_to_ptr.vmem [resolvable:$true] %s302_s29  ;;  %s333_s4 = int_to_ptr.hbm [resolvable:$true] %s332_s4 }
  0x34   : > { %10498 = dma.hbm_to_vmem [thread:$0]  (!%p10997_p10), %s301_s16, 9216, %s303_s29, [#allocation15], %s13695_s13, %s13695_s13, %s13694_s28  }
  0x35   : > { %s13698_s18 = sand.u32 1, %s10874_s26   ;;  %s375_s16 = scalar_lea.hbm %s13637_s2, %s11029_s12 }
  0x36   : > { %s323_s8 = scalar_lea.sflag [#allocation6], %s13698_s18  ;;  %s370_s29 = scalar_lea.vmem [#allocation10], %s11026_s11 }
  0x37   : > { %10502 = dma.hbm_to_vmem [thread:$0]  (!%p11034_p12), %s333_s4, 2048, %s335_s23, %s323_s8, %s13695_s13, %s13695_s13, %s13694_s28  }
  0x38   : > { %s378_s5 = sshll.u32 %s370_s29, 4  ;;  %s376_s1 = sshll.u32 %s375_s16, 4  ;;  %s379_s5 = int_to_ptr.vmem [resolvable:$true] %s378_s5  ;;  %s377_s1 = int_to_ptr.hbm [resolvable:$true] %s376_s1 }
  0x39   : > { %10508 = dma.hbm_to_vmem [thread:$0]  (!%p11034_p12), %s377_s1, 2048, %s379_s5, %s11044_s21, %s13695_s13, %s13695_s13, %s13694_s28  }
  0x3a   : > { %390 = sbr.rel (%p10989_p8) target bundleno = 1978 (0x7ba), region = 48 }
  0x3f   : > { %s11094_s4 = sand.u32 1, %s10870_s25  }
  0x40   : > { %s11097_s12 = sshll.u32 %s11094_s4, 7  ;;  %s393_s11 = scalar_lea.sflag [#allocation6], %s11094_s4 }
  0x41   : > { %s11101_s10 = scalar_lea.vmem [#allocation5], %s11097_s12 }
  0x42   : > { %10845 = dma.done.wait (%p10976_p4), %s393_s11, 2048  }
  0x43   : > { %10847 = vsyncadd (%p10976_p4), %s393_s11, 4294965248  ;;  %s402_s5 = sand.u32 1, %s10967_s30   ;;  %s11109_s14 = scalar_lea.vmem [#allocation8], %s11097_s12 }
  0x44   : > { %s403_s28 = scalar_lea.sflag [#allocation9], %s402_s5 }
  0x45   : > { %10849 = dma.done.wait (%p10976_p4), %s403_s28, 4096  }
  0x46   : > { %10851 = vsyncadd (%p10976_p4), %s403_s28, 4294963200  ;;  %s11116_s13 = scalar_lea.vmem [#allocation10], %s11097_s12 }
  0x47   : > { %10853 = dma.done.wait (%p61_p1), [#allocation12], 18432  }
  0x48   : > { %10855 = vsyncadd (%p61_p1), [#allocation12], 4294948864 }
  0x49   : > { %10857 = dma.done.wait (%p61_p1), [#allocation15], 9216  }
  0x4a   : > { %10859 = vsyncadd (%p61_p1), [#allocation15], 4294958080  ;;  %v10108_v0 = vld [vmem:[#allocation11 + $0x38] sm:$0xff]  ;;  %v10107_v3 = vld [vmem:[#allocation11 + $0x30] sm:$0xff]  ;;  %v13653_v29 = vmov 0   ;;  %vm8224_vm0 = vcmask 1040384  }
  0x4b   : > { %v10116_v1 = vld [vmem:[#allocation11 + $0x78] sm:$0xff]  ;;  %794 = vmatpush.bf16.msra.mxu0 %v10108_v0  ;;  %10445 = vmatpush.bf16.msra.mxu3 %v10108_v0  ;;  %v11129_v4 = vld [vmem:[#allocation11 + $0x70] sm:$0xff]  ;;  %v10106_v6 = vld [vmem:[#allocation11 + $0x28] sm:$0xff]  ;;  %vm8353_vm2 = vcmask 1046528   ;;  %s13338_s15 = scalar_lea.vmem [#allocation16], %s11097_s12  ;;  %s10349_s19 = sshll.u32 %s10878_s27, 7 }
  0x4c   : > { %v11126_v2 = vld [vmem:[#allocation11 + $0xb8] sm:$0xff]  ;;  %1044 = vmatpush.bf16.msra.mxu1 %v10116_v1  ;;  %v11131_v5 = vld [vmem:[#allocation11 + $0xb0] sm:$0xff]  ;;  %v10114_v7 = vld [vmem:[#allocation11 + $0x68] sm:$0xff]  ;;  %s8819_s8 = scalar_lea.hbm %s13642_s7, %s10349_s19  ;;  %s8820_s27 = sshll.u32 %s13338_s15, 4  ;;  %s8821_s27 = int_to_ptr.vmem [resolvable:$true] %s8820_s27 }
  0x4d   : > { %1294 = vmatpush.bf16.msra.mxu2 %v11126_v2  ;;  %v11135_v8 = vld [vmem:[#allocation11 + $0xa8] sm:$0xff]  ;;  %v10105_v9 = vld [vmem:[#allocation11 + $0x20] sm:$0xff]  ;;  %v10104_v12 = vld [vmem:[#allocation11 + $0x18] sm:$0xff]  ;;  %s8822_s17 = sshll.u32 %s8819_s8, 4  ;;  %s8807_s3 = scalar_lea.sflag [#allocation7], %s11094_s4  ;;  %s8823_s17 = int_to_ptr.hbm [resolvable:$true] %s8822_s17 }
  0x4e   : > { %v10113_v10 = vld [vmem:[#allocation11 + $0x60] sm:$0xff]  ;;  %v10112_v13 = vld [vmem:[#allocation11 + $0x58] sm:$0xff]  ;;  %v10103_v15 = vld [vmem:[#allocation11 + $0x10] sm:$0xff]  ;;  %s10806_s16 = sshra.s32 %s8823_s17, 4  ;;  %s10812_s11 = scalar_lea.hbm %s13642_s7, 256  ;;  %s10807_s16 = int_to_ptr.hbm [resolvable:$true] %s10806_s16 }
  0x4f   : > { %795 = vmatpush.bf16.msra.mxu0 %v10107_v3  ;;  %10446 = vmatpush.bf16.msra.mxu3 %v10107_v3  ;;  %v11138_v11 = vld [vmem:[#allocation11 + $0xa0] sm:$0xff]  ;;  %v11141_v14 = vld [vmem:[#allocation11 + $0x98] sm:$0xff]  ;;  %v10111_v16 = vld [vmem:[#allocation11 + $0x50] sm:$0xff]  ;;  %s10808_s29 = scalar_lea.hbm %s10807_s16, 128  ;;  %p10813_p8 = scmp.lt.s32.totalorder %s10807_s16, %s13642_s7 }
  0x50   : > { %1045 = vmatpush.bf16.msra.mxu1 %v11129_v4  ;;  %v11144_v17 = vld [vmem:[#allocation11 + $0x90] sm:$0xff]  ;;  %v10102_v18 = vld [vmem:[#allocation11 + $0x8] sm:$0xff]  ;;  %v10101_v21 = vld [vmem:[#allocation11] sm:$0xff]  ;;  %p10809_p1 = scmp.ne.s32.totalorder %s10807_s16, %s10808_s29  ;;  %p10814_p10 = scmp.lt.s32.totalorder %s10812_s11, %s10808_s29 }
  0x51   : > { %1295 = vmatpush.bf16.msra.mxu2 %v11131_v5  ;;  %v10110_v19 = vld [vmem:[#allocation11 + $0x48] sm:$0xff]  ;;  %v10109_v22 = vld [vmem:[#allocation11 + $0x40] sm:$0xff]  ;;  %v10156_v24 = vld [vmem:[#allocation11 + $0x1b8] sm:$0xff] }
  0x52   : > { %v11147_v20 = vld [vmem:[#allocation11 + $0x88] sm:$0xff]  ;;  %v11150_v23 = vld [vmem:[#allocation11 + $0x80] sm:$0xff]  ;;  %v11153_v25 = vld [vmem:[%s11101_s10 + $0x58] sm:$0xff]  ;;  %p10810_p2 = pnand %p10809_p1, %p11016_p5  ;;  %p10815_p13 = por %p10814_p10, %p10813_p8 }
  0x53   : > { %796 = vmatpush.bf16.msra.mxu0 %v10106_v6  ;;  %10447 = vmatpush.bf16.msra.mxu3 %v10106_v6  ;;  %v10140_v26 = vld [vmem:[#allocation11 + $0x138] sm:$0xff]  ;;  %v10155_v28 = vld [vmem:[#allocation11 + $0x1b0] sm:$0xff]  ;;  %v11162_v32 = vld [vmem:[%s11101_s10] sm:$0xff] }
  0x54   : > { %1046 = vmatpush.bf16.msra.mxu1 %v10114_v7  ;;  %v10148_v27 = vld [vmem:[#allocation11 + $0x178] sm:$0xff]  ;;  %v10139_v30 = vld [vmem:[#allocation11 + $0x130] sm:$0xff]  ;;  %v11165_v33 = vld [vmem:[%s11101_s10 + $0x60] sm:$0xff]  ;;  %p10811_p4 = pneg %p10810_p2 }
  0x55   : > { %1296 = vmatpush.bf16.msra.mxu2 %v11135_v8  ;;  %v10147_v31 = vld [vmem:[#allocation11 + $0x170] sm:$0xff]  ;;  %v10154_v34 = vld [vmem:[#allocation11 + $0x1a8] sm:$0xff]  ;;  %v10153_v39 = vld [vmem:[#allocation11 + $0x1a0] sm:$0xff] }
  0x56   : > { %v10138_v35 = vld [vmem:[#allocation11 + $0x128] sm:$0xff]  ;;  %v10137_v40 = vld [vmem:[#allocation11 + $0x120] sm:$0xff]  ;;  %v11186_v41 = vld [vmem:[%s11101_s10 + $0x10] sm:$0xff]  ;;  %p10816_p0 = pnand %p10815_p13, %p10811_p4 }
  0x57   : > { %797 = vmatpush.bf16.msra.mxu0 %v10105_v9  ;;  %10448 = vmatpush.bf16.msra.mxu3 %v10105_v9  ;;  %v10146_v36 = vld [vmem:[#allocation11 + $0x168] sm:$0xff]  ;;  %v11189_v42 = vld [vmem:[%s11101_s10 + $0x70] sm:$0xff]  ;;  %v10145_v43 = vld [vmem:[#allocation11 + $0x160] sm:$0xff] }
  0x58   : > { %1047 = vmatpush.bf16.msra.mxu1 %v10113_v10  ;;  %v11172_v37 = vld [vmem:[%s11101_s10 + $0x8] sm:$0xff]  ;;  %v11200_v44 = vld [vmem:[%s11101_s10 + $0x18] sm:$0xff]  ;;  %v11207_v48 = vld [vmem:[%s11101_s10 + $0x20] sm:$0xff] }
  0x59   : > { %1297 = vmatpush.bf16.msra.mxu2 %v11138_v11  ;;  %v11175_v38 = vld [vmem:[%s11101_s10 + $0x68] sm:$0xff]  ;;  %v10152_v45 = vld [vmem:[#allocation11 + $0x198] sm:$0xff]  ;;  %v10151_v49 = vld [vmem:[#allocation11 + $0x190] sm:$0xff] }
  0x5a   : > { %v10136_v46 = vld [vmem:[#allocation11 + $0x118] sm:$0xff]  ;;  %v11214_v50 = vld [vmem:[%s11101_s10 + $0x28] sm:$0xff]  ;;  %v10135_v51 = vld [vmem:[#allocation11 + $0x110] sm:$0xff] }
  0x5b   : > { %798 = vmatpush.bf16.msra.mxu0 %v10104_v12  ;;  %10449 = vmatpush.bf16.msra.mxu3 %v10104_v12  ;;  %v10144_v47 = vld [vmem:[#allocation11 + $0x158] sm:$0xff]  ;;  %v10143_v53 = vld [vmem:[#allocation11 + $0x150] sm:$0xff]  ;;  %v10130_v56 = vld [vmem:[#allocation11 + $0xe8] sm:$0xff] }
  0x5c   : > { %1048 = vmatpush.bf16.msra.mxu1 %v10112_v13  ;;  %v10132_v52 = vld [vmem:[#allocation11 + $0xf8] sm:$0xff]  ;;  %v10131_v54 = vld [vmem:[#allocation11 + $0xf0] sm:$0xff]  ;;  %v10150_v57 = vld [vmem:[#allocation11 + $0x188] sm:$0xff] }
  0x5d   : > { %1298 = vmatpush.bf16.msra.mxu2 %v11141_v14  ;;  %v11221_v55 = vld [vmem:[%s11101_s10 + $0x30] sm:$0xff]  ;;  %v10134_v58 = vld [vmem:[#allocation11 + $0x108] sm:$0xff]  ;;  %v10129_v59 = vld [vmem:[#allocation11 + $0xe0] sm:$0xff] }
  0x5e   : > { %v10142_v60 = vld [vmem:[#allocation11 + $0x148] sm:$0xff]  ;;  %v11228_v61 = vld [vmem:[%s11101_s10 + $0x38] sm:$0xff]  ;;  %v10149_v6 = vld [vmem:[#allocation11 + $0x180] sm:$0xff] }
  0x5f   : > { %799 = vmatpush.bf16.msra.mxu0 %v10103_v15  ;;  %10450 = vmatpush.bf16.msra.mxu3 %v10103_v15  ;;  %v10128_v0 = vld [vmem:[#allocation11 + $0xd8] sm:$0xff]  ;;  %v11251_v9 = vld [vmem:[%s11101_s10 + $0x40] sm:$0xff] }
  0x60   : > { %1049 = vmatpush.bf16.msra.mxu1 %v10111_v16  ;;  %v10133_v12 = vld [vmem:[#allocation11 + $0x100] sm:$0xff] }
  0x61   : > { %1299 = vmatpush.bf16.msra.mxu2 %v11144_v17 }
  0x63   : > { %800 = vmatpush.bf16.msra.mxu0 %v10102_v18  ;;  %10451 = vmatpush.bf16.msra.mxu3 %v10102_v18 }
  0x64   : > { %1050 = vmatpush.bf16.msra.mxu1 %v10110_v19 }
  0x65   : > { %1300 = vmatpush.bf16.msra.mxu2 %v11147_v20 }
  0x67   : > { %801 = vmatpush.bf16.msra.mxu0 %v10101_v21  ;;  %10452 = vmatpush.bf16.msra.mxu3 %v10101_v21 }
  0x68   : > { %1051 = vmatpush.bf16.msra.mxu1 %v10109_v22 }
  0x69   : > { %1301 = vmatpush.bf16.msra.mxu2 %v11150_v23 }
  0x6a   : > { %802 = vmatmul.bf16.vlgmr.msra.gmra.mxu0 %v13653_v29  ;;  %862 = vmatmul.bf16.vlgmr.msra.gmra.mxu3 %v11153_v25 }
  0x6b   : > { %10453 = vmatpush.bf16.msrb.mxu3 %v10116_v1  ;;  %1052 = vmatmul.bf16.vlgmr.msra.gmra.mxu1 %v13653_v29 }
  0x6c   : > { %1302 = vmatmul.bf16.vlgmr.msra.gmra.mxu2 %v13653_v29  ;;  %1800 = vmatpush.bf16.msrb.mxu0 %v10140_v26  ;;  %v10164_v26 = vld [vmem:[#allocation11 + $0x1f8] sm:$0xff] }
  0x6d   : > { %2304 = vmatpush.bf16.msrb.mxu2 %v10156_v24  ;;  %2050 = vmatpush.bf16.msrb.mxu1 %v10148_v27  ;;  %v10204_v27 = vld [vmem:[#allocation13 + $0x78] sm:$0xff] }
  0x6f   : > { %10454 = vmatpush.bf16.msrb.mxu3 %v11129_v4 }
  0x70   : > { %1801 = vmatpush.bf16.msrb.mxu0 %v10139_v30 }
  0x71   : > { %2305 = vmatpush.bf16.msrb.mxu2 %v10155_v28  ;;  %2051 = vmatpush.bf16.msrb.mxu1 %v10147_v31 }
  0x73   : > { %10455 = vmatpush.bf16.msrb.mxu3 %v10114_v7 }
  0x74   : > { %1802 = vmatpush.bf16.msrb.mxu0 %v10138_v35  ;;  %v10172_v35 = vld [vmem:[#allocation11 + $0x238] sm:$0xff] }
  0x75   : > { %2306 = vmatpush.bf16.msrb.mxu2 %v10154_v34  ;;  %2052 = vmatpush.bf16.msrb.mxu1 %v10146_v36  ;;  %v10196_v36 = vld [vmem:[#allocation13 + $0x38] sm:$0xff] }
  0x77   : > { %10456 = vmatpush.bf16.msrb.mxu3 %v10113_v10 }
  0x78   : > { %1803 = vmatpush.bf16.msrb.mxu0 %v10137_v40 }
  0x79   : > { %2307 = vmatpush.bf16.msrb.mxu2 %v10153_v39  ;;  %2053 = vmatpush.bf16.msrb.mxu1 %v10145_v43  ;;  %v11297_v43 = vld [vmem:[%s11101_s10 + $0x50] sm:$0xff] }
  0x7a   : > { %807 = vmatmul.bf16.gmra.mxu0 %v11162_v32  ;;  %867 = vmatmul.bf16.gmra.mxu3 %v11165_v33  ;;  %13709 = vst [vmem:[#allocation37_spill] sm:$0xff] %v11297_v43 }
  0x7b   : > { %10457 = vmatpush.bf16.msrb.mxu3 %v10112_v13  ;;  %1057 = vmatmul.bf16.gmra.mxu1 %v11162_v32  ;;  %v10126_v13 = vld [vmem:[#allocation11 + $0xc8] sm:$0xff] }
  0x7c   : > { %1307 = vmatmul.bf16.gmra.mxu2 %v11162_v32  ;;  %1804 = vmatpush.bf16.msrb.mxu0 %v10136_v46 }
  0x7d   : > { %2308 = vmatpush.bf16.msrb.mxu2 %v10152_v45  ;;  %2054 = vmatpush.bf16.msrb.mxu1 %v10144_v47 }
  0x7f   : > { %10458 = vmatpush.bf16.msrb.mxu3 %v10111_v16 }
  0x80   : > { %1805 = vmatpush.bf16.msrb.mxu0 %v10135_v51 }
  0x81   : > { %2309 = vmatpush.bf16.msrb.mxu2 %v10151_v49  ;;  %2055 = vmatpush.bf16.msrb.mxu1 %v10143_v53 }
  0x83   : > { %10459 = vmatpush.bf16.msrb.mxu3 %v10110_v19  ;;  %v10125_v19 = vld [vmem:[#allocation11 + $0xc0] sm:$0xff] }
  0x84   : > { %1806 = vmatpush.bf16.msrb.mxu0 %v10134_v58  ;;  %v10163_v58 = vld [vmem:[#allocation11 + $0x1f0] sm:$0xff] }
  0x85   : > { %2310 = vmatpush.bf16.msrb.mxu2 %v10150_v57  ;;  %2056 = vmatpush.bf16.msrb.mxu1 %v10142_v60 }
  0x87   : > { %10460 = vmatpush.bf16.msrb.mxu3 %v10109_v22  ;;  %v11274_v22 = vld [vmem:[%s11101_s10 + $0x48] sm:$0xff] }
  0x88   : > { %1807 = vmatpush.bf16.msrb.mxu0 %v10133_v12  ;;  %v10171_v12 = vld [vmem:[#allocation11 + $0x230] sm:$0xff] }
  0x89   : > { %2311 = vmatpush.bf16.msrb.mxu2 %v10149_v6 }
  0x8a   : > { %812 = vmatmul.bf16.gmra.mxu0 %v11172_v37  ;;  %872 = vmatmul.bf16.gmra.mxu3 %v11175_v38 }
  0x8b   : > { %10461 = vmatpush.bf16.msra.mxu3 %v11126_v2  ;;  %1062 = vmatmul.bf16.gmra.mxu1 %v11172_v37 }
  0x8c   : > { %1312 = vmatmul.bf16.gmra.mxu2 %v11172_v37  ;;  %2804 = vmatpush.bf16.msra.mxu0 %v10172_v35 }
  0x8d   : > { %3425 = vmatpush.bf16.msra.mxu2 %v10204_v27 }
  0x8f   : > { %10462 = vmatpush.bf16.msra.mxu3 %v11131_v5  ;;  %v10127_v5 = vld [vmem:[#allocation11 + $0xd0] sm:$0xff] }
  0x90   : > { %2805 = vmatpush.bf16.msra.mxu0 %v10171_v12 }
  0x93   : > { %10463 = vmatpush.bf16.msra.mxu3 %v11135_v8 }
  0x97   : > { %10464 = vmatpush.bf16.msra.mxu3 %v11138_v11 }
  0x9a   : > { %817 = vmatmul.bf16.gmra.mxu0 %v11186_v41  ;;  %877 = vmatmul.bf16.gmra.mxu3 %v11189_v42 }
  0x9b   : > { %10465 = vmatpush.bf16.msra.mxu3 %v11141_v14  ;;  %1067 = vmatmul.bf16.gmra.mxu1 %v11186_v41  ;;  %v10141_v14 = vld [vmem:[#allocation11 + $0x140] sm:$0xff] }
  0x9c   : > { %1317 = vmatmul.bf16.gmra.mxu2 %v11186_v41  ;;  %2057 = vmatpush.bf16.msrb.mxu1 %v10141_v14 }
  0x9f   : > { %10466 = vmatpush.bf16.msra.mxu3 %v11144_v17 }
  0xa0   : > { %3175 = vmatpush.bf16.msra.mxu1 %v10196_v36 }
  0xa3   : > { %10467 = vmatpush.bf16.msra.mxu3 %v11147_v20 }
  0xa7   : > { %10468 = vmatpush.bf16.msra.mxu3 %v11150_v23 }
  0xaa   : > { %822 = vmatmul.bf16.gmra.mxu0 %v11200_v44  ;;  %1112 = vmatmul.bf16.vlgmr.msrb.gmra.mxu3 %v11153_v25 }
  0xab   : > { %1072 = vmatmul.bf16.gmra.mxu1 %v11200_v44  ;;  %1550 = vmatpush.bf16.msrb.mxu3 %v10132_v52 }
  0xac   : > { %1322 = vmatmul.bf16.gmra.mxu2 %v11200_v44 }
  0xaf   : > { %1551 = vmatpush.bf16.msrb.mxu3 %v10131_v54 }
  0xb3   : > { %1552 = vmatpush.bf16.msrb.mxu3 %v10130_v56 }
  0xb7   : > { %1553 = vmatpush.bf16.msrb.mxu3 %v10129_v59  ;;  %v10203_v59 = vld [vmem:[#allocation13 + $0x70] sm:$0xff] }
  0xb8   : > { %3426 = vmatpush.bf16.msra.mxu2 %v10203_v59 }
  0xba   : > { %827 = vmatmul.bf16.gmra.mxu0 %v11207_v48  ;;  %1117 = vmatmul.bf16.gmra.mxu3 %v11165_v33 }
  0xbb   : > { %1077 = vmatmul.bf16.gmra.mxu1 %v11207_v48  ;;  %1554 = vmatpush.bf16.msrb.mxu3 %v10128_v0 }
  0xbc   : > { %1327 = vmatmul.bf16.gmra.mxu2 %v11207_v48 }
  0xbf   : > { %1555 = vmatpush.bf16.msrb.mxu3 %v10127_v5 }
  0xc3   : > { %1556 = vmatpush.bf16.msrb.mxu3 %v10126_v13  ;;  %v10195_v13 = vld [vmem:[#allocation13 + $0x30] sm:$0xff] }
  0xc4   : > { %3176 = vmatpush.bf16.msra.mxu1 %v10195_v13 }
  0xc7   : > { %1557 = vmatpush.bf16.msrb.mxu3 %v10125_v19 }
  0xca   : > { %832 = vmatmul.bf16.gmra.mxu0 %v11214_v50  ;;  %1122 = vmatmul.bf16.gmra.mxu3 %v11175_v38 }
  0xcb   : > { %1082 = vmatmul.bf16.gmra.mxu1 %v11214_v50 }
  0xcc   : > { %1332 = vmatmul.bf16.gmra.mxu2 %v11214_v50 }
  0xda   : > { %837 = vmatmul.bf16.gmra.mxu0 %v11221_v55  ;;  %1127 = vmatmul.bf16.gmra.mxu3 %v11189_v42 }
  0xdb   : > { %1087 = vmatmul.bf16.gmra.mxu1 %v11221_v55 }
  0xdc   : > { %1337 = vmatmul.bf16.gmra.mxu2 %v11221_v55 }
  0xe7   : > { %v11230_v62 = vpop.f32.mrf.mxu0 }
  0xe8   : > { %v11232_v63 = vpop.f32.mrf.mxu1 }
  0xea   : > { %842 = vmatmul.bf16.gmra.mxu0 %v11228_v61  ;;  %1362 = vmatmul.bf16.vlgmr.msra.gmra.mxu3 %v11153_v25 }
  0xeb   : > { %1092 = vmatmul.bf16.gmra.mxu1 %v11228_v61  ;;  %2554 = vmatpush.bf16.msra.mxu3 %v10164_v26 }
  0xec   : > { %1342 = vmatmul.bf16.gmra.mxu2 %v11228_v61 }
  0xed   : > { %v11238_v1 = vpop.f32.mrf.mxu3 }
  0xef   : > { %v11240_v2 = vpop.f32.mrf.mxu2  ;;  %v11242_v3 = vpop.f32.mrf.mxu0  ;;  %2555 = vmatpush.bf16.msra.mxu3 %v10163_v58 }
  0xf0   : > { %v11244_v4 = vpop.f32.mrf.mxu1 }
  0xf1   : > { %13699 = vst [vmem:[#allocation27_spill] sm:$0xff] %v11244_v4 }
  0xf5   : > { %v11246_v7 = vpop.f32.mrf.mxu3 }
  0xf7   : > { %v11248_v8 = vpop.f32.mrf.mxu2  ;;  %v11253_v10 = vpop.f32.mrf.mxu0 }
  0xf8   : > { %13700 = vst [vmem:[#allocation28_spill] sm:$0xff] %v11248_v8  ;;  %v11255_v11 = vpop.f32.mrf.mxu1 }
  0xf9   : > { %13701 = vst [vmem:[#allocation29_spill] sm:$0xff] %v11255_v11 }
  0xfa   : > { %847 = vmatmul.bf16.gmra.mxu0 %v11251_v9  ;;  %1367 = vmatmul.bf16.gmra.mxu3 %v11165_v33 }
  0xfb   : > { %1097 = vmatmul.bf16.gmra.mxu1 %v11251_v9 }
  0xfc   : > { %1347 = vmatmul.bf16.gmra.mxu2 %v11251_v9 }
  0xfd   : > { %v11261_v15 = vpop.f32.mrf.mxu3 }
  0xff   : > { %v11263_v16 = vpop.f32.mrf.mxu2  ;;  %v11265_v17 = vpop.f32.mrf.mxu0 }
 0x100   : > { %13702 = vst [vmem:[#allocation30_spill] sm:$0xff] %v11263_v16  ;;  %v11267_v18 = vpop.f32.mrf.mxu1 }
 0x101   : > { %13703 = vst [vmem:[#allocation31_spill] sm:$0xff] %v11267_v18  ;;  %v10167_v18 = vld [vmem:[#allocation11 + $0x210] sm:$0xff] }
 0x105   : > { %v11269_v20 = vpop.f32.mrf.mxu3 }
 0x107   : > { %v11271_v21 = vpop.f32.mrf.mxu2  ;;  %v11276_v23 = vpop.f32.mrf.mxu0 }
 0x108   : > { %13704 = vst [vmem:[#allocation32_spill] sm:$0xff] %v11271_v21  ;;  %v11278_v24 = vpop.f32.mrf.mxu1  ;;  %v10191_v21 = vld [vmem:[#allocation13 + $0x10] sm:$0xff] }
 0x109   : > { %13705 = vst [vmem:[#allocation33_spill] sm:$0xff] %v11278_v24 }
 0x10a   : > { %852 = vmatmul.bf16.gmra.mxu0 %v11274_v22  ;;  %1372 = vmatmul.bf16.gmra.mxu3 %v11175_v38 }
 0x10b   : > { %1102 = vmatmul.bf16.gmra.mxu1 %v11274_v22 }
 0x10c   : > { %1352 = vmatmul.bf16.gmra.mxu2 %v11274_v22 }
 0x10d   : > { %v11284_v28 = vpop.f32.mrf.mxu3 }
 0x10f   : > { %v11286_v30 = vpop.f32.mrf.mxu2  ;;  %v11288_v31 = vpop.f32.mrf.mxu0 }
 0x110   : > { %13706 = vst [vmem:[#allocation34_spill] sm:$0xff] %v11286_v30  ;;  %v11290_v34 = vpop.f32.mrf.mxu1 }
 0x111   : > { %13707 = vst [vmem:[#allocation35_spill] sm:$0xff] %v11290_v34 }
 0x115   : > { %v11292_v39 = vpop.f32.mrf.mxu3 }
 0x117   : > { %v11294_v40 = vpop.f32.mrf.mxu2  ;;  %v11299_v45 = vpop.f32.mrf.mxu0 }
 0x118   : > { %13708 = vst [vmem:[#allocation36_spill] sm:$0xff] %v11294_v40  ;;  %v11301_v46 = vpop.f32.mrf.mxu1 }
 0x119   : > { %13710 = vst [vmem:[#allocation38_spill] sm:$0xff] %v11301_v46 }
 0x11a   : > { %857 = vmatmul.bf16.gmra.mxu0 %v11297_v43  ;;  %1377 = vmatmul.bf16.gmra.mxu3 %v11189_v42 }
 0x11b   : > { %1107 = vmatmul.bf16.gmra.mxu1 %v11297_v43 }
 0x11c   : > { %1357 = vmatmul.bf16.gmra.mxu2 %v11297_v43 }
 0x11d   : > { %v11307_v47 = vpop.f32.mrf.mxu3 }
 0x11f   : > { %v11309_v49 = vpop.f32.mrf.mxu2  ;;  %v11311_v51 = vpop.f32.mrf.mxu0 }
 0x120   : > { %13711 = vst [vmem:[#allocation39_spill] sm:$0xff] %v11309_v49  ;;  %v11313_v52 = vpop.f32.mrf.mxu1 }
 0x121   : > { %13712 = vst [vmem:[#allocation40_spill] sm:$0xff] %v11313_v52 }
 0x125   : > { %v11315_v53 = vpop.f32.mrf.mxu3 }
 0x127   : > { %v11317_v54 = vpop.f32.mrf.mxu2  ;;  %v11319_v56 = vpop.f32.mrf.mxu0 }
 0x128   : > { %13713 = vst [vmem:[#allocation41_spill] sm:$0xff] %v11317_v54  ;;  %v11321_v57 = vpop.f32.mrf.mxu1 }
 0x129   : > { %13714 = vst [vmem:[#allocation42_spill] sm:$0xff] %v11321_v57 }
 0x12a   : > { %1558 = vmatmul.bf16.vlgmr.msrb.gmra.mxu3 %v11162_v32  ;;  %1808 = vmatmul.bf16.vlgmr.msrb.gmra.mxu0 %v11162_v32 }
 0x12b   : > { %2058 = vmatmul.bf16.vlgmr.msrb.gmra.mxu1 %v11162_v32 }
 0x12c   : > { %2312 = vmatmul.bf16.vlgmr.msrb.gmra.mxu2 %v11172_v37 }
 0x12d   : > { %v11327_v60 = vpop.f32.mrf.mxu3 }
 0x12e   : > { %13715 = vst [vmem:[#allocation43_spill] sm:$0xff] %v11327_v60 }
 0x12f   : > { %v11329_v0 = vpop.f32.mrf.mxu2  ;;  %v11331_v5 = vpop.f32.mrf.mxu0 }
 0x130   : > { %13716 = vst [vmem:[#allocation44_spill] sm:$0xff] %v11329_v0  ;;  %v11333_v6 = vpop.f32.mrf.mxu1 }
 0x131   : > { %13717 = vst [vmem:[#allocation45_spill] sm:$0xff] %v11333_v6 }
 0x135   : > { %v11335_v14 = vpop.f32.mrf.mxu3 }
 0x136   : > { %13718 = vst [vmem:[#allocation46_spill] sm:$0xff] %v11335_v14  ;;  %v10202_v14 = vld [vmem:[#allocation13 + $0x68] sm:$0xff] }
 0x137   : > { %v11337_v32 = vpop.f32.mrf.mxu2  ;;  %v11339_v19 = vpop.f32.mrf.mxu0  ;;  %3427 = vmatpush.bf16.msra.mxu2 %v10202_v14 }
 0x138   : > { %13719 = vst [vmem:[#allocation47_spill] sm:$0xff] %v11337_v32  ;;  %v11341_v26 = vpop.f32.mrf.mxu1 }
 0x139   : > { %13720 = vst [vmem:[#allocation48_spill] sm:$0xff] %v11341_v26  ;;  %v10194_v26 = vld [vmem:[#allocation13 + $0x28] sm:$0xff] }
 0x13a   : > { %1563 = vmatmul.bf16.gmra.mxu3 %v11172_v37  ;;  %1813 = vmatmul.bf16.gmra.mxu0 %v11172_v37 }
 0x13b   : > { %2063 = vmatmul.bf16.gmra.mxu1 %v11172_v37 }
 0x13c   : > { %2317 = vmatmul.bf16.gmra.mxu2 %v11186_v41  ;;  %3177 = vmatpush.bf16.msra.mxu1 %v10194_v26 }
 0x13d   : > { %v11347_v27 = vpop.f32.mrf.mxu3 }
 0x13e   : > { %13721 = vst [vmem:[#allocation49_spill] sm:$0xff] %v11347_v27  ;;  %v10162_v27 = vld [vmem:[#allocation11 + $0x1e8] sm:$0xff] }
 0x13f   : > { %v11349_v35 = vpop.f32.mrf.mxu2  ;;  %v11351_v36 = vpop.f32.mrf.mxu0  ;;  %2556 = vmatpush.bf16.msra.mxu3 %v10162_v27 }
 0x140   : > { %13722 = vst [vmem:[#allocation50_spill] sm:$0xff] %v11349_v35  ;;  %v11353_v58 = vpop.f32.mrf.mxu1 }
 0x141   : > { %13723 = vst [vmem:[#allocation51_spill] sm:$0xff] %v11353_v58 }
 0x145   : > { %v11355_v59 = vpop.f32.mrf.mxu3 }
 0x146   : > { %13724 = vst [vmem:[#allocation52_spill] sm:$0xff] %v11355_v59 }
 0x147   : > { %v11357_v12 = vpop.f32.mrf.mxu2  ;;  %v11359_v13 = vpop.f32.mrf.mxu0 }
 0x148   : > { %13725 = vst [vmem:[#allocation53_spill] sm:$0xff] %v11357_v12  ;;  %v11361_v29 = vpop.f32.mrf.mxu1 }
 0x149   : > { %13726 = vst [vmem:[#allocation54_spill] sm:$0xff] %v11361_v29  ;;  %v10170_v29 = vld [vmem:[#allocation11 + $0x228] sm:$0xff] }
 0x14a   : > { %1568 = vmatmul.bf16.gmra.mxu3 %v11186_v41  ;;  %1818 = vmatmul.bf16.gmra.mxu0 %v11186_v41 }
 0x14b   : > { %2068 = vmatmul.bf16.gmra.mxu1 %v11186_v41  ;;  %2806 = vmatpush.bf16.msra.mxu0 %v10170_v29 }
 0x14c   : > { %2322 = vmatmul.bf16.gmra.mxu2 %v11200_v44 }
 0x14d   : > { %v11367_v60 = vpop.f32.mrf.mxu3 }
 0x14e   : > { %13727 = vst [vmem:[#allocation55_spill] sm:$0xff] %v11367_v60 }
 0x14f   : > { %v11369_v59 = vpop.f32.mrf.mxu2  ;;  %v11371_v58 = vpop.f32.mrf.mxu0 }
 0x150   : > { %13728 = vst [vmem:[#allocation56_spill] sm:$0xff] %v11369_v59  ;;  %v11373_v12 = vpop.f32.mrf.mxu1  ;;  %v10193_v59 = vld [vmem:[#allocation13 + $0x20] sm:$0xff] }
 0x151   : > { %13729 = vst [vmem:[#allocation57_spill] sm:$0xff] %v11373_v12  ;;  %3178 = vmatpush.bf16.msra.mxu1 %v10193_v59 }
 0x155   : > { %v11375_v35 = vpop.f32.mrf.mxu3 }
 0x156   : > { %13730 = vst [vmem:[#allocation58_spill] sm:$0xff] %v11375_v35 }
 0x157   : > { %v11377_v6 = vpop.f32.mrf.mxu2  ;;  %v11379_v32 = vpop.f32.mrf.mxu0 }
 0x158   : > { %13731 = vst [vmem:[#allocation59_spill] sm:$0xff] %v11377_v6  ;;  %v11381_v57 = vpop.f32.mrf.mxu1 }
 0x159   : > { %13732 = vst [vmem:[#allocation60_spill] sm:$0xff] %v11381_v57 }
 0x15a   : > { %1573 = vmatmul.bf16.gmra.mxu3 %v11200_v44  ;;  %1823 = vmatmul.bf16.gmra.mxu0 %v11200_v44 }
 0x15b   : > { %2073 = vmatmul.bf16.gmra.mxu1 %v11200_v44 }
 0x15c   : > { %2327 = vmatmul.bf16.gmra.mxu2 %v11207_v48 }
 0x15d   : > { %v11387_v14 = vpop.f32.mrf.mxu3 }
 0x15e   : > { %13733 = vst [vmem:[#allocation61_spill] sm:$0xff] %v11387_v14  ;;  %v10161_v14 = vld [vmem:[#allocation11 + $0x1e0] sm:$0xff] }
 0x15f   : > { %v11389_v29 = vpop.f32.mrf.mxu2  ;;  %v11391_v26 = vpop.f32.mrf.mxu0  ;;  %2557 = vmatpush.bf16.msra.mxu3 %v10161_v14 }
 0x160   : > { %13734 = vst [vmem:[#allocation62_spill] sm:$0xff] %v11389_v29  ;;  %v11393_v27 = vpop.f32.mrf.mxu1  ;;  %v10201_v29 = vld [vmem:[#allocation13 + $0x60] sm:$0xff] }
 0x161   : > { %13735 = vst [vmem:[#allocation63_spill] sm:$0xff] %v11393_v27  ;;  %3428 = vmatpush.bf16.msra.mxu2 %v10201_v29 }
 0x165   : > { %v11395_v35 = vpop.f32.mrf.mxu3 }
 0x166   : > { %13736 = vst [vmem:[#allocation64_spill] sm:$0xff] %v11395_v35 }
 0x167   : > { %v11397_v60 = vpop.f32.mrf.mxu2  ;;  %v11399_v57 = vpop.f32.mrf.mxu0 }
 0x168   : > { %13737 = vst [vmem:[#allocation65_spill] sm:$0xff] %v11397_v60  ;;  %v11401_v12 = vpop.f32.mrf.mxu1 }
 0x169   : > { %13738 = vst [vmem:[#allocation66_spill] sm:$0xff] %v11401_v12  ;;  %v10169_v12 = vld [vmem:[#allocation11 + $0x220] sm:$0xff] }
 0x16a   : > { %1578 = vmatmul.bf16.gmra.mxu3 %v11207_v48  ;;  %1828 = vmatmul.bf16.gmra.mxu0 %v11207_v48 }
 0x16b   : > { %2078 = vmatmul.bf16.gmra.mxu1 %v11207_v48  ;;  %2807 = vmatpush.bf16.msra.mxu0 %v10169_v12 }
 0x16c   : > { %2332 = vmatmul.bf16.gmra.mxu2 %v11214_v50 }
 0x16d   : > { %v11407_v6 = vpop.f32.mrf.mxu3 }
 0x16e   : > { %13739 = vst [vmem:[#allocation67_spill] sm:$0xff] %v11407_v6 }
 0x16f   : > { %v11409_v35 = vpop.f32.mrf.mxu2  ;;  %v11411_v27 = vpop.f32.mrf.mxu0 }
 0x170   : > { %13740 = vst [vmem:[#allocation68_spill] sm:$0xff] %v11409_v35  ;;  %v11413_v60 = vpop.f32.mrf.mxu1  ;;  %v10192_v35 = vld [vmem:[#allocation13 + $0x18] sm:$0xff] }
 0x171   : > { %13741 = vst [vmem:[#allocation69_spill] sm:$0xff] %v11413_v60  ;;  %3179 = vmatpush.bf16.msra.mxu1 %v10192_v35 }
 0x175   : > { %v11415_v0 = vpop.f32.mrf.mxu3  ;;  %3180 = vmatpush.bf16.msra.mxu1 %v10191_v21 }
 0x176   : > { %13742 = vst [vmem:[#allocation70_spill] sm:$0xff] %v11415_v0 }
 0x177   : > { %v11417_v52 = vpop.f32.mrf.mxu2  ;;  %v11419_v54 = vpop.f32.mrf.mxu0 }
 0x178   : > { %13743 = vst [vmem:[#allocation71_spill] sm:$0xff] %v11417_v52  ;;  %v11421_v46 = vpop.f32.mrf.mxu1 }
 0x179   : > { %13744 = vst [vmem:[#allocation72_spill] sm:$0xff] %v11421_v46 }
 0x17a   : > { %1583 = vmatmul.bf16.gmra.mxu3 %v11214_v50  ;;  %1833 = vmatmul.bf16.gmra.mxu0 %v11214_v50 }
 0x17b   : > { %2083 = vmatmul.bf16.gmra.mxu1 %v11214_v50 }
 0x17c   : > { %2337 = vmatmul.bf16.gmra.mxu2 %v11221_v55 }
 0x17d   : > { %v11427_v14 = vpop.f32.mrf.mxu3 }
 0x17e   : > { %13745 = vst [vmem:[#allocation73_spill] sm:$0xff] %v11427_v14  ;;  %v10160_v14 = vld [vmem:[#allocation11 + $0x1d8] sm:$0xff] }
 0x17f   : > { %v11429_v12 = vpop.f32.mrf.mxu2  ;;  %v11431_v59 = vpop.f32.mrf.mxu0  ;;  %2558 = vmatpush.bf16.msra.mxu3 %v10160_v14 }
 0x180   : > { %13746 = vst [vmem:[#allocation74_spill] sm:$0xff] %v11429_v12  ;;  %v11433_v29 = vpop.f32.mrf.mxu1  ;;  %v10200_v12 = vld [vmem:[#allocation13 + $0x58] sm:$0xff] }
 0x181   : > { %13747 = vst [vmem:[#allocation75_spill] sm:$0xff] %v11433_v29  ;;  %3429 = vmatpush.bf16.msra.mxu2 %v10200_v12 }
 0x185   : > { %v11435_v0 = vpop.f32.mrf.mxu3 }
 0x186   : > { %13748 = vst [vmem:[#allocation76_spill] sm:$0xff] %v11435_v0 }
 0x187   : > { %v11437_v6 = vpop.f32.mrf.mxu2  ;;  %v11439_v46 = vpop.f32.mrf.mxu0 }
 0x188   : > { %13749 = vst [vmem:[#allocation77_spill] sm:$0xff] %v11437_v6  ;;  %v11441_v60 = vpop.f32.mrf.mxu1 }
 0x189   : > { %13750 = vst [vmem:[#allocation78_spill] sm:$0xff] %v11441_v60  ;;  %v10168_v60 = vld [vmem:[#allocation11 + $0x218] sm:$0xff] }
 0x18a   : > { %1588 = vmatmul.bf16.gmra.mxu3 %v11221_v55  ;;  %1838 = vmatmul.bf16.gmra.mxu0 %v11221_v55 }
 0x18b   : > { %2088 = vmatmul.bf16.gmra.mxu1 %v11221_v55  ;;  %2808 = vmatpush.bf16.msra.mxu0 %v10168_v60 }
 0x18c   : > { %2342 = vmatmul.bf16.gmra.mxu2 %v11228_v61 }
 0x18d   : > { %v11447_v52 = vpop.f32.mrf.mxu3 }
 0x18e   : > { %13751 = vst [vmem:[#allocation79_spill] sm:$0xff] %v11447_v52 }
 0x18f   : > { %v11449_v0 = vpop.f32.mrf.mxu2  ;;  %v11451_v29 = vpop.f32.mrf.mxu0  ;;  %2809 = vmatpush.bf16.msra.mxu0 %v10167_v18 }
 0x190   : > { %13752 = vst [vmem:[#allocation80_spill] sm:$0xff] %v11449_v0  ;;  %v11453_v6 = vpop.f32.mrf.mxu1 }
 0x191   : > { %13753 = vst [vmem:[#allocation81_spill] sm:$0xff] %v11453_v6 }
 0x195   : > { %v11455_v49 = vpop.f32.mrf.mxu3 }
 0x196   : > { %13754 = vst [vmem:[#allocation82_spill] sm:$0xff] %v11455_v49 }
 0x197   : > { %v11457_v34 = vpop.f32.mrf.mxu2  ;;  %v11459_v40 = vpop.f32.mrf.mxu0 }
 0x198   : > { %13755 = vst [vmem:[#allocation83_spill] sm:$0xff] %v11457_v34  ;;  %v11461_v24 = vpop.f32.mrf.mxu1 }
 0x199   : > { %13756 = vst [vmem:[#allocation84_spill] sm:$0xff] %v11461_v24 }
 0x19a   : > { %1593 = vmatmul.bf16.gmra.mxu3 %v11228_v61  ;;  %1843 = vmatmul.bf16.gmra.mxu0 %v11228_v61 }
 0x19b   : > { %2093 = vmatmul.bf16.gmra.mxu1 %v11228_v61 }
 0x19c   : > { %2347 = vmatmul.bf16.gmra.mxu2 %v11251_v9 }
 0x19d   : > { %v11467_v14 = vpop.f32.mrf.mxu3 }
 0x19e   : > { %13757 = vst [vmem:[#allocation85_spill] sm:$0xff] %v11467_v14  ;;  %v10159_v14 = vld [vmem:[#allocation11 + $0x1d0] sm:$0xff] }
 0x19f   : > { %v11469_v60 = vpop.f32.mrf.mxu2  ;;  %v11471_v35 = vpop.f32.mrf.mxu0  ;;  %2559 = vmatpush.bf16.msra.mxu3 %v10159_v14 }
 0x1a0   : > { %13758 = vst [vmem:[#allocation86_spill] sm:$0xff] %v11469_v60  ;;  %v11473_v12 = vpop.f32.mrf.mxu1  ;;  %v10199_v60 = vld [vmem:[#allocation13 + $0x50] sm:$0xff] }
 0x1a1   : > { %13759 = vst [vmem:[#allocation87_spill] sm:$0xff] %v11473_v12  ;;  %3430 = vmatpush.bf16.msra.mxu2 %v10199_v60 }
 0x1a5   : > { %v11475_v49 = vpop.f32.mrf.mxu3 }
 0x1a6   : > { %13760 = vst [vmem:[#allocation88_spill] sm:$0xff] %v11475_v49 }
 0x1a7   : > { %v11477_v52 = vpop.f32.mrf.mxu2  ;;  %v11479_v24 = vpop.f32.mrf.mxu0 }
 0x1a8   : > { %13761 = vst [vmem:[#allocation89_spill] sm:$0xff] %v11477_v52  ;;  %v11481_v6 = vpop.f32.mrf.mxu1 }
 0x1aa   : > { %1598 = vmatmul.bf16.gmra.mxu3 %v11251_v9  ;;  %1848 = vmatmul.bf16.gmra.mxu0 %v11251_v9 }
 0x1ab   : > { %2098 = vmatmul.bf16.gmra.mxu1 %v11251_v9 }
 0x1ac   : > { %2352 = vmatmul.bf16.gmra.mxu2 %v11274_v22 }
 0x1ad   : > { %v1559_v34 = vpop.f32.mrf.mxu3 }
 0x1ae   : > { %v1639_v49 = vadd.f32 %v1559_v34, %v11230_v62 }
 0x1af   : > { %v2313_v12 = vpop.f32.mrf.mxu2  ;;  %v11488_v52 = vpop.f32.mrf.mxu0 }
 0x1b0   : > { %v11490_v0 = vadd.f32 %v2313_v12, %v1639_v49  ;;  %v11492_v30 = vpop.f32.mrf.mxu1 }
 0x1b5   : > { %v1561_v11 = vpop.f32.mrf.mxu3 }
 0x1b6   : > { %v1640_v16 = vadd.f32 %v1561_v11, %v11242_v3 }
 0x1b7   : > { %v2315_v4 = vpop.f32.mrf.mxu2  ;;  %v11495_v8 = vpop.f32.mrf.mxu0 }
 0x1b8   : > { %13762 = vst [vmem:[#allocation90_spill] sm:$0xff] %v11495_v8  ;;  %v11497_v14 = vadd.f32 %v2315_v4, %v1640_v16  ;;  %v11499_v62 = vpop.f32.mrf.mxu1 }
 0x1b9   : > { %13763 = vst [vmem:[#allocation91_spill] sm:$0xff] %v11499_v62 }
 0x1ba   : > { %1603 = vmatmul.bf16.gmra.mxu3 %v11274_v22  ;;  %1853 = vmatmul.bf16.gmra.mxu0 %v11274_v22 }
 0x1bb   : > { %2103 = vmatmul.bf16.gmra.mxu1 %v11274_v22 }
 0x1bc   : > { %2357 = vmatmul.bf16.gmra.mxu2 %v11297_v43 }
 0x1bd   : > { %v1564_v18 = vpop.f32.mrf.mxu3 }
 0x1be   : > { %v1641_v21 = vadd.f32 %v1564_v18, %v11253_v10  ;;  %v10158_v10 = vld [vmem:[#allocation11 + $0x1c8] sm:$0xff] }
 0x1bf   : > { %v2318_v34 = vpop.f32.mrf.mxu2  ;;  %v11506_v3 = vpop.f32.mrf.mxu0  ;;  %v10198_v18 = vld [vmem:[#allocation13 + $0x48] sm:$0xff]  ;;  %2560 = vmatpush.bf16.msra.mxu3 %v10158_v10 }
 0x1c0   : > { %13764 = vst [vmem:[#allocation92_spill] sm:$0xff] %v11506_v3  ;;  %v11508_v11 = vadd.f32 %v2318_v34, %v1641_v21  ;;  %v11510_v4 = vpop.f32.mrf.mxu1  ;;  %3431 = vmatpush.bf16.msra.mxu2 %v10198_v18 }
 0x1c1   : > { %13765 = vst [vmem:[#allocation93_spill] sm:$0xff] %v11510_v4 }
 0x1c5   : > { %v1566_v16 = vpop.f32.mrf.mxu3 }
 0x1c6   : > { %v1642_v49 = vadd.f32 %v1566_v16, %v11265_v17 }
 0x1c7   : > { %v2320_v60 = vpop.f32.mrf.mxu2  ;;  %v11513_v12 = vpop.f32.mrf.mxu0 }
 0x1c8   : > { %13766 = vst [vmem:[#allocation94_spill] sm:$0xff] %v11513_v12  ;;  %v11515_v8 = vadd.f32 %v2320_v60, %v1642_v49  ;;  %v11517_v62 = vpop.f32.mrf.mxu1  ;;  %v10166_v12 = vld [vmem:[#allocation11 + $0x208] sm:$0xff] }
 0x1c9   : > { %13768 = vst [vmem:[#allocation96_spill] sm:$0xff] %v11517_v62  ;;  %v10190_v62 = vld [vmem:[#allocation13 + $0x8] sm:$0xff]  ;;  %2810 = vmatpush.bf16.msra.mxu0 %v10166_v12 }
 0x1ca   : > { %13767 = vst [vmem:[#allocation95_spill] sm:$0xff] %v11515_v8  ;;  %1608 = vmatmul.bf16.gmra.mxu3 %v11297_v43  ;;  %1858 = vmatmul.bf16.gmra.mxu0 %v11297_v43 }
 0x1cb   : > { %2108 = vmatmul.bf16.gmra.mxu1 %v11297_v43 }
 0x1cc   : > { %2362 = vmatmul.bf16.gmra.mxu2 %v11153_v25  ;;  %3181 = vmatpush.bf16.msra.mxu1 %v10190_v62 }
 0x1cd   : > { %v1569_v21 = vpop.f32.mrf.mxu3 }
 0x1ce   : > { %v1643_v17 = vadd.f32 %v1569_v21, %v11276_v23 }
 0x1cf   : > { %v2323_v34 = vpop.f32.mrf.mxu2  ;;  %v11524_v16 = vpop.f32.mrf.mxu0 }
 0x1d0   : > { %v11526_v49 = vadd.f32 %v2323_v34, %v1643_v17  ;;  %v11528_v60 = vpop.f32.mrf.mxu1 }
 0x1d5   : > { %v1571_v3 = vpop.f32.mrf.mxu3 }
 0x1d6   : > { %v1644_v8 = vadd.f32 %v1571_v3, %v11288_v31 }
 0x1d7   : > { %v2325_v4 = vpop.f32.mrf.mxu2  ;;  %v11531_v43 = vpop.f32.mrf.mxu0 }
 0x1d8   : > { %13769 = vst [vmem:[#allocation97_spill] sm:$0xff] %v11531_v43  ;;  %v11533_v10 = vadd.f32 %v2325_v4, %v1644_v8  ;;  %v11535_v23 = vpop.f32.mrf.mxu1 }
 0x1da   : > { %1613 = vmatmul.bf16.gmra.mxu3 %v11153_v25  ;;  %1863 = vmatmul.bf16.gmra.mxu0 %v11153_v25 }
 0x1db   : > { %2113 = vmatmul.bf16.gmra.mxu1 %v11153_v25 }
 0x1dc   : > { %2367 = vmatmul.bf16.gmra.mxu2 %v11165_v33 }
 0x1dd   : > { %v1574_v12 = vpop.f32.mrf.mxu3 }
 0x1de   : > { %v1645_v62 = vadd.f32 %v1574_v12, %v11299_v45  ;;  %v10157_v45 = vld [vmem:[#allocation11 + $0x1c0] sm:$0xff] }
 0x1df   : > { %v2328_v18 = vpop.f32.mrf.mxu2  ;;  %v11542_v31 = vpop.f32.mrf.mxu0  ;;  %v10197_v12 = vld [vmem:[#allocation13 + $0x40] sm:$0xff]  ;;  %2561 = vmatpush.bf16.msra.mxu3 %v10157_v45 }
 0x1e0   : > { %13770 = vst [vmem:[#allocation98_spill] sm:$0xff] %v11542_v31  ;;  %v11544_v3 = vadd.f32 %v2328_v18, %v1645_v62  ;;  %v11546_v8 = vpop.f32.mrf.mxu1  ;;  %3432 = vmatpush.bf16.msra.mxu2 %v10197_v12 }
 0x1e1   : > { %13771 = vst [vmem:[#allocation99_spill] sm:$0xff] %v11546_v8 }
 0x1e5   : > { %v1576_v4 = vpop.f32.mrf.mxu3 }
 0x1e6   : > { %v1646_v21 = vadd.f32 %v1576_v4, %v11311_v51 }
 0x1e7   : > { %v2330_v17 = vpop.f32.mrf.mxu2  ;;  %v11549_v34 = vpop.f32.mrf.mxu0 }
 0x1e8   : > { %13772 = vst [vmem:[#allocation100_spill] sm:$0xff] %v11549_v34  ;;  %v11551_v43 = vadd.f32 %v2330_v17, %v1646_v21  ;;  %v11553_v25 = vpop.f32.mrf.mxu1  ;;  %v10165_v34 = vld [vmem:[#allocation11 + $0x200] sm:$0xff] }
 0x1e9   : > { %13774 = vst [vmem:[#allocation102_spill] sm:$0xff] %v11553_v25  ;;  %v10189_v25 = vld [vmem:[#allocation13] sm:$0xff]  ;;  %2811 = vmatpush.bf16.msra.mxu0 %v10165_v34 }
 0x1ea   : > { %13773 = vst [vmem:[#allocation101_spill] sm:$0xff] %v11551_v43  ;;  %1618 = vmatmul.bf16.gmra.mxu3 %v11165_v33  ;;  %1868 = vmatmul.bf16.gmra.mxu0 %v11165_v33 }
 0x1eb   : > { %2118 = vmatmul.bf16.gmra.mxu1 %v11165_v33 }
 0x1ec   : > { %2372 = vmatmul.bf16.gmra.mxu2 %v11175_v38  ;;  %3182 = vmatpush.bf16.msra.mxu1 %v10189_v25 }
 0x1ed   : > { %v1579_v62 = vpop.f32.mrf.mxu3 }
 0x1ee   : > { %v1647_v51 = vadd.f32 %v1579_v62, %v11319_v56 }
 0x1ef   : > { %v2333_v18 = vpop.f32.mrf.mxu2  ;;  %v11560_v4 = vpop.f32.mrf.mxu0 }
 0x1f0   : > { %v11562_v21 = vadd.f32 %v2333_v18, %v1647_v51  ;;  %v11564_v17 = vpop.f32.mrf.mxu1 }
 0x1f5   : > { %v1581_v33 = vpop.f32.mrf.mxu3 }
 0x1f6   : > { %v1648_v31 = vadd.f32 %v1581_v33, %v11331_v5 }
 0x1f7   : > { %v2335_v43 = vpop.f32.mrf.mxu2  ;;  %v11567_v8 = vpop.f32.mrf.mxu0 }
 0x1f8   : > { %13775 = vst [vmem:[#allocation103_spill] sm:$0xff] %v11567_v8  ;;  %v11569_v45 = vadd.f32 %v2335_v43, %v1648_v31  ;;  %v11571_v56 = vpop.f32.mrf.mxu1  ;;  %v11588_v8 = vld [vmem:[%s11101_s10 + $0x78] sm:$0xff] }
 0x1f9   : > { %13776 = vst [vmem:[#allocation104_spill] sm:$0xff] %v11571_v56 }
 0x1fa   : > { %1623 = vmatmul.bf16.gmra.mxu3 %v11175_v38  ;;  %1873 = vmatmul.bf16.gmra.mxu0 %v11175_v38 }
 0x1fb   : > { %2123 = vmatmul.bf16.gmra.mxu1 %v11175_v38 }
 0x1fc   : > { %2377 = vmatmul.bf16.gmra.mxu2 %v11189_v42 }
 0x1fd   : > { %v1584_v34 = vpop.f32.mrf.mxu3 }
 0x1fe   : > { %v1649_v25 = vadd.f32 %v1584_v34, %v11339_v19  ;;  %v10212_v19 = vld [vmem:[#allocation13 + $0xb8] sm:$0xff] }
 0x1ff   : > { %v2338_v5 = vpop.f32.mrf.mxu2  ;;  %v11578_v12 = vpop.f32.mrf.mxu0  ;;  %v10236_v34 = vld [vmem:[#allocation13 + $0x178] sm:$0xff]  ;;  %3675 = vmatpush.bf16.msrb.mxu3 %v10212_v19 }
 0x200   : > { %13777 = vst [vmem:[#allocation105_spill] sm:$0xff] %v11578_v12  ;;  %v11580_v62 = vadd.f32 %v2338_v5, %v1649_v25  ;;  %v11582_v43 = vpop.f32.mrf.mxu1  ;;  %4431 = vmatpush.bf16.msrb.mxu2 %v10236_v34  ;;  %v13783_v12 = vmov 0  }
 0x201   : > { %13778 = vst [vmem:[#allocation106_spill] sm:$0xff] %v11582_v43 }
 0x205   : > { %v1586_v31 = vpop.f32.mrf.mxu3 }
 0x206   : > { %v1650_v51 = vadd.f32 %v1586_v31, %v11351_v36 }
 0x207   : > { %v2340_v18 = vpop.f32.mrf.mxu2  ;;  %v11585_v33 = vpop.f32.mrf.mxu0 }
 0x208   : > { %13779 = vst [vmem:[#allocation107_spill] sm:$0xff] %v11585_v33  ;;  %v11590_v38 = vadd.f32 %v2340_v18, %v1650_v51  ;;  %v11592_v56 = vpop.f32.mrf.mxu1  ;;  %v10220_v33 = vld [vmem:[#allocation13 + $0xf8] sm:$0xff] }
 0x209   : > { %13781 = vst [vmem:[#allocation109_spill] sm:$0xff] %v11592_v56  ;;  %v10228_v56 = vld [vmem:[#allocation13 + $0x138] sm:$0xff]  ;;  %3931 = vmatpush.bf16.msrb.mxu0 %v10220_v33 }
 0x20a   : > { %13780 = vst [vmem:[#allocation108_spill] sm:$0xff] %v11590_v38  ;;  %1628 = vmatmul.bf16.gmra.mxu3 %v11189_v42  ;;  %1878 = vmatmul.bf16.gmra.mxu0 %v11189_v42 }
 0x20b   : > { %2128 = vmatmul.bf16.gmra.mxu1 %v11189_v42  ;;  %v2253_v42 = vunpack.c.l.b16 %v13783_v12 }
 0x20c   : > { %2382 = vmatmul.bf16.gmra.mxu2 %v11588_v8  ;;  %4181 = vmatpush.bf16.msrb.mxu1 %v10228_v56 }
 0x20d   : > { %v1589_v36 = vpop.f32.mrf.mxu3 }
 0x20e   : > { %v1651_v25 = vadd.f32 %v1589_v36, %v11359_v13  ;;  %v11609_v13 = vpack.c.b16 %v2253_v42, %v2253_v42 }
 0x20f   : > { %v2343_v5 = vpop.f32.mrf.mxu2  ;;  %v11599_v31 = vpop.f32.mrf.mxu0 }
 0x210   : > { %13782 = vst [vmem:[#allocation110_spill] sm:$0xff] %v11599_v31  ;;  %v11601_v51 = vadd.f32 %v2343_v5, %v1651_v25  ;;  %v11603_v18 = vpop.f32.mrf.mxu1 }
 0x211   : > { %13785 = vst [vmem:[#allocation112_spill] sm:$0xff] %v11609_v13 }
 0x215   : > { %v1591_v38 = vpop.f32.mrf.mxu3 }
 0x216   : > { %v1652_v43 = vadd.f32 %v1591_v38, %v11371_v58 }
 0x217   : > { %v2345_v19 = vpop.f32.mrf.mxu2  ;;  %v11607_v34 = vpop.f32.mrf.mxu0 }
 0x218   : > { %13784 = vst [vmem:[#allocation111_spill] sm:$0xff] %v11607_v34  ;;  %v11611_v36 = vadd.f32 %v2345_v19, %v1652_v43  ;;  %v11613_v25 = vpop.f32.mrf.mxu1 }
 0x219   : > { %13787 = vst [vmem:[#allocation114_spill] sm:$0xff] %v11613_v25 }
 0x21a   : > { %13786 = vst [vmem:[#allocation113_spill] sm:$0xff] %v11611_v36  ;;  %1633 = vmatmul.bf16.gmra.mxu3 %v11588_v8  ;;  %1883 = vmatmul.bf16.gmra.mxu0 %v11588_v8 }
 0x21b   : > { %2133 = vmatmul.bf16.gmra.mxu1 %v11588_v8 }
 0x21c   : > { %2387 = vmatmul.bf16.gmra.mxu2 %v11609_v13 }
 0x21d   : > { %v1594_v56 = vpop.f32.mrf.mxu3 }
 0x21e   : > { %v1653_v58 = vadd.f32 %v1594_v56, %v11379_v32  ;;  %v10211_v32 = vld [vmem:[#allocation13 + $0xb0] sm:$0xff] }
 0x21f   : > { %v2348_v33 = vpop.f32.mrf.mxu2  ;;  %v11620_v38 = vpop.f32.mrf.mxu0  ;;  %v10235_v56 = vld [vmem:[#allocation13 + $0x170] sm:$0xff]  ;;  %3676 = vmatpush.bf16.msrb.mxu3 %v10211_v32  ;;  %v11648_v32 = vld [vmem:[%s11109_s14] sm:$0xff] }
 0x220   : > { %13788 = vst [vmem:[#allocation115_spill] sm:$0xff] %v11620_v38  ;;  %v11622_v5 = vadd.f32 %v2348_v33, %v1653_v58  ;;  %v11624_v43 = vpop.f32.mrf.mxu1  ;;  %4432 = vmatpush.bf16.msrb.mxu2 %v10235_v56 }
 0x225   : > { %v1596_v42 = vpop.f32.mrf.mxu3 }
 0x226   : > { %v1654_v19 = vadd.f32 %v1596_v42, %v11391_v26 }
 0x227   : > { %v2350_v34 = vpop.f32.mrf.mxu2  ;;  %v11627_v25 = vpop.f32.mrf.mxu0 }
 0x228   : > { %13789 = vst [vmem:[#allocation116_spill] sm:$0xff] %v11627_v25  ;;  %v11629_v31 = vadd.f32 %v2350_v34, %v1654_v19  ;;  %v11631_v36 = vpop.f32.mrf.mxu1  ;;  %v10227_v25 = vld [vmem:[#allocation13 + $0x130] sm:$0xff] }
 0x229   : > { %13791 = vst [vmem:[#allocation118_spill] sm:$0xff] %v11631_v36  ;;  %4182 = vmatpush.bf16.msrb.mxu1 %v10227_v25 }
 0x22a   : > { %13790 = vst [vmem:[#allocation117_spill] sm:$0xff] %v11629_v31  ;;  %2562 = vmatmul.bf16.vlgmr.msra.gmra.mxu3 %v11172_v37  ;;  %2812 = vmatmul.bf16.vlgmr.msra.gmra.mxu0 %v11172_v37  ;;  %v10219_v37 = vld [vmem:[#allocation13 + $0xf0] sm:$0xff] }
 0x22b   : > { %3183 = vmatmul.bf16.vlgmr.msra.gmra.mxu1 %v13783_v12  ;;  %3932 = vmatpush.bf16.msrb.mxu0 %v10219_v37 }
 0x22c   : > { %3433 = vmatmul.bf16.vlgmr.msra.gmra.mxu2 %v13783_v12 }
 0x22d   : > { %v1599_v58 = vpop.f32.mrf.mxu3 }
 0x22e   : > { %v1655_v26 = vadd.f32 %v1599_v58, %v11399_v57 }
 0x22f   : > { %v2353_v34 = vpop.f32.mrf.mxu2  ;;  %v11638_v33 = vpop.f32.mrf.mxu0 }
 0x230   : > { %13792 = vst [vmem:[#allocation119_spill] sm:$0xff] %v11638_v33  ;;  %v11640_v42 = vadd.f32 %v2353_v34, %v1655_v26  ;;  %v11642_v19 = vpop.f32.mrf.mxu1 }
 0x235   : > { %v1601_v12 = vpop.f32.mrf.mxu3 }
 0x236   : > { %v1656_v36 = vadd.f32 %v1601_v12, %v11411_v27 }
 0x237   : > { %v2355_v38 = vpop.f32.mrf.mxu2  ;;  %v11645_v31 = vpop.f32.mrf.mxu0 }
 0x238   : > { %13793 = vst [vmem:[#allocation120_spill] sm:$0xff] %v11645_v31  ;;  %v11650_v57 = vadd.f32 %v2355_v38, %v1656_v36  ;;  %v11652_v56 = vpop.f32.mrf.mxu1 }
 0x239   : > { %13794 = vst [vmem:[#allocation121_spill] sm:$0xff] %v11652_v56 }
 0x23a   : > { %2567 = vmatmul.bf16.gmra.mxu3 %v11186_v41  ;;  %2817 = vmatmul.bf16.gmra.mxu0 %v11186_v41  ;;  %v11669_v41 = vld [vmem:[%s11109_s14 + $0x8] sm:$0xff] }
 0x23b   : > { %3188 = vmatmul.bf16.gmra.mxu1 %v11648_v32 }
 0x23c   : > { %3438 = vmatmul.bf16.gmra.mxu2 %v11648_v32 }
 0x23d   : > { %v1604_v25 = vpop.f32.mrf.mxu3 }
 0x23e   : > { %v1657_v27 = vadd.f32 %v1604_v25, %v11419_v54  ;;  %v10210_v54 = vld [vmem:[#allocation13 + $0xa8] sm:$0xff] }
 0x23f   : > { %v2358_v12 = vpop.f32.mrf.mxu2  ;;  %v11659_v58 = vpop.f32.mrf.mxu0  ;;  %v10234_v25 = vld [vmem:[#allocation13 + $0x168] sm:$0xff]  ;;  %3677 = vmatpush.bf16.msrb.mxu3 %v10210_v54  ;;  %v11690_v54 = vld [vmem:[%s11109_s14 + $0x10] sm:$0xff] }
 0x240   : > { %13795 = vst [vmem:[#allocation122_spill] sm:$0xff] %v11659_v58  ;;  %v11661_v26 = vadd.f32 %v2358_v12, %v1657_v27  ;;  %v11663_v36 = vpop.f32.mrf.mxu1  ;;  %4433 = vmatpush.bf16.msrb.mxu2 %v10234_v25 }
 0x241   : > { %13796 = vst [vmem:[#allocation123_spill] sm:$0xff] %v11663_v36 }
 0x245   : > { %v1606_v38 = vpop.f32.mrf.mxu3 }
 0x246   : > { %v1658_v34 = vadd.f32 %v1606_v38, %v11431_v59 }
 0x247   : > { %v2360_v37 = vpop.f32.mrf.mxu2  ;;  %v11666_v31 = vpop.f32.mrf.mxu0 }
 0x248   : > { %13797 = vst [vmem:[#allocation124_spill] sm:$0xff] %v11666_v31  ;;  %v11671_v56 = vadd.f32 %v2360_v37, %v1658_v34  ;;  %v11673_v33 = vpop.f32.mrf.mxu1  ;;  %v10226_v31 = vld [vmem:[#allocation13 + $0x128] sm:$0xff] }
 0x249   : > { %13799 = vst [vmem:[#allocation126_spill] sm:$0xff] %v11673_v33  ;;  %4183 = vmatpush.bf16.msrb.mxu1 %v10226_v31 }
 0x24a   : > { %13798 = vst [vmem:[#allocation125_spill] sm:$0xff] %v11671_v56  ;;  %2572 = vmatmul.bf16.gmra.mxu3 %v11200_v44  ;;  %2822 = vmatmul.bf16.gmra.mxu0 %v11200_v44  ;;  %v10218_v44 = vld [vmem:[#allocation13 + $0xe8] sm:$0xff] }
 0x24b   : > { %3193 = vmatmul.bf16.gmra.mxu1 %v11669_v41  ;;  %3933 = vmatpush.bf16.msrb.mxu0 %v10218_v44 }
 0x24c   : > { %3443 = vmatmul.bf16.gmra.mxu2 %v11669_v41 }
 0x24d   : > { %v1609_v59 = vpop.f32.mrf.mxu3 }
 0x24e   : > { %v1659_v27 = vadd.f32 %v1609_v59, %v11439_v46 }
 0x24f   : > { %v2363_v12 = vpop.f32.mrf.mxu2  ;;  %v11680_v38 = vpop.f32.mrf.mxu0 }
 0x250   : > { %13800 = vst [vmem:[#allocation127_spill] sm:$0xff] %v11680_v38  ;;  %v11682_v34 = vadd.f32 %v2363_v12, %v1659_v27  ;;  %v11684_v37 = vpop.f32.mrf.mxu1 }
 0x255   : > { %v1611_v33 = vpop.f32.mrf.mxu3 }
 0x256   : > { %v1660_v58 = vadd.f32 %v1611_v33, %v11451_v29 }
 0x257   : > { %v2365_v56 = vpop.f32.mrf.mxu2  ;;  %v11687_v36 = vpop.f32.mrf.mxu0 }
 0x258   : > { %13801 = vst [vmem:[#allocation128_spill] sm:$0xff] %v11687_v36  ;;  %v11692_v46 = vadd.f32 %v2365_v56, %v1660_v58  ;;  %v11694_v25 = vpop.f32.mrf.mxu1 }
 0x259   : > { %13802 = vst [vmem:[#allocation129_spill] sm:$0xff] %v11694_v25 }
 0x25a   : > { %2577 = vmatmul.bf16.gmra.mxu3 %v11207_v48  ;;  %2827 = vmatmul.bf16.gmra.mxu0 %v11207_v48  ;;  %v11711_v48 = vld [vmem:[%s11109_s14 + $0x18] sm:$0xff] }
 0x25b   : > { %3198 = vmatmul.bf16.gmra.mxu1 %v11690_v54 }
 0x25c   : > { %3448 = vmatmul.bf16.gmra.mxu2 %v11690_v54 }
 0x25d   : > { %v1614_v31 = vpop.f32.mrf.mxu3 }
 0x25e   : > { %v1661_v29 = vadd.f32 %v1614_v31, %v11459_v40  ;;  %v10209_v40 = vld [vmem:[#allocation13 + $0xa0] sm:$0xff] }
 0x25f   : > { %v2368_v33 = vpop.f32.mrf.mxu2  ;;  %v11701_v59 = vpop.f32.mrf.mxu0  ;;  %v10233_v31 = vld [vmem:[#allocation13 + $0x160] sm:$0xff]  ;;  %3678 = vmatpush.bf16.msrb.mxu3 %v10209_v40 }
 0x260   : > { %13803 = vst [vmem:[#allocation130_spill] sm:$0xff] %v11701_v59  ;;  %v11703_v27 = vadd.f32 %v2368_v33, %v1661_v29  ;;  %v11705_v56 = vpop.f32.mrf.mxu1  ;;  %4434 = vmatpush.bf16.msrb.mxu2 %v10233_v31  ;;  %v11732_v40 = vld [vmem:[%s11109_s14 + $0x20] sm:$0xff] }
 0x261   : > { %13804 = vst [vmem:[#allocation131_spill] sm:$0xff] %v11705_v56 }
 0x265   : > { %v1616_v58 = vpop.f32.mrf.mxu3 }
 0x266   : > { %v1662_v12 = vadd.f32 %v1616_v58, %v11471_v35 }
 0x267   : > { %v2370_v44 = vpop.f32.mrf.mxu2  ;;  %v11708_v36 = vpop.f32.mrf.mxu0 }
 0x268   : > { %13805 = vst [vmem:[#allocation132_spill] sm:$0xff] %v11708_v36  ;;  %v11713_v25 = vadd.f32 %v2370_v44, %v1662_v12  ;;  %v11715_v38 = vpop.f32.mrf.mxu1  ;;  %v10225_v36 = vld [vmem:[#allocation13 + $0x120] sm:$0xff] }
 0x269   : > { %13807 = vst [vmem:[#allocation134_spill] sm:$0xff] %v11715_v38  ;;  %4184 = vmatpush.bf16.msrb.mxu1 %v10225_v36 }
 0x26a   : > { %13806 = vst [vmem:[#allocation133_spill] sm:$0xff] %v11713_v25  ;;  %2582 = vmatmul.bf16.gmra.mxu3 %v11214_v50  ;;  %2832 = vmatmul.bf16.gmra.mxu0 %v11214_v50  ;;  %v10217_v50 = vld [vmem:[#allocation13 + $0xe0] sm:$0xff] }
 0x26b   : > { %3203 = vmatmul.bf16.gmra.mxu1 %v11711_v48  ;;  %3934 = vmatpush.bf16.msrb.mxu0 %v10217_v50 }
 0x26c   : > { %3453 = vmatmul.bf16.gmra.mxu2 %v11711_v48 }
 0x26d   : > { %v1619_v35 = vpop.f32.mrf.mxu3 }
 0x26e   : > { %v1663_v29 = vadd.f32 %v1619_v35, %v11238_v1 }
 0x26f   : > { %v2373_v33 = vpop.f32.mrf.mxu2  ;;  %v11722_v58 = vpop.f32.mrf.mxu0 }
 0x270   : > { %13808 = vst [vmem:[#allocation135_spill] sm:$0xff] %v11722_v58  ;;  %v11724_v12 = vadd.f32 %v2373_v33, %v1663_v29  ;;  %v11726_v44 = vpop.f32.mrf.mxu1 }
 0x275   : > { %v1621_v38 = vpop.f32.mrf.mxu3 }
 0x276   : > { %v1664_v59 = vadd.f32 %v1621_v38, %v11246_v7 }
 0x277   : > { %v2375_v25 = vpop.f32.mrf.mxu2  ;;  %v11729_v56 = vpop.f32.mrf.mxu0 }
 0x278   : > { %13809 = vst [vmem:[#allocation136_spill] sm:$0xff] %v11729_v56  ;;  %v11734_v1 = vadd.f32 %v2375_v25, %v1664_v59  ;;  %v11736_v31 = vpop.f32.mrf.mxu1 }
 0x279   : > { %13810 = vst [vmem:[#allocation137_spill] sm:$0xff] %v11736_v31 }
 0x27a   : > { %2587 = vmatmul.bf16.gmra.mxu3 %v11221_v55  ;;  %2837 = vmatmul.bf16.gmra.mxu0 %v11221_v55  ;;  %v11753_v55 = vld [vmem:[%s11109_s14 + $0x28] sm:$0xff] }
 0x27b   : > { %3208 = vmatmul.bf16.gmra.mxu1 %v11732_v40 }
 0x27c   : > { %3458 = vmatmul.bf16.gmra.mxu2 %v11732_v40 }
 0x27d   : > { %v1624_v36 = vpop.f32.mrf.mxu3 }
 0x27e   : > { %v1665_v7 = vadd.f32 %v1624_v36, %v11261_v15  ;;  %v10208_v15 = vld [vmem:[#allocation13 + $0x98] sm:$0xff] }
 0x27f   : > { %v2378_v38 = vpop.f32.mrf.mxu2  ;;  %v11743_v35 = vpop.f32.mrf.mxu0  ;;  %v10232_v36 = vld [vmem:[#allocation13 + $0x158] sm:$0xff]  ;;  %3679 = vmatpush.bf16.msrb.mxu3 %v10208_v15  ;;  %v11774_v15 = vld [vmem:[%s11109_s14 + $0x30] sm:$0xff] }
 0x280   : > { %13811 = vst [vmem:[#allocation138_spill] sm:$0xff] %v11743_v35  ;;  %v11745_v29 = vadd.f32 %v2378_v38, %v1665_v7  ;;  %v11747_v25 = vpop.f32.mrf.mxu1  ;;  %4435 = vmatpush.bf16.msrb.mxu2 %v10232_v36 }
 0x281   : > { %13812 = vst [vmem:[#allocation139_spill] sm:$0xff] %v11747_v25 }
 0x285   : > { %v1626_v59 = vpop.f32.mrf.mxu3 }
 0x286   : > { %v1666_v33 = vadd.f32 %v1626_v59, %v11269_v20 }
 0x287   : > { %v2380_v50 = vpop.f32.mrf.mxu2  ;;  %v11750_v56 = vpop.f32.mrf.mxu0 }
 0x288   : > { %13813 = vst [vmem:[#allocation140_spill] sm:$0xff] %v11750_v56  ;;  %v11755_v31 = vadd.f32 %v2380_v50, %v1666_v33  ;;  %v11757_v58 = vpop.f32.mrf.mxu1  ;;  %v10224_v56 = vld [vmem:[#allocation13 + $0x118] sm:$0xff] }
 0x289   : > { %13815 = vst [vmem:[#allocation142_spill] sm:$0xff] %v11757_v58  ;;  %4185 = vmatpush.bf16.msrb.mxu1 %v10224_v56 }
 0x28a   : > { %13814 = vst [vmem:[#allocation141_spill] sm:$0xff] %v11755_v31  ;;  %2592 = vmatmul.bf16.gmra.mxu3 %v11228_v61  ;;  %2842 = vmatmul.bf16.gmra.mxu0 %v11228_v61  ;;  %v10216_v61 = vld [vmem:[#allocation13 + $0xd8] sm:$0xff] }
 0x28b   : > { %3213 = vmatmul.bf16.gmra.mxu1 %v11753_v55  ;;  %3935 = vmatpush.bf16.msrb.mxu0 %v10216_v61 }
 0x28c   : > { %3463 = vmatmul.bf16.gmra.mxu2 %v11753_v55 }
 0x28d   : > { %v1629_v20 = vpop.f32.mrf.mxu3 }
 0x28e   : > { %v1667_v7 = vadd.f32 %v1629_v20, %v11284_v28 }
 0x28f   : > { %v2383_v38 = vpop.f32.mrf.mxu2  ;;  %v11764_v59 = vpop.f32.mrf.mxu0 }
 0x290   : > { %13816 = vst [vmem:[#allocation143_spill] sm:$0xff] %v11764_v59  ;;  %v11766_v33 = vadd.f32 %v2383_v38, %v1667_v7  ;;  %v11768_v50 = vpop.f32.mrf.mxu1  ;;  %v2139_v38 = vadd.f32 %v11481_v6, %v11240_v2  ;;  %v10207_v2 = vld [vmem:[#allocation13 + $0x90] sm:$0xff]  ;;  %v1889_v6 = vadd.f32 %v11479_v24, %v11232_v63  ;;  %v13825_v24 = vld [vmem:[#allocation27_spill] sm:$0xff] }
 0x291   : > { %3680 = vmatpush.bf16.msrb.mxu3 %v10207_v2  ;;  %v10223_v63 = vld [vmem:[#allocation13 + $0x110] sm:$0xff]  ;;  %v1890_v2 = vadd.f32 %v11488_v52, %v13825_v24  ;;  %v13834_v24 = vld [vmem:[#allocation90_spill] sm:$0xff] }
 0x292   : > { %4186 = vmatpush.bf16.msrb.mxu1 %v10223_v63  ;;  %v13832_v63 = vld [vmem:[#allocation37_spill] sm:$0xff] }
 0x293   : > { %v13833_v52 = vld [vmem:[#allocation29_spill] sm:$0xff] }
 0x295   : > { %v1631_v58 = vpop.f32.mrf.mxu3 }
 0x296   : > { %v1668_v35 = vadd.f32 %v1631_v58, %v11292_v39 }
 0x297   : > { %v2385_v31 = vpop.f32.mrf.mxu2  ;;  %v11771_v25 = vpop.f32.mrf.mxu0 }
 0x298   : > { %13817 = vst [vmem:[#allocation144_spill] sm:$0xff] %v11771_v25  ;;  %v11776_v28 = vadd.f32 %v2385_v31, %v1668_v35  ;;  %v11778_v36 = vpop.f32.mrf.mxu1 }
 0x299   : > { %13818 = vst [vmem:[#allocation145_spill] sm:$0xff] %v11778_v36  ;;  %v11795_v36 = vld [vmem:[%s11109_s14 + $0x38] sm:$0xff] }
 0x29a   : > { %2597 = vmatmul.bf16.gmra.mxu3 %v11251_v9  ;;  %2847 = vmatmul.bf16.gmra.mxu0 %v11251_v9 }
 0x29b   : > { %3218 = vmatmul.bf16.gmra.mxu1 %v11774_v15 }
 0x29c   : > { %3468 = vmatmul.bf16.gmra.mxu2 %v11774_v15 }
 0x29d   : > { %v1634_v56 = vpop.f32.mrf.mxu3 }
 0x29e   : > { %v1669_v39 = vadd.f32 %v1634_v56, %v11307_v47 }
 0x29f   : > { %v2388_v58 = vpop.f32.mrf.mxu2  ;;  %v11785_v20 = vpop.f32.mrf.mxu0 }
 0x2a0   : > { %v11787_v7 = vadd.f32 %v2388_v58, %v1669_v39  ;;  %v11789_v31 = vpop.f32.mrf.mxu1 }
 0x2a5   : > { %v1636_v35 = vpop.f32.mrf.mxu3 }
 0x2a6   : > { %v1670_v9 = vadd.f32 %v1636_v35, %v11315_v53  ;;  %v10231_v53 = vld [vmem:[#allocation13 + $0x150] sm:$0xff] }
 0x2a7   : > { %v2390_v61 = vpop.f32.mrf.mxu2  ;;  %v2813_v25 = vpop.f32.mrf.mxu0  ;;  %4436 = vmatpush.bf16.msrb.mxu2 %v10231_v53  ;;  %v13826_v53 = vld [vmem:[#allocation30_spill] sm:$0xff] }
 0x2a8   : > { %v11797_v59 = vadd.f32 %v2390_v61, %v1670_v9  ;;  %v11799_v47 = vadd.f32 %v2813_v25, %v2139_v38  ;;  %v3184_v56 = vpop.f32.mrf.mxu1  ;;  %v13821_v25 = vld [vmem:[#allocation28_spill] sm:$0xff] }
 0x2a9   : > { %v11802_v39 = vadd.f32 %v3184_v56, %v11490_v0  ;;  %v2140_v0 = vadd.f32 %v11492_v30, %v13821_v25 }
 0x2aa   : > { %13819 = vst [vmem:[#allocation146_spill] sm:$0xff] %v11799_v47  ;;  %2602 = vmatmul.bf16.gmra.mxu3 %v11274_v22  ;;  %2852 = vmatmul.bf16.gmra.mxu0 %v11274_v22 }
 0x2ab   : > { %13820 = vst [vmem:[#allocation147_spill] sm:$0xff] %v11802_v39  ;;  %3223 = vmatmul.bf16.gmra.mxu1 %v11795_v36  ;;  %v10215_v39 = vld [vmem:[#allocation13 + $0xd0] sm:$0xff] }
 0x2ac   : > { %3473 = vmatmul.bf16.gmra.mxu2 %v11795_v36  ;;  %3936 = vmatpush.bf16.msrb.mxu0 %v10215_v39 }
 0x2ad   : > { %v2563_v58 = vpop.f32.mrf.mxu3 }
 0x2ae   : > { %v2643_v35 = vadd.f32 %v2563_v58, %v1889_v6  ;;  %v13827_v6 = vld [vmem:[#allocation91_spill] sm:$0xff] }
 0x2af   : > { %v3434_v38 = vpop.f32.mrf.mxu2  ;;  %v2815_v9 = vpop.f32.mrf.mxu0  ;;  %v2141_v58 = vadd.f32 %v13827_v6, %v13826_v53  ;;  %v13835_v53 = vld [vmem:[#allocation32_spill] sm:$0xff]  ;;  %v13836_v6 = vld [vmem:[#allocation93_spill] sm:$0xff] }
 0x2b0   : > { %v11812_v22 = vadd.f32 %v3434_v38, %v2643_v35  ;;  %v11814_v61 = vadd.f32 %v2815_v9, %v2140_v0  ;;  %v3186_v56 = vpop.f32.mrf.mxu1  ;;  %v11824_v0 = vld [vmem:[%s11109_s14 + $0x40] sm:$0xff] }
 0x2b1   : > { %v11817_v47 = vadd.f32 %v3186_v56, %v11497_v14  ;;  %13828 = vst [vmem:[#allocation27_spill] sm:$0xff] %v11824_v0 }
 0x2b2   : > { %13822 = vst [vmem:[#allocation28_spill] sm:$0xff] %v11812_v22 }
 0x2b3   : > { %13823 = vst [vmem:[#allocation148_spill] sm:$0xff] %v11814_v61  ;;  %v13838_v61 = vld [vmem:[#allocation31_spill] sm:$0xff] }
 0x2b4   : > { %13824 = vst [vmem:[#allocation149_spill] sm:$0xff] %v11817_v47  ;;  %v13840_v47 = vld [vmem:[#allocation34_spill] sm:$0xff] }
 0x2b5   : > { %v2565_v30 = vpop.f32.mrf.mxu3 }
 0x2b6   : > { %v2644_v25 = vadd.f32 %v2565_v30, %v1890_v2  ;;  %v1891_v2 = vadd.f32 %v13834_v24, %v13833_v52 }
 0x2b7   : > { %v3436_v35 = vpop.f32.mrf.mxu2  ;;  %v2818_v38 = vpop.f32.mrf.mxu0 }
 0x2b8   : > { %v11826_v9 = vadd.f32 %v3436_v35, %v2644_v25  ;;  %v11828_v14 = vadd.f32 %v2818_v38, %v2141_v58  ;;  %v3189_v56 = vpop.f32.mrf.mxu1  ;;  %v2142_v58 = vadd.f32 %v13836_v6, %v13835_v53  ;;  %v11853_v6 = vld [vmem:[%s11109_s14 + $0x48] sm:$0xff] }
 0x2b9   : > { %v11831_v39 = vadd.f32 %v3189_v56, %v11508_v11 }
 0x2ba   : > { %13829 = vst [vmem:[#allocation30_spill] sm:$0xff] %v11826_v9  ;;  %2607 = vmatmul.bf16.gmra.mxu3 %v13832_v63  ;;  %2857 = vmatmul.bf16.gmra.mxu0 %v13832_v63  ;;  %v13839_v9 = vld [vmem:[#allocation92_spill] sm:$0xff] }
 0x2bb   : > { %13830 = vst [vmem:[#allocation91_spill] sm:$0xff] %v11828_v14  ;;  %3228 = vmatmul.bf16.gmra.mxu1 %v11824_v0  ;;  %v13837_v14 = vld [vmem:[#allocation95_spill] sm:$0xff]  ;;  %v1892_v52 = vadd.f32 %v13839_v9, %v13838_v61  ;;  %v10230_v61 = vld [vmem:[#allocation13 + $0x148] sm:$0xff]  ;;  %v13844_v9 = vld [vmem:[#allocation94_spill] sm:$0xff] }
 0x2bc   : > { %13831 = vst [vmem:[#allocation150_spill] sm:$0xff] %v11831_v39  ;;  %3478 = vmatmul.bf16.gmra.mxu2 %v11824_v0  ;;  %v13841_v0 = vld [vmem:[#allocation96_spill] sm:$0xff] }
 0x2bd   : > { %v2568_v30 = vpop.f32.mrf.mxu3  ;;  %v2143_v22 = vadd.f32 %v13841_v0, %v13840_v47  ;;  %v10206_v47 = vld [vmem:[#allocation13 + $0x88] sm:$0xff]  ;;  %v13843_v0 = vld [vmem:[#allocation33_spill] sm:$0xff]  ;;  %4437 = vmatpush.bf16.msrb.mxu2 %v10230_v61 }
 0x2be   : > { %v2645_v25 = vadd.f32 %v2568_v30, %v1891_v2  ;;  %3681 = vmatpush.bf16.msrb.mxu3 %v10206_v47  ;;  %v13849_v47 = vld [vmem:[#allocation35_spill] sm:$0xff] }
 0x2bf   : > { %v3439_v35 = vpop.f32.mrf.mxu2  ;;  %v2820_v11 = vpop.f32.mrf.mxu0 }
 0x2c0   : > { %v11841_v38 = vadd.f32 %v3439_v35, %v2645_v25  ;;  %v11843_v56 = vadd.f32 %v2820_v11, %v2142_v58  ;;  %v3191_v63 = vpop.f32.mrf.mxu1  ;;  %v10578_v11 = vld [vmem:[%s11101_s10 + $0x58] sm:$0xff] }
 0x2c1   : > { %v11846_v39 = vadd.f32 %v3191_v63, %v13837_v14  ;;  %v1893_v63 = vadd.f32 %v13844_v9, %v13843_v0  ;;  %v10214_v0 = vld [vmem:[#allocation13 + $0xc8] sm:$0xff] }
 0x2c2   : > { %v10222_v9 = vld [vmem:[#allocation13 + $0x108] sm:$0xff]  ;;  %3937 = vmatpush.bf16.msrb.mxu0 %v10214_v0 }
 0x2c3   : > { %4187 = vmatpush.bf16.msrb.mxu1 %v10222_v9  ;;  %v10579_v9 = vld [vmem:[%s11101_s10 + $0x60] sm:$0xff] }
 0x2c5   : > { %v2570_v24 = vpop.f32.mrf.mxu3 }
 0x2c6   : > { %v2646_v53 = vadd.f32 %v2570_v24, %v1892_v52 }
 0x2c7   : > { %v3441_v2 = vpop.f32.mrf.mxu2  ;;  %v2823_v30 = vpop.f32.mrf.mxu0 }
 0x2c8   : > { %v11855_v25 = vadd.f32 %v3441_v2, %v2646_v53  ;;  %v11857_v58 = vadd.f32 %v2823_v30, %v2143_v22  ;;  %v3194_v35 = vpop.f32.mrf.mxu1  ;;  %v13845_v22 = vld [vmem:[#allocation36_spill] sm:$0xff] }
 0x2c9   : > { %v11860_v14 = vadd.f32 %v3194_v35, %v11526_v49  ;;  %v2144_v24 = vadd.f32 %v11528_v60, %v13845_v22  ;;  %v1894_v60 = vadd.f32 %v11524_v16, %v13849_v47  ;;  %v13855_v16 = vld [vmem:[#allocation38_spill] sm:$0xff] }
 0x2ca   : > { %13842 = vst [vmem:[#allocation37_spill] sm:$0xff] %v11857_v58  ;;  %2612 = vmatmul.bf16.gmra.mxu3 %v10578_v11  ;;  %2862 = vmatmul.bf16.gmra.mxu0 %v10578_v11 }
 0x2cb   : > { %3233 = vmatmul.bf16.gmra.mxu1 %v11853_v6 }
 0x2cc   : > { %3483 = vmatmul.bf16.gmra.mxu2 %v11853_v6 }
 0x2cd   : > { %v2573_v52 = vpop.f32.mrf.mxu3 }
 0x2ce   : > { %v2647_v49 = vadd.f32 %v2573_v52, %v1893_v63  ;;  %v13850_v63 = vld [vmem:[#allocation39_spill] sm:$0xff] }
 0x2cf   : > { %v3444_v53 = vpop.f32.mrf.mxu2  ;;  %v2825_v2 = vpop.f32.mrf.mxu0  ;;  %v2145_v52 = vadd.f32 %v11535_v23, %v13850_v63  ;;  %v13856_v23 = vld [vmem:[#allocation97_spill] sm:$0xff]  ;;  %v13858_v63 = vld [vmem:[#allocation99_spill] sm:$0xff] }
 0x2d0   : > { %v11869_v30 = vadd.f32 %v3444_v53, %v2647_v49  ;;  %v11871_v35 = vadd.f32 %v2825_v2, %v2144_v24  ;;  %v3196_v11 = vpop.f32.mrf.mxu1  ;;  %v11881_v53 = vld [vmem:[%s11109_s14 + $0x50] sm:$0xff]  ;;  %v1895_v47 = vadd.f32 %v13856_v23, %v13855_v16 }
 0x2d1   : > { %v11874_v58 = vadd.f32 %v3196_v11, %v11533_v10  ;;  %13851 = vst [vmem:[#allocation93_spill] sm:$0xff] %v11881_v53 }
 0x2d2   : > { %13846 = vst [vmem:[#allocation29_spill] sm:$0xff] %v11869_v30 }
 0x2d3   : > { %13847 = vst [vmem:[#allocation90_spill] sm:$0xff] %v11871_v35  ;;  %v13861_v35 = vld [vmem:[#allocation40_spill] sm:$0xff] }
 0x2d4   : > { %13848 = vst [vmem:[#allocation32_spill] sm:$0xff] %v11874_v58  ;;  %v13863_v58 = vld [vmem:[#allocation44_spill] sm:$0xff] }
 0x2d5   : > { %v2575_v61 = vpop.f32.mrf.mxu3 }
 0x2d6   : > { %v2648_v22 = vadd.f32 %v2575_v61, %v1894_v60  ;;  %v13857_v61 = vld [vmem:[#allocation41_spill] sm:$0xff] }
 0x2d7   : > { %v3446_v49 = vpop.f32.mrf.mxu2  ;;  %v2828_v24 = vpop.f32.mrf.mxu0 }
 0x2d8   : > { %v11883_v2 = vadd.f32 %v3446_v49, %v2648_v22  ;;  %v11885_v10 = vadd.f32 %v2828_v24, %v2145_v52  ;;  %v3199_v11 = vpop.f32.mrf.mxu1  ;;  %v2146_v52 = vadd.f32 %v13858_v63, %v13857_v61  ;;  %v11909_v63 = vld [vmem:[%s11109_s14 + $0x58] sm:$0xff] }
 0x2d9   : > { %v11888_v0 = vadd.f32 %v3199_v11, %v11544_v3 }
 0x2da   : > { %13852 = vst [vmem:[#allocation95_spill] sm:$0xff] %v11883_v2  ;;  %2617 = vmatmul.bf16.gmra.mxu3 %v10579_v9  ;;  %2867 = vmatmul.bf16.gmra.mxu0 %v10579_v9  ;;  %v13862_v2 = vld [vmem:[#allocation98_spill] sm:$0xff] }
 0x2db   : > { %13853 = vst [vmem:[#allocation31_spill] sm:$0xff] %v11885_v10  ;;  %3238 = vmatmul.bf16.gmra.mxu1 %v11881_v53  ;;  %v13860_v10 = vld [vmem:[#allocation101_spill] sm:$0xff]  ;;  %v1896_v16 = vadd.f32 %v13862_v2, %v13861_v35  ;;  %v10229_v35 = vld [vmem:[#allocation13 + $0x140] sm:$0xff]  ;;  %v13868_v2 = vld [vmem:[#allocation100_spill] sm:$0xff] }
 0x2dc   : > { %13854 = vst [vmem:[#allocation92_spill] sm:$0xff] %v11888_v0  ;;  %3488 = vmatmul.bf16.gmra.mxu2 %v11881_v53  ;;  %v13864_v53 = vld [vmem:[#allocation102_spill] sm:$0xff] }
 0x2dd   : > { %v2578_v60 = vpop.f32.mrf.mxu3  ;;  %v2147_v30 = vadd.f32 %v13864_v53, %v13863_v58  ;;  %v10205_v58 = vld [vmem:[#allocation13 + $0x80] sm:$0xff]  ;;  %v13867_v53 = vld [vmem:[#allocation42_spill] sm:$0xff]  ;;  %4438 = vmatpush.bf16.msrb.mxu2 %v10229_v35 }
 0x2de   : > { %v2649_v22 = vadd.f32 %v2578_v60, %v1895_v47  ;;  %3682 = vmatpush.bf16.msrb.mxu3 %v10205_v58  ;;  %v13873_v58 = vld [vmem:[#allocation45_spill] sm:$0xff] }
 0x2df   : > { %v3449_v49 = vpop.f32.mrf.mxu2  ;;  %v2830_v24 = vpop.f32.mrf.mxu0 }
 0x2e0   : > { %v11897_v3 = vadd.f32 %v3449_v49, %v2649_v22  ;;  %v11899_v11 = vadd.f32 %v2830_v24, %v2146_v52  ;;  %v3201_v9 = vpop.f32.mrf.mxu1  ;;  %v10580_v24 = vld [vmem:[%s11101_s10 + $0x68] sm:$0xff] }
 0x2e1   : > { %v11902_v0 = vadd.f32 %v3201_v9, %v13860_v10  ;;  %v1897_v9 = vadd.f32 %v13868_v2, %v13867_v53  ;;  %v10213_v53 = vld [vmem:[#allocation13 + $0xc0] sm:$0xff] }
 0x2e2   : > { %13859 = vst [vmem:[#allocation34_spill] sm:$0xff] %v11899_v11  ;;  %v10221_v2 = vld [vmem:[#allocation13 + $0x100] sm:$0xff]  ;;  %3938 = vmatpush.bf16.msrb.mxu0 %v10213_v53 }
 0x2e3   : > { %4188 = vmatpush.bf16.msrb.mxu1 %v10221_v2  ;;  %v10581_v2 = vld [vmem:[%s11101_s10 + $0x70] sm:$0xff] }
 0x2e5   : > { %v2580_v23 = vpop.f32.mrf.mxu3 }
 0x2e6   : > { %v2650_v61 = vadd.f32 %v2580_v23, %v1896_v16 }
 0x2e7   : > { %v3451_v47 = vpop.f32.mrf.mxu2  ;;  %v2833_v60 = vpop.f32.mrf.mxu0 }
 0x2e8   : > { %v11911_v22 = vadd.f32 %v3451_v47, %v2650_v61  ;;  %v11913_v52 = vadd.f32 %v2833_v60, %v2147_v30  ;;  %v3204_v49 = vpop.f32.mrf.mxu1  ;;  %v13869_v30 = vld [vmem:[#allocation47_spill] sm:$0xff] }
 0x2e9   : > { %v11916_v10 = vadd.f32 %v3204_v49, %v11562_v21  ;;  %v2148_v23 = vadd.f32 %v11564_v17, %v13869_v30  ;;  %v1898_v17 = vadd.f32 %v11560_v4, %v13873_v58  ;;  %v13880_v4 = vld [vmem:[#allocation48_spill] sm:$0xff]  ;;  %v13881_v58 = vld [vmem:[#allocation103_spill] sm:$0xff] }
 0x2ea   : > { %13865 = vst [vmem:[#allocation96_spill] sm:$0xff] %v11913_v52  ;;  %2622 = vmatmul.bf16.gmra.mxu3 %v10580_v24  ;;  %2872 = vmatmul.bf16.gmra.mxu0 %v10580_v24 }
 0x2eb   : > { %13866 = vst [vmem:[#allocation33_spill] sm:$0xff] %v11916_v10  ;;  %3243 = vmatmul.bf16.gmra.mxu1 %v11909_v63 }
 0x2ec   : > { %3493 = vmatmul.bf16.gmra.mxu2 %v11909_v63 }
 0x2ed   : > { %v2583_v16 = vpop.f32.mrf.mxu3 }
 0x2ee   : > { %v2651_v21 = vadd.f32 %v2583_v16, %v1897_v9  ;;  %v13874_v9 = vld [vmem:[#allocation50_spill] sm:$0xff]  ;;  %v13875_v16 = vld [vmem:[#allocation104_spill] sm:$0xff] }
 0x2ef   : > { %v3454_v61 = vpop.f32.mrf.mxu2  ;;  %v2835_v47 = vpop.f32.mrf.mxu0  ;;  %v2149_v30 = vadd.f32 %v13875_v16, %v13874_v9  ;;  %v13882_v9 = vld [vmem:[#allocation53_spill] sm:$0xff]  ;;  %v13883_v16 = vld [vmem:[#allocation106_spill] sm:$0xff] }
 0x2f0   : > { %v11925_v60 = vadd.f32 %v3454_v61, %v2651_v21  ;;  %v11927_v49 = vadd.f32 %v2835_v47, %v2148_v23  ;;  %v3206_v24 = vpop.f32.mrf.mxu1  ;;  %v11937_v47 = vld [vmem:[%s11109_s14 + $0x60] sm:$0xff] }
 0x2f1   : > { %v11930_v52 = vadd.f32 %v3206_v24, %v11569_v45  ;;  %13876 = vst [vmem:[#allocation39_spill] sm:$0xff] %v11937_v47 }
 0x2f2   : > { %13870 = vst [vmem:[#allocation94_spill] sm:$0xff] %v11925_v60  ;;  %v13888_v60 = vld [vmem:[#allocation109_spill] sm:$0xff] }
 0x2f3   : > { %13871 = vst [vmem:[#allocation36_spill] sm:$0xff] %v11927_v49 }
 0x2f4   : > { %13872 = vst [vmem:[#allocation35_spill] sm:$0xff] %v11930_v52  ;;  %v13886_v52 = vld [vmem:[#allocation105_spill] sm:$0xff] }
 0x2f5   : > { %v2585_v35 = vpop.f32.mrf.mxu3 }
 0x2f6   : > { %v2652_v21 = vadd.f32 %v2585_v35, %v1898_v17  ;;  %v1899_v17 = vadd.f32 %v13881_v58, %v13880_v4  ;;  %v13887_v58 = vld [vmem:[#allocation56_spill] sm:$0xff] }
 0x2f7   : > { %v3456_v61 = vpop.f32.mrf.mxu2  ;;  %v2838_v23 = vpop.f32.mrf.mxu0  ;;  %v2151_v10 = vadd.f32 %v13888_v60, %v13887_v58  ;;  %v10284_v60 = vld [vmem:[#allocation14 + $0x38] sm:$0xff] }
 0x2f8   : > { %v11939_v49 = vadd.f32 %v3456_v61, %v2652_v21  ;;  %v11941_v45 = vadd.f32 %v2838_v23, %v2149_v30  ;;  %v3209_v24 = vpop.f32.mrf.mxu1  ;;  %v2150_v30 = vadd.f32 %v13883_v16, %v13882_v9  ;;  %5552 = vmatpush.bf16.msra.mxu2 %v10284_v60  ;;  %v13898_v60 = vld [vmem:[#allocation110_spill] sm:$0xff] }
 0x2f9   : > { %v11944_v53 = vadd.f32 %v3209_v24, %v11580_v62 }
 0x2fa   : > { %13877 = vst [vmem:[#allocation38_spill] sm:$0xff] %v11939_v49  ;;  %2627 = vmatmul.bf16.gmra.mxu3 %v10581_v2  ;;  %2877 = vmatmul.bf16.gmra.mxu0 %v10581_v2  ;;  %v13885_v49 = vld [vmem:[#allocation51_spill] sm:$0xff] }
 0x2fb   : > { %13878 = vst [vmem:[#allocation97_spill] sm:$0xff] %v11941_v45  ;;  %3248 = vmatmul.bf16.gmra.mxu1 %v11937_v47  ;;  %v13884_v45 = vld [vmem:[#allocation108_spill] sm:$0xff] }
 0x2fc   : > { %13879 = vst [vmem:[#allocation41_spill] sm:$0xff] %v11944_v53  ;;  %3498 = vmatmul.bf16.gmra.mxu2 %v11937_v47  ;;  %v1900_v47 = vadd.f32 %v13886_v52, %v13885_v49  ;;  %v10244_v52 = vld [vmem:[#allocation13 + $0x1b8] sm:$0xff] }
 0x2fd   : > { %v2588_v35 = vpop.f32.mrf.mxu3  ;;  %v13891_v49 = vld [vmem:[#allocation54_spill] sm:$0xff]  ;;  %4681 = vmatpush.bf16.msra.mxu3 %v10244_v52  ;;  %v13897_v52 = vld [vmem:[#allocation57_spill] sm:$0xff] }
 0x2fe   : > { %v2653_v21 = vadd.f32 %v2588_v35, %v1899_v17  ;;  %v11965_v35 = vld [vmem:[%s11109_s14 + $0x68] sm:$0xff] }
 0x2ff   : > { %v3459_v61 = vpop.f32.mrf.mxu2  ;;  %v2840_v23 = vpop.f32.mrf.mxu0 }
 0x300   : > { %v11953_v62 = vadd.f32 %v3459_v61, %v2653_v21  ;;  %v11955_v24 = vadd.f32 %v2840_v23, %v2150_v30  ;;  %v3211_v2 = vpop.f32.mrf.mxu1 }
 0x301   : > { %v11958_v53 = vadd.f32 %v3211_v2, %v13884_v45 }
 0x305   : > { %v2590_v4 = vpop.f32.mrf.mxu3 }
 0x306   : > { %v2654_v11 = vadd.f32 %v2590_v4, %v1900_v47  ;;  %v13892_v47 = vld [vmem:[#allocation107_spill] sm:$0xff] }
 0x307   : > { %v3461_v9 = vpop.f32.mrf.mxu2  ;;  %v2843_v17 = vpop.f32.mrf.mxu0 }
 0x308   : > { %v11967_v16 = vadd.f32 %v3461_v9, %v2654_v11  ;;  %v11969_v30 = vadd.f32 %v2843_v17, %v2151_v10  ;;  %v3214_v21 = vpop.f32.mrf.mxu1  ;;  %v1901_v11 = vadd.f32 %v13892_v47, %v13891_v49  ;;  %v13893_v10 = vld [vmem:[#allocation59_spill] sm:$0xff]  ;;  %v13895_v17 = vld [vmem:[#allocation113_spill] sm:$0xff]  ;;  %v10260_v49 = vld [vmem:[#allocation13 + $0x238] sm:$0xff]  ;;  %v1902_v47 = vadd.f32 %v13898_v60, %v13897_v52 }
 0x309   : > { %v11972_v45 = vadd.f32 %v3214_v21, %v11601_v51  ;;  %v2152_v51 = vadd.f32 %v11603_v18, %v13893_v10  ;;  %5181 = vmatpush.bf16.msra.mxu1 %v10260_v49  ;;  %v13905_v49 = vld [vmem:[#allocation60_spill] sm:$0xff]  ;;  %v13906_v52 = vld [vmem:[#allocation111_spill] sm:$0xff] }
 0x30a   : > { %13889 = vst [vmem:[#allocation99_spill] sm:$0xff] %v11969_v30  ;;  %2632 = vmatmul.bf16.gmra.mxu3 %v11588_v8  ;;  %2882 = vmatmul.bf16.gmra.mxu0 %v11588_v8  ;;  %v10252_v30 = vld [vmem:[#allocation13 + $0x1f8] sm:$0xff]  ;;  %v1903_v60 = vadd.f32 %v13906_v52, %v13905_v49  ;;  %v13911_v49 = vld [vmem:[#allocation68_spill] sm:$0xff] }
 0x30b   : > { %13890 = vst [vmem:[#allocation101_spill] sm:$0xff] %v11972_v45  ;;  %3253 = vmatmul.bf16.gmra.mxu1 %v11965_v35  ;;  %4931 = vmatpush.bf16.msra.mxu0 %v10252_v30  ;;  %v13912_v52 = vld [vmem:[#allocation118_spill] sm:$0xff] }
 0x30c   : > { %3503 = vmatmul.bf16.gmra.mxu2 %v11965_v35 }
 0x30d   : > { %v2593_v61 = vpop.f32.mrf.mxu3 }
 0x30e   : > { %v2655_v23 = vadd.f32 %v2593_v61, %v1901_v11  ;;  %v13899_v11 = vld [vmem:[#allocation62_spill] sm:$0xff] }
 0x30f   : > { %v3464_v2 = vpop.f32.mrf.mxu2  ;;  %v2845_v4 = vpop.f32.mrf.mxu0  ;;  %v13900_v61 = vld [vmem:[#allocation114_spill] sm:$0xff] }
 0x310   : > { %v11982_v8 = vadd.f32 %v3464_v2, %v2655_v23  ;;  %v11984_v58 = vadd.f32 %v2845_v4, %v2152_v51  ;;  %v3216_v9 = vpop.f32.mrf.mxu1  ;;  %v2153_v10 = vadd.f32 %v13900_v61, %v13899_v11  ;;  %v11994_v51 = vld [vmem:[%s11109_s14 + $0x70] sm:$0xff] }
 0x311   : > { %v11987_v21 = vadd.f32 %v3216_v9, %v13895_v17  ;;  %13901 = vst [vmem:[#allocation44_spill] sm:$0xff] %v11994_v51 }
 0x312   : > { %13894 = vst [vmem:[#allocation40_spill] sm:$0xff] %v11984_v58 }
 0x313   : > { %13896 = vst [vmem:[#allocation98_spill] sm:$0xff] %v11987_v21  ;;  %v2155_v21 = vadd.f32 %v13912_v52, %v13911_v49 }
 0x315   : > { %v2595_v18 = vpop.f32.mrf.mxu3 }
 0x316   : > { %v2656_v45 = vadd.f32 %v2595_v18, %v1902_v47 }
 0x317   : > { %v3466_v23 = vpop.f32.mrf.mxu2  ;;  %v2848_v2 = vpop.f32.mrf.mxu0 }
 0x318   : > { %v11996_v4 = vadd.f32 %v3466_v23, %v2656_v45  ;;  %v11998_v9 = vadd.f32 %v2848_v2, %v2153_v10  ;;  %v3219_v17 = vpop.f32.mrf.mxu1  ;;  %v13907_v45 = vld [vmem:[#allocation65_spill] sm:$0xff] }
 0x319   : > { %v12001_v30 = vadd.f32 %v3219_v17, %v11622_v5  ;;  %v2154_v18 = vadd.f32 %v11624_v43, %v13907_v45  ;;  %v13908_v17 = vld [vmem:[#allocation117_spill] sm:$0xff] }
 0x31a   : > { %13902 = vst [vmem:[#allocation102_spill] sm:$0xff] %v11996_v4  ;;  %2637 = vmatmul.bf16.gmra.mxu3 %v11609_v13  ;;  %2887 = vmatmul.bf16.gmra.mxu0 %v11609_v13 }
 0x31b   : > { %13903 = vst [vmem:[#allocation42_spill] sm:$0xff] %v11998_v9  ;;  %3258 = vmatmul.bf16.gmra.mxu1 %v11994_v51  ;;  %v13909_v9 = vld [vmem:[#allocation63_spill] sm:$0xff] }
 0x31c   : > { %13904 = vst [vmem:[#allocation100_spill] sm:$0xff] %v12001_v30  ;;  %3508 = vmatmul.bf16.gmra.mxu2 %v11994_v51  ;;  %v13910_v30 = vld [vmem:[#allocation115_spill] sm:$0xff] }
 0x31d   : > { %v2598_v47 = vpop.f32.mrf.mxu3  ;;  %v1904_v58 = vadd.f32 %v13910_v30, %v13909_v9  ;;  %v10243_v9 = vld [vmem:[#allocation13 + $0x1b0] sm:$0xff]  ;;  %v13916_v30 = vld [vmem:[#allocation116_spill] sm:$0xff] }
 0x31e   : > { %v2657_v11 = vadd.f32 %v2598_v47, %v1903_v60  ;;  %4682 = vmatpush.bf16.msra.mxu3 %v10243_v9  ;;  %v13921_v9 = vld [vmem:[#allocation69_spill] sm:$0xff] }
 0x31f   : > { %v3469_v61 = vpop.f32.mrf.mxu2  ;;  %v2850_v10 = vpop.f32.mrf.mxu0 }
 0x320   : > { %v12011_v5 = vadd.f32 %v3469_v61, %v2657_v11  ;;  %v12013_v23 = vadd.f32 %v2850_v10, %v2154_v18  ;;  %v3221_v2 = vpop.f32.mrf.mxu1  ;;  %v13914_v61 = vmov 0  }
 0x321   : > { %v12016_v13 = vadd.f32 %v3221_v2, %v13908_v17 }
 0x325   : > { %v2600_v4 = vpop.f32.mrf.mxu3 }
 0x326   : > { %v2658_v51 = vadd.f32 %v2600_v4, %v1904_v58  ;;  %v10283_v58 = vld [vmem:[#allocation14 + $0x30] sm:$0xff]  ;;  %v13915_v4 = vld [vmem:[#allocation66_spill] sm:$0xff] }
 0x327   : > { %v3471_v43 = vpop.f32.mrf.mxu2  ;;  %v2853_v60 = vpop.f32.mrf.mxu0  ;;  %5553 = vmatpush.bf16.msra.mxu2 %v10283_v58  ;;  %v13922_v58 = vld [vmem:[#allocation119_spill] sm:$0xff] }
 0x328   : > { %v12022_v47 = vadd.f32 %v3471_v43, %v2658_v51  ;;  %v12024_v45 = vadd.f32 %v2853_v60, %v2155_v21  ;;  %v3224_v18 = vpop.f32.mrf.mxu1  ;;  %v1905_v51 = vadd.f32 %v13916_v30, %v13915_v4  ;;  %v13917_v21 = vld [vmem:[#allocation71_spill] sm:$0xff]  ;;  %v1906_v4 = vadd.f32 %v13922_v58, %v13921_v9 }
 0x329   : > { %v12027_v11 = vadd.f32 %v3224_v18, %v11640_v42  ;;  %v2156_v42 = vadd.f32 %v11642_v19, %v13917_v21  ;;  %v13923_v19 = vld [vmem:[#allocation74_spill] sm:$0xff] }
 0x32a   : > { %13913 = vst [vmem:[#allocation47_spill] sm:$0xff] %v12024_v45  ;;  %3683 = vmatmul.bf16.vlgmr.msrb.gmra.mxu3 %v13914_v61  ;;  %3939 = vmatmul.bf16.vlgmr.msrb.gmra.mxu0 %v11648_v32  ;;  %v10251_v45 = vld [vmem:[#allocation13 + $0x1f0] sm:$0xff] }
 0x32b   : > { %4189 = vmatmul.bf16.vlgmr.msrb.gmra.mxu1 %v11648_v32  ;;  %v10259_v61 = vld [vmem:[#allocation13 + $0x230] sm:$0xff]  ;;  %4932 = vmatpush.bf16.msra.mxu0 %v10251_v45  ;;  %v13928_v45 = vld [vmem:[#allocation72_spill] sm:$0xff] }
 0x32c   : > { %4439 = vmatmul.bf16.vlgmr.msrb.gmra.mxu2 %v11648_v32  ;;  %5182 = vmatpush.bf16.msra.mxu1 %v10259_v61  ;;  %v13929_v61 = vld [vmem:[#allocation120_spill] sm:$0xff] }
 0x32d   : > { %v2603_v10 = vpop.f32.mrf.mxu3  ;;  %v1907_v9 = vadd.f32 %v13929_v61, %v13928_v45  ;;  %v13935_v45 = vld [vmem:[#allocation80_spill] sm:$0xff]  ;;  %v13936_v61 = vld [vmem:[#allocation126_spill] sm:$0xff] }
 0x32e   : > { %v2659_v2 = vadd.f32 %v2603_v10, %v1905_v51  ;;  %v13924_v51 = vld [vmem:[#allocation121_spill] sm:$0xff] }
 0x32f   : > { %v3474_v17 = vpop.f32.mrf.mxu2  ;;  %v2855_v49 = vpop.f32.mrf.mxu0  ;;  %v2157_v10 = vadd.f32 %v13924_v51, %v13923_v19 }
 0x330   : > { %v12037_v52 = vadd.f32 %v3474_v17, %v2659_v2  ;;  %v12039_v43 = vadd.f32 %v2855_v49, %v2156_v42  ;;  %v3226_v60 = vpop.f32.mrf.mxu1 }
 0x331   : > { %v12042_v18 = vadd.f32 %v3226_v60, %v11650_v57 }
 0x332   : > { %13918 = vst [vmem:[#allocation45_spill] sm:$0xff] %v12037_v52 }
 0x333   : > { %13919 = vst [vmem:[#allocation50_spill] sm:$0xff] %v12039_v43 }
 0x334   : > { %13920 = vst [vmem:[#allocation104_spill] sm:$0xff] %v12042_v18  ;;  %v2159_v18 = vadd.f32 %v13936_v61, %v13935_v45 }
 0x335   : > { %v2605_v30 = vpop.f32.mrf.mxu3 }
 0x336   : > { %v2660_v21 = vadd.f32 %v2605_v30, %v1906_v4  ;;  %v13930_v4 = vld [vmem:[#allocation77_spill] sm:$0xff]  ;;  %v13931_v30 = vld [vmem:[#allocation123_spill] sm:$0xff] }
 0x337   : > { %v3476_v2 = vpop.f32.mrf.mxu2  ;;  %v2858_v17 = vpop.f32.mrf.mxu0  ;;  %v2158_v19 = vadd.f32 %v13931_v30, %v13930_v4 }
 0x338   : > { %v12048_v42 = vadd.f32 %v3476_v2, %v2660_v21  ;;  %v12050_v49 = vadd.f32 %v2858_v17, %v2157_v10  ;;  %v3229_v57 = vpop.f32.mrf.mxu1  ;;  %v13932_v17 = vld [vmem:[#allocation125_spill] sm:$0xff] }
 0x339   : > { %v12053_v60 = vadd.f32 %v3229_v57, %v11661_v26 }
 0x33a   : > { %13925 = vst [vmem:[#allocation48_spill] sm:$0xff] %v12048_v42  ;;  %3688 = vmatmul.bf16.gmra.mxu3 %v11648_v32  ;;  %3944 = vmatmul.bf16.gmra.mxu0 %v11669_v41 }
 0x33b   : > { %13926 = vst [vmem:[#allocation103_spill] sm:$0xff] %v12050_v49  ;;  %4194 = vmatmul.bf16.gmra.mxu1 %v11669_v41  ;;  %v13933_v49 = vld [vmem:[#allocation75_spill] sm:$0xff] }
 0x33c   : > { %13927 = vst [vmem:[#allocation53_spill] sm:$0xff] %v12053_v60  ;;  %4444 = vmatmul.bf16.gmra.mxu2 %v11669_v41  ;;  %v13934_v60 = vld [vmem:[#allocation122_spill] sm:$0xff] }
 0x33d   : > { %v2608_v58 = vpop.f32.mrf.mxu3  ;;  %v1908_v43 = vadd.f32 %v13934_v60, %v13933_v49  ;;  %v10242_v49 = vld [vmem:[#allocation13 + $0x1a8] sm:$0xff] }
 0x33e   : > { %v2661_v51 = vadd.f32 %v2608_v58, %v1907_v9  ;;  %v13939_v60 = vld [vmem:[#allocation124_spill] sm:$0xff]  ;;  %4683 = vmatpush.bf16.msra.mxu3 %v10242_v49  ;;  %v13943_v49 = vld [vmem:[#allocation81_spill] sm:$0xff] }
 0x33f   : > { %v3479_v10 = vpop.f32.mrf.mxu2  ;;  %v2860_v21 = vpop.f32.mrf.mxu0 }
 0x340   : > { %v12063_v26 = vadd.f32 %v3479_v10, %v2661_v51  ;;  %v12065_v2 = vadd.f32 %v2860_v21, %v2158_v19  ;;  %v3231_v32 = vpop.f32.mrf.mxu1 }
 0x341   : > { %v12068_v57 = vadd.f32 %v3231_v32, %v13932_v17 }
 0x345   : > { %v2610_v42 = vpop.f32.mrf.mxu3 }
 0x346   : > { %v2662_v52 = vadd.f32 %v2610_v42, %v1908_v43  ;;  %v10282_v43 = vld [vmem:[#allocation14 + $0x28] sm:$0xff]  ;;  %v13938_v42 = vld [vmem:[#allocation78_spill] sm:$0xff] }
 0x347   : > { %v3481_v4 = vpop.f32.mrf.mxu2  ;;  %v2863_v9 = vpop.f32.mrf.mxu0  ;;  %5554 = vmatpush.bf16.msra.mxu2 %v10282_v43  ;;  %v13944_v43 = vld [vmem:[#allocation127_spill] sm:$0xff] }
 0x348   : > { %v12074_v58 = vadd.f32 %v3481_v4, %v2662_v52  ;;  %v12076_v30 = vadd.f32 %v2863_v9, %v2159_v18  ;;  %v3234_v19 = vpop.f32.mrf.mxu1  ;;  %v1909_v52 = vadd.f32 %v13939_v60, %v13938_v42  ;;  %v13940_v18 = vld [vmem:[#allocation83_spill] sm:$0xff]  ;;  %v10250_v9 = vld [vmem:[#allocation13 + $0x1e8] sm:$0xff]  ;;  %v1910_v42 = vadd.f32 %v13944_v43, %v13943_v49 }
 0x349   : > { %v12079_v51 = vadd.f32 %v3234_v19, %v11682_v34  ;;  %v2160_v34 = vadd.f32 %v11684_v37, %v13940_v18  ;;  %v10258_v19 = vld [vmem:[#allocation13 + $0x228] sm:$0xff]  ;;  %4933 = vmatpush.bf16.msra.mxu0 %v10250_v9  ;;  %v13945_v37 = vld [vmem:[#allocation86_spill] sm:$0xff] }
 0x34a   : > { %13937 = vst [vmem:[#allocation106_spill] sm:$0xff] %v12076_v30  ;;  %3693 = vmatmul.bf16.gmra.mxu3 %v11669_v41  ;;  %3949 = vmatmul.bf16.gmra.mxu0 %v11690_v54  ;;  %v13950_v9 = vld [vmem:[#allocation84_spill] sm:$0xff] }
 0x34b   : > { %4199 = vmatmul.bf16.gmra.mxu1 %v11690_v54 }
 0x34c   : > { %4449 = vmatmul.bf16.gmra.mxu2 %v11690_v54  ;;  %5183 = vmatpush.bf16.msra.mxu1 %v10258_v19  ;;  %v13951_v19 = vld [vmem:[#allocation128_spill] sm:$0xff] }
 0x34d   : > { %v2613_v10 = vpop.f32.mrf.mxu3  ;;  %v1911_v49 = vadd.f32 %v13951_v19, %v13950_v9  ;;  %v13957_v9 = vld [vmem:[#allocation67_spill] sm:$0xff]  ;;  %v13958_v19 = vld [vmem:[#allocation134_spill] sm:$0xff] }
 0x34e   : > { %v2663_v21 = vadd.f32 %v2613_v10, %v1909_v52  ;;  %v13946_v52 = vld [vmem:[#allocation129_spill] sm:$0xff] }
 0x34f   : > { %v3484_v32 = vpop.f32.mrf.mxu2  ;;  %v2865_v41 = vpop.f32.mrf.mxu0  ;;  %v2161_v10 = vadd.f32 %v13946_v52, %v13945_v37 }
 0x350   : > { %v12089_v17 = vadd.f32 %v3484_v32, %v2663_v21  ;;  %v12091_v45 = vadd.f32 %v2865_v41, %v2160_v34  ;;  %v3236_v61 = vpop.f32.mrf.mxu1 }
 0x351   : > { %v12094_v4 = vadd.f32 %v3236_v61, %v11692_v46 }
 0x352   : > { %13941 = vst [vmem:[#allocation108_spill] sm:$0xff] %v12091_v45 }
 0x353   : > { %13942 = vst [vmem:[#allocation51_spill] sm:$0xff] %v12094_v4  ;;  %v2163_v4 = vadd.f32 %v13958_v19, %v13957_v9 }
 0x355   : > { %v2615_v60 = vpop.f32.mrf.mxu3 }
 0x356   : > { %v2664_v18 = vadd.f32 %v2615_v60, %v1910_v42  ;;  %v13952_v42 = vld [vmem:[#allocation89_spill] sm:$0xff]  ;;  %v13953_v60 = vld [vmem:[#allocation131_spill] sm:$0xff] }
 0x357   : > { %v3486_v21 = vpop.f32.mrf.mxu2  ;;  %v2868_v32 = vpop.f32.mrf.mxu0  ;;  %v2162_v37 = vadd.f32 %v13953_v60, %v13952_v42 }
 0x358   : > { %v12100_v34 = vadd.f32 %v3486_v21, %v2664_v18  ;;  %v12102_v41 = vadd.f32 %v2868_v32, %v2161_v10  ;;  %v3239_v46 = vpop.f32.mrf.mxu1  ;;  %v13954_v32 = vld [vmem:[#allocation133_spill] sm:$0xff] }
 0x359   : > { %v12105_v61 = vadd.f32 %v3239_v46, %v11703_v27 }
 0x35a   : > { %13947 = vst [vmem:[#allocation105_spill] sm:$0xff] %v12100_v34  ;;  %3698 = vmatmul.bf16.gmra.mxu3 %v11690_v54  ;;  %3954 = vmatmul.bf16.gmra.mxu0 %v11711_v48 }
 0x35b   : > { %13948 = vst [vmem:[#allocation56_spill] sm:$0xff] %v12102_v41  ;;  %4204 = vmatmul.bf16.gmra.mxu1 %v11711_v48  ;;  %v13955_v41 = vld [vmem:[#allocation87_spill] sm:$0xff] }
 0x35c   : > { %13949 = vst [vmem:[#allocation109_spill] sm:$0xff] %v12105_v61  ;;  %4454 = vmatmul.bf16.gmra.mxu2 %v11711_v48  ;;  %v13956_v61 = vld [vmem:[#allocation130_spill] sm:$0xff] }
 0x35d   : > { %v2618_v43 = vpop.f32.mrf.mxu3  ;;  %v1912_v45 = vadd.f32 %v13956_v61, %v13955_v41  ;;  %v10241_v41 = vld [vmem:[#allocation13 + $0x1a0] sm:$0xff]  ;;  %v13961_v61 = vld [vmem:[#allocation132_spill] sm:$0xff] }
 0x35e   : > { %v2665_v52 = vadd.f32 %v2618_v43, %v1911_v49  ;;  %4684 = vmatpush.bf16.msra.mxu3 %v10241_v41  ;;  %v13965_v41 = vld [vmem:[#allocation46_spill] sm:$0xff] }
 0x35f   : > { %v3489_v10 = vpop.f32.mrf.mxu2  ;;  %v2870_v18 = vpop.f32.mrf.mxu0 }
 0x360   : > { %v12115_v27 = vadd.f32 %v3489_v10, %v2665_v52  ;;  %v12117_v21 = vadd.f32 %v2870_v18, %v2162_v37  ;;  %v3241_v54 = vpop.f32.mrf.mxu1 }
 0x361   : > { %v12120_v46 = vadd.f32 %v3241_v54, %v13954_v32 }
 0x365   : > { %v2620_v34 = vpop.f32.mrf.mxu3 }
 0x366   : > { %v2666_v30 = vadd.f32 %v2620_v34, %v1912_v45  ;;  %v10281_v45 = vld [vmem:[#allocation14 + $0x20] sm:$0xff] }
 0x367   : > { %v3491_v42 = vpop.f32.mrf.mxu2  ;;  %v2873_v49 = vpop.f32.mrf.mxu0  ;;  %v13960_v34 = vld [vmem:[#allocation43_spill] sm:$0xff]  ;;  %5555 = vmatpush.bf16.msra.mxu2 %v10281_v45 }
 0x368   : > { %v12126_v43 = vadd.f32 %v3491_v42, %v2666_v30  ;;  %v12128_v60 = vadd.f32 %v2873_v49, %v2163_v4  ;;  %v3244_v37 = vpop.f32.mrf.mxu1  ;;  %v1913_v30 = vadd.f32 %v13961_v61, %v13960_v34  ;;  %v13962_v4 = vld [vmem:[#allocation70_spill] sm:$0xff]  ;;  %v10249_v49 = vld [vmem:[#allocation13 + $0x1e0] sm:$0xff] }
 0x369   : > { %v12131_v52 = vadd.f32 %v3244_v37, %v11724_v12  ;;  %v2164_v12 = vadd.f32 %v11726_v44, %v13962_v4  ;;  %v10257_v37 = vld [vmem:[#allocation13 + $0x220] sm:$0xff]  ;;  %4934 = vmatpush.bf16.msra.mxu0 %v10249_v49  ;;  %v13967_v44 = vld [vmem:[#allocation73_spill] sm:$0xff] }
 0x36a   : > { %13959 = vst [vmem:[#allocation54_spill] sm:$0xff] %v12128_v60  ;;  %3703 = vmatmul.bf16.gmra.mxu3 %v11711_v48  ;;  %3959 = vmatmul.bf16.gmra.mxu0 %v11732_v40  ;;  %v13966_v45 = vld [vmem:[#allocation135_spill] sm:$0xff]  ;;  %v13972_v49 = vld [vmem:[#allocation49_spill] sm:$0xff] }
 0x36b   : > { %4209 = vmatmul.bf16.gmra.mxu1 %v11732_v40  ;;  %v1914_v34 = vadd.f32 %v13966_v45, %v13965_v41 }
 0x36c   : > { %4459 = vmatmul.bf16.gmra.mxu2 %v11732_v40  ;;  %5184 = vmatpush.bf16.msra.mxu1 %v10257_v37  ;;  %v13973_v37 = vld [vmem:[#allocation136_spill] sm:$0xff] }
 0x36d   : > { %v2623_v10 = vpop.f32.mrf.mxu3  ;;  %v1915_v41 = vadd.f32 %v13973_v37, %v13972_v49  ;;  %v13979_v49 = vld [vmem:[#allocation79_spill] sm:$0xff]  ;;  %v13980_v37 = vld [vmem:[#allocation142_spill] sm:$0xff] }
 0x36e   : > { %v2667_v18 = vadd.f32 %v2623_v10, %v1913_v30  ;;  %v13968_v30 = vld [vmem:[#allocation137_spill] sm:$0xff] }
 0x36f   : > { %v3494_v54 = vpop.f32.mrf.mxu2  ;;  %v2875_v48 = vpop.f32.mrf.mxu0  ;;  %v2165_v10 = vadd.f32 %v13968_v30, %v13967_v44 }
 0x370   : > { %v12141_v32 = vadd.f32 %v3494_v54, %v2667_v18  ;;  %v12143_v9 = vadd.f32 %v2875_v48, %v2164_v12  ;;  %v3246_v19 = vpop.f32.mrf.mxu1 }
 0x371   : > { %v12146_v42 = vadd.f32 %v3246_v19, %v11734_v1 }
 0x372   : > { %13963 = vst [vmem:[#allocation107_spill] sm:$0xff] %v12143_v9 }
 0x373   : > { %13964 = vst [vmem:[#allocation59_spill] sm:$0xff] %v12146_v42  ;;  %v2167_v42 = vadd.f32 %v13980_v37, %v13979_v49 }
 0x375   : > { %v2625_v61 = vpop.f32.mrf.mxu3 }
 0x376   : > { %v2668_v4 = vadd.f32 %v2625_v61, %v1914_v34  ;;  %v13974_v34 = vld [vmem:[#allocation76_spill] sm:$0xff]  ;;  %v13975_v61 = vld [vmem:[#allocation139_spill] sm:$0xff] }
 0x377   : > { %v3496_v18 = vpop.f32.mrf.mxu2  ;;  %v2878_v54 = vpop.f32.mrf.mxu0  ;;  %v2166_v44 = vadd.f32 %v13975_v61, %v13974_v34 }
 0x378   : > { %v12152_v12 = vadd.f32 %v3496_v18, %v2668_v4  ;;  %v12154_v48 = vadd.f32 %v2878_v54, %v2165_v10  ;;  %v3249_v1 = vpop.f32.mrf.mxu1  ;;  %v13976_v54 = vld [vmem:[#allocation141_spill] sm:$0xff] }
 0x379   : > { %v12157_v19 = vadd.f32 %v3249_v1, %v11745_v29 }
 0x37a   : > { %13969 = vst [vmem:[#allocation113_spill] sm:$0xff] %v12152_v12  ;;  %3708 = vmatmul.bf16.gmra.mxu3 %v11732_v40  ;;  %3964 = vmatmul.bf16.gmra.mxu0 %v11753_v55 }
 0x37b   : > { %13970 = vst [vmem:[#allocation57_spill] sm:$0xff] %v12154_v48  ;;  %4214 = vmatmul.bf16.gmra.mxu1 %v11753_v55  ;;  %v13977_v48 = vld [vmem:[#allocation52_spill] sm:$0xff] }
 0x37c   : > { %13971 = vst [vmem:[#allocation110_spill] sm:$0xff] %v12157_v19  ;;  %4464 = vmatmul.bf16.gmra.mxu2 %v11753_v55  ;;  %v13978_v19 = vld [vmem:[#allocation138_spill] sm:$0xff] }
 0x37d   : > { %v2628_v45 = vpop.f32.mrf.mxu3  ;;  %v1916_v9 = vadd.f32 %v13978_v19, %v13977_v48  ;;  %v10240_v48 = vld [vmem:[#allocation13 + $0x198] sm:$0xff]  ;;  %v13982_v19 = vld [vmem:[#allocation140_spill] sm:$0xff] }
 0x37e   : > { %v2669_v30 = vadd.f32 %v2628_v45, %v1915_v41  ;;  %4685 = vmatpush.bf16.msra.mxu3 %v10240_v48  ;;  %v13985_v48 = vld [vmem:[#allocation58_spill] sm:$0xff] }
 0x37f   : > { %v3499_v10 = vpop.f32.mrf.mxu2  ;;  %v2880_v4 = vpop.f32.mrf.mxu0 }
 0x380   : > { %v12167_v29 = vadd.f32 %v3499_v10, %v2669_v30  ;;  %v12169_v18 = vadd.f32 %v2880_v4, %v2166_v44  ;;  %v3251_v40 = vpop.f32.mrf.mxu1 }
 0x381   : > { %v12172_v1 = vadd.f32 %v3251_v40, %v13976_v54 }
 0x385   : > { %v2630_v12 = vpop.f32.mrf.mxu3 }
 0x386   : > { %v2670_v60 = vadd.f32 %v2630_v12, %v1916_v9  ;;  %v10280_v9 = vld [vmem:[#allocation14 + $0x18] sm:$0xff]  ;;  %v13981_v12 = vld [vmem:[#allocation55_spill] sm:$0xff] }
 0x387   : > { %v3501_v34 = vpop.f32.mrf.mxu2  ;;  %v2883_v41 = vpop.f32.mrf.mxu0  ;;  %5556 = vmatpush.bf16.msra.mxu2 %v10280_v9  ;;  %v13986_v9 = vld [vmem:[#allocation143_spill] sm:$0xff] }
 0x388   : > { %v12178_v45 = vadd.f32 %v3501_v34, %v2670_v60  ;;  %v12180_v61 = vadd.f32 %v2883_v41, %v2167_v42  ;;  %v3254_v44 = vpop.f32.mrf.mxu1  ;;  %v1917_v60 = vadd.f32 %v13982_v19, %v13981_v12  ;;  %v13983_v42 = vld [vmem:[#allocation82_spill] sm:$0xff]  ;;  %v1918_v12 = vadd.f32 %v13986_v9, %v13985_v48 }
 0x389   : > { %v12183_v30 = vadd.f32 %v3254_v44, %v11766_v33  ;;  %v2168_v33 = vadd.f32 %v11768_v50, %v13983_v42  ;;  %v10248_v41 = vld [vmem:[#allocation13 + $0x1d8] sm:$0xff]  ;;  %v13987_v50 = vld [vmem:[#allocation85_spill] sm:$0xff] }
 0x38a   : > { %3713 = vmatmul.bf16.gmra.mxu3 %v11753_v55  ;;  %3969 = vmatmul.bf16.gmra.mxu0 %v11774_v15  ;;  %v10256_v44 = vld [vmem:[#allocation13 + $0x218] sm:$0xff] }
 0x38b   : > { %4219 = vmatmul.bf16.gmra.mxu1 %v11774_v15  ;;  %4935 = vmatpush.bf16.msra.mxu0 %v10248_v41  ;;  %v13991_v41 = vld [vmem:[#allocation61_spill] sm:$0xff] }
 0x38c   : > { %4469 = vmatmul.bf16.gmra.mxu2 %v11774_v15  ;;  %5185 = vmatpush.bf16.msra.mxu1 %v10256_v44  ;;  %v13992_v44 = vld [vmem:[#allocation144_spill] sm:$0xff] }
 0x38d   : > { %v2633_v10 = vpop.f32.mrf.mxu3  ;;  %v1919_v48 = vadd.f32 %v13992_v44, %v13991_v41 }
 0x38e   : > { %v2671_v4 = vadd.f32 %v2633_v10, %v1917_v60  ;;  %v13988_v60 = vld [vmem:[#allocation145_spill] sm:$0xff] }
 0x38f   : > { %v3504_v40 = vpop.f32.mrf.mxu2  ;;  %v2885_v55 = vpop.f32.mrf.mxu0  ;;  %v2169_v10 = vadd.f32 %v13988_v60, %v13987_v50 }
 0x390   : > { %v12193_v54 = vadd.f32 %v3504_v40, %v2671_v4  ;;  %v12195_v49 = vadd.f32 %v2885_v55, %v2168_v33  ;;  %v3256_v37 = vpop.f32.mrf.mxu1 }
 0x391   : > { %v12198_v34 = vadd.f32 %v3256_v37, %v11776_v28 }
 0x392   : > { %13984 = vst [vmem:[#allocation62_spill] sm:$0xff] %v12195_v49 }
 0x395   : > { %v2635_v19 = vpop.f32.mrf.mxu3 }
 0x396   : > { %v2672_v42 = vadd.f32 %v2635_v19, %v1918_v12  ;;  %v13993_v12 = vld [vmem:[#allocation88_spill] sm:$0xff] }
 0x397   : > { %v3506_v4 = vpop.f32.mrf.mxu2  ;;  %v2888_v40 = vpop.f32.mrf.mxu0  ;;  %v2170_v19 = vadd.f32 %v11789_v31, %v13993_v12  ;;  %v13995_v31 = vld [vmem:[#allocation147_spill] sm:$0xff]  ;;  %v13997_v12 = vld [vmem:[#allocation28_spill] sm:$0xff] }
 0x398   : > { %v12204_v33 = vadd.f32 %v3506_v4, %v2672_v42  ;;  %v12206_v55 = vadd.f32 %v2888_v40, %v2169_v10  ;;  %v3259_v28 = vpop.f32.mrf.mxu1  ;;  %v13994_v40 = vld [vmem:[#allocation64_spill] sm:$0xff] }
 0x399   : > { %v12209_v37 = vadd.f32 %v3259_v28, %v11787_v7  ;;  %v1920_v28 = vadd.f32 %v11785_v20, %v13994_v40  ;;  %v10239_v20 = vld [vmem:[#allocation13 + $0x190] sm:$0xff] }
 0x39a   : > { %13989 = vst [vmem:[#allocation114_spill] sm:$0xff] %v12206_v55  ;;  %3718 = vmatmul.bf16.gmra.mxu3 %v11774_v15  ;;  %3974 = vmatmul.bf16.gmra.mxu0 %v11795_v36 }
 0x39b   : > { %13990 = vst [vmem:[#allocation60_spill] sm:$0xff] %v12209_v37  ;;  %4224 = vmatmul.bf16.gmra.mxu1 %v11795_v36  ;;  %4686 = vmatpush.bf16.msra.mxu3 %v10239_v20  ;;  %v14003_v20 = vld [vmem:[#allocation148_spill] sm:$0xff] }
 0x39c   : > { %4474 = vmatmul.bf16.gmra.mxu2 %v11795_v36 }
 0x39d   : > { %v2638_v9 = vpop.f32.mrf.mxu3 }
 0x39e   : > { %v2673_v50 = vadd.f32 %v2638_v9, %v1919_v48 }
 0x39f   : > { %v3509_v60 = vpop.f32.mrf.mxu2  ;;  %v2890_v10 = vpop.f32.mrf.mxu0 }
 0x3a0   : > { %v12219_v7 = vadd.f32 %v3509_v60, %v2673_v50  ;;  %v12221_v42 = vadd.f32 %v2890_v10, %v2170_v19  ;;  %v3261_v15 = vpop.f32.mrf.mxu1  ;;  %v14000_v60 = vld [vmem:[#allocation146_spill] sm:$0xff] }
 0x3a1   : > { %v12224_v4 = vadd.f32 %v3261_v15, %v11797_v59  ;;  %v13999_v59 = vld [vmem:[#allocation27_spill] sm:$0xff] }
 0x3a5   : > { %v2640_v55 = vpop.f32.mrf.mxu3 }
 0x3a6   : > { %v2674_v41 = vadd.f32 %v2640_v55, %v1920_v28  ;;  %v10279_v55 = vld [vmem:[#allocation14 + $0x10] sm:$0xff] }
 0x3a7   : > { %v3511_v44 = vpop.f32.mrf.mxu2  ;;  %v3940_v37 = vpop.f32.mrf.mxu0  ;;  %5557 = vmatpush.bf16.msra.mxu2 %v10279_v55  ;;  %v14001_v28 = vld [vmem:[#allocation149_spill] sm:$0xff] }
 0x3a8   : > { %v12228_v49 = vadd.f32 %v3511_v44, %v2674_v41  ;;  %v12231_v48 = vadd.f32 %v3940_v37, %v13995_v31  ;;  %v4190_v9 = vpop.f32.mrf.mxu1  ;;  %v14002_v44 = vld [vmem:[#allocation30_spill] sm:$0xff] }
 0x3a9   : > { %v12234_v19 = vadd.f32 %v4190_v9, %v13997_v12  ;;  %v10247_v9 = vld [vmem:[#allocation13 + $0x1d0] sm:$0xff] }
 0x3aa   : > { %13996 = vst [vmem:[#allocation111_spill] sm:$0xff] %v12231_v48  ;;  %3723 = vmatmul.bf16.gmra.mxu3 %v11795_v36  ;;  %3979 = vmatmul.bf16.gmra.mxu0 %v13999_v59  ;;  %v10255_v12 = vld [vmem:[#allocation13 + $0x210] sm:$0xff] }
 0x3ab   : > { %13998 = vst [vmem:[#allocation65_spill] sm:$0xff] %v12234_v19  ;;  %4229 = vmatmul.bf16.gmra.mxu1 %v13999_v59  ;;  %4936 = vmatpush.bf16.msra.mxu0 %v10247_v9 }
 0x3ac   : > { %4479 = vmatmul.bf16.gmra.mxu2 %v13999_v59  ;;  %5186 = vmatpush.bf16.msra.mxu1 %v10255_v12 }
 0x3ad   : > { %v3684_v50 = vpop.f32.mrf.mxu3 }
 0x3ae   : > { %v3764_v37 = vadd.f32 %v3684_v50, %v14000_v60 }
 0x3af   : > { %v4440_v10 = vpop.f32.mrf.mxu2  ;;  %v3942_v15 = vpop.f32.mrf.mxu0 }
 0x3b0   : > { %v12241_v40 = vadd.f32 %v4440_v10, %v3764_v37  ;;  %v12244_v41 = vadd.f32 %v3942_v15, %v14001_v28  ;;  %v4192_v36 = vpop.f32.mrf.mxu1  ;;  %v14004_v37 = vld [vmem:[#allocation150_spill] sm:$0xff] }
 0x3b1   : > { %v12247_v31 = vadd.f32 %v4192_v36, %v14002_v44  ;;  %v14006_v36 = vld [vmem:[#allocation91_spill] sm:$0xff] }
 0x3b5   : > { %v3686_v48 = vpop.f32.mrf.mxu3 }
 0x3b6   : > { %v3765_v55 = vadd.f32 %v3686_v48, %v14003_v20 }
 0x3b7   : > { %v4442_v19 = vpop.f32.mrf.mxu2  ;;  %v3945_v50 = vpop.f32.mrf.mxu0 }
 0x3b8   : > { %v12250_v60 = vadd.f32 %v4442_v19, %v3765_v55  ;;  %v12253_v10 = vadd.f32 %v3945_v50, %v14004_v37  ;;  %v4195_v15 = vpop.f32.mrf.mxu1 }
 0x3b9   : > { %v12256_v28 = vadd.f32 %v4195_v15, %v11841_v38 }
 0x3ba   : > { %14005 = vst [vmem:[#allocation117_spill] sm:$0xff] %v12253_v10  ;;  %3728 = vmatmul.bf16.gmra.mxu3 %v13999_v59  ;;  %3984 = vmatmul.bf16.gmra.mxu0 %v11853_v6 }
 0x3bb   : > { %4234 = vmatmul.bf16.gmra.mxu1 %v11853_v6 }
 0x3bc   : > { %4484 = vmatmul.bf16.gmra.mxu2 %v11853_v6 }
 0x3bd   : > { %v3689_v48 = vpop.f32.mrf.mxu3 }
 0x3be   : > { %v3766_v44 = vadd.f32 %v3689_v48, %v14006_v36 }
 0x3bf   : > { %v4445_v19 = vpop.f32.mrf.mxu2  ;;  %v3947_v9 = vpop.f32.mrf.mxu0 }
 0x3c0   : > { %v12263_v12 = vadd.f32 %v4445_v19, %v3766_v44  ;;  %v12266_v20 = vadd.f32 %v3947_v9, %v11846_v39  ;;  %v4197_v38 = vpop.f32.mrf.mxu1  ;;  %v14011_v44 = vld [vmem:[#allocation29_spill] sm:$0xff] }
 0x3c1   : > { %v12269_v55 = vadd.f32 %v4197_v38, %v11855_v25  ;;  %v14013_v39 = vld [vmem:[#allocation93_spill] sm:$0xff]  ;;  %v10278_v25 = vld [vmem:[#allocation14 + $0x8] sm:$0xff] }
 0x3c2   : > { %14007 = vst [vmem:[#allocation63_spill] sm:$0xff] %v12266_v20  ;;  %5558 = vmatpush.bf16.msra.mxu2 %v10278_v25  ;;  %v14014_v38 = vld [vmem:[#allocation37_spill] sm:$0xff]  ;;  %v10254_v20 = vld [vmem:[#allocation13 + $0x208] sm:$0xff] }
 0x3c3   : > { %14008 = vst [vmem:[#allocation115_spill] sm:$0xff] %v12269_v55  ;;  %5187 = vmatpush.bf16.msra.mxu1 %v10254_v20  ;;  %v14022_v20 = vld [vmem:[#allocation31_spill] sm:$0xff] }
 0x3c5   : > { %v3691_v59 = vpop.f32.mrf.mxu3 }
 0x3c6   : > { %v3767_v50 = vadd.f32 %v3691_v59, %v11843_v56  ;;  %v10238_v56 = vld [vmem:[#allocation13 + $0x188] sm:$0xff] }
 0x3c7   : > { %v4447_v37 = vpop.f32.mrf.mxu2  ;;  %v3950_v15 = vpop.f32.mrf.mxu0  ;;  %4687 = vmatpush.bf16.msra.mxu3 %v10238_v56  ;;  %v14018_v56 = vld [vmem:[#allocation90_spill] sm:$0xff] }
 0x3c8   : > { %v12272_v10 = vadd.f32 %v4447_v37, %v3767_v50  ;;  %v12275_v48 = vadd.f32 %v3950_v15, %v11860_v14  ;;  %v4200_v36 = vpop.f32.mrf.mxu1  ;;  %v14015_v15 = vld [vmem:[#allocation32_spill] sm:$0xff] }
 0x3c9   : > { %v12278_v19 = vadd.f32 %v4200_v36, %v14011_v44  ;;  %v14017_v44 = vld [vmem:[#allocation95_spill] sm:$0xff] }
 0x3ca   : > { %14009 = vst [vmem:[#allocation68_spill] sm:$0xff] %v12272_v10  ;;  %3733 = vmatmul.bf16.gmra.mxu3 %v11853_v6  ;;  %3989 = vmatmul.bf16.gmra.mxu0 %v14013_v39 }
 0x3cb   : > { %14010 = vst [vmem:[#allocation118_spill] sm:$0xff] %v12275_v48  ;;  %4239 = vmatmul.bf16.gmra.mxu1 %v14013_v39 }
 0x3cc   : > { %14012 = vst [vmem:[#allocation66_spill] sm:$0xff] %v12278_v19  ;;  %4489 = vmatmul.bf16.gmra.mxu2 %v14013_v39  ;;  %v10246_v19 = vld [vmem:[#allocation13 + $0x1c8] sm:$0xff] }
 0x3cd   : > { %v3694_v9 = vpop.f32.mrf.mxu3  ;;  %4937 = vmatpush.bf16.msra.mxu0 %v10246_v19 }
 0x3ce   : > { %v3768_v14 = vadd.f32 %v3694_v9, %v14014_v38 }
 0x3cf   : > { %v4450_v59 = vpop.f32.mrf.mxu2  ;;  %v3952_v50 = vpop.f32.mrf.mxu0 }
 0x3d0   : > { %v12285_v37 = vadd.f32 %v4450_v59, %v3768_v14  ;;  %v12288_v36 = vadd.f32 %v3952_v50, %v14015_v15  ;;  %v4202_v6 = vpop.f32.mrf.mxu1  ;;  %v14019_v14 = vld [vmem:[#allocation92_spill] sm:$0xff] }
 0x3d1   : > { %v12291_v48 = vadd.f32 %v4202_v6, %v14017_v44 }
 0x3d2   : > { %14016 = vst [vmem:[#allocation116_spill] sm:$0xff] %v12288_v36  ;;  %v14027_v36 = vld [vmem:[#allocation33_spill] sm:$0xff] }
 0x3d5   : > { %v3696_v10 = vpop.f32.mrf.mxu3 }
 0x3d6   : > { %v3769_v25 = vadd.f32 %v3696_v10, %v14018_v56 }
 0x3d7   : > { %v4452_v55 = vpop.f32.mrf.mxu2  ;;  %v3955_v9 = vpop.f32.mrf.mxu0 }
 0x3d8   : > { %v12294_v38 = vadd.f32 %v4452_v55, %v3769_v25  ;;  %v12297_v59 = vadd.f32 %v3955_v9, %v14019_v14  ;;  %v4205_v50 = vpop.f32.mrf.mxu1  ;;  %v14025_v9 = vld [vmem:[#allocation34_spill] sm:$0xff] }
 0x3d9   : > { %v12300_v15 = vadd.f32 %v4205_v50, %v11897_v3 }
 0x3da   : > { %14020 = vst [vmem:[#allocation71_spill] sm:$0xff] %v12297_v59  ;;  %3738 = vmatmul.bf16.gmra.mxu3 %v14013_v39  ;;  %3994 = vmatmul.bf16.gmra.mxu0 %v11909_v63 }
 0x3db   : > { %14021 = vst [vmem:[#allocation69_spill] sm:$0xff] %v12300_v15  ;;  %4244 = vmatmul.bf16.gmra.mxu1 %v11909_v63 }
 0x3dc   : > { %4494 = vmatmul.bf16.gmra.mxu2 %v11909_v63 }
 0x3dd   : > { %v3699_v10 = vpop.f32.mrf.mxu3 }
 0x3de   : > { %v3770_v19 = vadd.f32 %v3699_v10, %v14022_v20 }
 0x3df   : > { %v4455_v55 = vpop.f32.mrf.mxu2  ;;  %v3957_v6 = vpop.f32.mrf.mxu0 }
 0x3e0   : > { %v12307_v44 = vadd.f32 %v4455_v55, %v3770_v19  ;;  %v12310_v56 = vadd.f32 %v3957_v6, %v11902_v0  ;;  %v4207_v3 = vpop.f32.mrf.mxu1  ;;  %v14029_v19 = vld [vmem:[#allocation94_spill] sm:$0xff]  ;;  %v14031_v0 = vld [vmem:[#allocation39_spill] sm:$0xff] }
 0x3e1   : > { %v12313_v25 = vadd.f32 %v4207_v3, %v11911_v22  ;;  %v10237_v22 = vld [vmem:[#allocation13 + $0x180] sm:$0xff] }
 0x3e2   : > { %14023 = vst [vmem:[#allocation119_spill] sm:$0xff] %v12310_v56  ;;  %v10277_v6 = vld [vmem:[#allocation14] sm:$0xff]  ;;  %4688 = vmatpush.bf16.msra.mxu3 %v10237_v22  ;;  %v14035_v22 = vld [vmem:[#allocation36_spill] sm:$0xff] }
 0x3e3   : > { %14024 = vst [vmem:[#allocation74_spill] sm:$0xff] %v12313_v25  ;;  %5559 = vmatpush.bf16.msra.mxu2 %v10277_v6  ;;  %v10253_v56 = vld [vmem:[#allocation13 + $0x200] sm:$0xff] }
 0x3e4   : > { %5188 = vmatpush.bf16.msra.mxu1 %v10253_v56  ;;  %v14039_v56 = vld [vmem:[#allocation97_spill] sm:$0xff] }
 0x3e5   : > { %v3701_v39 = vpop.f32.mrf.mxu3 }
 0x3e6   : > { %v3771_v14 = vadd.f32 %v3701_v39, %v14025_v9  ;;  %v14032_v39 = vld [vmem:[#allocation96_spill] sm:$0xff] }
 0x3e7   : > { %v4457_v50 = vpop.f32.mrf.mxu2  ;;  %v3960_v59 = vpop.f32.mrf.mxu0 }
 0x3e8   : > { %v12316_v15 = vadd.f32 %v4457_v50, %v3771_v14  ;;  %v12319_v10 = vadd.f32 %v3960_v59, %v14027_v36  ;;  %v4210_v20 = vpop.f32.mrf.mxu1  ;;  %v14033_v50 = vld [vmem:[#allocation35_spill] sm:$0xff] }
 0x3e9   : > { %v12322_v55 = vadd.f32 %v4210_v20, %v14029_v19  ;;  %v14034_v19 = vld [vmem:[#allocation38_spill] sm:$0xff] }
 0x3ea   : > { %14026 = vst [vmem:[#allocation121_spill] sm:$0xff] %v12316_v15  ;;  %3743 = vmatmul.bf16.gmra.mxu3 %v11909_v63  ;;  %3999 = vmatmul.bf16.gmra.mxu0 %v14031_v0 }
 0x3eb   : > { %14028 = vst [vmem:[#allocation72_spill] sm:$0xff] %v12319_v10  ;;  %4249 = vmatmul.bf16.gmra.mxu1 %v14031_v0 }
 0x3ec   : > { %14030 = vst [vmem:[#allocation120_spill] sm:$0xff] %v12322_v55  ;;  %4499 = vmatmul.bf16.gmra.mxu2 %v14031_v0  ;;  %v10245_v55 = vld [vmem:[#allocation13 + $0x1c0] sm:$0xff] }
 0x3ed   : > { %v3704_v3 = vpop.f32.mrf.mxu3  ;;  %4938 = vmatpush.bf16.msra.mxu0 %v10245_v55 }
 0x3ee   : > { %v3772_v36 = vadd.f32 %v3704_v3, %v14032_v39 }
 0x3ef   : > { %v4460_v59 = vpop.f32.mrf.mxu2  ;;  %v3962_v9 = vpop.f32.mrf.mxu0 }
 0x3f0   : > { %v12329_v14 = vadd.f32 %v4460_v59, %v3772_v36  ;;  %v12332_v20 = vadd.f32 %v3962_v9, %v14033_v50  ;;  %v4212_v63 = vpop.f32.mrf.mxu1  ;;  %v14036_v36 = vld [vmem:[#allocation41_spill] sm:$0xff] }
 0x3f1   : > { %v12335_v10 = vadd.f32 %v4212_v63, %v14034_v19 }
 0x3f5   : > { %v3706_v15 = vpop.f32.mrf.mxu3 }
 0x3f6   : > { %v3773_v6 = vadd.f32 %v3706_v15, %v14035_v22 }
 0x3f7   : > { %v4462_v25 = vpop.f32.mrf.mxu2  ;;  %v3965_v3 = vpop.f32.mrf.mxu0 }
 0x3f8   : > { %v12338_v39 = vadd.f32 %v4462_v25, %v3773_v6  ;;  %v12341_v59 = vadd.f32 %v3965_v3, %v14036_v36  ;;  %v4215_v9 = vpop.f32.mrf.mxu1 }
 0x3f9   : > { %v12344_v50 = vadd.f32 %v4215_v9, %v11953_v62 }
 0x3fa   : > { %14037 = vst [vmem:[#allocation77_spill] sm:$0xff] %v12341_v59  ;;  %3748 = vmatmul.bf16.gmra.mxu3 %v14031_v0  ;;  %4004 = vmatmul.bf16.gmra.mxu0 %v11965_v35 }
 0x3fb   : > { %14038 = vst [vmem:[#allocation123_spill] sm:$0xff] %v12344_v50  ;;  %4254 = vmatmul.bf16.gmra.mxu1 %v11965_v35  ;;  %v14042_v50 = vld [vmem:[#allocation101_spill] sm:$0xff] }
 0x3fc   : > { %4504 = vmatmul.bf16.gmra.mxu2 %v11965_v35 }
 0x3fd   : > { %v3709_v15 = vpop.f32.mrf.mxu3 }
 0x3fe   : > { %v3774_v55 = vadd.f32 %v3709_v15, %v14039_v56 }
 0x3ff   : > { %v4465_v25 = vpop.f32.mrf.mxu2  ;;  %v3967_v63 = vpop.f32.mrf.mxu0 }
 0x400   : > { %v12351_v19 = vadd.f32 %v4465_v25, %v3774_v55  ;;  %v12354_v22 = vadd.f32 %v3967_v63, %v11958_v53  ;;  %v4217_v62 = vpop.f32.mrf.mxu1  ;;  %v14045_v53 = vld [vmem:[#allocation44_spill] sm:$0xff] }
 0x401   : > { %v12357_v6 = vadd.f32 %v4217_v62, %v11967_v16  ;;  %v10316_v16 = vld [vmem:[#allocation14 + $0x138] sm:$0xff] }
 0x402   : > { %14040 = vst [vmem:[#allocation125_spill] sm:$0xff] %v12354_v22  ;;  %6558 = vmatpush.bf16.msrb.mxu2 %v10316_v16  ;;  %v14049_v22 = vld [vmem:[#allocation40_spill] sm:$0xff] }
 0x405   : > { %v3711_v0 = vpop.f32.mrf.mxu3 }
 0x406   : > { %v3775_v3 = vadd.f32 %v3711_v0, %v11955_v24  ;;  %v10292_v24 = vld [vmem:[#allocation14 + $0x78] sm:$0xff] }
 0x407   : > { %v4467_v36 = vpop.f32.mrf.mxu2  ;;  %v3970_v9 = vpop.f32.mrf.mxu0  ;;  %5802 = vmatpush.bf16.msrb.mxu3 %v10292_v24 }
 0x408   : > { %v12360_v59 = vadd.f32 %v4467_v36, %v3775_v3  ;;  %v12363_v15 = vadd.f32 %v3970_v9, %v14042_v50  ;;  %v4220_v56 = vpop.f32.mrf.mxu1  ;;  %v14046_v50 = vld [vmem:[#allocation99_spill] sm:$0xff]  ;;  %v14047_v3 = vld [vmem:[#allocation98_spill] sm:$0xff] }
 0x409   : > { %v12366_v55 = vadd.f32 %v4220_v56, %v11982_v8  ;;  %v14048_v9 = vld [vmem:[#allocation102_spill] sm:$0xff] }
 0x40a   : > { %14041 = vst [vmem:[#allocation75_spill] sm:$0xff] %v12360_v59  ;;  %3753 = vmatmul.bf16.gmra.mxu3 %v11965_v35  ;;  %4009 = vmatmul.bf16.gmra.mxu0 %v14045_v53 }
 0x40b   : > { %14043 = vst [vmem:[#allocation122_spill] sm:$0xff] %v12363_v15  ;;  %4259 = vmatmul.bf16.gmra.mxu1 %v14045_v53  ;;  %v10300_v15 = vld [vmem:[#allocation14 + $0xb8] sm:$0xff] }
 0x40c   : > { %14044 = vst [vmem:[#allocation80_spill] sm:$0xff] %v12366_v55  ;;  %4509 = vmatmul.bf16.gmra.mxu2 %v14045_v53  ;;  %v10308_v55 = vld [vmem:[#allocation14 + $0xf8] sm:$0xff]  ;;  %6052 = vmatpush.bf16.msrb.mxu0 %v10300_v15 }
 0x40d   : > { %v3714_v25 = vpop.f32.mrf.mxu3  ;;  %6308 = vmatpush.bf16.msrb.mxu1 %v10308_v55  ;;  %v14053_v15 = vld [vmem:[#allocation42_spill] sm:$0xff] }
 0x40e   : > { %v3776_v63 = vadd.f32 %v3714_v25, %v14046_v50  ;;  %v12383_v25 = vld [vmem:[%s11109_s14 + $0x78] sm:$0xff] }
 0x40f   : > { %v4470_v62 = vpop.f32.mrf.mxu2  ;;  %v3972_v0 = vpop.f32.mrf.mxu0 }
 0x410   : > { %v12373_v8 = vadd.f32 %v4470_v62, %v3776_v63  ;;  %v12376_v35 = vadd.f32 %v3972_v0, %v14047_v3  ;;  %v4222_v36 = vpop.f32.mrf.mxu1  ;;  %v14050_v62 = vld [vmem:[#allocation100_spill] sm:$0xff] }
 0x411   : > { %v12379_v56 = vadd.f32 %v4222_v36, %v14048_v9 }
 0x415   : > { %v3716_v24 = vpop.f32.mrf.mxu3 }
 0x416   : > { %v3777_v16 = vadd.f32 %v3716_v24, %v14049_v22 }
 0x417   : > { %v4472_v59 = vpop.f32.mrf.mxu2  ;;  %v3975_v50 = vpop.f32.mrf.mxu0 }
 0x418   : > { %v12385_v63 = vadd.f32 %v4472_v59, %v3777_v16  ;;  %v12388_v0 = vadd.f32 %v3975_v50, %v14050_v62  ;;  %v4225_v3 = vpop.f32.mrf.mxu1 }
 0x419   : > { %v12391_v36 = vadd.f32 %v4225_v3, %v12011_v5 }
 0x41a   : > { %14051 = vst [vmem:[#allocation126_spill] sm:$0xff] %v12388_v0  ;;  %3758 = vmatmul.bf16.gmra.mxu3 %v14045_v53  ;;  %4014 = vmatmul.bf16.gmra.mxu0 %v12383_v25 }
 0x41b   : > { %14052 = vst [vmem:[#allocation78_spill] sm:$0xff] %v12391_v36  ;;  %4264 = vmatmul.bf16.gmra.mxu1 %v12383_v25 }
 0x41c   : > { %4514 = vmatmul.bf16.gmra.mxu2 %v12383_v25 }
 0x41d   : > { %v3719_v22 = vpop.f32.mrf.mxu3 }
 0x41e   : > { %v3778_v59 = vadd.f32 %v3719_v22, %v14053_v15 }
 0x41f   : > { %v4475_v55 = vpop.f32.mrf.mxu2  ;;  %v3977_v9 = vpop.f32.mrf.mxu0 }
 0x420   : > { %v12398_v24 = vadd.f32 %v4475_v55, %v3778_v59  ;;  %v12401_v16 = vadd.f32 %v3977_v9, %v12016_v13  ;;  %v4227_v5 = vpop.f32.mrf.mxu1  ;;  %v14058_v59 = vld [vmem:[#allocation45_spill] sm:$0xff]  ;;  %v10582_v13 = vld [vmem:[%s11109_s14 + $0x8] sm:$0xff] }
 0x421   : > { %v12404_v53 = vadd.f32 %v4227_v5, %v12022_v47  ;;  %v14060_v47 = vmov 0   ;;  %v10291_v9 = vld [vmem:[#allocation14 + $0x70] sm:$0xff] }
 0x422   : > { %14054 = vst [vmem:[#allocation124_spill] sm:$0xff] %v12401_v16  ;;  %v10315_v5 = vld [vmem:[#allocation14 + $0x130] sm:$0xff]  ;;  %5803 = vmatpush.bf16.msrb.mxu3 %v10291_v9 }
 0x423   : > { %14055 = vst [vmem:[#allocation83_spill] sm:$0xff] %v12404_v53  ;;  %6559 = vmatpush.bf16.msrb.mxu2 %v10315_v5  ;;  %v10307_v16 = vld [vmem:[#allocation14 + $0xf0] sm:$0xff]  ;;  %v14065_v5 = vld [vmem:[#allocation50_spill] sm:$0xff]  ;;  %v12428_v53 = vld [vmem:[%s11116_s13] sm:$0xff] }
 0x424   : > { %6309 = vmatpush.bf16.msrb.mxu1 %v10307_v16 }
 0x425   : > { %v3721_v50 = vpop.f32.mrf.mxu3 }
 0x426   : > { %v3779_v62 = vadd.f32 %v3721_v50, %v12013_v23  ;;  %v14061_v50 = vld [vmem:[#allocation47_spill] sm:$0xff] }
 0x427   : > { %v4477_v3 = vpop.f32.mrf.mxu2  ;;  %v3980_v0 = vpop.f32.mrf.mxu0 }
 0x428   : > { %v12407_v36 = vadd.f32 %v4477_v3, %v3779_v62  ;;  %v12410_v22 = vadd.f32 %v3980_v0, %v12027_v11  ;;  %v4230_v15 = vpop.f32.mrf.mxu1 }
 0x429   : > { %v12413_v55 = vadd.f32 %v4230_v15, %v14058_v59  ;;  %v14062_v15 = vld [vmem:[#allocation104_spill] sm:$0xff] }
 0x42a   : > { %14056 = vst [vmem:[#allocation81_spill] sm:$0xff] %v12407_v36  ;;  %4689 = vmatmul.bf16.vlgmr.msra.gmra.mxu3 %v10582_v13  ;;  %4939 = vmatmul.bf16.vlgmr.msra.gmra.mxu0 %v10582_v13 }
 0x42b   : > { %14057 = vst [vmem:[#allocation127_spill] sm:$0xff] %v12410_v22  ;;  %5189 = vmatmul.bf16.vlgmr.msra.gmra.mxu1 %v10582_v13  ;;  %v14064_v13 = vld [vmem:[#allocation48_spill] sm:$0xff] }
 0x42c   : > { %14059 = vst [vmem:[#allocation86_spill] sm:$0xff] %v12413_v55  ;;  %5560 = vmatmul.bf16.vlgmr.msra.gmra.mxu2 %v14060_v47  ;;  %v10299_v47 = vld [vmem:[#allocation14 + $0xb0] sm:$0xff] }
 0x42d   : > { %v3724_v23 = vpop.f32.mrf.mxu3  ;;  %6053 = vmatpush.bf16.msrb.mxu0 %v10299_v47  ;;  %v14069_v47 = vld [vmem:[#allocation103_spill] sm:$0xff] }
 0x42e   : > { %v3780_v62 = vadd.f32 %v3724_v23, %v14061_v50 }
 0x42f   : > { %v4480_v11 = vpop.f32.mrf.mxu2  ;;  %v3982_v0 = vpop.f32.mrf.mxu0 }
 0x430   : > { %v12418_v3 = vadd.f32 %v4480_v11, %v3780_v62  ;;  %v12421_v59 = vadd.f32 %v3982_v0, %v14062_v15  ;;  %v4232_v22 = vpop.f32.mrf.mxu1  ;;  %v14066_v11 = vld [vmem:[#allocation53_spill] sm:$0xff] }
 0x431   : > { %v12424_v55 = vadd.f32 %v4232_v22, %v14064_v13  ;;  %v10583_v13 = vld [vmem:[%s11109_s14 + $0x10] sm:$0xff] }
 0x432   : > { %14063 = vst [vmem:[#allocation129_spill] sm:$0xff] %v12421_v59  ;;  %v12451_v59 = vld [vmem:[%s11116_s13 + $0x8] sm:$0xff] }
 0x435   : > { %v3726_v9 = vpop.f32.mrf.mxu3 }
 0x436   : > { %v3781_v36 = vadd.f32 %v3726_v9, %v14065_v5 }
 0x437   : > { %v4482_v23 = vpop.f32.mrf.mxu2  ;;  %v3985_v50 = vpop.f32.mrf.mxu0 }
 0x438   : > { %v12430_v62 = vadd.f32 %v4482_v23, %v3781_v36  ;;  %v12433_v0 = vadd.f32 %v3985_v50, %v14066_v11  ;;  %v4235_v15 = vpop.f32.mrf.mxu1 }
 0x439   : > { %v12436_v22 = vadd.f32 %v4235_v15, %v12063_v26 }
 0x43a   : > { %14067 = vst [vmem:[#allocation84_spill] sm:$0xff] %v12433_v0  ;;  %4694 = vmatmul.bf16.gmra.mxu3 %v10583_v13  ;;  %4944 = vmatmul.bf16.gmra.mxu0 %v10583_v13 }
 0x43b   : > { %14068 = vst [vmem:[#allocation128_spill] sm:$0xff] %v12436_v22  ;;  %5194 = vmatmul.bf16.gmra.mxu1 %v10583_v13 }
 0x43c   : > { %5565 = vmatmul.bf16.gmra.mxu2 %v12428_v53 }
 0x43d   : > { %v3729_v16 = vpop.f32.mrf.mxu3 }
 0x43e   : > { %v3782_v9 = vadd.f32 %v3729_v16, %v14069_v47 }
 0x43f   : > { %v4485_v36 = vpop.f32.mrf.mxu2  ;;  %v3987_v5 = vpop.f32.mrf.mxu0 }
 0x440   : > { %v12441_v23 = vadd.f32 %v4485_v36, %v3782_v9  ;;  %v12444_v50 = vadd.f32 %v3987_v5, %v12068_v57  ;;  %v4237_v26 = vpop.f32.mrf.mxu1  ;;  %v10584_v36 = vld [vmem:[%s11109_s14 + $0x18] sm:$0xff] }
 0x441   : > { %v12447_v11 = vadd.f32 %v4237_v26, %v12074_v58  ;;  %v10314_v58 = vld [vmem:[#allocation14 + $0x128] sm:$0xff] }
 0x442   : > { %14070 = vst [vmem:[#allocation89_spill] sm:$0xff] %v12444_v50  ;;  %6560 = vmatpush.bf16.msrb.mxu2 %v10314_v58  ;;  %v10306_v50 = vld [vmem:[#allocation14 + $0xe8] sm:$0xff] }
 0x443   : > { %14071 = vst [vmem:[#allocation131_spill] sm:$0xff] %v12447_v11  ;;  %6310 = vmatpush.bf16.msrb.mxu1 %v10306_v50  ;;  %v14079_v58 = vld [vmem:[#allocation108_spill] sm:$0xff]  ;;  %v12474_v11 = vld [vmem:[%s11116_s13 + $0x10] sm:$0xff] }
 0x445   : > { %v3731_v15 = vpop.f32.mrf.mxu3 }
 0x446   : > { %v3783_v13 = vadd.f32 %v3731_v15, %v12065_v2  ;;  %v10290_v2 = vld [vmem:[#allocation14 + $0x68] sm:$0xff] }
 0x447   : > { %v4487_v0 = vpop.f32.mrf.mxu2  ;;  %v3990_v22 = vpop.f32.mrf.mxu0  ;;  %5804 = vmatpush.bf16.msrb.mxu3 %v10290_v2 }
 0x448   : > { %v12453_v16 = vadd.f32 %v4487_v0, %v3783_v13  ;;  %v12456_v47 = vadd.f32 %v3990_v22, %v12079_v51  ;;  %v4240_v9 = vpop.f32.mrf.mxu1  ;;  %v14075_v0 = vld [vmem:[#allocation106_spill] sm:$0xff] }
 0x449   : > { %v12459_v57 = vadd.f32 %v4240_v9, %v12089_v17  ;;  %v14076_v17 = vld [vmem:[#allocation51_spill] sm:$0xff] }
 0x44a   : > { %14072 = vst [vmem:[#allocation133_spill] sm:$0xff] %v12453_v16  ;;  %4699 = vmatmul.bf16.gmra.mxu3 %v10584_v36  ;;  %4949 = vmatmul.bf16.gmra.mxu0 %v10584_v36 }
 0x44b   : > { %14073 = vst [vmem:[#allocation87_spill] sm:$0xff] %v12456_v47  ;;  %5199 = vmatmul.bf16.gmra.mxu1 %v10584_v36  ;;  %v14078_v36 = vld [vmem:[#allocation105_spill] sm:$0xff] }
 0x44c   : > { %14074 = vst [vmem:[#allocation130_spill] sm:$0xff] %v12459_v57  ;;  %5570 = vmatmul.bf16.gmra.mxu2 %v12451_v59  ;;  %v10298_v57 = vld [vmem:[#allocation14 + $0xa8] sm:$0xff] }
 0x44d   : > { %v3734_v5 = vpop.f32.mrf.mxu3  ;;  %6054 = vmatpush.bf16.msrb.mxu0 %v10298_v57  ;;  %v14083_v57 = vld [vmem:[#allocation56_spill] sm:$0xff] }
 0x44e   : > { %v3784_v26 = vadd.f32 %v3734_v5, %v14075_v0 }
 0x44f   : > { %v4490_v51 = vpop.f32.mrf.mxu2  ;;  %v3992_v22 = vpop.f32.mrf.mxu0 }
 0x450   : > { %v12464_v15 = vadd.f32 %v4490_v51, %v3784_v26  ;;  %v12467_v13 = vadd.f32 %v3992_v22, %v14076_v17  ;;  %v4242_v9 = vpop.f32.mrf.mxu1  ;;  %v14080_v51 = vld [vmem:[#allocation109_spill] sm:$0xff] }
 0x451   : > { %v12470_v47 = vadd.f32 %v4242_v9, %v14078_v36  ;;  %v10585_v36 = vld [vmem:[%s11109_s14 + $0x20] sm:$0xff] }
 0x452   : > { %14077 = vst [vmem:[#allocation67_spill] sm:$0xff] %v12467_v13  ;;  %v12497_v13 = vld [vmem:[%s11116_s13 + $0x18] sm:$0xff] }
 0x455   : > { %v3736_v2 = vpop.f32.mrf.mxu3 }
 0x456   : > { %v3785_v16 = vadd.f32 %v3736_v2, %v14079_v58 }
 0x457   : > { %v4492_v5 = vpop.f32.mrf.mxu2  ;;  %v3995_v0 = vpop.f32.mrf.mxu0 }
 0x458   : > { %v12476_v26 = vadd.f32 %v4492_v5, %v3785_v16  ;;  %v12479_v22 = vadd.f32 %v3995_v0, %v14080_v51  ;;  %v4245_v17 = vpop.f32.mrf.mxu1 }
 0x459   : > { %v12482_v9 = vadd.f32 %v4245_v17, %v12115_v27 }
 0x45a   : > { %14081 = vst [vmem:[#allocation134_spill] sm:$0xff] %v12479_v22  ;;  %4704 = vmatmul.bf16.gmra.mxu3 %v10585_v36  ;;  %4954 = vmatmul.bf16.gmra.mxu0 %v10585_v36 }
 0x45b   : > { %14082 = vst [vmem:[#allocation43_spill] sm:$0xff] %v12482_v9  ;;  %5204 = vmatmul.bf16.gmra.mxu1 %v10585_v36 }
 0x45c   : > { %5575 = vmatmul.bf16.gmra.mxu2 %v12474_v11 }
 0x45d   : > { %v3739_v50 = vpop.f32.mrf.mxu3 }
 0x45e   : > { %v3786_v2 = vadd.f32 %v3739_v50, %v14083_v57 }
 0x45f   : > { %v4495_v16 = vpop.f32.mrf.mxu2  ;;  %v3997_v58 = vpop.f32.mrf.mxu0 }
 0x460   : > { %v12487_v5 = vadd.f32 %v4495_v16, %v3786_v2  ;;  %v12490_v0 = vadd.f32 %v3997_v58, %v12120_v46  ;;  %v4247_v27 = vpop.f32.mrf.mxu1  ;;  %v10586_v16 = vld [vmem:[%s11109_s14 + $0x28] sm:$0xff] }
 0x461   : > { %v12493_v51 = vadd.f32 %v4247_v27, %v12126_v43  ;;  %v10313_v43 = vld [vmem:[#allocation14 + $0x120] sm:$0xff] }
 0x462   : > { %14084 = vst [vmem:[#allocation132_spill] sm:$0xff] %v12490_v0  ;;  %6561 = vmatpush.bf16.msrb.mxu2 %v10313_v43  ;;  %v10305_v0 = vld [vmem:[#allocation14 + $0xe0] sm:$0xff] }
 0x463   : > { %14085 = vst [vmem:[#allocation70_spill] sm:$0xff] %v12493_v51  ;;  %6311 = vmatpush.bf16.msrb.mxu1 %v10305_v0  ;;  %v14093_v43 = vld [vmem:[#allocation107_spill] sm:$0xff] }
 0x464   : > { %v12520_v51 = vld [vmem:[%s11116_s13 + $0x20] sm:$0xff] }
 0x465   : > { %v3741_v17 = vpop.f32.mrf.mxu3 }
 0x466   : > { %v3787_v36 = vadd.f32 %v3741_v17, %v12117_v21  ;;  %v10289_v21 = vld [vmem:[#allocation14 + $0x60] sm:$0xff] }
 0x467   : > { %v4497_v22 = vpop.f32.mrf.mxu2  ;;  %v4000_v9 = vpop.f32.mrf.mxu0  ;;  %5805 = vmatpush.bf16.msrb.mxu3 %v10289_v21 }
 0x468   : > { %v12499_v50 = vadd.f32 %v4497_v22, %v3787_v36  ;;  %v12502_v57 = vadd.f32 %v4000_v9, %v12131_v52  ;;  %v4250_v2 = vpop.f32.mrf.mxu1  ;;  %v14089_v22 = vld [vmem:[#allocation54_spill] sm:$0xff] }
 0x469   : > { %v12505_v46 = vadd.f32 %v4250_v2, %v12141_v32  ;;  %v14090_v32 = vld [vmem:[#allocation59_spill] sm:$0xff] }
 0x46a   : > { %14086 = vst [vmem:[#allocation46_spill] sm:$0xff] %v12499_v50  ;;  %4709 = vmatmul.bf16.gmra.mxu3 %v10586_v16  ;;  %4959 = vmatmul.bf16.gmra.mxu0 %v10586_v16 }
 0x46b   : > { %14087 = vst [vmem:[#allocation135_spill] sm:$0xff] %v12502_v57  ;;  %5209 = vmatmul.bf16.gmra.mxu1 %v10586_v16  ;;  %v14092_v16 = vld [vmem:[#allocation113_spill] sm:$0xff] }
 0x46c   : > { %14088 = vst [vmem:[#allocation73_spill] sm:$0xff] %v12505_v46  ;;  %5580 = vmatmul.bf16.gmra.mxu2 %v12497_v13  ;;  %v10297_v46 = vld [vmem:[#allocation14 + $0xa0] sm:$0xff] }
 0x46d   : > { %v3744_v58 = vpop.f32.mrf.mxu3  ;;  %6055 = vmatpush.bf16.msrb.mxu0 %v10297_v46  ;;  %v14097_v46 = vld [vmem:[#allocation57_spill] sm:$0xff] }
 0x46e   : > { %v3788_v27 = vadd.f32 %v3744_v58, %v14089_v22 }
 0x46f   : > { %v4500_v52 = vpop.f32.mrf.mxu2  ;;  %v4002_v9 = vpop.f32.mrf.mxu0 }
 0x470   : > { %v12510_v17 = vadd.f32 %v4500_v52, %v3788_v27  ;;  %v12513_v36 = vadd.f32 %v4002_v9, %v14090_v32  ;;  %v4252_v2 = vpop.f32.mrf.mxu1  ;;  %v14094_v52 = vld [vmem:[#allocation110_spill] sm:$0xff] }
 0x471   : > { %v12516_v57 = vadd.f32 %v4252_v2, %v14092_v16  ;;  %v10587_v16 = vld [vmem:[%s11109_s14 + $0x30] sm:$0xff] }
 0x472   : > { %14091 = vst [vmem:[#allocation137_spill] sm:$0xff] %v12513_v36  ;;  %v12543_v36 = vld [vmem:[%s11116_s13 + $0x28] sm:$0xff] }
 0x475   : > { %v3746_v21 = vpop.f32.mrf.mxu3 }
 0x476   : > { %v3789_v50 = vadd.f32 %v3746_v21, %v14093_v43 }
 0x477   : > { %v4502_v58 = vpop.f32.mrf.mxu2  ;;  %v4005_v22 = vpop.f32.mrf.mxu0 }
 0x478   : > { %v12522_v27 = vadd.f32 %v4502_v58, %v3789_v50  ;;  %v12525_v9 = vadd.f32 %v4005_v22, %v14094_v52  ;;  %v4255_v32 = vpop.f32.mrf.mxu1 }
 0x479   : > { %v12528_v2 = vadd.f32 %v4255_v32, %v12167_v29 }
 0x47a   : > { %14095 = vst [vmem:[#allocation49_spill] sm:$0xff] %v12525_v9  ;;  %4714 = vmatmul.bf16.gmra.mxu3 %v10587_v16  ;;  %4964 = vmatmul.bf16.gmra.mxu0 %v10587_v16 }
 0x47b   : > { %14096 = vst [vmem:[#allocation136_spill] sm:$0xff] %v12528_v2  ;;  %5214 = vmatmul.bf16.gmra.mxu1 %v10587_v16 }
 0x47c   : > { %5585 = vmatmul.bf16.gmra.mxu2 %v12520_v51 }
 0x47d   : > { %v3749_v0 = vpop.f32.mrf.mxu3 }
 0x47e   : > { %v3790_v21 = vadd.f32 %v3749_v0, %v14097_v46 }
 0x47f   : > { %v4505_v50 = vpop.f32.mrf.mxu2  ;;  %v4007_v43 = vpop.f32.mrf.mxu0 }
 0x480   : > { %v12533_v58 = vadd.f32 %v4505_v50, %v3790_v21  ;;  %v12536_v22 = vadd.f32 %v4007_v43, %v12172_v1  ;;  %v4257_v29 = vpop.f32.mrf.mxu1  ;;  %v10588_v50 = vld [vmem:[%s11109_s14 + $0x38] sm:$0xff] }
 0x481   : > { %v12539_v52 = vadd.f32 %v4257_v29, %v12178_v45  ;;  %v10312_v45 = vld [vmem:[#allocation14 + $0x118] sm:$0xff] }
 0x482   : > { %6562 = vmatpush.bf16.msrb.mxu2 %v10312_v45  ;;  %v14101_v45 = vld [vmem:[#allocation62_spill] sm:$0xff] }
 0x485   : > { %v3751_v32 = vpop.f32.mrf.mxu3 }
 0x486   : > { %v3791_v16 = vadd.f32 %v3751_v32, %v12169_v18  ;;  %v10288_v18 = vld [vmem:[#allocation14 + $0x58] sm:$0xff] }
 0x487   : > { %v4507_v9 = vpop.f32.mrf.mxu2  ;;  %v4010_v2 = vpop.f32.mrf.mxu0  ;;  %5806 = vmatpush.bf16.msrb.mxu3 %v10288_v18 }
 0x488   : > { %v12545_v0 = vadd.f32 %v4507_v9, %v3791_v16  ;;  %v12548_v46 = vadd.f32 %v4010_v2, %v12183_v30  ;;  %v4260_v21 = vpop.f32.mrf.mxu1 }
 0x489   : > { %v12551_v1 = vadd.f32 %v4260_v21, %v12193_v54  ;;  %v10296_v21 = vld [vmem:[#allocation14 + $0x98] sm:$0xff] }
 0x48a   : > { %14098 = vst [vmem:[#allocation76_spill] sm:$0xff] %v12548_v46  ;;  %4719 = vmatmul.bf16.gmra.mxu3 %v10588_v50  ;;  %4969 = vmatmul.bf16.gmra.mxu0 %v10588_v50 }
 0x48b   : > { %14099 = vst [vmem:[#allocation139_spill] sm:$0xff] %v12551_v1  ;;  %5219 = vmatmul.bf16.gmra.mxu1 %v10588_v50  ;;  %v10304_v50 = vld [vmem:[#allocation14 + $0xd8] sm:$0xff]  ;;  %6056 = vmatpush.bf16.msrb.mxu0 %v10296_v21  ;;  %v12566_v1 = vld [vmem:[%s11116_s13 + $0x30] sm:$0xff] }
 0x48c   : > { %5590 = vmatmul.bf16.gmra.mxu2 %v12543_v36  ;;  %6312 = vmatpush.bf16.msrb.mxu1 %v10304_v50  ;;  %v14106_v50 = vld [vmem:[#allocation114_spill] sm:$0xff] }
 0x48d   : > { %v3754_v43 = vpop.f32.mrf.mxu3 }
 0x48e   : > { %v3792_v9 = vadd.f32 %v3754_v43, %v12180_v61 }
 0x48f   : > { %v4510_v30 = vpop.f32.mrf.mxu2  ;;  %v4012_v2 = vpop.f32.mrf.mxu0 }
 0x490   : > { %v12556_v29 = vadd.f32 %v4510_v30, %v3792_v9  ;;  %v12559_v54 = vadd.f32 %v4012_v2, %v12198_v34  ;;  %v4262_v32 = vpop.f32.mrf.mxu1  ;;  %v14103_v34 = vld [vmem:[#allocation60_spill] sm:$0xff] }
 0x491   : > { %v12562_v16 = vadd.f32 %v4262_v32, %v12204_v33  ;;  %v10589_v32 = vld [vmem:[%s11109_s14 + $0x40] sm:$0xff] }
 0x492   : > { %14100 = vst [vmem:[#allocation141_spill] sm:$0xff] %v12559_v54  ;;  %v12589_v54 = vld [vmem:[%s11116_s13 + $0x38] sm:$0xff] }
 0x495   : > { %v3756_v18 = vpop.f32.mrf.mxu3 }
 0x496   : > { %v3793_v46 = vadd.f32 %v3756_v18, %v14101_v45 }
 0x497   : > { %v4512_v61 = vpop.f32.mrf.mxu2  ;;  %v4015_v43 = vpop.f32.mrf.mxu0 }
 0x498   : > { %v12568_v9 = vadd.f32 %v4512_v61, %v3793_v46  ;;  %v12571_v30 = vadd.f32 %v4015_v43, %v14103_v34  ;;  %v4265_v2 = vpop.f32.mrf.mxu1 }
 0x499   : > { %v12574_v33 = vadd.f32 %v4265_v2, %v12219_v7 }
 0x49a   : > { %14102 = vst [vmem:[#allocation52_spill] sm:$0xff] %v12568_v9  ;;  %4724 = vmatmul.bf16.gmra.mxu3 %v10589_v32  ;;  %4974 = vmatmul.bf16.gmra.mxu0 %v10589_v32 }
 0x49b   : > { %14104 = vst [vmem:[#allocation138_spill] sm:$0xff] %v12571_v30  ;;  %5224 = vmatmul.bf16.gmra.mxu1 %v10589_v32 }
 0x49c   : > { %14105 = vst [vmem:[#allocation79_spill] sm:$0xff] %v12574_v33  ;;  %5595 = vmatmul.bf16.gmra.mxu2 %v12566_v1 }
 0x49d   : > { %v3759_v21 = vpop.f32.mrf.mxu3 }
 0x49e   : > { %v3794_v18 = vadd.f32 %v3759_v21, %v14106_v50  ;;  %v14107_v50 = vld [vmem:[#allocation65_spill] sm:$0xff] }
 0x49f   : > { %v4515_v46 = vpop.f32.mrf.mxu2  ;;  %v4017_v45 = vpop.f32.mrf.mxu0 }
 0x4a0   : > { %v12579_v61 = vadd.f32 %v4515_v46, %v3794_v18  ;;  %v12582_v43 = vadd.f32 %v4017_v45, %v12224_v4  ;;  %v4267_v7 = vpop.f32.mrf.mxu1  ;;  %v10590_v46 = vld [vmem:[%s11109_s14 + $0x48] sm:$0xff] }
 0x4a1   : > { %v12585_v34 = vadd.f32 %v4267_v7, %v12228_v49  ;;  %v10287_v49 = vld [vmem:[#allocation14 + $0x50] sm:$0xff] }
 0x4a2   : > { %5807 = vmatpush.bf16.msrb.mxu3 %v10287_v49 }
 0x4a5   : > { %v3761_v2 = vpop.f32.mrf.mxu3 }
 0x4a6   : > { %v3795_v32 = vadd.f32 %v3761_v2, %v12221_v42  ;;  %v10311_v42 = vld [vmem:[#allocation14 + $0x110] sm:$0xff] }
 0x4a7   : > { %v4517_v30 = vpop.f32.mrf.mxu2  ;;  %v4940_v33 = vpop.f32.mrf.mxu0  ;;  %6563 = vmatpush.bf16.msrb.mxu2 %v10311_v42 }
 0x4a8   : > { %v12591_v21 = vadd.f32 %v4517_v30, %v3795_v32  ;;  %v12594_v9 = vadd.f32 %v4940_v33, %v14107_v50  ;;  %v5190_v18 = vpop.f32.mrf.mxu1  ;;  %v14110_v30 = vld [vmem:[#allocation111_spill] sm:$0xff] }
 0x4a9   : > { %v12597_v4 = vadd.f32 %v5190_v18, %v12241_v40 }
 0x4aa   : > { %14108 = vst [vmem:[#allocation142_spill] sm:$0xff] %v12594_v9  ;;  %4729 = vmatmul.bf16.gmra.mxu3 %v10590_v46  ;;  %4979 = vmatmul.bf16.gmra.mxu0 %v10590_v46  ;;  %v10303_v9 = vld [vmem:[#allocation14 + $0xd0] sm:$0xff] }
 0x4ab   : > { %14109 = vst [vmem:[#allocation55_spill] sm:$0xff] %v12597_v4  ;;  %5229 = vmatmul.bf16.gmra.mxu1 %v10590_v46  ;;  %v10295_v46 = vld [vmem:[#allocation14 + $0x90] sm:$0xff]  ;;  %v12612_v4 = vld [vmem:[%s11116_s13 + $0x40] sm:$0xff] }
 0x4ac   : > { %5600 = vmatmul.bf16.gmra.mxu2 %v12589_v54  ;;  %6057 = vmatpush.bf16.msrb.mxu0 %v10295_v46  ;;  %14113 = vst [vmem:[#allocation58_spill] sm:$0xff] %v12612_v4 }
 0x4ad   : > { %v4690_v45 = vpop.f32.mrf.mxu3  ;;  %6313 = vmatpush.bf16.msrb.mxu1 %v10303_v9  ;;  %v14117_v9 = vld [vmem:[#allocation117_spill] sm:$0xff] }
 0x4ae   : > { %v4770_v7 = vadd.f32 %v4690_v45, %v14110_v30 }
 0x4af   : > { %v5561_v33 = vpop.f32.mrf.mxu2  ;;  %v4942_v2 = vpop.f32.mrf.mxu0 }
 0x4b0   : > { %v12602_v32 = vadd.f32 %v5561_v33, %v4770_v7  ;;  %v12605_v40 = vadd.f32 %v4942_v2, %v12247_v31  ;;  %v5192_v50 = vpop.f32.mrf.mxu1  ;;  %v10591_v2 = vld [vmem:[%s11109_s14 + $0x50] sm:$0xff] }
 0x4b1   : > { %v12608_v18 = vadd.f32 %v5192_v50, %v12250_v60 }
 0x4b2   : > { %14111 = vst [vmem:[#allocation140_spill] sm:$0xff] %v12605_v40 }
 0x4b3   : > { %14112 = vst [vmem:[#allocation82_spill] sm:$0xff] %v12608_v18  ;;  %v12635_v18 = vld [vmem:[%s11116_s13 + $0x48] sm:$0xff] }
 0x4b5   : > { %v4692_v49 = vpop.f32.mrf.mxu3 }
 0x4b6   : > { %v4771_v42 = vadd.f32 %v4692_v49, %v12244_v41 }
 0x4b7   : > { %v5563_v45 = vpop.f32.mrf.mxu2  ;;  %v4945_v30 = vpop.f32.mrf.mxu0 }
 0x4b8   : > { %v12614_v7 = vadd.f32 %v5563_v45, %v4771_v42  ;;  %v12617_v31 = vadd.f32 %v4945_v30, %v12256_v28  ;;  %v5195_v33 = vpop.f32.mrf.mxu1  ;;  %v14118_v28 = vld [vmem:[#allocation115_spill] sm:$0xff]  ;;  %v14120_v30 = vld [vmem:[#allocation68_spill] sm:$0xff] }
 0x4b9   : > { %v12620_v60 = vadd.f32 %v5195_v33, %v12263_v12 }
 0x4ba   : > { %14114 = vst [vmem:[#allocation143_spill] sm:$0xff] %v12614_v7  ;;  %4734 = vmatmul.bf16.gmra.mxu3 %v10591_v2  ;;  %4984 = vmatmul.bf16.gmra.mxu0 %v10591_v2 }
 0x4bb   : > { %14115 = vst [vmem:[#allocation85_spill] sm:$0xff] %v12617_v31  ;;  %5234 = vmatmul.bf16.gmra.mxu1 %v10591_v2 }
 0x4bc   : > { %14116 = vst [vmem:[#allocation145_spill] sm:$0xff] %v12620_v60  ;;  %5605 = vmatmul.bf16.gmra.mxu2 %v12612_v4  ;;  %v14121_v60 = vld [vmem:[#allocation63_spill] sm:$0xff] }
 0x4bd   : > { %v4695_v41 = vpop.f32.mrf.mxu3 }
 0x4be   : > { %v4772_v50 = vadd.f32 %v4695_v41, %v14117_v9  ;;  %v14122_v9 = vld [vmem:[#allocation66_spill] sm:$0xff] }
 0x4bf   : > { %v5566_v46 = vpop.f32.mrf.mxu2  ;;  %v4947_v49 = vpop.f32.mrf.mxu0 }
 0x4c0   : > { %v12625_v42 = vadd.f32 %v5566_v46, %v4772_v50  ;;  %v12628_v45 = vadd.f32 %v4947_v49, %v14118_v28  ;;  %v5197_v12 = vpop.f32.mrf.mxu1  ;;  %v10592_v49 = vld [vmem:[%s11109_s14 + $0x58] sm:$0xff] }
 0x4c1   : > { %v12631_v33 = vadd.f32 %v5197_v12, %v14120_v30 }
 0x4c2   : > { %14119 = vst [vmem:[#allocation61_spill] sm:$0xff] %v12628_v45  ;;  %v12658_v45 = vld [vmem:[%s11116_s13 + $0x50] sm:$0xff] }
 0x4c3   : > { %14130 = vst [vmem:[#allocation27_spill] sm:$0xff] %v12658_v45 }
 0x4c5   : > { %v4697_v31 = vpop.f32.mrf.mxu3 }
 0x4c6   : > { %v4773_v2 = vadd.f32 %v4697_v31, %v14121_v60  ;;  %v10286_v31 = vld [vmem:[#allocation14 + $0x48] sm:$0xff] }
 0x4c7   : > { %v5568_v40 = vpop.f32.mrf.mxu2  ;;  %v4950_v7 = vpop.f32.mrf.mxu0  ;;  %v10310_v60 = vld [vmem:[#allocation14 + $0x108] sm:$0xff]  ;;  %5808 = vmatpush.bf16.msrb.mxu3 %v10286_v31 }
 0x4c8   : > { %v12637_v41 = vadd.f32 %v5568_v40, %v4773_v2  ;;  %v12640_v4 = vadd.f32 %v4950_v7, %v14122_v9  ;;  %v5200_v50 = vpop.f32.mrf.mxu1  ;;  %6564 = vmatpush.bf16.msrb.mxu2 %v10310_v60  ;;  %v14125_v40 = vld [vmem:[#allocation118_spill] sm:$0xff]  ;;  %v14129_v60 = vld [vmem:[#allocation116_spill] sm:$0xff] }
 0x4c9   : > { %v12643_v46 = vadd.f32 %v5200_v50, %v12285_v37 }
 0x4ca   : > { %14123 = vst [vmem:[#allocation144_spill] sm:$0xff] %v12640_v4  ;;  %4739 = vmatmul.bf16.gmra.mxu3 %v10592_v49  ;;  %4989 = vmatmul.bf16.gmra.mxu0 %v10592_v49  ;;  %v10302_v4 = vld [vmem:[#allocation14 + $0xc8] sm:$0xff] }
 0x4cb   : > { %14124 = vst [vmem:[#allocation88_spill] sm:$0xff] %v12643_v46  ;;  %5239 = vmatmul.bf16.gmra.mxu1 %v10592_v49  ;;  %v10294_v49 = vld [vmem:[#allocation14 + $0x88] sm:$0xff] }
 0x4cc   : > { %5610 = vmatmul.bf16.gmra.mxu2 %v12635_v18  ;;  %6058 = vmatpush.bf16.msrb.mxu0 %v10294_v49  ;;  %v14135_v49 = vld [vmem:[#allocation71_spill] sm:$0xff] }
 0x4cd   : > { %v4700_v28 = vpop.f32.mrf.mxu3  ;;  %6314 = vmatpush.bf16.msrb.mxu1 %v10302_v4 }
 0x4ce   : > { %v4774_v12 = vadd.f32 %v4700_v28, %v14125_v40 }
 0x4cf   : > { %v5571_v7 = vpop.f32.mrf.mxu2  ;;  %v4952_v30 = vpop.f32.mrf.mxu0 }
 0x4d0   : > { %v12648_v2 = vadd.f32 %v5571_v7, %v4774_v12  ;;  %v12651_v37 = vadd.f32 %v4952_v30, %v12291_v48  ;;  %v5202_v9 = vpop.f32.mrf.mxu1  ;;  %v14132_v48 = vld [vmem:[#allocation69_spill] sm:$0xff] }
 0x4d1   : > { %v12654_v50 = vadd.f32 %v5202_v9, %v12294_v38  ;;  %v10593_v9 = vld [vmem:[%s11109_s14 + $0x60] sm:$0xff] }
 0x4d2   : > { %14126 = vst [vmem:[#allocation64_spill] sm:$0xff] %v12648_v2 }
 0x4d3   : > { %14127 = vst [vmem:[#allocation147_spill] sm:$0xff] %v12651_v37  ;;  %v14138_v37 = vld [vmem:[#allocation119_spill] sm:$0xff] }
 0x4d4   : > { %14128 = vst [vmem:[#allocation28_spill] sm:$0xff] %v12654_v50 }
 0x4d5   : > { %v4702_v31 = vpop.f32.mrf.mxu3 }
 0x4d6   : > { %v4775_v46 = vadd.f32 %v4702_v31, %v14129_v60 }
 0x4d7   : > { %v5573_v28 = vpop.f32.mrf.mxu2  ;;  %v4955_v40 = vpop.f32.mrf.mxu0 }
 0x4d8   : > { %v12660_v12 = vadd.f32 %v5573_v28, %v4775_v46  ;;  %v12663_v7 = vadd.f32 %v4955_v40, %v14132_v48  ;;  %v5205_v30 = vpop.f32.mrf.mxu1  ;;  %v14136_v40 = vld [vmem:[#allocation74_spill] sm:$0xff] }
 0x4d9   : > { %v12666_v38 = vadd.f32 %v5205_v30, %v12307_v44  ;;  %v14137_v30 = vld [vmem:[#allocation121_spill] sm:$0xff] }
 0x4da   : > { %14131 = vst [vmem:[#allocation146_spill] sm:$0xff] %v12660_v12  ;;  %4744 = vmatmul.bf16.gmra.mxu3 %v10593_v9  ;;  %4994 = vmatmul.bf16.gmra.mxu0 %v10593_v9 }
 0x4db   : > { %14133 = vst [vmem:[#allocation149_spill] sm:$0xff] %v12663_v7  ;;  %5244 = vmatmul.bf16.gmra.mxu1 %v10593_v9 }
 0x4dc   : > { %14134 = vst [vmem:[#allocation30_spill] sm:$0xff] %v12666_v38  ;;  %5615 = vmatmul.bf16.gmra.mxu2 %v12658_v45  ;;  %v12681_v45 = vld [vmem:[%s11116_s13 + $0x58] sm:$0xff] }
 0x4dd   : > { %v4705_v4 = vpop.f32.mrf.mxu3 }
 0x4de   : > { %v4776_v31 = vadd.f32 %v4705_v4, %v14135_v49  ;;  %v14139_v49 = vld [vmem:[#allocation120_spill] sm:$0xff] }
 0x4df   : > { %v5576_v46 = vpop.f32.mrf.mxu2  ;;  %v4957_v60 = vpop.f32.mrf.mxu0 }
 0x4e0   : > { %v12671_v28 = vadd.f32 %v5576_v46, %v4776_v31  ;;  %v12674_v48 = vadd.f32 %v4957_v60, %v14136_v40  ;;  %v5207_v44 = vpop.f32.mrf.mxu1  ;;  %v10594_v60 = vld [vmem:[%s11109_s14 + $0x68] sm:$0xff] }
 0x4e1   : > { %v12677_v7 = vadd.f32 %v5207_v44, %v14137_v30 }
 0x4e5   : > { %v4707_v38 = vpop.f32.mrf.mxu3 }
 0x4e6   : > { %v4777_v9 = vadd.f32 %v4707_v38, %v14138_v37  ;;  %v10285_v37 = vld [vmem:[#allocation14 + $0x40] sm:$0xff] }
 0x4e7   : > { %v5578_v12 = vpop.f32.mrf.mxu2  ;;  %v4960_v50 = vpop.f32.mrf.mxu0  ;;  %v10309_v38 = vld [vmem:[#allocation14 + $0x100] sm:$0xff]  ;;  %5809 = vmatpush.bf16.msrb.mxu3 %v10285_v37 }
 0x4e8   : > { %v12683_v4 = vadd.f32 %v5578_v12, %v4777_v9  ;;  %v12686_v2 = vadd.f32 %v4960_v50, %v14139_v49  ;;  %v5210_v31 = vpop.f32.mrf.mxu1  ;;  %6565 = vmatpush.bf16.msrb.mxu2 %v10309_v38  ;;  %v14142_v12 = vld [vmem:[#allocation72_spill] sm:$0xff] }
 0x4e9   : > { %v12689_v46 = vadd.f32 %v5210_v31, %v12329_v14 }
 0x4ea   : > { %14140 = vst [vmem:[#allocation148_spill] sm:$0xff] %v12686_v2  ;;  %4749 = vmatmul.bf16.gmra.mxu3 %v10594_v60  ;;  %4999 = vmatmul.bf16.gmra.mxu0 %v10594_v60  ;;  %v10301_v2 = vld [vmem:[#allocation14 + $0xc0] sm:$0xff] }
 0x4eb   : > { %14141 = vst [vmem:[#allocation150_spill] sm:$0xff] %v12689_v46  ;;  %5249 = vmatmul.bf16.gmra.mxu1 %v10594_v60  ;;  %v10293_v60 = vld [vmem:[#allocation14 + $0x80] sm:$0xff] }
 0x4ec   : > { %5620 = vmatmul.bf16.gmra.mxu2 %v12681_v45  ;;  %6059 = vmatpush.bf16.msrb.mxu0 %v10293_v60  ;;  %v12704_v46 = vld [vmem:[%s11116_s13 + $0x60] sm:$0xff] }
 0x4ed   : > { %v4710_v40 = vpop.f32.mrf.mxu3  ;;  %6315 = vmatpush.bf16.msrb.mxu1 %v10301_v2  ;;  %14145 = vst [vmem:[#allocation93_spill] sm:$0xff] %v12704_v46  ;;  %v14150_v2 = vld [vmem:[#allocation77_spill] sm:$0xff] }
 0x4ee   : > { %v4778_v44 = vadd.f32 %v4710_v40, %v14142_v12 }
 0x4ef   : > { %v5581_v50 = vpop.f32.mrf.mxu2  ;;  %v4962_v30 = vpop.f32.mrf.mxu0 }
 0x4f0   : > { %v12694_v9 = vadd.f32 %v5581_v50, %v4778_v44  ;;  %v12697_v14 = vadd.f32 %v4962_v30, %v12335_v10  ;;  %v5212_v49 = vpop.f32.mrf.mxu1  ;;  %v14147_v10 = vld [vmem:[#allocation123_spill] sm:$0xff] }
 0x4f1   : > { %v12700_v31 = vadd.f32 %v5212_v49, %v12338_v39  ;;  %v10595_v49 = vld [vmem:[%s11109_s14 + $0x70] sm:$0xff] }
 0x4f2   : > { %14143 = vst [vmem:[#allocation91_spill] sm:$0xff] %v12697_v14 }
 0x4f3   : > { %14144 = vst [vmem:[#allocation29_spill] sm:$0xff] %v12700_v31  ;;  %v12727_v31 = vld [vmem:[%s11116_s13 + $0x68] sm:$0xff] }
 0x4f5   : > { %v4712_v37 = vpop.f32.mrf.mxu3 }
 0x4f6   : > { %v4779_v38 = vadd.f32 %v4712_v37, %v12332_v20 }
 0x4f7   : > { %v5583_v40 = vpop.f32.mrf.mxu2  ;;  %v4965_v12 = vpop.f32.mrf.mxu0 }
 0x4f8   : > { %v12706_v44 = vadd.f32 %v5583_v40, %v4779_v38  ;;  %v12709_v50 = vadd.f32 %v4965_v12, %v14147_v10  ;;  %v5215_v30 = vpop.f32.mrf.mxu1 }
 0x4f9   : > { %v12712_v39 = vadd.f32 %v5215_v30, %v12351_v19  ;;  %v14151_v19 = vld [vmem:[#allocation75_spill] sm:$0xff] }
 0x4fa   : > { %14146 = vst [vmem:[#allocation37_spill] sm:$0xff] %v12706_v44  ;;  %4754 = vmatmul.bf16.gmra.mxu3 %v10595_v49  ;;  %5004 = vmatmul.bf16.gmra.mxu0 %v10595_v49 }
 0x4fb   : > { %14148 = vst [vmem:[#allocation32_spill] sm:$0xff] %v12709_v50  ;;  %5254 = vmatmul.bf16.gmra.mxu1 %v10595_v49 }
 0x4fc   : > { %14149 = vst [vmem:[#allocation95_spill] sm:$0xff] %v12712_v39  ;;  %5625 = vmatmul.bf16.gmra.mxu2 %v12704_v46  ;;  %v14152_v39 = vld [vmem:[#allocation125_spill] sm:$0xff] }
 0x4fd   : > { %v4715_v20 = vpop.f32.mrf.mxu3 }
 0x4fe   : > { %v4780_v60 = vadd.f32 %v4715_v20, %v14150_v2  ;;  %v14153_v20 = vld [vmem:[#allocation80_spill] sm:$0xff] }
 0x4ff   : > { %v5586_v37 = vpop.f32.mrf.mxu2  ;;  %v4967_v38 = vpop.f32.mrf.mxu0 }
 0x500   : > { %v12717_v40 = vadd.f32 %v5586_v37, %v4780_v60  ;;  %v12720_v12 = vadd.f32 %v4967_v38, %v12357_v6  ;;  %v5217_v10 = vpop.f32.mrf.mxu1 }
 0x501   : > { %v12723_v30 = vadd.f32 %v5217_v10, %v14151_v19 }
 0x505   : > { %v4717_v50 = vpop.f32.mrf.mxu3 }
 0x506   : > { %v4781_v14 = vadd.f32 %v4717_v50, %v14152_v39  ;;  %v10324_v50 = vld [vmem:[#allocation14 + $0x178] sm:$0xff] }
 0x507   : > { %v5588_v49 = vpop.f32.mrf.mxu2  ;;  %v4970_v44 = vpop.f32.mrf.mxu0  ;;  %v10348_v39 = vld [vmem:[#allocation14 + $0x238] sm:$0xff]  ;;  %6808 = vmatpush.bf16.msra.mxu3 %v10324_v50 }
 0x508   : > { %v12729_v46 = vadd.f32 %v5588_v49, %v4781_v14  ;;  %v12732_v2 = vadd.f32 %v4970_v44, %v14153_v20  ;;  %v5220_v60 = vpop.f32.mrf.mxu1  ;;  %7558 = vmatpush.bf16.msra.mxu2 %v10348_v39  ;;  %v14155_v14 = vld [vmem:[#allocation122_spill] sm:$0xff] }
 0x509   : > { %v12735_v6 = vadd.f32 %v5220_v60, %v12373_v8  ;;  %v10332_v20 = vld [vmem:[#allocation14 + $0x1b8] sm:$0xff] }
 0x50a   : > { %14154 = vst [vmem:[#allocation90_spill] sm:$0xff] %v12732_v2  ;;  %4759 = vmatmul.bf16.gmra.mxu3 %v12383_v25  ;;  %5009 = vmatmul.bf16.gmra.mxu0 %v12383_v25  ;;  %v10340_v60 = vld [vmem:[#allocation14 + $0x1f8] sm:$0xff] }
 0x50b   : > { %5259 = vmatmul.bf16.gmra.mxu1 %v12383_v25  ;;  %7058 = vmatpush.bf16.msra.mxu0 %v10332_v20  ;;  %v14165_v20 = vld [vmem:[#allocation126_spill] sm:$0xff] }
 0x50c   : > { %5630 = vmatmul.bf16.gmra.mxu2 %v12727_v31  ;;  %7308 = vmatpush.bf16.msra.mxu1 %v10340_v60 }
 0x50d   : > { %v4720_v37 = vpop.f32.mrf.mxu3 }
 0x50e   : > { %v4782_v44 = vadd.f32 %v4720_v37, %v14155_v14  ;;  %v12752_v14 = vld [vmem:[%s11116_s13 + $0x70] sm:$0xff] }
 0x50f   : > { %v5591_v38 = vpop.f32.mrf.mxu2  ;;  %v4972_v10 = vpop.f32.mrf.mxu0  ;;  %14159 = vst [vmem:[#allocation33_spill] sm:$0xff] %v12752_v14 }
 0x510   : > { %v12742_v8 = vadd.f32 %v5591_v38, %v4782_v44  ;;  %v12745_v19 = vadd.f32 %v4972_v10, %v12379_v56  ;;  %v5222_v49 = vpop.f32.mrf.mxu1  ;;  %v14161_v38 = vld [vmem:[#allocation78_spill] sm:$0xff] }
 0x511   : > { %v12748_v25 = vadd.f32 %v5222_v49, %v12385_v63  ;;  %v14164_v49 = vld [vmem:[#allocation112_spill] sm:$0xff] }
 0x512   : > { %14156 = vst [vmem:[#allocation92_spill] sm:$0xff] %v12742_v8  ;;  %v14169_v8 = vld [vmem:[#allocation86_spill] sm:$0xff] }
 0x513   : > { %14157 = vst [vmem:[#allocation31_spill] sm:$0xff] %v12745_v19  ;;  %v14168_v19 = vld [vmem:[#allocation124_spill] sm:$0xff] }
 0x514   : > { %14158 = vst [vmem:[#allocation34_spill] sm:$0xff] %v12748_v25 }
 0x515   : > { %v4722_v50 = vpop.f32.mrf.mxu3 }
 0x516   : > { %v4783_v39 = vadd.f32 %v4722_v50, %v12376_v35 }
 0x517   : > { %v5593_v2 = vpop.f32.mrf.mxu2  ;;  %v4975_v37 = vpop.f32.mrf.mxu0 }
 0x518   : > { %v12754_v44 = vadd.f32 %v5593_v2, %v4783_v39  ;;  %v12757_v56 = vadd.f32 %v4975_v37, %v14161_v38  ;;  %v5225_v10 = vpop.f32.mrf.mxu1  ;;  %v14166_v37 = vld [vmem:[#allocation83_spill] sm:$0xff] }
 0x519   : > { %v12760_v63 = vadd.f32 %v5225_v10, %v12398_v24  ;;  %v14167_v10 = vld [vmem:[#allocation81_spill] sm:$0xff] }
 0x51a   : > { %14160 = vst [vmem:[#allocation94_spill] sm:$0xff] %v12754_v44  ;;  %4764 = vmatmul.bf16.gmra.mxu3 %v14164_v49  ;;  %5014 = vmatmul.bf16.gmra.mxu0 %v14164_v49 }
 0x51b   : > { %14162 = vst [vmem:[#allocation39_spill] sm:$0xff] %v12757_v56  ;;  %5264 = vmatmul.bf16.gmra.mxu1 %v14164_v49 }
 0x51c   : > { %14163 = vst [vmem:[#allocation96_spill] sm:$0xff] %v12760_v63  ;;  %5635 = vmatmul.bf16.gmra.mxu2 %v12752_v14 }
 0x51d   : > { %v4725_v35 = vpop.f32.mrf.mxu3 }
 0x51e   : > { %v4784_v60 = vadd.f32 %v4725_v35, %v14165_v20 }
 0x51f   : > { %v5596_v2 = vpop.f32.mrf.mxu2  ;;  %v4977_v50 = vpop.f32.mrf.mxu0 }
 0x520   : > { %v12767_v39 = vadd.f32 %v5596_v2, %v4784_v60  ;;  %v12770_v38 = vadd.f32 %v4977_v50, %v14166_v37  ;;  %v5227_v24 = vpop.f32.mrf.mxu1  ;;  %v14172_v2 = vmov 0  }
 0x521   : > { %v12773_v56 = vadd.f32 %v5227_v24, %v14167_v10 }
 0x525   : > { %v4727_v63 = vpop.f32.mrf.mxu3 }
 0x526   : > { %v4785_v44 = vadd.f32 %v4727_v63, %v14168_v19  ;;  %v10323_v19 = vld [vmem:[#allocation14 + $0x170] sm:$0xff] }
 0x527   : > { %v5598_v49 = vpop.f32.mrf.mxu2  ;;  %v4980_v25 = vpop.f32.mrf.mxu0  ;;  %v10347_v63 = vld [vmem:[#allocation14 + $0x230] sm:$0xff]  ;;  %6809 = vmatpush.bf16.msra.mxu3 %v10323_v19 }
 0x528   : > { %v12776_v14 = vadd.f32 %v5598_v49, %v4785_v44  ;;  %v12779_v35 = vadd.f32 %v4980_v25, %v14169_v8  ;;  %v5230_v20 = vpop.f32.mrf.mxu1  ;;  %7559 = vmatpush.bf16.msra.mxu2 %v10347_v63  ;;  %v14173_v44 = vld [vmem:[#allocation127_spill] sm:$0xff]  ;;  %v14176_v19 = vld [vmem:[#allocation129_spill] sm:$0xff] }
 0x529   : > { %v12782_v60 = vadd.f32 %v5230_v20, %v12418_v3  ;;  %v10331_v20 = vld [vmem:[#allocation14 + $0x1b0] sm:$0xff] }
 0x52a   : > { %14170 = vst [vmem:[#allocation35_spill] sm:$0xff] %v12779_v35  ;;  %5810 = vmatmul.bf16.vlgmr.msrb.gmra.mxu3 %v14172_v2  ;;  %6060 = vmatmul.bf16.vlgmr.msrb.gmra.mxu0 %v14172_v2  ;;  %v10339_v2 = vld [vmem:[#allocation14 + $0x1f0] sm:$0xff] }
 0x52b   : > { %14171 = vst [vmem:[#allocation38_spill] sm:$0xff] %v12782_v60  ;;  %6316 = vmatmul.bf16.vlgmr.msrb.gmra.mxu1 %v12428_v53  ;;  %7059 = vmatpush.bf16.msra.mxu0 %v10331_v20 }
 0x52c   : > { %6566 = vmatmul.bf16.vlgmr.msrb.gmra.mxu2 %v12428_v53  ;;  %7309 = vmatpush.bf16.msra.mxu1 %v10339_v2 }
 0x52d   : > { %v4730_v50 = vpop.f32.mrf.mxu3 }
 0x52e   : > { %v4786_v8 = vadd.f32 %v4730_v50, %v14173_v44 }
 0x52f   : > { %v5601_v25 = vpop.f32.mrf.mxu2  ;;  %v4982_v49 = vpop.f32.mrf.mxu0 }
 0x530   : > { %v12789_v37 = vadd.f32 %v5601_v25, %v4786_v8  ;;  %v12792_v3 = vadd.f32 %v4982_v49, %v12424_v55  ;;  %v5232_v24 = vpop.f32.mrf.mxu1  ;;  %v14178_v8 = vld [vmem:[#allocation128_spill] sm:$0xff] }
 0x531   : > { %v12795_v10 = vadd.f32 %v5232_v24, %v12430_v62 }
 0x532   : > { %14174 = vst [vmem:[#allocation36_spill] sm:$0xff] %v12792_v3 }
 0x533   : > { %14175 = vst [vmem:[#allocation41_spill] sm:$0xff] %v12795_v10  ;;  %v14185_v10 = vld [vmem:[#allocation130_spill] sm:$0xff] }
 0x535   : > { %v4732_v35 = vpop.f32.mrf.mxu3 }
 0x536   : > { %v4787_v63 = vadd.f32 %v4732_v35, %v14176_v19  ;;  %v14181_v35 = vld [vmem:[#allocation84_spill] sm:$0xff]  ;;  %v14182_v19 = vld [vmem:[#allocation131_spill] sm:$0xff] }
 0x537   : > { %v5603_v60 = vpop.f32.mrf.mxu2  ;;  %v4985_v50 = vpop.f32.mrf.mxu0 }
 0x538   : > { %v12798_v44 = vadd.f32 %v5603_v60, %v4787_v63  ;;  %v12801_v25 = vadd.f32 %v4985_v50, %v14178_v8  ;;  %v5235_v55 = vpop.f32.mrf.mxu1  ;;  %v14183_v50 = vld [vmem:[#allocation133_spill] sm:$0xff] }
 0x539   : > { %v12804_v49 = vadd.f32 %v5235_v55, %v12441_v23 }
 0x53a   : > { %14177 = vst [vmem:[#allocation97_spill] sm:$0xff] %v12798_v44  ;;  %5815 = vmatmul.bf16.gmra.mxu3 %v12428_v53  ;;  %6065 = vmatmul.bf16.gmra.mxu0 %v12428_v53  ;;  %v14184_v53 = vld [vmem:[#allocation89_spill] sm:$0xff] }
 0x53b   : > { %14179 = vst [vmem:[#allocation101_spill] sm:$0xff] %v12801_v25  ;;  %6321 = vmatmul.bf16.gmra.mxu1 %v12451_v59 }
 0x53c   : > { %14180 = vst [vmem:[#allocation44_spill] sm:$0xff] %v12804_v49  ;;  %6571 = vmatmul.bf16.gmra.mxu2 %v12451_v59 }
 0x53d   : > { %v4735_v62 = vpop.f32.mrf.mxu3 }
 0x53e   : > { %v4788_v24 = vadd.f32 %v4735_v62, %v14181_v35 }
 0x53f   : > { %v5606_v60 = vpop.f32.mrf.mxu2  ;;  %v4987_v20 = vpop.f32.mrf.mxu0 }
 0x540   : > { %v12811_v2 = vadd.f32 %v5606_v60, %v4788_v24  ;;  %v12814_v63 = vadd.f32 %v4987_v20, %v14182_v19  ;;  %v5237_v23 = vpop.f32.mrf.mxu1  ;;  %v10322_v60 = vld [vmem:[#allocation14 + $0x168] sm:$0xff] }
 0x541   : > { %v12817_v8 = vadd.f32 %v5237_v23, %v14183_v50  ;;  %v10346_v20 = vld [vmem:[#allocation14 + $0x228] sm:$0xff]  ;;  %6810 = vmatpush.bf16.msra.mxu3 %v10322_v60  ;;  %v14190_v60 = vld [vmem:[#allocation67_spill] sm:$0xff] }
 0x542   : > { %7560 = vmatpush.bf16.msra.mxu2 %v10346_v20 }
 0x545   : > { %v4737_v55 = vpop.f32.mrf.mxu3 }
 0x546   : > { %v4789_v25 = vadd.f32 %v4737_v55, %v14184_v53  ;;  %v10330_v55 = vld [vmem:[#allocation14 + $0x1a8] sm:$0xff] }
 0x547   : > { %v5608_v49 = vpop.f32.mrf.mxu2  ;;  %v4990_v3 = vpop.f32.mrf.mxu0  ;;  %v10338_v53 = vld [vmem:[#allocation14 + $0x1e8] sm:$0xff]  ;;  %7060 = vmatpush.bf16.msra.mxu0 %v10330_v55 }
 0x548   : > { %v12820_v44 = vadd.f32 %v5608_v49, %v4789_v25  ;;  %v12823_v62 = vadd.f32 %v4990_v3, %v14185_v10  ;;  %v5240_v35 = vpop.f32.mrf.mxu1  ;;  %v14187_v25 = vld [vmem:[#allocation87_spill] sm:$0xff]  ;;  %7310 = vmatpush.bf16.msra.mxu1 %v10338_v53 }
 0x549   : > { %v12826_v24 = vadd.f32 %v5240_v35, %v12464_v15 }
 0x54a   : > { %14186 = vst [vmem:[#allocation99_spill] sm:$0xff] %v12823_v62  ;;  %5820 = vmatmul.bf16.gmra.mxu3 %v12451_v59  ;;  %6070 = vmatmul.bf16.gmra.mxu0 %v12451_v59 }
 0x54b   : > { %6326 = vmatmul.bf16.gmra.mxu1 %v12474_v11 }
 0x54c   : > { %6576 = vmatmul.bf16.gmra.mxu2 %v12474_v11 }
 0x54d   : > { %v4740_v19 = vpop.f32.mrf.mxu3 }
 0x54e   : > { %v4790_v3 = vadd.f32 %v4740_v19, %v14187_v25 }
 0x54f   : > { %v5611_v10 = vpop.f32.mrf.mxu2  ;;  %v4992_v49 = vpop.f32.mrf.mxu0 }
 0x550   : > { %v12833_v23 = vadd.f32 %v5611_v10, %v4790_v3  ;;  %v12836_v15 = vadd.f32 %v4992_v49, %v12470_v47  ;;  %v5242_v50 = vpop.f32.mrf.mxu1  ;;  %v14192_v3 = vld [vmem:[#allocation43_spill] sm:$0xff] }
 0x551   : > { %v12839_v59 = vadd.f32 %v5242_v50, %v12476_v26  ;;  %v14195_v50 = vld [vmem:[#allocation134_spill] sm:$0xff] }
 0x552   : > { %14188 = vst [vmem:[#allocation98_spill] sm:$0xff] %v12836_v15 }
 0x553   : > { %14189 = vst [vmem:[#allocation102_spill] sm:$0xff] %v12839_v59  ;;  %v14199_v59 = vld [vmem:[#allocation73_spill] sm:$0xff] }
 0x555   : > { %v4742_v35 = vpop.f32.mrf.mxu3 }
 0x556   : > { %v4791_v20 = vadd.f32 %v4742_v35, %v14190_v60  ;;  %v14196_v60 = vld [vmem:[#allocation70_spill] sm:$0xff] }
 0x557   : > { %v5613_v62 = vpop.f32.mrf.mxu2  ;;  %v4995_v19 = vpop.f32.mrf.mxu0 }
 0x558   : > { %v12842_v25 = vadd.f32 %v5613_v62, %v4791_v20  ;;  %v12845_v10 = vadd.f32 %v4995_v19, %v14192_v3  ;;  %v5245_v47 = vpop.f32.mrf.mxu1  ;;  %v14197_v19 = vld [vmem:[#allocation46_spill] sm:$0xff] }
 0x559   : > { %v12848_v49 = vadd.f32 %v5245_v47, %v12487_v5 }
 0x55a   : > { %14191 = vst [vmem:[#allocation40_spill] sm:$0xff] %v12842_v25  ;;  %5825 = vmatmul.bf16.gmra.mxu3 %v12474_v11  ;;  %6075 = vmatmul.bf16.gmra.mxu0 %v12474_v11  ;;  %v14198_v11 = vld [vmem:[#allocation132_spill] sm:$0xff] }
 0x55b   : > { %14193 = vst [vmem:[#allocation100_spill] sm:$0xff] %v12845_v10  ;;  %6331 = vmatmul.bf16.gmra.mxu1 %v12497_v13 }
 0x55c   : > { %14194 = vst [vmem:[#allocation42_spill] sm:$0xff] %v12848_v49  ;;  %6581 = vmatmul.bf16.gmra.mxu2 %v12497_v13 }
 0x55d   : > { %v4745_v26 = vpop.f32.mrf.mxu3 }
 0x55e   : > { %v4792_v55 = vadd.f32 %v4745_v26, %v14195_v50 }
 0x55f   : > { %v5616_v62 = vpop.f32.mrf.mxu2  ;;  %v4997_v53 = vpop.f32.mrf.mxu0 }
 0x560   : > { %v12855_v35 = vadd.f32 %v5616_v62, %v4792_v55  ;;  %v12858_v20 = vadd.f32 %v4997_v53, %v14196_v60  ;;  %v5247_v5 = vpop.f32.mrf.mxu1  ;;  %v10321_v62 = vld [vmem:[#allocation14 + $0x160] sm:$0xff] }
 0x561   : > { %v12861_v3 = vadd.f32 %v5247_v5, %v14197_v19  ;;  %v10345_v53 = vld [vmem:[#allocation14 + $0x220] sm:$0xff]  ;;  %6811 = vmatpush.bf16.msra.mxu3 %v10321_v62  ;;  %v14202_v62 = vld [vmem:[#allocation137_spill] sm:$0xff] }
 0x562   : > { %7561 = vmatpush.bf16.msra.mxu2 %v10345_v53 }
 0x565   : > { %v4747_v47 = vpop.f32.mrf.mxu3 }
 0x566   : > { %v4793_v10 = vadd.f32 %v4747_v47, %v14198_v11  ;;  %v10329_v47 = vld [vmem:[#allocation14 + $0x1a0] sm:$0xff] }
 0x567   : > { %v5618_v49 = vpop.f32.mrf.mxu2  ;;  %v5000_v15 = vpop.f32.mrf.mxu0  ;;  %v10337_v11 = vld [vmem:[#allocation14 + $0x1e0] sm:$0xff]  ;;  %7061 = vmatpush.bf16.msra.mxu0 %v10329_v47 }
 0x568   : > { %v12864_v25 = vadd.f32 %v5618_v49, %v4793_v10  ;;  %v12867_v26 = vadd.f32 %v5000_v15, %v14199_v59  ;;  %v5250_v50 = vpop.f32.mrf.mxu1  ;;  %v14201_v10 = vld [vmem:[#allocation135_spill] sm:$0xff]  ;;  %7311 = vmatpush.bf16.msra.mxu1 %v10337_v11 }
 0x569   : > { %v12870_v55 = vadd.f32 %v5250_v50, %v12510_v17 }
 0x56a   : > { %14200 = vst [vmem:[#allocation45_spill] sm:$0xff] %v12867_v26  ;;  %5830 = vmatmul.bf16.gmra.mxu3 %v12497_v13  ;;  %6080 = vmatmul.bf16.gmra.mxu0 %v12497_v13 }
 0x56b   : > { %6336 = vmatmul.bf16.gmra.mxu1 %v12520_v51 }
 0x56c   : > { %6586 = vmatmul.bf16.gmra.mxu2 %v12520_v51 }
 0x56d   : > { %v4750_v60 = vpop.f32.mrf.mxu3 }
 0x56e   : > { %v4794_v15 = vadd.f32 %v4750_v60, %v14201_v10 }
 0x56f   : > { %v5621_v59 = vpop.f32.mrf.mxu2  ;;  %v5002_v49 = vpop.f32.mrf.mxu0 }
 0x570   : > { %v12877_v5 = vadd.f32 %v5621_v59, %v4794_v15  ;;  %v12880_v17 = vadd.f32 %v5002_v49, %v12516_v57  ;;  %v5252_v19 = vpop.f32.mrf.mxu1  ;;  %v14203_v15 = vld [vmem:[#allocation136_spill] sm:$0xff] }
 0x571   : > { %v12883_v13 = vadd.f32 %v5252_v19, %v12522_v27  ;;  %v14206_v19 = vld [vmem:[#allocation49_spill] sm:$0xff] }
 0x575   : > { %v4752_v50 = vpop.f32.mrf.mxu3 }
 0x576   : > { %v4795_v53 = vadd.f32 %v4752_v50, %v14202_v62 }
 0x577   : > { %v5623_v26 = vpop.f32.mrf.mxu2  ;;  %v5005_v60 = vpop.f32.mrf.mxu0 }
 0x578   : > { %v12886_v10 = vadd.f32 %v5623_v26, %v4795_v53  ;;  %v12889_v59 = vadd.f32 %v5005_v60, %v14203_v15  ;;  %v5255_v57 = vpop.f32.mrf.mxu1 }
 0x579   : > { %v12892_v49 = vadd.f32 %v5255_v57, %v12533_v58 }
 0x57a   : > { %14204 = vst [vmem:[#allocation47_spill] sm:$0xff] %v12889_v59  ;;  %5835 = vmatmul.bf16.gmra.mxu3 %v12520_v51  ;;  %6085 = vmatmul.bf16.gmra.mxu0 %v12520_v51 }
 0x57b   : > { %14205 = vst [vmem:[#allocation104_spill] sm:$0xff] %v12892_v49  ;;  %6341 = vmatmul.bf16.gmra.mxu1 %v12543_v36  ;;  %v14207_v49 = vld [vmem:[#allocation139_spill] sm:$0xff] }
 0x57c   : > { %6591 = vmatmul.bf16.gmra.mxu2 %v12543_v36 }
 0x57d   : > { %v4755_v27 = vpop.f32.mrf.mxu3 }
 0x57e   : > { %v4796_v47 = vadd.f32 %v4755_v27, %v14206_v19 }
 0x57f   : > { %v5626_v26 = vpop.f32.mrf.mxu2  ;;  %v5007_v11 = vpop.f32.mrf.mxu0 }
 0x580   : > { %v12899_v50 = vadd.f32 %v5626_v26, %v4796_v47  ;;  %v12902_v62 = vadd.f32 %v5007_v11, %v12539_v52  ;;  %v5257_v58 = vpop.f32.mrf.mxu1  ;;  %v10344_v52 = vld [vmem:[#allocation14 + $0x218] sm:$0xff]  ;;  %v14210_v26 = vld [vmem:[#allocation76_spill] sm:$0xff] }
 0x581   : > { %v12905_v53 = vadd.f32 %v5257_v58, %v12545_v0  ;;  %7562 = vmatpush.bf16.msra.mxu2 %v10344_v52 }
 0x585   : > { %v4757_v60 = vpop.f32.mrf.mxu3 }
 0x586   : > { %v4797_v51 = vadd.f32 %v4757_v60, %v12536_v22  ;;  %v10320_v22 = vld [vmem:[#allocation14 + $0x158] sm:$0xff] }
 0x587   : > { %v5628_v15 = vpop.f32.mrf.mxu2  ;;  %v5010_v57 = vpop.f32.mrf.mxu0  ;;  %6812 = vmatpush.bf16.msra.mxu3 %v10320_v22  ;;  %v14212_v22 = vld [vmem:[#allocation141_spill] sm:$0xff] }
 0x588   : > { %v12908_v59 = vadd.f32 %v5628_v15, %v4797_v51  ;;  %v12911_v27 = vadd.f32 %v5010_v57, %v14207_v49  ;;  %v5260_v19 = vpop.f32.mrf.mxu1  ;;  %v10328_v57 = vld [vmem:[#allocation14 + $0x198] sm:$0xff] }
 0x589   : > { %v12914_v47 = vadd.f32 %v5260_v19, %v12556_v29  ;;  %v10336_v19 = vld [vmem:[#allocation14 + $0x1d8] sm:$0xff]  ;;  %7062 = vmatpush.bf16.msra.mxu0 %v10328_v57 }
 0x58a   : > { %14208 = vst [vmem:[#allocation48_spill] sm:$0xff] %v12911_v27  ;;  %5840 = vmatmul.bf16.gmra.mxu3 %v12543_v36  ;;  %6090 = vmatmul.bf16.gmra.mxu0 %v12543_v36  ;;  %v14211_v36 = vld [vmem:[#allocation52_spill] sm:$0xff] }
 0x58b   : > { %14209 = vst [vmem:[#allocation50_spill] sm:$0xff] %v12914_v47  ;;  %6346 = vmatmul.bf16.gmra.mxu1 %v12566_v1 }
 0x58c   : > { %6596 = vmatmul.bf16.gmra.mxu2 %v12566_v1  ;;  %7312 = vmatpush.bf16.msra.mxu1 %v10336_v19 }
 0x58d   : > { %v4760_v0 = vpop.f32.mrf.mxu3 }
 0x58e   : > { %v4798_v49 = vadd.f32 %v4760_v0, %v14210_v26 }
 0x58f   : > { %v5631_v11 = vpop.f32.mrf.mxu2  ;;  %v5012_v58 = vpop.f32.mrf.mxu0 }
 0x590   : > { %v12921_v60 = vadd.f32 %v5631_v11, %v4798_v49  ;;  %v12924_v29 = vadd.f32 %v5012_v58, %v12562_v16  ;;  %v5262_v51 = vpop.f32.mrf.mxu1  ;;  %v14213_v49 = vld [vmem:[#allocation79_spill] sm:$0xff] }
 0x591   : > { %v12927_v15 = vadd.f32 %v5262_v51, %v14211_v36  ;;  %v14216_v51 = vld [vmem:[#allocation138_spill] sm:$0xff] }
 0x595   : > { %v4762_v27 = vpop.f32.mrf.mxu3 }
 0x596   : > { %v4799_v52 = vadd.f32 %v4762_v27, %v14212_v22 }
 0x597   : > { %v5633_v47 = vpop.f32.mrf.mxu2  ;;  %v5015_v0 = vpop.f32.mrf.mxu0 }
 0x598   : > { %v12930_v26 = vadd.f32 %v5633_v47, %v4799_v52  ;;  %v12933_v11 = vadd.f32 %v5015_v0, %v14213_v49  ;;  %v5265_v16 = vpop.f32.mrf.mxu1 }
 0x599   : > { %v12936_v58 = vadd.f32 %v5265_v16, %v12579_v61 }
 0x59a   : > { %14214 = vst [vmem:[#allocation53_spill] sm:$0xff] %v12933_v11  ;;  %5845 = vmatmul.bf16.gmra.mxu3 %v12566_v1  ;;  %6095 = vmatmul.bf16.gmra.mxu0 %v12566_v1 }
 0x59b   : > { %14215 = vst [vmem:[#allocation103_spill] sm:$0xff] %v12936_v58  ;;  %6351 = vmatmul.bf16.gmra.mxu1 %v12589_v54  ;;  %v14219_v58 = vld [vmem:[#allocation55_spill] sm:$0xff] }
 0x59c   : > { %6601 = vmatmul.bf16.gmra.mxu2 %v12589_v54 }
 0x59d   : > { %v4765_v27 = vpop.f32.mrf.mxu3 }
 0x59e   : > { %v4800_v36 = vadd.f32 %v4765_v27, %v14216_v51 }
 0x59f   : > { %v5636_v47 = vpop.f32.mrf.mxu2  ;;  %v5017_v57 = vpop.f32.mrf.mxu0 }
 0x5a0   : > { %v12943_v19 = vadd.f32 %v5636_v47, %v4800_v36  ;;  %v12946_v22 = vadd.f32 %v5017_v57, %v12585_v34  ;;  %v5267_v61 = vpop.f32.mrf.mxu1  ;;  %v14222_v34 = vld [vmem:[#allocation58_spill] sm:$0xff] }
 0x5a1   : > { %v12949_v52 = vadd.f32 %v5267_v61, %v12591_v21  ;;  %v10343_v21 = vld [vmem:[#allocation14 + $0x210] sm:$0xff]  ;;  %v14223_v57 = vld [vmem:[#allocation142_spill] sm:$0xff] }
 0x5a2   : > { %14217 = vst [vmem:[#allocation106_spill] sm:$0xff] %v12946_v22  ;;  %7563 = vmatpush.bf16.msra.mxu2 %v10343_v21 }
 0x5a5   : > { %v4767_v0 = vpop.f32.mrf.mxu3 }
 0x5a6   : > { %v4801_v1 = vadd.f32 %v4767_v0, %v12582_v43  ;;  %v10319_v43 = vld [vmem:[#allocation14 + $0x150] sm:$0xff] }
 0x5a7   : > { %v5638_v49 = vpop.f32.mrf.mxu2  ;;  %v6061_v16 = vpop.f32.mrf.mxu0  ;;  %6813 = vmatpush.bf16.msra.mxu3 %v10319_v43  ;;  %v14227_v43 = vld [vmem:[#allocation140_spill] sm:$0xff] }
 0x5a8   : > { %v12952_v11 = vadd.f32 %v5638_v49, %v4801_v1  ;;  %v12955_v27 = vadd.f32 %v6061_v16, %v14219_v58  ;;  %v6317_v51 = vpop.f32.mrf.mxu1 }
 0x5a9   : > { %v12958_v36 = vadd.f32 %v6317_v51, %v12602_v32  ;;  %v14224_v32 = vld [vmem:[#allocation82_spill] sm:$0xff] }
 0x5aa   : > { %14218 = vst [vmem:[#allocation51_spill] sm:$0xff] %v12952_v11  ;;  %5850 = vmatmul.bf16.gmra.mxu3 %v12589_v54  ;;  %6100 = vmatmul.bf16.gmra.mxu0 %v12589_v54  ;;  %v14226_v54 = vld [vmem:[#allocation143_spill] sm:$0xff] }
 0x5ab   : > { %14220 = vst [vmem:[#allocation105_spill] sm:$0xff] %v12955_v27  ;;  %6356 = vmatmul.bf16.gmra.mxu1 %v14222_v34  ;;  %v10327_v27 = vld [vmem:[#allocation14 + $0x190] sm:$0xff] }
 0x5ac   : > { %14221 = vst [vmem:[#allocation108_spill] sm:$0xff] %v12958_v36  ;;  %6606 = vmatmul.bf16.gmra.mxu2 %v14222_v34  ;;  %v10335_v36 = vld [vmem:[#allocation14 + $0x1d0] sm:$0xff]  ;;  %7063 = vmatpush.bf16.msra.mxu0 %v10327_v27 }
 0x5ad   : > { %v5811_v47 = vpop.f32.mrf.mxu3  ;;  %7313 = vmatpush.bf16.msra.mxu1 %v10335_v36  ;;  %v14231_v27 = vld [vmem:[#allocation85_spill] sm:$0xff] }
 0x5ae   : > { %v5891_v58 = vadd.f32 %v5811_v47, %v14223_v57 }
 0x5af   : > { %v6567_v61 = vpop.f32.mrf.mxu2  ;;  %v6063_v0 = vpop.f32.mrf.mxu0 }
 0x5b0   : > { %v12965_v1 = vadd.f32 %v6567_v61, %v5891_v58  ;;  %v12968_v49 = vadd.f32 %v6063_v0, %v14224_v32  ;;  %v6319_v16 = vpop.f32.mrf.mxu1  ;;  %v14228_v58 = vld [vmem:[#allocation145_spill] sm:$0xff] }
 0x5b1   : > { %v12971_v51 = vadd.f32 %v6319_v16, %v14226_v54 }
 0x5b2   : > { %14225 = vst [vmem:[#allocation109_spill] sm:$0xff] %v12968_v49  ;;  %v14236_v49 = vld [vmem:[#allocation88_spill] sm:$0xff] }
 0x5b5   : > { %v5813_v22 = vpop.f32.mrf.mxu3 }
 0x5b6   : > { %v5892_v21 = vadd.f32 %v5813_v22, %v14227_v43 }
 0x5b7   : > { %v6569_v11 = vpop.f32.mrf.mxu2  ;;  %v6066_v47 = vpop.f32.mrf.mxu0 }
 0x5b8   : > { %v12974_v57 = vadd.f32 %v6569_v11, %v5892_v21  ;;  %v12977_v61 = vadd.f32 %v6066_v47, %v14228_v58  ;;  %v6322_v0 = vpop.f32.mrf.mxu1 }
 0x5b9   : > { %v12980_v32 = vadd.f32 %v6322_v0, %v12625_v42 }
 0x5ba   : > { %14229 = vst [vmem:[#allocation56_spill] sm:$0xff] %v12977_v61  ;;  %5855 = vmatmul.bf16.gmra.mxu3 %v14222_v34  ;;  %6105 = vmatmul.bf16.gmra.mxu0 %v14222_v34  ;;  %v14234_v34 = vld [vmem:[#allocation61_spill] sm:$0xff] }
 0x5bb   : > { %14230 = vst [vmem:[#allocation54_spill] sm:$0xff] %v12980_v32  ;;  %6361 = vmatmul.bf16.gmra.mxu1 %v12635_v18 }
 0x5bc   : > { %6611 = vmatmul.bf16.gmra.mxu2 %v12635_v18 }
 0x5bd   : > { %v5816_v22 = vpop.f32.mrf.mxu3 }
 0x5be   : > { %v5893_v36 = vadd.f32 %v5816_v22, %v14231_v27 }
 0x5bf   : > { %v6572_v11 = vpop.f32.mrf.mxu2  ;;  %v6068_v16 = vpop.f32.mrf.mxu0 }
 0x5c0   : > { %v12987_v54 = vadd.f32 %v6572_v11, %v5893_v36  ;;  %v12990_v43 = vadd.f32 %v6068_v16, %v12631_v33  ;;  %v6324_v42 = vpop.f32.mrf.mxu1  ;;  %v14238_v36 = vld [vmem:[#allocation64_spill] sm:$0xff]  ;;  %v14240_v33 = vld [vmem:[#allocation27_spill] sm:$0xff] }
 0x5c1   : > { %v12993_v21 = vadd.f32 %v6324_v42, %v12637_v41  ;;  %v10318_v41 = vld [vmem:[#allocation14 + $0x148] sm:$0xff] }
 0x5c2   : > { %14232 = vst [vmem:[#allocation59_spill] sm:$0xff] %v12990_v43  ;;  %v10342_v16 = vld [vmem:[#allocation14 + $0x208] sm:$0xff]  ;;  %6814 = vmatpush.bf16.msra.mxu3 %v10318_v41  ;;  %v14244_v41 = vld [vmem:[#allocation147_spill] sm:$0xff] }
 0x5c3   : > { %14233 = vst [vmem:[#allocation113_spill] sm:$0xff] %v12993_v21  ;;  %7564 = vmatpush.bf16.msra.mxu2 %v10342_v16  ;;  %v10334_v43 = vld [vmem:[#allocation14 + $0x1c8] sm:$0xff] }
 0x5c4   : > { %7314 = vmatpush.bf16.msra.mxu1 %v10334_v43  ;;  %v14248_v43 = vld [vmem:[#allocation149_spill] sm:$0xff] }
 0x5c5   : > { %v5818_v47 = vpop.f32.mrf.mxu3 }
 0x5c6   : > { %v5894_v58 = vadd.f32 %v5818_v47, %v14234_v34  ;;  %v14241_v47 = vld [vmem:[#allocation144_spill] sm:$0xff] }
 0x5c7   : > { %v6574_v0 = vpop.f32.mrf.mxu2  ;;  %v6071_v61 = vpop.f32.mrf.mxu0 }
 0x5c8   : > { %v12996_v32 = vadd.f32 %v6574_v0, %v5894_v58  ;;  %v12999_v22 = vadd.f32 %v6071_v61, %v14236_v49  ;;  %v6327_v27 = vpop.f32.mrf.mxu1  ;;  %v14242_v0 = vld [vmem:[#allocation28_spill] sm:$0xff] }
 0x5c9   : > { %v13002_v11 = vadd.f32 %v6327_v27, %v14238_v36 }
 0x5ca   : > { %14235 = vst [vmem:[#allocation107_spill] sm:$0xff] %v12996_v32  ;;  %5860 = vmatmul.bf16.gmra.mxu3 %v12635_v18  ;;  %6110 = vmatmul.bf16.gmra.mxu0 %v12635_v18  ;;  %v14243_v18 = vld [vmem:[#allocation146_spill] sm:$0xff] }
 0x5cb   : > { %14237 = vst [vmem:[#allocation110_spill] sm:$0xff] %v12999_v22  ;;  %6366 = vmatmul.bf16.gmra.mxu1 %v14240_v33 }
 0x5cc   : > { %14239 = vst [vmem:[#allocation57_spill] sm:$0xff] %v13002_v11  ;;  %6616 = vmatmul.bf16.gmra.mxu2 %v14240_v33  ;;  %v10326_v11 = vld [vmem:[#allocation14 + $0x188] sm:$0xff] }
 0x5cd   : > { %v5821_v42 = vpop.f32.mrf.mxu3  ;;  %7064 = vmatpush.bf16.msra.mxu0 %v10326_v11 }
 0x5ce   : > { %v5895_v49 = vadd.f32 %v5821_v42, %v14241_v47 }
 0x5cf   : > { %v6577_v61 = vpop.f32.mrf.mxu2  ;;  %v6073_v34 = vpop.f32.mrf.mxu0 }
 0x5d0   : > { %v13009_v58 = vadd.f32 %v6577_v61, %v5895_v49  ;;  %v13012_v27 = vadd.f32 %v6073_v34, %v14242_v0  ;;  %v6329_v36 = vpop.f32.mrf.mxu1  ;;  %v14245_v49 = vld [vmem:[#allocation30_spill] sm:$0xff] }
 0x5d1   : > { %v13015_v22 = vadd.f32 %v6329_v36, %v14243_v18 }
 0x5d5   : > { %v5823_v32 = vpop.f32.mrf.mxu3 }
 0x5d6   : > { %v5896_v16 = vadd.f32 %v5823_v32, %v14244_v41 }
 0x5d7   : > { %v6579_v21 = vpop.f32.mrf.mxu2  ;;  %v6076_v42 = vpop.f32.mrf.mxu0 }
 0x5d8   : > { %v13018_v47 = vadd.f32 %v6579_v21, %v5896_v16  ;;  %v13021_v61 = vadd.f32 %v6076_v42, %v14245_v49  ;;  %v6332_v34 = vpop.f32.mrf.mxu1 }
 0x5d9   : > { %v13024_v0 = vadd.f32 %v6332_v34, %v12671_v28 }
 0x5da   : > { %14246 = vst [vmem:[#allocation62_spill] sm:$0xff] %v13021_v61  ;;  %5865 = vmatmul.bf16.gmra.mxu3 %v14240_v33  ;;  %6115 = vmatmul.bf16.gmra.mxu0 %v14240_v33 }
 0x5db   : > { %14247 = vst [vmem:[#allocation60_spill] sm:$0xff] %v13024_v0  ;;  %6371 = vmatmul.bf16.gmra.mxu1 %v12681_v45  ;;  %v14251_v0 = vld [vmem:[#allocation150_spill] sm:$0xff] }
 0x5dc   : > { %6621 = vmatmul.bf16.gmra.mxu2 %v12681_v45 }
 0x5dd   : > { %v5826_v32 = vpop.f32.mrf.mxu3 }
 0x5de   : > { %v5897_v11 = vadd.f32 %v5826_v32, %v14248_v43 }
 0x5df   : > { %v6582_v21 = vpop.f32.mrf.mxu2  ;;  %v6078_v36 = vpop.f32.mrf.mxu0 }
 0x5e0   : > { %v13031_v18 = vadd.f32 %v6582_v21, %v5897_v11  ;;  %v13034_v41 = vadd.f32 %v6078_v36, %v12677_v7  ;;  %v6334_v28 = vpop.f32.mrf.mxu1  ;;  %v14254_v7 = vld [vmem:[#allocation93_spill] sm:$0xff]  ;;  %v14255_v36 = vld [vmem:[#allocation148_spill] sm:$0xff] }
 0x5e1   : > { %v13037_v16 = vadd.f32 %v6334_v28, %v12683_v4  ;;  %v10341_v4 = vld [vmem:[#allocation14 + $0x200] sm:$0xff] }
 0x5e2   : > { %14249 = vst [vmem:[#allocation114_spill] sm:$0xff] %v13034_v41  ;;  %7565 = vmatpush.bf16.msra.mxu2 %v10341_v4 }
 0x5e5   : > { %v5828_v42 = vpop.f32.mrf.mxu3 }
 0x5e6   : > { %v5898_v33 = vadd.f32 %v5828_v42, %v12674_v48  ;;  %v10317_v48 = vld [vmem:[#allocation14 + $0x140] sm:$0xff] }
 0x5e7   : > { %v6584_v49 = vpop.f32.mrf.mxu2  ;;  %v6081_v34 = vpop.f32.mrf.mxu0  ;;  %6815 = vmatpush.bf16.msra.mxu3 %v10317_v48  ;;  %v14258_v48 = vld [vmem:[#allocation91_spill] sm:$0xff] }
 0x5e8   : > { %v13040_v61 = vadd.f32 %v6584_v49, %v5898_v33  ;;  %v13043_v32 = vadd.f32 %v6081_v34, %v14251_v0  ;;  %v6337_v43 = vpop.f32.mrf.mxu1 }
 0x5e9   : > { %v13046_v11 = vadd.f32 %v6337_v43, %v12694_v9  ;;  %v14256_v9 = vld [vmem:[#allocation29_spill] sm:$0xff] }
 0x5ea   : > { %14250 = vst [vmem:[#allocation65_spill] sm:$0xff] %v13040_v61  ;;  %5870 = vmatmul.bf16.gmra.mxu3 %v12681_v45  ;;  %6120 = vmatmul.bf16.gmra.mxu0 %v12681_v45  ;;  %v14257_v45 = vld [vmem:[#allocation37_spill] sm:$0xff] }
 0x5eb   : > { %14252 = vst [vmem:[#allocation111_spill] sm:$0xff] %v13043_v32  ;;  %6376 = vmatmul.bf16.gmra.mxu1 %v14254_v7  ;;  %v10325_v32 = vld [vmem:[#allocation14 + $0x180] sm:$0xff] }
 0x5ec   : > { %14253 = vst [vmem:[#allocation117_spill] sm:$0xff] %v13046_v11  ;;  %6626 = vmatmul.bf16.gmra.mxu2 %v14254_v7  ;;  %v10333_v11 = vld [vmem:[#allocation14 + $0x1c0] sm:$0xff]  ;;  %7065 = vmatpush.bf16.msra.mxu0 %v10325_v32  ;;  %v14261_v32 = vld [vmem:[#allocation32_spill] sm:$0xff] }
 0x5ed   : > { %v5831_v21 = vpop.f32.mrf.mxu3  ;;  %7315 = vmatpush.bf16.msra.mxu1 %v10333_v11 }
 0x5ee   : > { %v5899_v0 = vadd.f32 %v5831_v21, %v14255_v36 }
 0x5ef   : > { %v6587_v28 = vpop.f32.mrf.mxu2  ;;  %v6083_v42 = vpop.f32.mrf.mxu0 }
 0x5f0   : > { %v13053_v33 = vadd.f32 %v6587_v28, %v5899_v0  ;;  %v13056_v49 = vadd.f32 %v6083_v42, %v14256_v9  ;;  %v6339_v34 = vpop.f32.mrf.mxu1  ;;  %v14259_v0 = vld [vmem:[#allocation95_spill] sm:$0xff] }
 0x5f1   : > { %v13059_v43 = vadd.f32 %v6339_v34, %v14257_v45 }
 0x5f5   : > { %v5833_v41 = vpop.f32.mrf.mxu3 }
 0x5f6   : > { %v5900_v4 = vadd.f32 %v5833_v41, %v14258_v48 }
 0x5f7   : > { %v6589_v61 = vpop.f32.mrf.mxu2  ;;  %v6086_v21 = vpop.f32.mrf.mxu0 }
 0x5f8   : > { %v13062_v36 = vadd.f32 %v6589_v61, %v5900_v4  ;;  %v13065_v28 = vadd.f32 %v6086_v21, %v14259_v0  ;;  %v6342_v42 = vpop.f32.mrf.mxu1 }
 0x5f9   : > { %v13068_v9 = vadd.f32 %v6342_v42, %v12717_v40 }
 0x5fa   : > { %14260 = vst [vmem:[#allocation115_spill] sm:$0xff] %v13065_v28  ;;  %5875 = vmatmul.bf16.gmra.mxu3 %v14254_v7  ;;  %6125 = vmatmul.bf16.gmra.mxu0 %v14254_v7 }
 0x5fb   : > { %6381 = vmatmul.bf16.gmra.mxu1 %v12727_v31 }
 0x5fc   : > { %6631 = vmatmul.bf16.gmra.mxu2 %v12727_v31 }
 0x5fd   : > { %v5836_v41 = vpop.f32.mrf.mxu3 }
 0x5fe   : > { %v5901_v11 = vadd.f32 %v5836_v41, %v14261_v32 }
 0x5ff   : > { %v6592_v61 = vpop.f32.mrf.mxu2  ;;  %v6088_v34 = vpop.f32.mrf.mxu0 }
 0x600   : > { %v13075_v45 = vadd.f32 %v6592_v61, %v5901_v11  ;;  %v13078_v48 = vadd.f32 %v6088_v34, %v12723_v30  ;;  %v6344_v40 = vpop.f32.mrf.mxu1  ;;  %v14267_v11 = vld [vmem:[#allocation92_spill] sm:$0xff]  ;;  %v14270_v30 = vld [vmem:[#allocation90_spill] sm:$0xff] }
 0x601   : > { %v13081_v4 = vadd.f32 %v6344_v40, %v12729_v46  ;;  %v14269_v46 = vld [vmem:[#allocation33_spill] sm:$0xff] }
 0x602   : > { %14262 = vst [vmem:[#allocation68_spill] sm:$0xff] %v13075_v45 }
 0x603   : > { %14263 = vst [vmem:[#allocation63_spill] sm:$0xff] %v13078_v48 }
 0x604   : > { %14264 = vst [vmem:[#allocation66_spill] sm:$0xff] %v13081_v4  ;;  %v13107_v4 = vld [vmem:[%s11116_s13 + $0x78] sm:$0xff] }
 0x605   : > { %v5838_v21 = vpop.f32.mrf.mxu3 }
 0x606   : > { %v5902_v7 = vadd.f32 %v5838_v21, %v12720_v12 }
 0x607   : > { %v6594_v0 = vpop.f32.mrf.mxu2  ;;  %v6091_v42 = vpop.f32.mrf.mxu0 }
 0x608   : > { %v13084_v28 = vadd.f32 %v6594_v0, %v5902_v7  ;;  %v13087_v41 = vadd.f32 %v6091_v42, %v12735_v6  ;;  %v6347_v32 = vpop.f32.mrf.mxu1  ;;  %v14271_v7 = vld [vmem:[#allocation34_spill] sm:$0xff] }
 0x609   : > { %v13090_v61 = vadd.f32 %v6347_v32, %v14267_v11  ;;  %v14272_v32 = vld [vmem:[#allocation94_spill] sm:$0xff] }
 0x60a   : > { %14265 = vst [vmem:[#allocation118_spill] sm:$0xff] %v13084_v28  ;;  %5880 = vmatmul.bf16.gmra.mxu3 %v12727_v31  ;;  %6130 = vmatmul.bf16.gmra.mxu0 %v12727_v31  ;;  %v14273_v31 = vld [vmem:[#allocation31_spill] sm:$0xff] }
 0x60b   : > { %14266 = vst [vmem:[#allocation116_spill] sm:$0xff] %v13087_v41  ;;  %6386 = vmatmul.bf16.gmra.mxu1 %v14269_v46 }
 0x60c   : > { %14268 = vst [vmem:[#allocation69_spill] sm:$0xff] %v13090_v61  ;;  %6636 = vmatmul.bf16.gmra.mxu2 %v14269_v46 }
 0x60d   : > { %v5841_v12 = vpop.f32.mrf.mxu3 }
 0x60e   : > { %v5903_v34 = vadd.f32 %v5841_v12, %v14270_v30  ;;  %v14274_v12 = vld [vmem:[#allocation96_spill] sm:$0xff] }
 0x60f   : > { %v6597_v40 = vpop.f32.mrf.mxu2  ;;  %v6093_v21 = vpop.f32.mrf.mxu0 }
 0x610   : > { %v13097_v6 = vadd.f32 %v6597_v40, %v5903_v34  ;;  %v13100_v0 = vadd.f32 %v6093_v21, %v14271_v7  ;;  %v6349_v42 = vpop.f32.mrf.mxu1  ;;  %v14277_v21 = vld [vmem:[#allocation39_spill] sm:$0xff] }
 0x611   : > { %v13103_v11 = vadd.f32 %v6349_v42, %v14272_v32 }
 0x615   : > { %v5843_v41 = vpop.f32.mrf.mxu3 }
 0x616   : > { %v5904_v61 = vadd.f32 %v5843_v41, %v14273_v31 }
 0x617   : > { %v6599_v48 = vpop.f32.mrf.mxu2  ;;  %v6096_v28 = vpop.f32.mrf.mxu0 }
 0x618   : > { %v13109_v45 = vadd.f32 %v6599_v48, %v5904_v61  ;;  %v13112_v30 = vadd.f32 %v6096_v28, %v14274_v12  ;;  %v6352_v34 = vpop.f32.mrf.mxu1 }
 0x619   : > { %v13115_v40 = vadd.f32 %v6352_v34, %v12767_v39 }
 0x61a   : > { %14275 = vst [vmem:[#allocation71_spill] sm:$0xff] %v13112_v30  ;;  %5885 = vmatmul.bf16.gmra.mxu3 %v14269_v46  ;;  %6135 = vmatmul.bf16.gmra.mxu0 %v14269_v46 }
 0x61b   : > { %14276 = vst [vmem:[#allocation74_spill] sm:$0xff] %v13115_v40  ;;  %6391 = vmatmul.bf16.gmra.mxu1 %v13107_v4 }
 0x61c   : > { %6641 = vmatmul.bf16.gmra.mxu2 %v13107_v4 }
 0x61d   : > { %v5846_v41 = vpop.f32.mrf.mxu3 }
 0x61e   : > { %v5905_v48 = vadd.f32 %v5846_v41, %v14277_v21  ;;  %v14282_v41 = vld [vmem:[#allocation38_spill] sm:$0xff] }
 0x61f   : > { %v6602_v61 = vpop.f32.mrf.mxu2  ;;  %v6098_v28 = vpop.f32.mrf.mxu0 }
 0x620   : > { %v13122_v7 = vadd.f32 %v6602_v61, %v5905_v48  ;;  %v13125_v39 = vadd.f32 %v6098_v28, %v12773_v56  ;;  %v6354_v42 = vpop.f32.mrf.mxu1  ;;  %v10596_v56 = vld [vmem:[%s11116_s13] sm:$0xff]  ;;  %v10597_v61 = vld [vmem:[%s11116_s13 + $0x8] sm:$0xff] }
 0x621   : > { %v13128_v32 = vadd.f32 %v6354_v42, %v12776_v14  ;;  %v14285_v28 = vld [vmem:[#allocation35_spill] sm:$0xff] }
 0x622   : > { %14278 = vst [vmem:[#allocation121_spill] sm:$0xff] %v13122_v7 }
 0x623   : > { %14279 = vst [vmem:[#allocation119_spill] sm:$0xff] %v13125_v39 }
 0x624   : > { %14280 = vst [vmem:[#allocation120_spill] sm:$0xff] %v13128_v32 }
 0x625   : > { %v5848_v46 = vpop.f32.mrf.mxu3 }
 0x626   : > { %v5906_v31 = vadd.f32 %v5848_v46, %v12770_v38 }
 0x627   : > { %v6604_v12 = vpop.f32.mrf.mxu2  ;;  %v6101_v34 = vpop.f32.mrf.mxu0 }
 0x628   : > { %v13131_v30 = vadd.f32 %v6604_v12, %v5906_v31  ;;  %v13134_v21 = vadd.f32 %v6101_v34, %v14282_v41  ;;  %v6357_v40 = vpop.f32.mrf.mxu1  ;;  %v14286_v12 = vld [vmem:[#allocation41_spill] sm:$0xff] }
 0x629   : > { %v13137_v48 = vadd.f32 %v6357_v40, %v12789_v37  ;;  %v14287_v37 = vld [vmem:[#allocation97_spill] sm:$0xff] }
 0x62a   : > { %14281 = vst [vmem:[#allocation72_spill] sm:$0xff] %v13131_v30  ;;  %6816 = vmatmul.bf16.vlgmr.msra.gmra.mxu3 %v10596_v56  ;;  %7066 = vmatmul.bf16.vlgmr.msra.gmra.mxu0 %v10597_v61 }
 0x62b   : > { %14283 = vst [vmem:[#allocation123_spill] sm:$0xff] %v13134_v21  ;;  %7316 = vmatmul.bf16.vlgmr.msra.gmra.mxu1 %v10597_v61  ;;  %v14288_v21 = vld [vmem:[#allocation36_spill] sm:$0xff] }
 0x62c   : > { %14284 = vst [vmem:[#allocation77_spill] sm:$0xff] %v13137_v48  ;;  %7566 = vmatmul.bf16.vlgmr.msra.gmra.mxu2 %v10597_v61 }
 0x62d   : > { %v5851_v14 = vpop.f32.mrf.mxu3 }
 0x62e   : > { %v5907_v38 = vadd.f32 %v5851_v14, %v14285_v28  ;;  %v14289_v14 = vld [vmem:[#allocation44_spill] sm:$0xff] }
 0x62f   : > { %v6607_v42 = vpop.f32.mrf.mxu2  ;;  %v6103_v46 = vpop.f32.mrf.mxu0 }
 0x630   : > { %v13142_v31 = vadd.f32 %v6607_v42, %v5907_v38  ;;  %v13145_v34 = vadd.f32 %v6103_v46, %v14286_v12  ;;  %v6359_v41 = vpop.f32.mrf.mxu1  ;;  %v10598_v42 = vld [vmem:[%s11116_s13 + $0x10] sm:$0xff] }
 0x631   : > { %v13148_v40 = vadd.f32 %v6359_v41, %v14287_v37  ;;  %v14291_v12 = vld [vmem:[#allocation101_spill] sm:$0xff] }
 0x635   : > { %v5853_v56 = vpop.f32.mrf.mxu3 }
 0x636   : > { %v5908_v48 = vadd.f32 %v5853_v56, %v14288_v21 }
 0x637   : > { %v6609_v39 = vpop.f32.mrf.mxu2  ;;  %v6106_v30 = vpop.f32.mrf.mxu0 }
 0x638   : > { %v13151_v32 = vadd.f32 %v6609_v39, %v5908_v48  ;;  %v13154_v28 = vadd.f32 %v6106_v30, %v14289_v14  ;;  %v6362_v7 = vpop.f32.mrf.mxu1 }
 0x639   : > { %v13157_v38 = vadd.f32 %v6362_v7, %v12811_v2 }
 0x63a   : > { %14290 = vst [vmem:[#allocation75_spill] sm:$0xff] %v13154_v28  ;;  %6821 = vmatmul.bf16.gmra.mxu3 %v10597_v61  ;;  %7071 = vmatmul.bf16.gmra.mxu0 %v10598_v42 }
 0x63b   : > { %7321 = vmatmul.bf16.gmra.mxu1 %v10598_v42 }
 0x63c   : > { %7571 = vmatmul.bf16.gmra.mxu2 %v10598_v42 }
 0x63d   : > { %v5856_v46 = vpop.f32.mrf.mxu3 }
 0x63e   : > { %v5909_v41 = vadd.f32 %v5856_v46, %v14291_v12 }
 0x63f   : > { %v6612_v21 = vpop.f32.mrf.mxu2  ;;  %v6108_v37 = vpop.f32.mrf.mxu0 }
 0x640   : > { %v13161_v39 = vadd.f32 %v6612_v21, %v5909_v41  ;;  %v13164_v30 = vadd.f32 %v6108_v37, %v12817_v8  ;;  %v6364_v48 = vpop.f32.mrf.mxu1  ;;  %v10599_v8 = vld [vmem:[%s11116_s13 + $0x18] sm:$0xff]  ;;  %v14297_v21 = vld [vmem:[#allocation99_spill] sm:$0xff] }
 0x641   : > { %v13167_v2 = vadd.f32 %v6364_v48, %v12820_v44 }
 0x642   : > { %14292 = vst [vmem:[#allocation125_spill] sm:$0xff] %v13164_v30 }
 0x643   : > { %14293 = vst [vmem:[#allocation80_spill] sm:$0xff] %v13167_v2 }
 0x645   : > { %v5858_v7 = vpop.f32.mrf.mxu3 }
 0x646   : > { %v5910_v61 = vadd.f32 %v5858_v7, %v12814_v63 }
 0x647   : > { %v6614_v56 = vpop.f32.mrf.mxu2  ;;  %v6111_v14 = vpop.f32.mrf.mxu0 }
 0x648   : > { %v13170_v28 = vadd.f32 %v6614_v56, %v5910_v61  ;;  %v13173_v46 = vadd.f32 %v6111_v14, %v12826_v24  ;;  %v6367_v12 = vpop.f32.mrf.mxu1  ;;  %v14298_v61 = vld [vmem:[#allocation102_spill] sm:$0xff]  ;;  %v14299_v14 = vld [vmem:[#allocation40_spill] sm:$0xff] }
 0x649   : > { %v13176_v41 = vadd.f32 %v6367_v12, %v12833_v23  ;;  %v14300_v12 = vld [vmem:[#allocation98_spill] sm:$0xff] }
 0x64a   : > { %14294 = vst [vmem:[#allocation122_spill] sm:$0xff] %v13170_v28  ;;  %6826 = vmatmul.bf16.gmra.mxu3 %v10598_v42  ;;  %7076 = vmatmul.bf16.gmra.mxu0 %v10599_v8 }
 0x64b   : > { %14295 = vst [vmem:[#allocation78_spill] sm:$0xff] %v13173_v46  ;;  %7326 = vmatmul.bf16.gmra.mxu1 %v10599_v8 }
 0x64c   : > { %14296 = vst [vmem:[#allocation126_spill] sm:$0xff] %v13176_v41  ;;  %7576 = vmatmul.bf16.gmra.mxu2 %v10599_v8 }
 0x64d   : > { %v5861_v44 = vpop.f32.mrf.mxu3 }
 0x64e   : > { %v5911_v37 = vadd.f32 %v5861_v44, %v14297_v21  ;;  %v14301_v44 = vld [vmem:[#allocation42_spill] sm:$0xff] }
 0x64f   : > { %v6617_v63 = vpop.f32.mrf.mxu2  ;;  %v6113_v48 = vpop.f32.mrf.mxu0 }
 0x650   : > { %v13180_v7 = vadd.f32 %v6617_v63, %v5911_v37  ;;  %v13183_v24 = vadd.f32 %v6113_v48, %v14298_v61  ;;  %v6369_v56 = vpop.f32.mrf.mxu1  ;;  %v10600_v63 = vld [vmem:[%s11116_s13 + $0x20] sm:$0xff]  ;;  %v14303_v61 = vld [vmem:[#allocation100_spill] sm:$0xff] }
 0x651   : > { %v13186_v23 = vadd.f32 %v6369_v56, %v14299_v14 }
 0x655   : > { %v5863_v42 = vpop.f32.mrf.mxu3 }
 0x656   : > { %v5912_v46 = vadd.f32 %v5863_v42, %v14300_v12 }
 0x657   : > { %v6619_v41 = vpop.f32.mrf.mxu2  ;;  %v6116_v30 = vpop.f32.mrf.mxu0 }
 0x658   : > { %v13189_v28 = vadd.f32 %v6619_v41, %v5912_v46  ;;  %v13192_v21 = vadd.f32 %v6116_v30, %v14301_v44  ;;  %v6372_v2 = vpop.f32.mrf.mxu1 }
 0x659   : > { %v13195_v37 = vadd.f32 %v6372_v2, %v12855_v35 }
 0x65a   : > { %14302 = vst [vmem:[#allocation83_spill] sm:$0xff] %v13192_v21  ;;  %6831 = vmatmul.bf16.gmra.mxu3 %v10599_v8  ;;  %7081 = vmatmul.bf16.gmra.mxu0 %v10600_v63 }
 0x65b   : > { %7331 = vmatmul.bf16.gmra.mxu1 %v10600_v63 }
 0x65c   : > { %7581 = vmatmul.bf16.gmra.mxu2 %v10600_v63 }
 0x65d   : > { %v5866_v48 = vpop.f32.mrf.mxu3 }
 0x65e   : > { %v5913_v56 = vadd.f32 %v5866_v48, %v14303_v61 }
 0x65f   : > { %v6622_v14 = vpop.f32.mrf.mxu2  ;;  %v6118_v42 = vpop.f32.mrf.mxu0 }
 0x660   : > { %v13199_v46 = vadd.f32 %v6622_v14, %v5913_v56  ;;  %v13202_v30 = vadd.f32 %v6118_v42, %v12861_v3  ;;  %v6374_v41 = vpop.f32.mrf.mxu1  ;;  %v10601_v3 = vld [vmem:[%s11116_s13 + $0x28] sm:$0xff]  ;;  %v14306_v14 = vld [vmem:[#allocation45_spill] sm:$0xff] }
 0x661   : > { %v13205_v35 = vadd.f32 %v6374_v41, %v12864_v25 }
 0x665   : > { %v5868_v2 = vpop.f32.mrf.mxu3 }
 0x666   : > { %v5914_v8 = vadd.f32 %v5868_v2, %v12858_v20 }
 0x667   : > { %v6624_v12 = vpop.f32.mrf.mxu2  ;;  %v6121_v44 = vpop.f32.mrf.mxu0 }
 0x668   : > { %v13208_v21 = vadd.f32 %v6624_v12, %v5914_v8  ;;  %v13211_v48 = vadd.f32 %v6121_v44, %v12870_v55  ;;  %v6377_v61 = vpop.f32.mrf.mxu1 }
 0x669   : > { %v13214_v56 = vadd.f32 %v6377_v61, %v12877_v5 }
 0x66a   : > { %14304 = vst [vmem:[#allocation81_spill] sm:$0xff] %v13211_v48  ;;  %6836 = vmatmul.bf16.gmra.mxu3 %v10600_v63  ;;  %7086 = vmatmul.bf16.gmra.mxu0 %v10601_v3 }
 0x66b   : > { %14305 = vst [vmem:[#allocation124_spill] sm:$0xff] %v13214_v56  ;;  %7336 = vmatmul.bf16.gmra.mxu1 %v10601_v3 }
 0x66c   : > { %7586 = vmatmul.bf16.gmra.mxu2 %v10601_v3 }
 0x66d   : > { %v5871_v25 = vpop.f32.mrf.mxu3 }
 0x66e   : > { %v5915_v42 = vadd.f32 %v5871_v25, %v14306_v14  ;;  %v14307_v25 = vld [vmem:[#allocation104_spill] sm:$0xff] }
 0x66f   : > { %v6627_v20 = vpop.f32.mrf.mxu2  ;;  %v6123_v41 = vpop.f32.mrf.mxu0 }
 0x670   : > { %v13218_v2 = vadd.f32 %v6627_v20, %v5915_v42  ;;  %v13221_v55 = vadd.f32 %v6123_v41, %v12883_v13  ;;  %v6379_v8 = vpop.f32.mrf.mxu1  ;;  %v10602_v13 = vld [vmem:[%s11116_s13 + $0x30] sm:$0xff]  ;;  %v14310_v20 = vld [vmem:[#allocation47_spill] sm:$0xff] }
 0x671   : > { %v13224_v5 = vadd.f32 %v6379_v8, %v12886_v10 }
 0x675   : > { %v5873_v63 = vpop.f32.mrf.mxu3 }
 0x676   : > { %v5916_v12 = vadd.f32 %v5873_v63, %v12880_v17 }
 0x677   : > { %v6629_v44 = vpop.f32.mrf.mxu2  ;;  %v6126_v61 = vpop.f32.mrf.mxu0 }
 0x678   : > { %v13227_v48 = vadd.f32 %v6629_v44, %v5916_v12  ;;  %v13230_v14 = vadd.f32 %v6126_v61, %v14307_v25  ;;  %v6382_v56 = vpop.f32.mrf.mxu1 }
 0x679   : > { %v13233_v42 = vadd.f32 %v6382_v56, %v12899_v50 }
 0x67a   : > { %14308 = vst [vmem:[#allocation86_spill] sm:$0xff] %v13230_v14  ;;  %6841 = vmatmul.bf16.gmra.mxu3 %v10601_v3  ;;  %7091 = vmatmul.bf16.gmra.mxu0 %v10602_v13 }
 0x67b   : > { %14309 = vst [vmem:[#allocation127_spill] sm:$0xff] %v13233_v42  ;;  %7341 = vmatmul.bf16.gmra.mxu1 %v10602_v13 }
 0x67c   : > { %7591 = vmatmul.bf16.gmra.mxu2 %v10602_v13 }
 0x67d   : > { %v5876_v10 = vpop.f32.mrf.mxu3 }
 0x67e   : > { %v5917_v41 = vadd.f32 %v5876_v10, %v14310_v20  ;;  %v14314_v10 = vld [vmem:[#allocation50_spill] sm:$0xff] }
 0x67f   : > { %v6632_v17 = vpop.f32.mrf.mxu2  ;;  %v6128_v8 = vpop.f32.mrf.mxu0 }
 0x680   : > { %v13237_v63 = vadd.f32 %v6632_v17, %v5917_v41  ;;  %v13240_v12 = vadd.f32 %v6128_v8, %v12905_v53  ;;  %v6384_v44 = vpop.f32.mrf.mxu1  ;;  %v10603_v53 = vld [vmem:[%s11116_s13 + $0x38] sm:$0xff]  ;;  %v14317_v17 = vld [vmem:[#allocation48_spill] sm:$0xff] }
 0x681   : > { %v13243_v50 = vadd.f32 %v6384_v44, %v12908_v59 }
 0x682   : > { %14311 = vst [vmem:[#allocation129_spill] sm:$0xff] %v13240_v12 }
 0x683   : > { %14312 = vst [vmem:[#allocation128_spill] sm:$0xff] %v13243_v50 }
 0x685   : > { %v5878_v56 = vpop.f32.mrf.mxu3 }
 0x686   : > { %v5918_v3 = vadd.f32 %v5878_v56, %v12902_v62 }
 0x687   : > { %v6634_v61 = vpop.f32.mrf.mxu2  ;;  %v6131_v25 = vpop.f32.mrf.mxu0 }
 0x688   : > { %v13246_v14 = vadd.f32 %v6634_v61, %v5918_v3  ;;  %v13249_v20 = vadd.f32 %v6131_v25, %v14314_v10  ;;  %v6387_v42 = vpop.f32.mrf.mxu1 }
 0x689   : > { %v13252_v41 = vadd.f32 %v6387_v42, %v12921_v60 }
 0x68a   : > { %14313 = vst [vmem:[#allocation84_spill] sm:$0xff] %v13246_v14  ;;  %6846 = vmatmul.bf16.gmra.mxu3 %v10602_v13  ;;  %7096 = vmatmul.bf16.gmra.mxu0 %v10603_v53 }
 0x68b   : > { %14315 = vst [vmem:[#allocation131_spill] sm:$0xff] %v13249_v20  ;;  %7346 = vmatmul.bf16.gmra.mxu1 %v10603_v53 }
 0x68c   : > { %14316 = vst [vmem:[#allocation133_spill] sm:$0xff] %v13252_v41  ;;  %7596 = vmatmul.bf16.gmra.mxu2 %v10603_v53 }
 0x68d   : > { %v5881_v59 = vpop.f32.mrf.mxu3 }
 0x68e   : > { %v5919_v8 = vadd.f32 %v5881_v59, %v14317_v17  ;;  %v14322_v59 = vld [vmem:[#allocation103_spill] sm:$0xff] }
 0x68f   : > { %v6637_v62 = vpop.f32.mrf.mxu2  ;;  %v6133_v44 = vpop.f32.mrf.mxu0 }
 0x690   : > { %v13256_v56 = vadd.f32 %v6637_v62, %v5919_v8  ;;  %v13259_v3 = vadd.f32 %v6133_v44, %v12927_v15  ;;  %v6389_v61 = vpop.f32.mrf.mxu1  ;;  %v10604_v15 = vld [vmem:[%s11116_s13 + $0x40] sm:$0xff]  ;;  %v14325_v62 = vld [vmem:[#allocation53_spill] sm:$0xff] }
 0x691   : > { %v13262_v60 = vadd.f32 %v6389_v61, %v12930_v26  ;;  %v7711_v61 = vlaneseq }
 0x692   : > { %14318 = vst [vmem:[#allocation89_spill] sm:$0xff] %v13256_v56 }
 0x693   : > { %14319 = vst [vmem:[#allocation130_spill] sm:$0xff] %v13259_v3 }
 0x694   : > { %14320 = vst [vmem:[#allocation87_spill] sm:$0xff] %v13262_v60 }
 0x695   : > { %v5883_v42 = vpop.f32.mrf.mxu3 }
 0x696   : > { %v5920_v13 = vadd.f32 %v5883_v42, %v12924_v29 }
 0x697   : > { %v6639_v25 = vpop.f32.mrf.mxu2  ;;  %v6136_v10 = vpop.f32.mrf.mxu0 }
 0x698   : > { %v13265_v20 = vadd.f32 %v6639_v25, %v5920_v13  ;;  %v13268_v17 = vadd.f32 %v6136_v10, %v14322_v59  ;;  %v6392_v41 = vpop.f32.mrf.mxu1 }
 0x699   : > { %v13271_v8 = vadd.f32 %v6392_v41, %v12943_v19  ;;  %v14328_v19 = vld [vmem:[#allocation51_spill] sm:$0xff] }
 0x69a   : > { %14321 = vst [vmem:[#allocation67_spill] sm:$0xff] %v13265_v20  ;;  %6851 = vmatmul.bf16.gmra.mxu3 %v10603_v53  ;;  %7101 = vmatmul.bf16.gmra.mxu0 %v10604_v15  ;;  %v13283_v53 = vshrl.u32 %v7711_v61, 7 }
 0x69b   : > { %14323 = vst [vmem:[#allocation43_spill] sm:$0xff] %v13268_v17  ;;  %7351 = vmatmul.bf16.gmra.mxu1 %v10604_v15  ;;  %v14330_v17 = vld [vmem:[#allocation106_spill] sm:$0xff] }
 0x69c   : > { %14324 = vst [vmem:[#allocation134_spill] sm:$0xff] %v13271_v8  ;;  %7601 = vmatmul.bf16.gmra.mxu2 %v10604_v15 }
 0x69d   : > { %v5886_v26 = vpop.f32.mrf.mxu3 }
 0x69e   : > { %v5921_v44 = vadd.f32 %v5886_v26, %v14325_v62  ;;  %v7748_v26 = vand.u32 15, %v13283_v53 }
 0x69f   : > { %v6642_v29 = vpop.f32.mrf.mxu2  ;;  %v6138_v42 = vpop.f32.mrf.mxu0 }
 0x6a0   : > { %v13275_v13 = vadd.f32 %v6642_v29, %v5921_v44  ;;  %v13278_v25 = vadd.f32 %v6138_v42, %v12949_v52  ;;  %v6394_v10 = vpop.f32.mrf.mxu1  ;;  %v14332_v44 = vld [vmem:[#allocation108_spill] sm:$0xff]  ;;  %vm8482_vm1 = vcmp.eq.s32.totalorder %v7748_v26, 0  ;;  %v14333_v26 = vld [vmem:[#allocation105_spill] sm:$0xff] }
 0x6a1   : > { %v13281_v41 = vadd.f32 %v6394_v10, %v14328_v19  ;;  %v10605_v10 = vld [vmem:[%s11116_s13 + $0x48] sm:$0xff] }
 0x6a2   : > { %14326 = vst [vmem:[#allocation70_spill] sm:$0xff] %v13275_v13 }
 0x6a3   : > { %14327 = vst [vmem:[#allocation46_spill] sm:$0xff] %v13278_v25 }
 0x6a4   : > { %14329 = vst [vmem:[#allocation132_spill] sm:$0xff] %v13281_v41 }
 0x6a5   : > { %v5888_v59 = vpop.f32.mrf.mxu3 }
 0x6a6   : > { %v5922_v8 = vadd.f32 %v5888_v59, %v14330_v17 }
 0x6a7   : > { %v6644_v3 = vpop.f32.mrf.mxu2  ;;  %v7067_v62 = vpop.f32.mrf.mxu0 }
 0x6a8   : > { %v13287_v20 = vadd.f32 %v6644_v3, %v5922_v8  ;;  %v7147_v29 = vadd.f32 %v7067_v62, %v14332_v44  ;;  %v7317_v52 = vpop.f32.mrf.mxu1 }
 0x6a9   : > { %v7397_v17 = vadd.f32 %v7317_v52, %v12965_v1 }
 0x6aa   : > { %14331 = vst [vmem:[#allocation73_spill] sm:$0xff] %v13287_v20  ;;  %v8225_v42 = vrot.slane %v7147_v29, 7  ;;  %6856 = vmatmul.bf16.gmra.mxu3 %v10604_v15  ;;  %7106 = vmatmul.bf16.gmra.mxu0 %v10605_v10  ;;  %v7714_v29 = vadd.s32 16, %v13283_v53 }
 0x6ab   : > { %7356 = vmatmul.bf16.gmra.mxu1 %v10605_v10 }
 0x6ac   : > { %7606 = vmatmul.bf16.gmra.mxu2 %v10605_v10  ;;  %v8320_v61 = vsel %vm8224_vm0, 0.0, %v8225_v42  ;;  %v7762_v52 = vand.u32 15, %v7714_v29 }
 0x6ad   : > { %v8514_v19 = vsel %vm8482_vm1, 0.0, %v8320_v61  ;;  %v6817_v59 = vpop.f32.mrf.mxu3 }
 0x6ae   : > { %v8546_v25 = vadd.f32 %v8514_v19, %v7397_v17  ;;  %v6897_v15 = vadd.f32 %v6817_v59, %v14333_v26  ;;  %v14334_v17 = vld [vmem:[#allocation109_spill] sm:$0xff]  ;;  %vm13300_vm3 = vcmp.eq.s32.totalorder %v7762_v52, 0 }
 0x6af   : > { %v7567_v3 = vpop.f32.mrf.mxu2  ;;  %v7069_v8 = vpop.f32.mrf.mxu0 }
 0x6b0   : > { %v7148_v62 = vadd.f32 %v7069_v8, %v12971_v51  ;;  %v7319_v44 = vpop.f32.mrf.mxu1  ;;  %v7647_v61 = vadd.f32 %v7567_v3, %v6897_v15  ;;  %v14335_v8 = vld [vmem:[#allocation54_spill] sm:$0xff]  ;;  %v7713_v3 = vadd.s32 8, %v13283_v53 }
 0x6b1   : > { %v7398_v41 = vadd.f32 %v7319_v44, %v12974_v57 }
 0x6b2   : > { %v8226_v20 = vrot.slane %v7148_v62, 7  ;;  %v8354_v57 = vrot.slane %v7647_v61, 1  ;;  %v7755_v52 = vand.u32 15, %v7713_v3 }
 0x6b4   : > { %v8227_v13 = vsel %vm8224_vm0, %v8225_v42, %v8226_v20  ;;  %vm8579_vm4 = vcmp.eq.s32.totalorder %v7755_v52, 15 }
 0x6b5   : > { %v8547_v60 = vadd.f32 %v8227_v13, %v7398_v41  ;;  %v6819_v1 = vpop.f32.mrf.mxu3  ;;  %v10606_v41 = vld [vmem:[%s11116_s13 + $0x50] sm:$0xff] }
 0x6b6   : > { %v6898_v19 = vadd.f32 %v6819_v1, %v14334_v17 }
 0x6b7   : > { %v7569_v56 = vpop.f32.mrf.mxu2  ;;  %v7072_v12 = vpop.f32.mrf.mxu0 }
 0x6b8   : > { %v7648_v51 = vadd.f32 %v7569_v56, %v6898_v19  ;;  %v7149_v14 = vadd.f32 %v7072_v12, %v14335_v8  ;;  %v7322_v50 = vpop.f32.mrf.mxu1  ;;  %v14339_v19 = vld [vmem:[#allocation113_spill] sm:$0xff] }
 0x6b9   : > { %v7399_v12 = vadd.f32 %v7322_v50, %v12987_v54  ;;  %v13317_v54 = vld [vmem:[%s13641_s6] ss:$0 sm:$0xff] }
 0x6ba   : > { %v8355_v42 = vrot.slane %v7648_v51, 1  ;;  %v8228_v13 = vrot.slane %v7149_v14, 7  ;;  %6861 = vmatmul.bf16.gmra.mxu3 %v10605_v10  ;;  %7111 = vmatmul.bf16.gmra.mxu0 %v10606_v41  ;;  %v14338_v14 = vld [vmem:[#allocation56_spill] sm:$0xff] }
 0x6bb   : > { %7361 = vmatmul.bf16.gmra.mxu1 %v10606_v41 }
 0x6bc   : > { %7611 = vmatmul.bf16.gmra.mxu2 %v10606_v41  ;;  %v8356_v56 = vsel %vm8353_vm2, %v8354_v57, %v8355_v42  ;;  %v8229_v62 = vsel %vm8224_vm0, %v8226_v20, %v8228_v13  ;;  %v7716_v57 = vadd.s32 32, %v13283_v53 }
 0x6bd   : > { %v8642_v44 = vadd.f32 %v8546_v25, %v8356_v56  ;;  %v8516_v29 = vsel %vm13300_vm3, 0.0, %v8229_v62  ;;  %v6822_v26 = vpop.f32.mrf.mxu3  ;;  %v14340_v25 = vld [vmem:[#allocation107_spill] sm:$0xff] }
 0x6be   : > { %v8548_v15 = vadd.f32 %v8516_v29, %v7399_v12  ;;  %v6899_v10 = vadd.f32 %v6822_v26, %v14338_v14  ;;  %v7776_v26 = vand.u32 15, %v7716_v57  ;;  %v7715_v57 = vadd.s32 24, %v13283_v53 }
 0x6bf   : > { %v7572_v1 = vpop.f32.mrf.mxu2  ;;  %v7074_v61 = vpop.f32.mrf.mxu0  ;;  %v8678_v14 = vadd.f32 %v13317_v54, %v8642_v44 }
 0x6c0   : > { %v7649_v17 = vadd.f32 %v7572_v1, %v6899_v10  ;;  %v7150_v51 = vadd.f32 %v7074_v61, %v14339_v19  ;;  %v7324_v8 = vpop.f32.mrf.mxu1  ;;  %v14341_v1 = vld [vmem:[#allocation59_spill] sm:$0xff]  ;;  %vm13326_vm5 = vcmp.eq.s32.totalorder %v7776_v26, 0 }
 0x6c1   : > { %v7400_v59 = vadd.f32 %v7324_v8, %v14340_v25  ;;  %v14342_v8 = vld [vmem:[#allocation57_spill] sm:$0xff] }
 0x6c2   : > { %v8357_v50 = vrot.slane %v7649_v17, 1  ;;  %v8230_v20 = vrot.slane %v7150_v51, 7 }
 0x6c4   : > { %v8358_v56 = vsel %vm8353_vm2, %v8355_v42, %v8357_v50  ;;  %v8231_v3 = vsel %vm8224_vm0, %v8228_v13, %v8230_v20 }
 0x6c5   : > { %v8611_v12 = vsel %vm8579_vm4, 0.0, %v8358_v56  ;;  %v8549_v62 = vadd.f32 %v8231_v3, %v7400_v59  ;;  %v6824_v29 = vpop.f32.mrf.mxu3  ;;  %v8710_v59 = vmax.f32 %v8678_v14, 0.0  ;;  %v10607_v3 = vld [vmem:[%s11116_s13 + $0x58] sm:$0xff] }
 0x6c6   : > { %v8643_v10 = vadd.f32 %v8611_v12, %v8547_v60  ;;  %v6900_v61 = vadd.f32 %v6824_v29, %v14341_v1 }
 0x6c7   : > { %v7574_v19 = vpop.f32.mrf.mxu2  ;;  %v7077_v17 = vpop.f32.mrf.mxu0 }
 0x6c8   : > { %v8679_v52 = vadd.f32 %v13317_v54, %v8643_v10  ;;  %v7650_v51 = vadd.f32 %v7574_v19, %v6900_v61  ;;  %v7151_v25 = vadd.f32 %v7077_v17, %v14342_v8  ;;  %v7327_v42 = vpop.f32.mrf.mxu1  ;;  %v14345_v19 = vld [vmem:[#allocation110_spill] sm:$0xff] }
 0x6c9   : > { %v7401_v26 = vadd.f32 %v7327_v42, %v13009_v58 }
 0x6ca   : > { %v8711_v44 = vmax.f32 %v8679_v52, 0.0  ;;  %v8359_v60 = vrot.slane %v7650_v51, 1  ;;  %v8232_v56 = vrot.slane %v7151_v25, 7  ;;  %6866 = vmatmul.bf16.gmra.mxu3 %v10606_v41  ;;  %7116 = vmatmul.bf16.gmra.mxu0 %v10607_v3  ;;  %v7769_v51 = vand.u32 15, %v7715_v57 }
 0x6cb   : > { %7366 = vmatmul.bf16.gmra.mxu1 %v10607_v3 }
 0x6cc   : > { %7616 = vmatmul.bf16.gmra.mxu2 %v10607_v3  ;;  %v10353_v12 = vpack.c.bf16 %v8711_v44, %v8710_v59  ;;  %v8360_v29 = vsel %vm8353_vm2, %v8357_v50, %v8359_v60  ;;  %v8233_v10 = vsel %vm8224_vm0, %v8230_v20, %v8232_v56  ;;  %vm8581_vm6 = vcmp.eq.s32.totalorder %v7769_v51, 15 }
 0x6cd   : > { %v8644_v1 = vadd.f32 %v8548_v15, %v8360_v29  ;;  %v8518_v14 = vsel %vm13326_vm5, 0.0, %v8233_v10  ;;  %v6827_v61 = vpop.f32.mrf.mxu3  ;;  %v7718_v15 = vadd.s32 48, %v13283_v53 }
 0x6ce   : > { %10354 = vst [vmem:[%s13338_s15] sm:$0xff] %v10353_v12   ;;  %v8550_v41 = vadd.f32 %v8518_v14, %v7401_v26  ;;  %v6901_v17 = vadd.f32 %v6827_v61, %v14345_v19 }
 0x6cf   : > { %v7577_v52 = vpop.f32.mrf.mxu2  ;;  %v7079_v8 = vpop.f32.mrf.mxu0  ;;  %v7790_v57 = vand.u32 15, %v7718_v15  ;;  %v8680_v10 = vadd.f32 %v13317_v54, %v8644_v1 }
 0x6d0   : > { %v7651_v50 = vadd.f32 %v7577_v52, %v6901_v17  ;;  %v7152_v58 = vadd.f32 %v7079_v8, %v13015_v22  ;;  %v7329_v25 = vpop.f32.mrf.mxu1  ;;  %v7717_v8 = vadd.s32 40, %v13283_v53 }
 0x6d1   : > { %v7402_v13 = vadd.f32 %v7329_v25, %v13018_v47  ;;  %v14346_v47 = vld [vmem:[#allocation60_spill] sm:$0xff]  ;;  %vm13351_vm7 = vcmp.eq.s32.totalorder %v7790_v57, 0 }
 0x6d2   : > { %v8361_v20 = vrot.slane %v7651_v50, 1  ;;  %v8234_v42 = vrot.slane %v7152_v58, 7  ;;  %v8712_v50 = vmax.f32 %v8680_v10, 0.0  ;;  %v14349_v10 = vld [vmem:[#allocation62_spill] sm:$0xff] }
 0x6d4   : > { %v8362_v59 = vsel %vm8353_vm2, %v8359_v60, %v8361_v20  ;;  %v8235_v44 = vsel %vm8224_vm0, %v8232_v56, %v8234_v42 }
 0x6d5   : > { %v8613_v12 = vsel %vm8581_vm6, 0.0, %v8362_v59  ;;  %v8551_v29 = vadd.f32 %v8235_v44, %v7402_v13  ;;  %v6829_v26 = vpop.f32.mrf.mxu3 }
 0x6d6   : > { %v8645_v22 = vadd.f32 %v8613_v12, %v8549_v62  ;;  %v6902_v14 = vadd.f32 %v6829_v26, %v13012_v27  ;;  %v10608_v27 = vld [vmem:[%s11116_s13 + $0x60] sm:$0xff] }
 0x6d7   : > { %v7579_v61 = vpop.f32.mrf.mxu2  ;;  %v7082_v19 = vpop.f32.mrf.mxu0 }
 0x6d8   : > { %v8681_v17 = vadd.f32 %v13317_v54, %v8645_v22  ;;  %v7652_v52 = vadd.f32 %v7579_v61, %v6902_v14  ;;  %v7153_v51 = vadd.f32 %v7082_v19, %v14346_v47  ;;  %v7332_v60 = vpop.f32.mrf.mxu1  ;;  %v7783_v14 = vand.u32 15, %v7717_v8 }
 0x6d9   : > { %v7403_v13 = vadd.f32 %v7332_v60, %v13031_v18  ;;  %v7720_v18 = vadd.s32 64, %v13283_v53 }
 0x6da   : > { %v8713_v1 = vmax.f32 %v8681_v17, 0.0  ;;  %v8363_v62 = vrot.slane %v7652_v52, 1  ;;  %v8236_v58 = vrot.slane %v7153_v51, 7  ;;  %6871 = vmatmul.bf16.gmra.mxu3 %v10607_v3  ;;  %7121 = vmatmul.bf16.gmra.mxu0 %v10608_v27  ;;  %vm8583_vm8 = vcmp.eq.s32.totalorder %v7783_v14, 15 }
 0x6db   : > { %7371 = vmatmul.bf16.gmra.mxu1 %v10608_v27  ;;  %v7804_v8 = vand.u32 15, %v7720_v18  ;;  %v7719_v14 = vadd.s32 56, %v13283_v53 }
 0x6dc   : > { %7621 = vmatmul.bf16.gmra.mxu2 %v10608_v27  ;;  %v10358_v25 = vpack.c.bf16 %v8713_v1, %v8712_v50  ;;  %v8364_v15 = vsel %vm8353_vm2, %v8361_v20, %v8363_v62  ;;  %v8237_v59 = vsel %vm8224_vm0, %v8234_v42, %v8236_v58  ;;  %v14350_v42 = vld [vmem:[#allocation65_spill] sm:$0xff] }
 0x6dd   : > { %v8646_v44 = vadd.f32 %v8550_v41, %v8364_v15  ;;  %v8520_v12 = vsel %vm13351_vm7, 0.0, %v8237_v59  ;;  %v6832_v26 = vpop.f32.mrf.mxu3  ;;  %v14351_v15 = vld [vmem:[#allocation114_spill] sm:$0xff]  ;;  %vm13373_vm9 = vcmp.eq.s32.totalorder %v7804_v8, 0  ;;  %v14355_v8 = vld [vmem:[#allocation111_spill] sm:$0xff] }
 0x6de   : > { %10430 = vst [vmem:[%s13338_s15 + $0x8] sm:$0xff] %v10358_v25   ;;  %v8552_v57 = vadd.f32 %v8520_v12, %v7403_v13  ;;  %v6903_v3 = vadd.f32 %v6832_v26, %v14349_v10 }
 0x6df   : > { %v7582_v22 = vpop.f32.mrf.mxu2  ;;  %v7084_v61 = vpop.f32.mrf.mxu0  ;;  %v8682_v25 = vadd.f32 %v13317_v54, %v8646_v44 }
 0x6e0   : > { %v7653_v19 = vadd.f32 %v7582_v22, %v6903_v3  ;;  %v7154_v17 = vadd.f32 %v7084_v61, %v13037_v16  ;;  %v7334_v20 = vpop.f32.mrf.mxu1  ;;  %v14352_v3 = vld [vmem:[#allocation117_spill] sm:$0xff] }
 0x6e1   : > { %v7404_v47 = vadd.f32 %v7334_v20, %v14350_v42  ;;  %v8714_v61 = vmax.f32 %v8682_v25, 0.0 }
 0x6e2   : > { %v8365_v52 = vrot.slane %v7653_v19, 1  ;;  %v8238_v41 = vrot.slane %v7154_v17, 7  ;;  %v10609_v17 = vld [vmem:[%s11116_s13 + $0x68] sm:$0xff] }
 0x6e4   : > { %v8366_v51 = vsel %vm8353_vm2, %v8363_v62, %v8365_v52  ;;  %v8239_v60 = vsel %vm8224_vm0, %v8236_v58, %v8238_v41 }
 0x6e5   : > { %v8615_v56 = vsel %vm8583_vm8, 0.0, %v8366_v51  ;;  %v8553_v50 = vadd.f32 %v8239_v60, %v7404_v47  ;;  %v6834_v1 = vpop.f32.mrf.mxu3 }
 0x6e6   : > { %v8647_v16 = vadd.f32 %v8615_v56, %v8551_v29  ;;  %v6904_v13 = vadd.f32 %v6834_v1, %v14351_v15 }
 0x6e7   : > { %v7584_v59 = vpop.f32.mrf.mxu2  ;;  %v7087_v12 = vpop.f32.mrf.mxu0 }
 0x6e8   : > { %v8683_v26 = vadd.f32 %v13317_v54, %v8647_v16  ;;  %v7654_v10 = vadd.f32 %v7584_v59, %v6904_v13  ;;  %v7155_v22 = vadd.f32 %v7087_v12, %v14352_v3  ;;  %v7337_v62 = vpop.f32.mrf.mxu1  ;;  %v7797_v16 = vand.u32 15, %v7719_v14 }
 0x6e9   : > { %v7405_v42 = vadd.f32 %v7337_v62, %v13053_v33  ;;  %v7722_v33 = vadd.s32 80, %v13283_v53 }
 0x6ea   : > { %v8715_v44 = vmax.f32 %v8683_v26, 0.0  ;;  %v8367_v29 = vrot.slane %v7654_v10, 1  ;;  %v8240_v19 = vrot.slane %v7155_v22, 7  ;;  %6876 = vmatmul.bf16.gmra.mxu3 %v10608_v27  ;;  %7126 = vmatmul.bf16.gmra.mxu0 %v10609_v17  ;;  %vm8585_vm10 = vcmp.eq.s32.totalorder %v7797_v16, 15 }
 0x6eb   : > { %7376 = vmatmul.bf16.gmra.mxu1 %v10609_v17  ;;  %v7818_v58 = vand.u32 15, %v7722_v33  ;;  %v14359_v33 = vld [vmem:[#allocation115_spill] sm:$0xff] }
 0x6ec   : > { %7626 = vmatmul.bf16.gmra.mxu2 %v10609_v17  ;;  %v10363_v20 = vpack.c.bf16 %v8715_v44, %v8714_v61  ;;  %v8368_v18 = vsel %vm8353_vm2, %v8365_v52, %v8367_v29  ;;  %v8241_v47 = vsel %vm8224_vm0, %v8238_v41, %v8240_v19 }
 0x6ed   : > { %v8648_v51 = vadd.f32 %v8552_v57, %v8368_v18  ;;  %v8522_v60 = vsel %vm13373_vm9, 0.0, %v8241_v47  ;;  %v6837_v56 = vpop.f32.mrf.mxu3  ;;  %vm13395_vm11 = vcmp.eq.s32.totalorder %v7818_v58, 0  ;;  %v7721_v47 = vadd.s32 72, %v13283_v53 }
 0x6ee   : > { %10431 = vst [vmem:[%s13338_s15 + $0x10] sm:$0xff] %v10363_v20   ;;  %v8554_v1 = vadd.f32 %v8522_v60, %v7405_v42  ;;  %v6905_v27 = vadd.f32 %v6837_v56, %v14355_v8 }
 0x6ef   : > { %v7587_v25 = vpop.f32.mrf.mxu2  ;;  %v7089_v15 = vpop.f32.mrf.mxu0  ;;  %v8684_v14 = vadd.f32 %v13317_v54, %v8648_v51 }
 0x6f0   : > { %v7655_v13 = vadd.f32 %v7587_v25, %v6905_v27  ;;  %v7156_v59 = vadd.f32 %v7089_v15, %v13059_v43  ;;  %v7339_v52 = vpop.f32.mrf.mxu1  ;;  %v14358_v27 = vld [vmem:[#allocation68_spill] sm:$0xff] }
 0x6f1   : > { %v7406_v41 = vadd.f32 %v7339_v52, %v13062_v36  ;;  %v8716_v60 = vmax.f32 %v8684_v14, 0.0  ;;  %v7724_v14 = vadd.s32 96, %v13283_v53 }
 0x6f2   : > { %v8369_v12 = vrot.slane %v7655_v13, 1  ;;  %v8242_v57 = vrot.slane %v7156_v59, 7 }
 0x6f4   : > { %v8370_v26 = vsel %vm8353_vm2, %v8367_v29, %v8369_v12  ;;  %v8243_v10 = vsel %vm8224_vm0, %v8240_v19, %v8242_v57 }
 0x6f5   : > { %v8617_v3 = vsel %vm8585_vm10, 0.0, %v8370_v26  ;;  %v8555_v22 = vadd.f32 %v8243_v10, %v7406_v41  ;;  %v6839_v62 = vpop.f32.mrf.mxu3  ;;  %v7811_v26 = vand.u32 15, %v7721_v47 }
 0x6f6   : > { %v8649_v43 = vadd.f32 %v8617_v3, %v8553_v50  ;;  %v6906_v61 = vadd.f32 %v6839_v62, %v13056_v49  ;;  %v10610_v49 = vld [vmem:[%s11116_s13 + $0x70] sm:$0xff]  ;;  %v14360_v62 = vld [vmem:[#allocation66_spill] sm:$0xff] }
 0x6f7   : > { %v7589_v44 = vpop.f32.mrf.mxu2  ;;  %v7092_v20 = vpop.f32.mrf.mxu0  ;;  %vm8587_vm12 = vcmp.eq.s32.totalorder %v7811_v26, 15 }
 0x6f8   : > { %v8685_v18 = vadd.f32 %v13317_v54, %v8649_v43  ;;  %v7656_v42 = vadd.f32 %v7589_v44, %v6906_v61  ;;  %v7157_v36 = vadd.f32 %v7092_v20, %v13068_v9  ;;  %v7342_v29 = vpop.f32.mrf.mxu1 }
 0x6f9   : > { %v7407_v25 = vadd.f32 %v7342_v29, %v14358_v27  ;;  %v7832_v29 = vand.u32 15, %v7724_v14  ;;  %v14366_v14 = vld [vmem:[#allocation116_spill] sm:$0xff] }
 0x6fa   : > { %v8717_v51 = vmax.f32 %v8685_v18, 0.0  ;;  %v8371_v50 = vrot.slane %v7656_v42, 1  ;;  %v8244_v56 = vrot.slane %v7157_v36, 7  ;;  %6881 = vmatmul.bf16.gmra.mxu3 %v10609_v17  ;;  %7131 = vmatmul.bf16.gmra.mxu0 %v10610_v49 }
 0x6fb   : > { %7381 = vmatmul.bf16.gmra.mxu1 %v10610_v49  ;;  %vm13417_vm13 = vcmp.eq.s32.totalorder %v7832_v29, 0 }
 0x6fc   : > { %7631 = vmatmul.bf16.gmra.mxu2 %v10610_v49  ;;  %v10368_v8 = vpack.c.bf16 %v8717_v51, %v8716_v60  ;;  %v8372_v9 = vsel %vm8353_vm2, %v8369_v12, %v8371_v50  ;;  %v8245_v16 = vsel %vm8224_vm0, %v8242_v57, %v8244_v56  ;;  %v14361_v57 = vld [vmem:[#allocation118_spill] sm:$0xff]  ;;  %v14362_v60 = vld [vmem:[#allocation63_spill] sm:$0xff] }
 0x6fd   : > { %v8650_v15 = vadd.f32 %v8554_v1, %v8372_v9  ;;  %v8524_v13 = vsel %vm13395_vm11, 0.0, %v8245_v16  ;;  %v6842_v59 = vpop.f32.mrf.mxu3  ;;  %v14363_v16 = vld [vmem:[#allocation69_spill] sm:$0xff] }
 0x6fe   : > { %10432 = vst [vmem:[%s13338_s15 + $0x18] sm:$0xff] %v10368_v8   ;;  %v8556_v52 = vadd.f32 %v8524_v13, %v7407_v25  ;;  %v6907_v17 = vadd.f32 %v6842_v59, %v14359_v33 }
 0x6ff   : > { %v7592_v41 = vpop.f32.mrf.mxu2  ;;  %v7094_v10 = vpop.f32.mrf.mxu0  ;;  %v8686_v19 = vadd.f32 %v13317_v54, %v8650_v15 }
 0x700   : > { %v7657_v3 = vadd.f32 %v7592_v41, %v6907_v17  ;;  %v7158_v58 = vadd.f32 %v7094_v10, %v14360_v62  ;;  %v7344_v12 = vpop.f32.mrf.mxu1 }
 0x701   : > { %v7408_v61 = vadd.f32 %v7344_v12, %v14361_v57  ;;  %v8718_v33 = vmax.f32 %v8686_v19, 0.0 }
 0x702   : > { %v8373_v43 = vrot.slane %v7657_v3, 1  ;;  %v8246_v1 = vrot.slane %v7158_v58, 7 }
 0x704   : > { %v8374_v44 = vsel %vm8353_vm2, %v8371_v50, %v8373_v43  ;;  %v8247_v20 = vsel %vm8224_vm0, %v8244_v56, %v8246_v1  ;;  %v7723_v56 = vadd.s32 88, %v13283_v53 }
 0x705   : > { %v8619_v18 = vsel %vm8587_vm12, 0.0, %v8374_v44  ;;  %v8557_v42 = vadd.f32 %v8247_v20, %v7408_v61  ;;  %v6844_v36 = vpop.f32.mrf.mxu3 }
 0x706   : > { %v8651_v47 = vadd.f32 %v8619_v18, %v8555_v22  ;;  %v6908_v51 = vadd.f32 %v6844_v36, %v14362_v60  ;;  %v7825_v44 = vand.u32 15, %v7723_v56  ;;  %v14367_v56 = vld [vmem:[#allocation74_spill] sm:$0xff] }
 0x707   : > { %v7594_v8 = vpop.f32.mrf.mxu2  ;;  %v7097_v9 = vpop.f32.mrf.mxu0 }
 0x708   : > { %v8687_v27 = vadd.f32 %v13317_v54, %v8651_v47  ;;  %v7658_v25 = vadd.f32 %v7594_v8, %v6908_v51  ;;  %v7159_v13 = vadd.f32 %v7097_v9, %v14363_v16  ;;  %v7347_v59 = vpop.f32.mrf.mxu1  ;;  %vm8589_vm14 = vcmp.eq.s32.totalorder %v7825_v44, 15  ;;  %v14372_v44 = vld [vmem:[#allocation71_spill] sm:$0xff] }
 0x709   : > { %v7409_v10 = vadd.f32 %v7347_v59, %v13097_v6  ;;  %v7726_v6 = vadd.s32 112, %v13283_v53 }
 0x70a   : > { %v8719_v15 = vmax.f32 %v8687_v27, 0.0  ;;  %v8375_v22 = vrot.slane %v7658_v25, 1  ;;  %v8248_v17 = vrot.slane %v7159_v13, 7  ;;  %6886 = vmatmul.bf16.gmra.mxu3 %v10610_v49  ;;  %7136 = vmatmul.bf16.gmra.mxu0 %v13107_v4 }
 0x70b   : > { %7386 = vmatmul.bf16.gmra.mxu1 %v13107_v4  ;;  %v7846_v9 = vand.u32 15, %v7726_v6 }
 0x70c   : > { %7636 = vmatmul.bf16.gmra.mxu2 %v13107_v4  ;;  %v10373_v41 = vpack.c.bf16 %v8719_v15, %v8718_v33  ;;  %v8376_v26 = vsel %vm8353_vm2, %v8373_v43, %v8375_v22  ;;  %v8249_v3 = vsel %vm8224_vm0, %v8246_v1, %v8248_v17 }
 0x70d   : > { %v8652_v62 = vadd.f32 %v8556_v52, %v8376_v26  ;;  %v8526_v58 = vsel %vm13417_vm13, 0.0, %v8249_v3  ;;  %v6847_v12 = vpop.f32.mrf.mxu3  ;;  %vm13441_vm15 = vcmp.eq.s32.totalorder %v7846_v9, 0 }
 0x70e   : > { %10433 = vst [vmem:[%s13338_s15 + $0x20] sm:$0xff] %v10373_v41   ;;  %v8558_v49 = vadd.f32 %v8526_v58, %v7409_v10  ;;  %v6909_v57 = vadd.f32 %v6847_v12, %v14366_v14 }
 0x70f   : > { %v7597_v61 = vpop.f32.mrf.mxu2  ;;  %v7099_v20 = vpop.f32.mrf.mxu0  ;;  %v8688_v27 = vadd.f32 %v13317_v54, %v8652_v62  ;;  %v14371_v62 = vld [vmem:[#allocation121_spill] sm:$0xff] }
 0x710   : > { %v7659_v18 = vadd.f32 %v7597_v61, %v6909_v57  ;;  %v7160_v36 = vadd.f32 %v7099_v20, %v13103_v11  ;;  %v7349_v43 = vpop.f32.mrf.mxu1 }
 0x711   : > { %v7410_v1 = vadd.f32 %v7349_v43, %v13109_v45 }
 0x712   : > { %v8377_v29 = vrot.slane %v7659_v18, 1  ;;  %v8250_v52 = vrot.slane %v7160_v36, 7 }
 0x714   : > { %v8378_v19 = vsel %vm8353_vm2, %v8375_v22, %v8377_v29  ;;  %v8251_v47 = vsel %vm8224_vm0, %v8248_v17, %v8250_v52  ;;  %v7725_v22 = vadd.s32 104, %v13283_v53  ;;  %v8720_v17 = vmax.f32 %v8688_v27, 0.0 }
 0x715   : > { %v8621_v60 = vsel %vm8589_vm14, 0.0, %v8378_v19  ;;  %v8559_v51 = vadd.f32 %v8251_v47, %v7410_v1  ;;  %v6849_v8 = vpop.f32.mrf.mxu3  ;;  %v14373_v1 = vld [vmem:[#allocation120_spill] sm:$0xff]  ;;  %v7728_v47 = vadd.s32 128, %v13283_v53 }
 0x716   : > { %v8653_v25 = vadd.f32 %v8621_v60, %v8557_v42  ;;  %v6910_v11 = vadd.f32 %v6849_v8, %v13100_v0  ;;  %v14370_v0 = vld [vmem:[#allocation112_spill] sm:$0xff]  ;;  %v7839_v36 = vand.u32 15, %v7725_v22 }
 0x717   : > { %v7599_v16 = vpop.f32.mrf.mxu2  ;;  %v7102_v13 = vpop.f32.mrf.mxu0 }
 0x718   : > { %v8689_v59 = vadd.f32 %v13317_v54, %v8653_v25  ;;  %v7660_v50 = vadd.f32 %v7599_v16, %v6910_v11  ;;  %v7161_v45 = vadd.f32 %v7102_v13, %v14367_v56  ;;  %v7352_v33 = vpop.f32.mrf.mxu1  ;;  %vm8591_vm1 = vcmp.eq.s32.totalorder %v7839_v36, 15  ;;  %v14375_v56 = vld [vmem:[#allocation119_spill] sm:$0xff] }
 0x719   : > { %v7411_v58 = vadd.f32 %v7352_v33, %v14371_v62  ;;  %v7860_v13 = vand.u32 15, %v7728_v47  ;;  %v14377_v36 = vld [vmem:[#allocation123_spill] sm:$0xff] }
 0x71a   : > { %v8721_v41 = vmax.f32 %v8689_v59, 0.0  ;;  %v8379_v42 = vrot.slane %v7660_v50, 1  ;;  %v8252_v26 = vrot.slane %v7161_v45, 7  ;;  %6891 = vmatmul.bf16.gmra.mxu3 %v13107_v4  ;;  %7141 = vmatmul.bf16.gmra.mxu0 %v14370_v0 }
 0x71b   : > { %7391 = vmatmul.bf16.gmra.mxu1 %v14370_v0  ;;  %vm8498_vm3 = vcmp.eq.s32.totalorder %v7860_v13, 0 }
 0x71c   : > { %7641 = vmatmul.bf16.gmra.mxu2 %v14370_v0  ;;  %v10378_v10 = vpack.c.bf16 %v8721_v41, %v8720_v17  ;;  %v8380_v3 = vsel %vm8353_vm2, %v8377_v29, %v8379_v42  ;;  %v8253_v12 = vsel %vm8224_vm0, %v8250_v52, %v8252_v26  ;;  %v14374_v52 = vld [vmem:[#allocation72_spill] sm:$0xff]  ;;  %v14376_v41 = vld [vmem:[#allocation77_spill] sm:$0xff] }
 0x71d   : > { %v8654_v14 = vadd.f32 %v8558_v49, %v8380_v3  ;;  %v8528_v57 = vsel %vm13441_vm15, 0.0, %v8253_v12  ;;  %v6852_v61 = vpop.f32.mrf.mxu3 }
 0x71e   : > { %10434 = vst [vmem:[%s13338_s15 + $0x28] sm:$0xff] %v10378_v10   ;;  %v8560_v4 = vadd.f32 %v8528_v57, %v7411_v58  ;;  %v6911_v20 = vadd.f32 %v6852_v61, %v14372_v44 }
 0x71f   : > { %v7602_v18 = vpop.f32.mrf.mxu2  ;;  %v7104_v43 = vpop.f32.mrf.mxu0  ;;  %v8690_v59 = vadd.f32 %v13317_v54, %v8654_v14 }
 0x720   : > { %v7661_v6 = vadd.f32 %v7602_v18, %v6911_v20  ;;  %v7162_v19 = vadd.f32 %v7104_v43, %v14373_v1  ;;  %v7354_v29 = vpop.f32.mrf.mxu1 }
 0x721   : > { %v7412_v8 = vadd.f32 %v7354_v29, %v14374_v52  ;;  %v8722_v10 = vmax.f32 %v8690_v59, 0.0 }
 0x722   : > { %v8381_v60 = vrot.slane %v7661_v6, 1  ;;  %v8254_v49 = vrot.slane %v7162_v19, 7 }
 0x724   : > { %v8382_v9 = vsel %vm8353_vm2, %v8379_v42, %v8381_v60  ;;  %v8255_v27 = vsel %vm8224_vm0, %v8252_v26, %v8254_v49  ;;  %v7727_v26 = vadd.s32 120, %v13283_v53 }
 0x725   : > { %v8623_v25 = vsel %vm8591_vm1, 0.0, %v8382_v9  ;;  %v8561_v11 = vadd.f32 %v8255_v27, %v7412_v8  ;;  %v6854_v16 = vpop.f32.mrf.mxu3 }
 0x726   : > { %v8655_v50 = vadd.f32 %v8623_v25, %v8559_v51  ;;  %v6912_v45 = vadd.f32 %v6854_v16, %v14375_v56  ;;  %v7853_v1 = vand.u32 15, %v7727_v26 }
 0x727   : > { %v7604_v33 = vpop.f32.mrf.mxu2  ;;  %v7107_v15 = vpop.f32.mrf.mxu0 }
 0x728   : > { %v8691_v22 = vadd.f32 %v13317_v54, %v8655_v50  ;;  %v7662_v17 = vadd.f32 %v7604_v33, %v6912_v45  ;;  %v7163_v0 = vadd.f32 %v7107_v15, %v14376_v41  ;;  %v7357_v42 = vpop.f32.mrf.mxu1  ;;  %vm8593_vm4 = vcmp.eq.s32.totalorder %v7853_v1, 15 }
 0x729   : > { %v7413_v14 = vadd.f32 %v7357_v42, %v13142_v31  ;;  %v7732_v1 = vadd.s32 160, %v13283_v53 }
 0x72a   : > { %v8723_v3 = vmax.f32 %v8691_v22, 0.0  ;;  %v8383_v62 = vrot.slane %v7662_v17, 1  ;;  %v8256_v58 = vrot.slane %v7163_v0, 7  ;;  %v7729_v17 = vadd.s32 136, %v13283_v53 }
 0x72c   : > { %v10383_v12 = vpack.c.bf16 %v8723_v3, %v8722_v10  ;;  %v8384_v51 = vsel %vm8353_vm2, %v8381_v60, %v8383_v62  ;;  %v8257_v57 = vsel %vm8224_vm0, %v8254_v49, %v8256_v58  ;;  %v7730_v60 = vadd.s32 144, %v13283_v53 }
 0x72d   : > { %v8656_v61 = vadd.f32 %v8560_v4, %v8384_v51  ;;  %v8530_v44 = vsel %vm8498_vm3, 0.0, %v8257_v57  ;;  %v6857_v20 = vpop.f32.mrf.mxu3  ;;  %v14378_v51 = vld [vmem:[#allocation75_spill] sm:$0xff] }
 0x72e   : > { %10435 = vst [vmem:[%s13338_s15 + $0x30] sm:$0xff] %v10383_v12   ;;  %v8562_v18 = vadd.f32 %v8530_v44, %v7413_v14  ;;  %v6913_v43 = vadd.f32 %v6857_v20, %v14377_v36  ;;  %v7874_v13 = vand.u32 15, %v7730_v60  ;;  %v14379_v36 = vld [vmem:[#allocation80_spill] sm:$0xff] }
 0x72f   : > { %v7607_v6 = vpop.f32.mrf.mxu2  ;;  %v7109_v19 = vpop.f32.mrf.mxu0  ;;  %v8692_v59 = vadd.f32 %v13317_v54, %v8656_v61  ;;  %v7867_v61 = vand.u32 15, %v7729_v17 }
 0x730   : > { %v7663_v29 = vadd.f32 %v7607_v6, %v6913_v43  ;;  %v7164_v47 = vadd.f32 %v7109_v19, %v13148_v40  ;;  %v7359_v52 = vpop.f32.mrf.mxu1  ;;  %vm8500_vm5 = vcmp.eq.s32.totalorder %v7874_v13, 0 }
 0x731   : > { %v7414_v4 = vadd.f32 %v7359_v52, %v13151_v32  ;;  %v8724_v41 = vmax.f32 %v8692_v59, 0.0  ;;  %vm8595_vm6 = vcmp.eq.s32.totalorder %v7867_v61, 15 }
 0x732   : > { %v8385_v8 = vrot.slane %v7663_v29, 1  ;;  %v8258_v31 = vrot.slane %v7164_v47, 7  ;;  %v14380_v29 = vld [vmem:[#allocation122_spill] sm:$0xff] }
 0x734   : > { %v8386_v49 = vsel %vm8353_vm2, %v8383_v62, %v8385_v8  ;;  %v8259_v9 = vsel %vm8224_vm0, %v8256_v58, %v8258_v31 }
 0x735   : > { %v8625_v27 = vsel %vm8593_vm4, 0.0, %v8386_v49  ;;  %v8563_v25 = vadd.f32 %v8259_v9, %v7414_v4  ;;  %v6859_v16 = vpop.f32.mrf.mxu3  ;;  %v7888_v4 = vand.u32 15, %v7732_v1 }
 0x736   : > { %v8657_v50 = vadd.f32 %v8625_v27, %v8561_v11  ;;  %v6914_v40 = vadd.f32 %v6859_v16, %v13145_v34  ;;  %v14381_v27 = vld [vmem:[#allocation125_spill] sm:$0xff] }
 0x737   : > { %v7609_v56 = vpop.f32.mrf.mxu2  ;;  %v7112_v45 = vpop.f32.mrf.mxu0  ;;  %vm8502_vm7 = vcmp.eq.s32.totalorder %v7888_v4, 0 }
 0x738   : > { %v8693_v33 = vadd.f32 %v13317_v54, %v8657_v50  ;;  %v7664_v15 = vadd.f32 %v7609_v56, %v6914_v40  ;;  %v7165_v32 = vadd.f32 %v7112_v45, %v13157_v38  ;;  %v7362_v22 = vpop.f32.mrf.mxu1  ;;  %v14382_v56 = vld [vmem:[#allocation126_spill] sm:$0xff] }
 0x739   : > { %v7415_v34 = vadd.f32 %v7362_v22, %v13161_v39 }
 0x73a   : > { %v8725_v0 = vmax.f32 %v8693_v33, 0.0  ;;  %v8387_v42 = vrot.slane %v7664_v15, 1  ;;  %v8260_v26 = vrot.slane %v7165_v32, 7  ;;  %v7731_v15 = vadd.s32 152, %v13283_v53 }
 0x73c   : > { %v10388_v10 = vpack.c.bf16 %v8725_v0, %v8724_v41  ;;  %v8388_v11 = vsel %vm8353_vm2, %v8385_v8, %v8387_v42  ;;  %v8261_v3 = vsel %vm8224_vm0, %v8258_v31, %v8260_v26 }
 0x73d   : > { %v8658_v62 = vadd.f32 %v8562_v18, %v8388_v11  ;;  %v8532_v58 = vsel %vm8500_vm5, 0.0, %v8261_v3  ;;  %v6862_v12 = vpop.f32.mrf.mxu3 }
 0x73e   : > { %10436 = vst [vmem:[%s13338_s15 + $0x38] sm:$0xff] %v10388_v10   ;;  %v8564_v38 = vadd.f32 %v8532_v58, %v7415_v34  ;;  %v6915_v14 = vadd.f32 %v6862_v12, %v14378_v51  ;;  %v7881_v51 = vand.u32 15, %v7731_v15  ;;  %v14384_v15 = vld [vmem:[#allocation83_spill] sm:$0xff] }
 0x73f   : > { %v7612_v57 = vpop.f32.mrf.mxu2  ;;  %v7114_v44 = vpop.f32.mrf.mxu0  ;;  %v8694_v49 = vadd.f32 %v13317_v54, %v8658_v62  ;;  %v14383_v62 = vld [vmem:[#allocation78_spill] sm:$0xff] }
 0x740   : > { %v7665_v20 = vadd.f32 %v7612_v57, %v6915_v14  ;;  %v7166_v43 = vadd.f32 %v7114_v44, %v14379_v36  ;;  %v7364_v6 = vpop.f32.mrf.mxu1  ;;  %vm8597_vm8 = vcmp.eq.s32.totalorder %v7881_v51, 15 }
 0x741   : > { %v7416_v18 = vadd.f32 %v7364_v6, %v14380_v29  ;;  %v8726_v32 = vmax.f32 %v8694_v49, 0.0 }
 0x742   : > { %v8389_v19 = vrot.slane %v7665_v20, 1  ;;  %v8262_v39 = vrot.slane %v7166_v43, 7  ;;  %v7734_v20 = vadd.s32 176, %v13283_v53 }
 0x744   : > { %v8390_v47 = vsel %vm8353_vm2, %v8387_v42, %v8389_v19  ;;  %v8263_v52 = vsel %vm8224_vm0, %v8260_v26, %v8262_v39  ;;  %v7902_v29 = vand.u32 15, %v7734_v20 }
 0x745   : > { %v8627_v60 = vsel %vm8595_vm6, 0.0, %v8390_v47  ;;  %v8565_v8 = vadd.f32 %v8263_v52, %v7416_v18  ;;  %v6864_v31 = vpop.f32.mrf.mxu3 }
 0x746   : > { %v8659_v9 = vadd.f32 %v8627_v60, %v8563_v25  ;;  %v6916_v16 = vadd.f32 %v6864_v31, %v14381_v27  ;;  %vm8504_vm9 = vcmp.eq.s32.totalorder %v7902_v29, 0 }
 0x747   : > { %v7614_v13 = vpop.f32.mrf.mxu2  ;;  %v7117_v59 = vpop.f32.mrf.mxu0 }
 0x748   : > { %v8695_v50 = vadd.f32 %v13317_v54, %v8659_v9  ;;  %v7666_v40 = vadd.f32 %v7614_v13, %v6916_v16  ;;  %v7167_v45 = vadd.f32 %v7117_v59, %v14382_v56  ;;  %v7367_v33 = vpop.f32.mrf.mxu1  ;;  %v7733_v9 = vadd.s32 168, %v13283_v53 }
 0x749   : > { %v7417_v42 = vadd.f32 %v7367_v33, %v13180_v7 }
 0x74a   : > { %v8727_v22 = vmax.f32 %v8695_v50, 0.0  ;;  %v8391_v17 = vrot.slane %v7666_v40, 1  ;;  %v8264_v41 = vrot.slane %v7167_v45, 7 }
 0x74c   : > { %v10393_v0 = vpack.c.bf16 %v8727_v22, %v8726_v32  ;;  %v8392_v25 = vsel %vm8353_vm2, %v8389_v19, %v8391_v17  ;;  %v8265_v26 = vsel %vm8224_vm0, %v8262_v39, %v8264_v41 }
 0x74d   : > { %v8660_v10 = vadd.f32 %v8564_v38, %v8392_v25  ;;  %v8534_v11 = vsel %vm8502_vm7, 0.0, %v8265_v26  ;;  %v6867_v34 = vpop.f32.mrf.mxu3  ;;  %v7736_v26 = vadd.s32 192, %v13283_v53 }
 0x74e   : > { %10437 = vst [vmem:[%s13338_s15 + $0x40] sm:$0xff] %v10393_v0   ;;  %v8566_v3 = vadd.f32 %v8534_v11, %v7417_v42  ;;  %v6917_v58 = vadd.f32 %v6867_v34, %v14383_v62 }
 0x74f   : > { %v7617_v12 = vpop.f32.mrf.mxu2  ;;  %v7119_v14 = vpop.f32.mrf.mxu0  ;;  %v8696_v18 = vadd.f32 %v13317_v54, %v8660_v10  ;;  %v7916_v51 = vand.u32 15, %v7736_v26 }
 0x750   : > { %v7667_v57 = vadd.f32 %v7617_v12, %v6917_v58  ;;  %v7168_v61 = vadd.f32 %v7119_v14, %v13186_v23  ;;  %v7369_v44 = vpop.f32.mrf.mxu1 }
 0x751   : > { %v7418_v38 = vadd.f32 %v7369_v44, %v13189_v28  ;;  %v8728_v27 = vmax.f32 %v8696_v18, 0.0  ;;  %vm8506_vm11 = vcmp.eq.s32.totalorder %v7916_v51, 0 }
 0x752   : > { %v8393_v36 = vrot.slane %v7667_v57, 1  ;;  %v8266_v7 = vrot.slane %v7168_v61, 7 }
 0x754   : > { %v8394_v43 = vsel %vm8353_vm2, %v8391_v17, %v8393_v36  ;;  %v8267_v6 = vsel %vm8224_vm0, %v8264_v41, %v8266_v7  ;;  %v7895_v17 = vand.u32 15, %v7733_v9 }
 0x755   : > { %v8629_v1 = vsel %vm8597_vm8, 0.0, %v8394_v43  ;;  %v8567_v19 = vadd.f32 %v8267_v6, %v7418_v38  ;;  %v6869_v39 = vpop.f32.mrf.mxu3  ;;  %v7735_v43 = vadd.s32 184, %v13283_v53 }
 0x756   : > { %v8661_v47 = vadd.f32 %v8629_v1, %v8565_v8  ;;  %v6918_v23 = vadd.f32 %v6869_v39, %v13183_v24  ;;  %vm8599_vm10 = vcmp.eq.s32.totalorder %v7895_v17, 15 }
 0x757   : > { %v7619_v52 = vpop.f32.mrf.mxu2  ;;  %v7122_v60 = vpop.f32.mrf.mxu0  ;;  %v7909_v9 = vand.u32 15, %v7735_v43 }
 0x758   : > { %v8697_v31 = vadd.f32 %v13317_v54, %v8661_v47  ;;  %v7668_v4 = vadd.f32 %v7619_v52, %v6918_v23  ;;  %v7169_v28 = vadd.f32 %v7122_v60, %v13195_v37  ;;  %v7372_v49 = vpop.f32.mrf.mxu1 }
 0x759   : > { %v7419_v24 = vadd.f32 %v7372_v49, %v13199_v46  ;;  %vm8601_vm12 = vcmp.eq.s32.totalorder %v7909_v9, 15 }
 0x75a   : > { %v8729_v16 = vmax.f32 %v8697_v31, 0.0  ;;  %v8395_v13 = vrot.slane %v7668_v4, 1  ;;  %v8268_v59 = vrot.slane %v7169_v28, 7  ;;  %v14386_v4 = vld [vmem:[#allocation81_spill] sm:$0xff] }
 0x75c   : > { %v10398_v50 = vpack.c.bf16 %v8729_v16, %v8728_v27  ;;  %v8396_v8 = vsel %vm8353_vm2, %v8393_v36, %v8395_v13  ;;  %v8269_v40 = vsel %vm8224_vm0, %v8266_v7, %v8268_v59  ;;  %v14385_v7 = vld [vmem:[#allocation124_spill] sm:$0xff] }
 0x75d   : > { %v8662_v56 = vadd.f32 %v8566_v3, %v8396_v8  ;;  %v8536_v45 = vsel %vm8504_vm9, 0.0, %v8269_v40  ;;  %v6872_v33 = vpop.f32.mrf.mxu3 }
 0x75e   : > { %10438 = vst [vmem:[%s13338_s15 + $0x48] sm:$0xff] %v10398_v50   ;;  %v8568_v37 = vadd.f32 %v8536_v45, %v7419_v24  ;;  %v6919_v32 = vadd.f32 %v6872_v33, %v14384_v15  ;;  %v7738_v50 = vadd.s32 208, %v13283_v53 }
 0x75f   : > { %v7622_v22 = vpop.f32.mrf.mxu2  ;;  %v7124_v41 = vpop.f32.mrf.mxu0  ;;  %v8698_v14 = vadd.f32 %v13317_v54, %v8662_v56 }
 0x760   : > { %v7669_v0 = vadd.f32 %v7622_v22, %v6919_v32  ;;  %v7170_v25 = vadd.f32 %v7124_v41, %v13205_v35  ;;  %v7374_v42 = vpop.f32.mrf.mxu1  ;;  %v7930_v15 = vand.u32 15, %v7738_v50 }
 0x761   : > { %v7420_v11 = vadd.f32 %v7374_v42, %v13208_v21  ;;  %v8730_v6 = vmax.f32 %v8698_v14, 0.0  ;;  %v14387_v42 = vld [vmem:[#allocation127_spill] sm:$0xff] }
 0x762   : > { %v8397_v10 = vrot.slane %v7669_v0, 1  ;;  %v8270_v46 = vrot.slane %v7170_v25, 7  ;;  %vm8508_vm13 = vcmp.eq.s32.totalorder %v7930_v15, 0  ;;  %v14393_v15 = vld [vmem:[#allocation89_spill] sm:$0xff] }
 0x764   : > { %v8398_v34 = vsel %vm8353_vm2, %v8395_v13, %v8397_v10  ;;  %v8271_v3 = vsel %vm8224_vm0, %v8268_v59, %v8270_v46 }
 0x765   : > { %v8631_v62 = vsel %vm8599_vm10, 0.0, %v8398_v34  ;;  %v8569_v58 = vadd.f32 %v8271_v3, %v7420_v11  ;;  %v6874_v12 = vpop.f32.mrf.mxu3 }
 0x766   : > { %v8663_v57 = vadd.f32 %v8631_v62, %v8567_v19  ;;  %v6920_v35 = vadd.f32 %v6874_v12, %v13202_v30 }
 0x767   : > { %v7624_v61 = vpop.f32.mrf.mxu2  ;;  %v7127_v44 = vpop.f32.mrf.mxu0 }
 0x768   : > { %v8699_v20 = vadd.f32 %v13317_v54, %v8663_v57  ;;  %v7670_v36 = vadd.f32 %v7624_v61, %v6920_v35  ;;  %v7171_v21 = vadd.f32 %v7127_v44, %v14385_v7  ;;  %v7377_v38 = vpop.f32.mrf.mxu1  ;;  %v14388_v35 = vld [vmem:[#allocation86_spill] sm:$0xff] }
 0x769   : > { %v7421_v30 = vadd.f32 %v7377_v38, %v13218_v2 }
 0x76a   : > { %v8731_v1 = vmax.f32 %v8699_v20, 0.0  ;;  %v8399_v39 = vrot.slane %v7670_v36, 1  ;;  %v8272_v29 = vrot.slane %v7171_v21, 7  ;;  %v14389_v21 = vld [vmem:[#allocation128_spill] sm:$0xff] }
 0x76c   : > { %v10403_v18 = vpack.c.bf16 %v8731_v1, %v8730_v6  ;;  %v8400_v19 = vsel %vm8353_vm2, %v8397_v10, %v8399_v39  ;;  %v8273_v47 = vsel %vm8224_vm0, %v8270_v46, %v8272_v29  ;;  %v7737_v10 = vadd.s32 200, %v13283_v53 }
 0x76d   : > { %v8664_v23 = vadd.f32 %v8568_v37, %v8400_v19  ;;  %v8538_v52 = vsel %vm8506_vm11, 0.0, %v8273_v47  ;;  %v6877_v60 = vpop.f32.mrf.mxu3  ;;  %v7740_v6 = vadd.s32 224, %v13283_v53 }
 0x76e   : > { %10439 = vst [vmem:[%s13338_s15 + $0x50] sm:$0xff] %v10403_v18   ;;  %v8570_v31 = vadd.f32 %v8538_v52, %v7421_v30  ;;  %v6921_v28 = vadd.f32 %v6877_v60, %v14386_v4  ;;  %v7923_v20 = vand.u32 15, %v7737_v10  ;;  %v13555_v60 = vld [vmem:[%s13641_s6] ss:$0 sm:$0xff] }
 0x76f   : > { %v7627_v49 = vpop.f32.mrf.mxu2  ;;  %v7129_v27 = vpop.f32.mrf.mxu0  ;;  %v8700_v32 = vadd.f32 %v13317_v54, %v8664_v23  ;;  %v7944_v52 = vand.u32 15, %v7740_v6 }
 0x770   : > { %v7671_v16 = vadd.f32 %v7627_v49, %v6921_v28  ;;  %v7172_v13 = vadd.f32 %v7129_v27, %v13224_v5  ;;  %v7379_v59 = vpop.f32.mrf.mxu1  ;;  %vm8603_vm14 = vcmp.eq.s32.totalorder %v7923_v20, 15  ;;  %v14391_v28 = vld [vmem:[#allocation129_spill] sm:$0xff] }
 0x771   : > { %v7422_v24 = vadd.f32 %v7379_v59, %v13227_v48  ;;  %v8732_v46 = vmax.f32 %v8700_v32, 0.0  ;;  %v14392_v59 = vld [vmem:[#allocation133_spill] sm:$0xff]  ;;  %vm8510_vm15 = vcmp.eq.s32.totalorder %v7944_v52, 0 }
 0x772   : > { %v8401_v8 = vrot.slane %v7671_v16, 1  ;;  %v8274_v2 = vrot.slane %v7172_v13, 7 }
 0x774   : > { %v8402_v40 = vsel %vm8353_vm2, %v8399_v39, %v8401_v8  ;;  %v8275_v56 = vsel %vm8224_vm0, %v8272_v29, %v8274_v2  ;;  %v14390_v39 = vld [vmem:[#allocation84_spill] sm:$0xff] }
 0x775   : > { %v8633_v45 = vsel %vm8601_vm12, 0.0, %v8402_v40  ;;  %v8571_v33 = vadd.f32 %v8275_v56, %v7422_v24  ;;  %v6879_v37 = vpop.f32.mrf.mxu3 }
 0x776   : > { %v8665_v22 = vadd.f32 %v8633_v45, %v8569_v58  ;;  %v6922_v5 = vadd.f32 %v6879_v37, %v13221_v55 }
 0x777   : > { %v7629_v17 = vpop.f32.mrf.mxu2  ;;  %v7132_v41 = vpop.f32.mrf.mxu0 }
 0x778   : > { %v8701_v0 = vadd.f32 %v13317_v54, %v8665_v22  ;;  %v7672_v25 = vadd.f32 %v7629_v17, %v6922_v5  ;;  %v7173_v48 = vadd.f32 %v7132_v41, %v14387_v42  ;;  %v7382_v26 = vpop.f32.mrf.mxu1 }
 0x779   : > { %v7423_v55 = vadd.f32 %v7382_v26, %v13237_v63 }
 0x77a   : > { %v8733_v11 = vmax.f32 %v8701_v0, 0.0  ;;  %v8403_v34 = vrot.slane %v7672_v25, 1  ;;  %v8276_v3 = vrot.slane %v7173_v48, 7  ;;  %v14394_v25 = vld [vmem:[#allocation131_spill] sm:$0xff] }
 0x77c   : > { %v10408_v62 = vpack.c.bf16 %v8733_v11, %v8732_v46  ;;  %v8404_v58 = vsel %vm8353_vm2, %v8401_v8, %v8403_v34  ;;  %v8277_v12 = vsel %vm8224_vm0, %v8274_v2, %v8276_v3  ;;  %v7739_v2 = vadd.s32 216, %v13283_v53  ;;  %v14395_v11 = vld [vmem:[#allocation87_spill] sm:$0xff] }
 0x77d   : > { %v8666_v54 = vadd.f32 %v8570_v31, %v8404_v58  ;;  %v8540_v51 = vsel %vm8508_vm13, 0.0, %v8277_v12  ;;  %v6882_v14 = vpop.f32.mrf.mxu3  ;;  %v14396_v12 = vld [vmem:[#allocation67_spill] sm:$0xff] }
 0x77e   : > { %10440 = vst [vmem:[%s13338_s15 + $0x58] sm:$0xff] %v10408_v62   ;;  %v8572_v57 = vadd.f32 %v8540_v51, %v7423_v55  ;;  %v6923_v61 = vadd.f32 %v6882_v14, %v14388_v35  ;;  %v7937_v26 = vand.u32 15, %v7739_v2  ;;  %v7742_v62 = vadd.s32 240, %v13283_v53 }
 0x77f   : > { %v7632_v44 = vpop.f32.mrf.mxu2  ;;  %v7134_v36 = vpop.f32.mrf.mxu0  ;;  %v8702_v31 = vadd.f32 %v13555_v60, %v8666_v54 }
 0x780   : > { %v7673_v7 = vadd.f32 %v7632_v44, %v6923_v61  ;;  %v7174_v38 = vadd.f32 %v7134_v36, %v14389_v21  ;;  %v7384_v43 = vpop.f32.mrf.mxu1  ;;  %vm8605_vm1 = vcmp.eq.s32.totalorder %v7937_v26, 15  ;;  %v7958_v44 = vand.u32 15, %v7742_v62 }
 0x781   : > { %v7424_v29 = vadd.f32 %v7384_v43, %v14390_v39  ;;  %v8734_v24 = vmax.f32 %v8702_v31, 0.0 }
 0x782   : > { %v8405_v1 = vrot.slane %v7673_v7, 1  ;;  %v8278_v63 = vrot.slane %v7174_v38, 7  ;;  %v14397_v7 = vld [vmem:[#allocation130_spill] sm:$0xff]  ;;  %vm8512_vm3 = vcmp.eq.s32.totalorder %v7958_v44, 0 }
 0x784   : > { %v8406_v18 = vsel %vm8353_vm2, %v8403_v34, %v8405_v1  ;;  %v8279_v19 = vsel %vm8224_vm0, %v8276_v3, %v8278_v63 }
 0x785   : > { %v8635_v30 = vsel %vm8603_vm14, 0.0, %v8406_v18  ;;  %v8573_v47 = vadd.f32 %v8279_v19, %v7424_v29  ;;  %v6884_v23 = vpop.f32.mrf.mxu3  ;;  %v7741_v18 = vadd.s32 232, %v13283_v53 }
 0x786   : > { %v8667_v4 = vadd.f32 %v8635_v30, %v8571_v33  ;;  %v6924_v49 = vadd.f32 %v6884_v23, %v14391_v28 }
 0x787   : > { %v7634_v9 = vpop.f32.mrf.mxu2  ;;  %v7137_v27 = vpop.f32.mrf.mxu0  ;;  %v7951_v2 = vand.u32 15, %v7741_v18 }
 0x788   : > { %v8703_v16 = vadd.f32 %v13555_v60, %v8667_v4  ;;  %v7674_v13 = vadd.f32 %v7634_v9, %v6924_v49  ;;  %v7175_v50 = vadd.f32 %v7137_v27, %v14392_v59  ;;  %v7387_v8 = vpop.f32.mrf.mxu1  ;;  %v14399_v4 = vld [vmem:[#allocation70_spill] sm:$0xff]  ;;  %v14400_v59 = vld [vmem:[#allocation43_spill] sm:$0xff] }
 0x789   : > { %v7425_v32 = vadd.f32 %v7387_v8, %v14393_v15  ;;  %vm8607_vm4 = vcmp.eq.s32.totalorder %v7951_v2, 15 }
 0x78a   : > { %v8735_v40 = vmax.f32 %v8703_v16, 0.0  ;;  %v8407_v56 = vrot.slane %v7674_v13, 1  ;;  %v8280_v45 = vrot.slane %v7175_v50, 7 }
 0x78c   : > { %v10413_v37 = vpack.c.bf16 %v8735_v40, %v8734_v24  ;;  %v8408_v33 = vsel %vm8353_vm2, %v8405_v1, %v8407_v56  ;;  %v8281_v22 = vsel %vm8224_vm0, %v8278_v63, %v8280_v45  ;;  %v14398_v63 = vld [vmem:[#allocation134_spill] sm:$0xff] }
 0x78d   : > { %v8668_v5 = vadd.f32 %v8572_v57, %v8408_v33  ;;  %v8542_v17 = vsel %vm8510_vm15, 0.0, %v8281_v22  ;;  %v6887_v41 = vpop.f32.mrf.mxu3  ;;  %v14402_v22 = vld [vmem:[#allocation73_spill] sm:$0xff] }
 0x78e   : > { %10441 = vst [vmem:[%s13338_s15 + $0x60] sm:$0xff] %v10413_v37   ;;  %v8574_v0 = vadd.f32 %v8542_v17, %v7425_v32  ;;  %v6925_v42 = vadd.f32 %v6887_v41, %v14394_v25  ;;  %v7743_v32 = vadd.s32 248, %v13283_v53 }
 0x78f   : > { %v7637_v48 = vpop.f32.mrf.mxu2  ;;  %v7139_v10 = vpop.f32.mrf.mxu0  ;;  %v8704_v20 = vadd.f32 %v13555_v60, %v8668_v5 }
 0x790   : > { %v7675_v46 = vadd.f32 %v7637_v48, %v6925_v42  ;;  %v7176_v34 = vadd.f32 %v7139_v10, %v14395_v11  ;;  %v7389_v3 = vpop.f32.mrf.mxu1  ;;  %v14403_v10 = vld [vmem:[#allocation46_spill] sm:$0xff]  ;;  %v7965_v11 = vand.u32 15, %v7743_v32 }
 0x791   : > { %v7426_v54 = vadd.f32 %v7389_v3, %v14396_v12  ;;  %v8736_v19 = vmax.f32 %v8704_v20, 0.0 }
 0x792   : > { %v8409_v58 = vrot.slane %v7675_v46, 1  ;;  %v8282_v55 = vrot.slane %v7176_v34, 7  ;;  %vm8609_vm5 = vcmp.eq.s32.totalorder %v7965_v11, 15 }
 0x794   : > { %v8410_v51 = vsel %vm8353_vm2, %v8407_v56, %v8409_v58  ;;  %v8283_v14 = vsel %vm8224_vm0, %v8280_v45, %v8282_v55  ;;  %v14401_v56 = vld [vmem:[#allocation132_spill] sm:$0xff] }
 0x795   : > { %v8637_v57 = vsel %vm8605_vm1, 0.0, %v8410_v51  ;;  %v8575_v35 = vadd.f32 %v8283_v14, %v7426_v54  ;;  %v6889_v61 = vpop.f32.mrf.mxu3 }
 0x796   : > { %v8669_v36 = vadd.f32 %v8637_v57, %v8573_v47  ;;  %v6926_v21 = vadd.f32 %v6889_v61, %v14397_v7 }
 0x797   : > { %v7639_v38 = vpop.f32.mrf.mxu2  ;;  %v7142_v43 = vpop.f32.mrf.mxu0 }
 0x798   : > { %v8705_v6 = vadd.f32 %v13555_v60, %v8669_v36  ;;  %v7676_v1 = vadd.f32 %v7639_v38, %v6926_v21  ;;  %v7177_v39 = vadd.f32 %v7142_v43, %v14398_v63  ;;  %v7392_v29 = vpop.f32.mrf.mxu1 }
 0x799   : > { %v7427_v28 = vadd.f32 %v7392_v29, %v14399_v4 }
 0x79a   : > { %v8737_v30 = vmax.f32 %v8705_v6, 0.0  ;;  %v8411_v23 = vrot.slane %v7676_v1, 1  ;;  %v8284_v52 = vrot.slane %v7177_v39, 7 }
 0x79c   : > { %v10418_v31 = vpack.c.bf16 %v8737_v30, %v8736_v19  ;;  %v8412_v47 = vsel %vm8353_vm2, %v8409_v58, %v8411_v23  ;;  %v8285_v49 = vsel %vm8224_vm0, %v8282_v55, %v8284_v52 }
 0x79d   : > { %v8670_v9 = vadd.f32 %v8574_v0, %v8412_v47  ;;  %v8544_v27 = vsel %vm8512_vm3, 0.0, %v8285_v49  ;;  %v6892_v16 = vpop.f32.mrf.mxu3 }
 0x79e   : > { %10442 = vst [vmem:[%s13338_s15 + $0x68] sm:$0xff] %v10418_v31   ;;  %v8576_v13 = vadd.f32 %v8544_v27, %v7427_v28  ;;  %v6927_v50 = vadd.f32 %v6892_v16, %v14400_v59 }
 0x79f   : > { %v7642_v8 = vpop.f32.mrf.mxu2  ;;  %v7144_v24 = vpop.f32.mrf.mxu0  ;;  %v8706_v48 = vadd.f32 %v13555_v60, %v8670_v9 }
 0x7a0   : > { %v7677_v40 = vadd.f32 %v7642_v8, %v6927_v50  ;;  %v7178_v45 = vadd.f32 %v7144_v24, %v14401_v56  ;;  %v7394_v37 = vpop.f32.mrf.mxu1 }
 0x7a1   : > { %v7428_v5 = vadd.f32 %v7394_v37, %v14402_v22  ;;  %v8738_v62 = vmax.f32 %v8706_v48, 0.0 }
 0x7a2   : > { %v8413_v33 = vrot.slane %v7677_v40, 1  ;;  %v8286_v15 = vrot.slane %v7178_v45, 7 }
 0x7a4   : > { %v8414_v17 = vsel %vm8353_vm2, %v8411_v23, %v8413_v33  ;;  %v8287_v41 = vsel %vm8224_vm0, %v8284_v52, %v8286_v15 }
 0x7a5   : > { %v8639_v0 = vsel %vm8607_vm4, 0.0, %v8414_v17  ;;  %v8577_v25 = vadd.f32 %v8287_v41, %v7428_v5  ;;  %v6894_v42 = vpop.f32.mrf.mxu3 }
 0x7a6   : > { %v8671_v26 = vadd.f32 %v8639_v0, %v8575_v35  ;;  %v6928_v46 = vadd.f32 %v6894_v42, %v14403_v10 }
 0x7a7   : > { %v7644_v34 = vpop.f32.mrf.mxu2 }
 0x7a8   : > { %v8707_v53 = vadd.f32 %v13555_v60, %v8671_v26  ;;  %v7678_v3 = vadd.f32 %v7644_v34, %v6928_v46 }
 0x7aa   : > { %v8739_v58 = vmax.f32 %v8707_v53, 0.0  ;;  %v8415_v55 = vrot.slane %v7678_v3, 1 }
 0x7ac   : > { %v10423_v12 = vpack.c.bf16 %v8739_v58, %v8738_v62  ;;  %v8416_v54 = vsel %vm8353_vm2, %v8413_v33, %v8415_v55  ;;  %v8449_v51 = vsel %vm8353_vm2, %v8415_v55, 0.0 }
 0x7ad   : > { %v8641_v14 = vsel %vm8609_vm5, 0.0, %v8449_v51  ;;  %v8672_v57 = vadd.f32 %v8576_v13, %v8416_v54 }
 0x7ae   : > { %10443 = vst [vmem:[%s13338_s15 + $0x70] sm:$0xff] %v10423_v12   ;;  %v8673_v35 = vadd.f32 %v8641_v14, %v8577_v25 }
 0x7af   : > { %v8708_v61 = vadd.f32 %v13555_v60, %v8672_v57 }
 0x7b0   : > { %v8709_v44 = vadd.f32 %v13555_v60, %v8673_v35 }
 0x7b1   : > { %v8740_v20 = vmax.f32 %v8708_v61, 0.0 }
 0x7b2   : > { %v8741_v36 = vmax.f32 %v8709_v44, 0.0 }
 0x7b4   : > { %v10428_v7 = vpack.c.bf16 %v8741_v36, %v8740_v20 }
 0x7b6   : > { %10444 = vst [vmem:[%s13338_s15 + $0x78] sm:$0xff] %v10428_v7  }
 0x7b7   : > { %10819 = shalt.err (!%p10816_p0)
}
 0x7b8   : > { %s10894_s4 = smov 64   ;;  %s10895_s28 = smov 4  }
 0x7b9   : > { %10487 = dma.vmem_to_hbm [thread:$0]  (%p11016_p5), %s8821_s27, 2048, %s8823_s17, %s8807_s3, %s10894_s4, %s10894_s4, %s10895_s28  }
 0x7ba PF: > { %s14405_s13 = sld [smem:[#allocation23_spill]]  ;;  %s8837_s30 = sand.u32 1, %s10866_s24  }
 0x7bb   : > { %p10510_p3 = pnand %p9003_p11, %p10981_p6  ;;  %s8838_s9 = scalar_lea.sflag [#allocation7], %s8837_s30 }
 0x7bd   : > { %p10511_p7 = pneg %p10510_p3 }
 0x7bf   : > { %10861 = dma.done.wait (%p10511_p7), %s8838_s9, 2048  }
 0x7c0   : > { %10863 = vsyncadd (%p10511_p7), %s8838_s9, 4294965248  ;;  %s28_s29 = sadd.s32 1, %s14405_s13   ;;  %s14406_s15 = sld [smem:[#allocation26_spill]] }
 0x7c1   : > { %p25_p9 = scmp.ge.s32.totalorder %s28_s29, 4   ;;  %s14407_s27 = sld [smem:[#allocation22_spill]] }
 0x7c2   : > { %s14408_s28 = sld [smem:[#allocation25_spill]]  ;;  %s14409_s24 = smov %s10870_s25 }
 0x7c3   : > { %s14410_s25 = smov %s10874_s26  ;;  %27 = sbr.rel (!%p25_p9) target bundleno = 15 (0xf), region = 159 }
 0x7c6   : > { %s14411_s26 = smov %s14406_s15 }
 0x7c8   :  { %8844 = vsyncpa [#allocation6], 1 }
 0x7c9   :  { %8846 = vsyncpa [#allocation6 + $0x1], 1 }
 0x7ca   :  { %8847 = vsyncpa [#allocation9], 1 }
 0x7cb   :  { %8849 = vsyncpa [#allocation9 + $0x1], 1 }
 0x7cc   :  { %8850 = vsyncpa [#allocation12], 1 }
 0x7cd   :  { %8851 = vsyncpa [#allocation15], 1 }
 0x7ce   :  { %8852 = vsyncpa [#allocation7], 1 }
 0x7cf   :  { %8854 = vsyncpa [#allocation7 + $0x1], 1 }

</bundles_post_ra>
